<compile_context>
chip_gen: v7x
topology: tpu7x:2x2x1
jax: 0.10.0
libtpu: 0.0.40
codegen_flags: <defaults>
</compile_context>

<pallas_src>
import math
from functools import partial

import jax
import jax.numpy as jnp
from jax.experimental import pallas as pl
from jax.experimental.pallas import tpu as pltpu


# -------------------------------------------------------------------------
# Pallas kernels
# -------------------------------------------------------------------------

def _apply_epilogue(acc, act):
    if act == "relu":
        acc = jnp.maximum(acc, 0.0)
    elif act == "silu":
        acc = acc * jax.nn.sigmoid(acc)      # logistic -> EUP slot
    return acc


def _matmul_kernel(a_ref, w_ref, b_ref, o_ref, *, act, pre_act):
    """o = act(pre_act(a) @ w + b) on one (tile_m, N) output tile."""
    a = a_ref[...]
    if pre_act == "relu":
        a = jnp.maximum(a, 0)
    acc = jnp.dot(a, w_ref[...], preferred_element_type=jnp.float32)
    acc = acc + b_ref[...]
    acc = _apply_epilogue(acc, act)
    o_ref[...] = acc.astype(o_ref.dtype)


def _matmul_res_kernel(a_ref, w_ref, b_ref, r_ref, o_ref, *, act, pre_act):
    """o = act(pre_act(a) @ w + b + r) — FPN lateral conv with fused top-down add."""
    a = a_ref[...]
    if pre_act == "relu":
        a = jnp.maximum(a, 0)
    acc = jnp.dot(a, w_ref[...], preferred_element_type=jnp.float32)
    acc = acc + b_ref[...] + r_ref[...].astype(jnp.float32)
    acc = _apply_epilogue(acc, act)
    o_ref[...] = acc.astype(o_ref.dtype)


def _round_up(x, m):
    return ((x + m - 1) // m) * m


def _pick_tile_m(M):
    """Adaptive M tile: tiny levels use a single small tile, big ones 128/256."""
    if M <= 256:
        return _round_up(M, 8)
    if M % 256 == 0:
        return 256
    return 128


def pallas_matmul_bias_act(a, w, b, *, act="none", pre_act="none",
                           residual=None, out_dtype=jnp.bfloat16):
    """a:[M,K] @ w:[K,N] (bf16 operands, f32 accumulation) + b:[1,N] (f32),
    optional fused residual add / pre-ReLU / activation epilogue.

    K and N blocks span the full array extent (no per-call padding); M is
    padded only up to the adaptive tile size when needed.
    """
    M, K = a.shape
    K2, N = w.shape
    assert K == K2

    tile_m = _pick_tile_m(M)
    Mp = _round_up(M, tile_m)

    a = a.astype(jnp.bfloat16)
    if residual is not None:
        residual = residual.astype(jnp.bfloat16)
    if Mp != M:
        a = jnp.pad(a, ((0, Mp - M), (0, 0)))
        if residual is not None:
            residual = jnp.pad(residual, ((0, Mp - M), (0, 0)))

    in_specs = [
        pl.BlockSpec((tile_m, K), lambda i: (i, 0)),
        pl.BlockSpec((K, N), lambda i: (0, 0)),
        pl.BlockSpec((1, N), lambda i: (0, 0)),
    ]
    args = [a, w, b]
    if residual is not None:
        in_specs.append(pl.BlockSpec((tile_m, N), lambda i: (i, 0)))
        args.append(residual)
        kernel = partial(_matmul_res_kernel, act=act, pre_act=pre_act)
    else:
        kernel = partial(_matmul_kernel, act=act, pre_act=pre_act)

    # TODO(synk): at real RetinaNet channel counts (K up to 9*1280, N=256) add a
    # K grid axis with an f32 VMEM accumulator to stay inside v7x's 64 MiB VMEM.
    out = pl.pallas_call(
        kernel,
        out_shape=jax.ShapeDtypeStruct((Mp, N), out_dtype),
        grid=(Mp // tile_m,),
        in_specs=in_specs,
        out_specs=pl.BlockSpec((tile_m, N), lambda i: (i, 0)),
        compiler_params=pltpu.CompilerParams(dimension_semantics=("parallel",)),
    )(*args)
    if Mp != M:
        out = out[:M]
    return out


# -------------------------------------------------------------------------
# Conv = im2col (glue) + Pallas fused matmul (hot path)
# -------------------------------------------------------------------------

def _im2col(x, k, stride, padding):
    """x: [N,H,W,C] -> ([N*Ho*Wo, k*k*C], (N,Ho,Wo)). bf16 to halve patch bytes."""
    N, H, W, C = x.shape
    if k == 1 and stride == 1 and padding == 0:
        return x.reshape(N * H * W, C), (N, H, W)
    xp = jnp.pad(x, ((0, 0), (padding, padding), (padding, padding), (0, 0))) \
        if padding > 0 else x
    Ho = (H + 2 * padding - k) // stride + 1
    Wo = (W + 2 * padding - k) // stride + 1
    # TODO(synk): im2col still materializes a k*k-expanded patch tensor in HBM;
    # an in-kernel tap loop over DMA'd shifted windows would remove this.
    cols = [xp[:, i:i + stride * Ho:stride, j:j + stride * Wo:stride, :]
            for i in range(k) for j in range(k)]
    patches = jnp.concatenate(cols, axis=-1)
    return patches.reshape(N * Ho * Wo, k * k * C), (N, Ho, Wo)


def conv2d_nhwc(x, prm, *, kernel, stride=1, padding=0, act="none",
                pre_act="none", residual=None, out_dtype=jnp.bfloat16):
    """x: [N,H,W,Cin] NHWC.  prm: {'w': [k*k*Cin, Cout] bf16, 'b': [1, Cout] f32}."""
    a, (n, ho, wo) = _im2col(x.astype(jnp.bfloat16), kernel, stride, padding)
    out = pallas_matmul_bias_act(a, prm["w"], prm["b"], act=act, pre_act=pre_act,
                                 residual=residual, out_dtype=out_dtype)
    return out.reshape(n, ho, wo, -1)


def conv3x3_multi(levels, prm, *, act="none", out_dtype=jnp.bfloat16):
    """Shared 3x3 stride-1 conv applied to a list of pyramid levels as ONE matmul."""
    rows, shapes = [], []
    for x in levels:
        a, (n, ho, wo) = _im2col(x.astype(jnp.bfloat16), 3, 1, 1)
        rows.append(a)
        shapes.append((n, ho, wo))
    A = jnp.concatenate(rows, axis=0)
    out = pallas_matmul_bias_act(A, prm["w"], prm["b"], act=act, out_dtype=out_dtype)
    outs, off = [], 0
    for (n, ho, wo) in shapes:
        m = n * ho * wo
        outs.append(out[off:off + m].reshape(n, ho, wo, -1))
        off += m
    return outs


def _upsample_nearest(x, th, tw):
    """Nearest-neighbour upsample NHWC x to (th, tw) via a single broadcast."""
    n, sh, sw, c = x.shape
    fh, fw = th // sh, tw // sw
    up = jnp.broadcast_to(x[:, :, None, :, None, :], (n, sh, fh, sw, fw, c))
    return up.reshape(n, th, tw, c)


# -------------------------------------------------------------------------
# Model definition (scaled-down, structure-faithful)
# -------------------------------------------------------------------------

# (kernel, stride, out_ch, returned_name-or-None)  — mirrors efficientnet_v2_s
# .features strides; stages 2,4,6,7 are the FPN-returned layers.
# TODO(synk): MBConv / Fused-MBConv blocks with BN + stochastic depth are
# approximated by single conv+SiLU layers at reduced channel counts.
BACKBONE_CFG = [
    (3, 2, 8,  None),   # 0 stem           /2
    (3, 1, 8,  None),   # 1 stage1         /2
    (3, 2, 12, "0"),    # 2 stage2 (ret)   /4
    (3, 2, 16, None),   # 3 stage3         /8
    (3, 2, 24, "1"),    # 4 stage4 (ret)   /16
    (3, 1, 32, None),   # 5 stage5         /16
    (3, 2, 48, "2"),    # 6 stage6 (ret)   /32
    (1, 1, 96, "3"),    # 7 last 1x1 (ret) /32
]
FPN_CH = 128         # stand-in for out_channels=256 (lane-dense on TPU)
NUM_ANCHORS = 1      # ((8,),...,(256,)) sizes x ((1.0,),) ratios -> 1 per loc
NUM_CLASSES = 2


def _conv_init(key, kh, kw, cin, cout, bias=0.0):
    w = jax.random.normal(key, (kh, kw, cin, cout), jnp.float32) / math.sqrt(kh * kw * cin)
    # Pre-reshape + pre-cast once at init: matmul-ready [K, N] bf16 weight and
    # [1, N] f32 bias (bias add + activation stay in f32 accumulation).
    return {"w": w.reshape(kh * kw * cin, cout).astype(jnp.bfloat16),
            "b": jnp.full((1, cout), bias, jnp.float32)}


def init_params(key):
    keys = iter(jax.random.split(key, 64))
    p = {}
    cin = 3
    backbone = []
    for (k, _s, cout, _name) in BACKBONE_CFG:
        backbone.append(_conv_init(next(keys), k, k, cin, cout))
        cin = cout
    p["backbone"] = backbone
    in_channels_list = [cfg[2] for cfg in BACKBONE_CFG if cfg[3] is not None]
    # FPN lateral 1x1 + output 3x3 per returned level
    p["fpn_inner"] = [_conv_init(next(keys), 1, 1, c, FPN_CH) for c in in_channels_list]
    p["fpn_layer"] = [_conv_init(next(keys), 3, 3, FPN_CH, FPN_CH) for _ in in_channels_list]
    # LastLevelP6P7 (use_P5=False since in_channels_list[-1] != FPN_CH -> P6 from C5)
    p["p6"] = _conv_init(next(keys), 3, 3, in_channels_list[-1], FPN_CH)
    p["p7"] = _conv_init(next(keys), 3, 3, FPN_CH, FPN_CH)
    # RetinaNetClassificationHead: 4x (conv3x3 + ReLU) + cls_logits conv
    p["cls_conv"] = [_conv_init(next(keys), 3, 3, FPN_CH, FPN_CH) for _ in range(4)]
    prior = 0.01
    p["cls_logits"] = _conv_init(next(keys), 3, 3, FPN_CH, NUM_ANCHORS * NUM_CLASSES,
                                 bias=-math.log((1.0 - prior) / prior))
    # RetinaNetRegressionHead: 4x (conv3x3 + ReLU) + bbox_reg conv
    p["reg_conv"] = [_conv_init(next(keys), 3, 3, FPN_CH, FPN_CH) for _ in range(4)]
    p["bbox_reg"] = _conv_init(next(keys), 3, 3, FPN_CH, NUM_ANCHORS * 4)
    return p


def _head_forward(feats, conv_params, final_prm, out_ch, n):
    t = feats
    for prm in conv_params:                        # 4 shared conv3x3+ReLU layers,
        t = conv3x3_multi(t, prm, act="relu")      # each ONE pallas_call over 6 levels
    outs = conv3x3_multi(t, final_prm, act="none", out_dtype=jnp.float32)
    return jnp.concatenate([o.reshape(n, -1, out_ch) for o in outs], axis=1)


def retinanet_forward(params, images_nchw):
    # TODO(synk): GeneralizedRCNNTransform preprocessing (resize/normalize) not implemented.
    x = jnp.transpose(images_nchw, (0, 2, 3, 1)).astype(jnp.float32)  # NCHW -> NHWC
    n = x.shape[0]

    # ---- backbone (EfficientNetV2-S stand-in), returned stages {2,4,6,7} ----
    returned = []
    for cfg, prm in zip(BACKBONE_CFG, params["backbone"]):
        k, s, _cout, name = cfg
        x = conv2d_nhwc(x, prm, kernel=k, stride=s, padding=k // 2, act="silu")
        if name is not None:
            returned.append(x)

    # ---- FPN (torchvision FeaturePyramidNetwork semantics) ----
    last_inner = conv2d_nhwc(returned[-1], params["fpn_inner"][-1],
                             kernel=1, stride=1, padding=0)
    results = [conv2d_nhwc(last_inner, params["fpn_layer"][-1],
                           kernel=3, stride=1, padding=1)]
    for idx in range(len(returned) - 2, -1, -1):
        tgt = returned[idx]
        th, tw = tgt.shape[1], tgt.shape[2]
        up = _upsample_nearest(last_inner, th, tw)
        # lateral 1x1 conv with the top-down add fused into the matmul epilogue
        last_inner = conv2d_nhwc(tgt, params["fpn_inner"][idx],
                                 kernel=1, stride=1, padding=0,
                                 residual=up.reshape(n * th * tw, FPN_CH))
        results.insert(0, conv2d_nhwc(last_inner, params["fpn_layer"][idx],
                                      kernel=3, stride=1, padding=1))

    # LastLevelP6P7: use_P5=False -> P6 computed from the raw C5 backbone feature;
    # the ReLU before P7 is fused into the P7 matmul's A-load (pre_act).
    c5 = returned[-1]
    p6 = conv2d_nhwc(c5, params["p6"], kernel=3, stride=2, padding=1)
    p7 = conv2d_nhwc(p6, params["p7"], kernel=3, stride=2, padding=1, pre_act="relu")
    features = results + [p6, p7]   # 6 pyramid levels

    # ---- RetinaNet heads shared across levels (batched over all 6 levels) ----
    cls_logits = _head_forward(features, params["cls_conv"], params["cls_logits"],
                               NUM_CLASSES, n)
    bbox_regression = _head_forward(features, params["reg_conv"], params["bbox_reg"],
                                    4, n)
    # TODO(synk): anchor generation, box decoding and per-image NMS (eval-mode
    # detection list) have no clean Pallas equivalent; returning raw head outputs.
    return {"cls_logits": cls_logits, "bbox_regression": bbox_regression}


# -------------------------------------------------------------------------

if __name__ == "__main__":
    key = jax.random.PRNGKey(0)
    pkey, xkey = jax.random.split(key)
    params = init_params(pkey)
    images = jax.random.normal(xkey, (2, 3, 64, 64), jnp.float32)   # NCHW, like PyTorch

    fwd = jax.jit(retinanet_forward)
    out = fwd(params, images)
    out = jax.block_until_ready(out)

    # pyramid anchors per image: 16*16 + 4*4 + 2*2 + 2*2 + 1 + 1 = 282
    assert out["cls_logits"].shape == (2, 282, NUM_CLASSES), out["cls_logits"].shape
    assert out["bbox_regression"].shape == (2, 282, 4), out["bbox_regression"].shape
    assert bool(jnp.all(jnp.isfinite(out["cls_logits"])))
    assert bool(jnp.all(jnp.isfinite(out["bbox_regression"])))
    print("KERNEL_OK")
</pallas_src>

<mosaic_0001>
module attributes {stable_mosaic.version = 11 : i64} {
  func.func @_matmul_kernel(%arg0: i32, %arg1: memref<256x27xbf16, #tpu.memory_space<vmem>>, %arg2: memref<27x8xbf16, #tpu.memory_space<vmem>>, %arg3: memref<1x8xf32, #tpu.memory_space<vmem>>, %arg4: memref<256x8xbf16, #tpu.memory_space<vmem>>) attributes {dimension_semantics = [#tpu.dimension_semantics<parallel>], iteration_bounds = array<i64: 8>, scalar_prefetch = 0 : i64, scratch_operands = 0 : i64, tpu.core_type = #tpu.core_type<tc>, window_params = [{transform_indices = @transform_0, window_bounds = array<i64: 256, 27>}, {pipeline_mode = #tpu.pipeline_mode<synchronous>, transform_indices = @transform_1, window_bounds = array<i64: 27, 8>}, {pipeline_mode = #tpu.pipeline_mode<synchronous>, transform_indices = @transform_2, window_bounds = array<i64: 1, 8>}, {transform_indices = @transform_3, window_bounds = array<i64: 256, 8>}]} {
    %c0 = arith.constant 0 : index
    %c0_0 = arith.constant 0 : index
    %0 = vector.load %arg1[%c0, %c0_0] : memref<256x27xbf16, #tpu.memory_space<vmem>>, vector<256x27xbf16>
    %c0_1 = arith.constant 0 : index
    %c0_2 = arith.constant 0 : index
    %1 = vector.load %arg2[%c0_1, %c0_2] : memref<27x8xbf16, #tpu.memory_space<vmem>>, vector<27x8xbf16>
    %cst = arith.constant dense<0.000000e+00> : vector<256x8xf32>
    %2 = tpu.matmul %0, %1, %cst {dimension_numbers = #tpu.dot_dimension_numbers<[1], [0], [0], [1], [0, 0, 1, 1], [], []>} : vector<256x27xbf16>, vector<27x8xbf16>, vector<256x8xf32> -> vector<256x8xf32>
    %c0_3 = arith.constant 0 : index
    %c0_4 = arith.constant 0 : index
    %3 = vector.load %arg3[%c0_3, %c0_4] : memref<1x8xf32, #tpu.memory_space<vmem>>, vector<1x8xf32>
    %4 = vector.broadcast %3 : vector<1x8xf32> to vector<256x8xf32>
    %5 = arith.addf %2, %4 : vector<256x8xf32>
    %6 = arith.negf %5 : vector<256x8xf32>
    %7 = math.exp %6 : vector<256x8xf32>
    %cst_5 = arith.constant 1.000000e+00 : f32
    %8 = vector.broadcast %cst_5 : f32 to vector<256x8xf32>
    %9 = arith.addf %8, %7 : vector<256x8xf32>
    %10 = arith.divf %8, %9 : vector<256x8xf32>
    %11 = arith.mulf %5, %10 : vector<256x8xf32>
    %12 = arith.truncf %11 : vector<256x8xf32> to vector<256x8xbf16>
    %c0_6 = arith.constant 0 : index
    %c0_7 = arith.constant 0 : index
    %13 = vector.load %arg4[%c0_6, %c0_7] : memref<256x8xbf16, #tpu.memory_space<vmem>>, vector<256x8xbf16>
    tpu.vector_store %arg4[%c0_6, %c0_7], %12 {strides = array<i32>} : memref<256x8xbf16, #tpu.memory_space<vmem>>, vector<256x8xbf16>,
    return
  }
  func.func @transform_0(%arg0: i32) -> (i32, i32) {
    %c0_i32 = arith.constant 0 : i32
    %c0_i32_0 = arith.constant 0 : i32
    return %arg0, %c0_i32 : i32, i32
  }
  func.func @transform_1(%arg0: i32) -> (i32, i32) {
    %c0_i32 = arith.constant 0 : i32
    %c0_i32_0 = arith.constant 0 : i32
    %c0_i32_1 = arith.constant 0 : i32
    return %c0_i32, %c0_i32_0 : i32, i32
  }
  func.func @transform_2(%arg0: i32) -> (i32, i32) {
    %c0_i32 = arith.constant 0 : i32
    %c0_i32_0 = arith.constant 0 : i32
    %c0_i32_1 = arith.constant 0 : i32
    return %c0_i32, %c0_i32_0 : i32, i32
  }
  func.func @transform_3(%arg0: i32) -> (i32, i32) {
    %c0_i32 = arith.constant 0 : i32
    %c0_i32_0 = arith.constant 0 : i32
    return %arg0, %c0_i32 : i32, i32
  }
}

module attributes {stable_mosaic.version = 11 : i64} {
  func.func @_matmul_kernel(%arg0: i32, %arg1: memref<256x72xbf16, #tpu.memory_space<vmem>>, %arg2: memref<72x8xbf16, #tpu.memory_space<vmem>>, %arg3: memref<1x8xf32, #tpu.memory_space<vmem>>, %arg4: memref<256x8xbf16, #tpu.memory_space<vmem>>) attributes {dimension_semantics = [#tpu.dimension_semantics<parallel>], iteration_bounds = array<i64: 8>, scalar_prefetch = 0 : i64, scratch_operands = 0 : i64, tpu.core_type = #tpu.core_type<tc>, window_params = [{transform_indices = @transform_0, window_bounds = array<i64: 256, 72>}, {pipeline_mode = #tpu.pipeline_mode<synchronous>, transform_indices = @transform_1, window_bounds = array<i64: 72, 8>}, {pipeline_mode = #tpu.pipeline_mode<synchronous>, transform_indices = @transform_2, window_bounds = array<i64: 1, 8>}, {transform_indices = @transform_3, window_bounds = array<i64: 256, 8>}]} {
    %c0 = arith.constant 0 : index
    %c0_0 = arith.constant 0 : index
    %0 = vector.load %arg1[%c0, %c0_0] : memref<256x72xbf16, #tpu.memory_space<vmem>>, vector<256x72xbf16>
    %c0_1 = arith.constant 0 : index
    %c0_2 = arith.constant 0 : index
    %1 = vector.load %arg2[%c0_1, %c0_2] : memref<72x8xbf16, #tpu.memory_space<vmem>>, vector<72x8xbf16>
    %cst = arith.constant dense<0.000000e+00> : vector<256x8xf32>
    %2 = tpu.matmul %0, %1, %cst {dimension_numbers = #tpu.dot_dimension_numbers<[1], [0], [0], [1], [0, 0, 1, 1], [], []>} : vector<256x72xbf16>, vector<72x8xbf16>, vector<256x8xf32> -> vector<256x8xf32>
    %c0_3 = arith.constant 0 : index
    %c0_4 = arith.constant 0 : index
    %3 = vector.load %arg3[%c0_3, %c0_4] : memref<1x8xf32, #tpu.memory_space<vmem>>, vector<1x8xf32>
    %4 = vector.broadcast %3 : vector<1x8xf32> to vector<256x8xf32>
    %5 = arith.addf %2, %4 : vector<256x8xf32>
    %6 = arith.negf %5 : vector<256x8xf32>
    %7 = math.exp %6 : vector<256x8xf32>
    %cst_5 = arith.constant 1.000000e+00 : f32
    %8 = vector.broadcast %cst_5 : f32 to vector<256x8xf32>
    %9 = arith.addf %8, %7 : vector<256x8xf32>
    %10 = arith.divf %8, %9 : vector<256x8xf32>
    %11 = arith.mulf %5, %10 : vector<256x8xf32>
    %12 = arith.truncf %11 : vector<256x8xf32> to vector<256x8xbf16>
    %c0_6 = arith.constant 0 : index
    %c0_7 = arith.constant 0 : index
    %13 = vector.load %arg4[%c0_6, %c0_7] : memref<256x8xbf16, #tpu.memory_space<vmem>>, vector<256x8xbf16>
    tpu.vector_store %arg4[%c0_6, %c0_7], %12 {strides = array<i32>} : memref<256x8xbf16, #tpu.memory_space<vmem>>, vector<256x8xbf16>,
    return
  }
  func.func @transform_0(%arg0: i32) -> (i32, i32) {
    %c0_i32 = arith.constant 0 : i32
    %c0_i32_0 = arith.constant 0 : i32
    return %arg0, %c0_i32 : i32, i32
  }
  func.func @transform_1(%arg0: i32) -> (i32, i32) {
    %c0_i32 = arith.constant 0 : i32
    %c0_i32_0 = arith.constant 0 : i32
    %c0_i32_1 = arith.constant 0 : i32
    return %c0_i32, %c0_i32_0 : i32, i32
  }
  func.func @transform_2(%arg0: i32) -> (i32, i32) {
    %c0_i32 = arith.constant 0 : i32
    %c0_i32_0 = arith.constant 0 : i32
    %c0_i32_1 = arith.constant 0 : i32
    return %c0_i32, %c0_i32_0 : i32, i32
  }
  func.func @transform_3(%arg0: i32) -> (i32, i32) {
    %c0_i32 = arith.constant 0 : i32
    %c0_i32_0 = arith.constant 0 : i32
    return %arg0, %c0_i32 : i32, i32
  }
}

module attributes {stable_mosaic.version = 11 : i64} {
  func.func @_matmul_kernel(%arg0: i32, %arg1: memref<256x72xbf16, #tpu.memory_space<vmem>>, %arg2: memref<72x12xbf16, #tpu.memory_space<vmem>>, %arg3: memref<1x12xf32, #tpu.memory_space<vmem>>, %arg4: memref<256x12xbf16, #tpu.memory_space<vmem>>) attributes {dimension_semantics = [#tpu.dimension_semantics<parallel>], iteration_bounds = array<i64: 2>, scalar_prefetch = 0 : i64, scratch_operands = 0 : i64, tpu.core_type = #tpu.core_type<tc>, window_params = [{transform_indices = @transform_0, window_bounds = array<i64: 256, 72>}, {pipeline_mode = #tpu.pipeline_mode<synchronous>, transform_indices = @transform_1, window_bounds = array<i64: 72, 12>}, {pipeline_mode = #tpu.pipeline_mode<synchronous>, transform_indices = @transform_2, window_bounds = array<i64: 1, 12>}, {transform_indices = @transform_3, window_bounds = array<i64: 256, 12>}]} {
    %c0 = arith.constant 0 : index
    %c0_0 = arith.constant 0 : index
    %0 = vector.load %arg1[%c0, %c0_0] : memref<256x72xbf16, #tpu.memory_space<vmem>>, vector<256x72xbf16>
    %c0_1 = arith.constant 0 : index
    %c0_2 = arith.constant 0 : index
    %1 = vector.load %arg2[%c0_1, %c0_2] : memref<72x12xbf16, #tpu.memory_space<vmem>>, vector<72x12xbf16>
    %cst = arith.constant dense<0.000000e+00> : vector<256x12xf32>
    %2 = tpu.matmul %0, %1, %cst {dimension_numbers = #tpu.dot_dimension_numbers<[1], [0], [0], [1], [0, 0, 1, 1], [], []>} : vector<256x72xbf16>, vector<72x12xbf16>, vector<256x12xf32> -> vector<256x12xf32>
    %c0_3 = arith.constant 0 : index
    %c0_4 = arith.constant 0 : index
    %3 = vector.load %arg3[%c0_3, %c0_4] : memref<1x12xf32, #tpu.memory_space<vmem>>, vector<1x12xf32>
    %4 = vector.broadcast %3 : vector<1x12xf32> to vector<256x12xf32>
    %5 = arith.addf %2, %4 : vector<256x12xf32>
    %6 = arith.negf %5 : vector<256x12xf32>
    %7 = math.exp %6 : vector<256x12xf32>
    %cst_5 = arith.constant 1.000000e+00 : f32
    %8 = vector.broadcast %cst_5 : f32 to vector<256x12xf32>
    %9 = arith.addf %8, %7 : vector<256x12xf32>
    %10 = arith.divf %8, %9 : vector<256x12xf32>
    %11 = arith.mulf %5, %10 : vector<256x12xf32>
    %12 = arith.truncf %11 : vector<256x12xf32> to vector<256x12xbf16>
    %c0_6 = arith.constant 0 : index
    %c0_7 = arith.constant 0 : index
    %13 = vector.load %arg4[%c0_6, %c0_7] : memref<256x12xbf16, #tpu.memory_space<vmem>>, vector<256x12xbf16>
    tpu.vector_store %arg4[%c0_6, %c0_7], %12 {strides = array<i32>} : memref<256x12xbf16, #tpu.memory_space<vmem>>, vector<256x12xbf16>,
    return
  }
  func.func @transform_0(%arg0: i32) -> (i32, i32) {
    %c0_i32 = arith.constant 0 : i32
    %c0_i32_0 = arith.constant 0 : i32
    return %arg0, %c0_i32 : i32, i32
  }
  func.func @transform_1(%arg0: i32) -> (i32, i32) {
    %c0_i32 = arith.constant 0 : i32
    %c0_i32_0 = arith.constant 0 : i32
    %c0_i32_1 = arith.constant 0 : i32
    return %c0_i32, %c0_i32_0 : i32, i32
  }
  func.func @transform_2(%arg0: i32) -> (i32, i32) {
    %c0_i32 = arith.constant 0 : i32
    %c0_i32_0 = arith.constant 0 : i32
    %c0_i32_1 = arith.constant 0 : i32
    return %c0_i32, %c0_i32_0 : i32, i32
  }
  func.func @transform_3(%arg0: i32) -> (i32, i32) {
    %c0_i32 = arith.constant 0 : i32
    %c0_i32_0 = arith.constant 0 : i32
    return %arg0, %c0_i32 : i32, i32
  }
}

module attributes {stable_mosaic.version = 11 : i64} {
  func.func @_matmul_kernel(%arg0: i32, %arg1: memref<128x108xbf16, #tpu.memory_space<vmem>>, %arg2: memref<108x16xbf16, #tpu.memory_space<vmem>>, %arg3: memref<1x16xf32, #tpu.memory_space<vmem>>, %arg4: memref<128x16xbf16, #tpu.memory_space<vmem>>) attributes {dimension_semantics = [#tpu.dimension_semantics<parallel>], iteration_bounds = array<i64: 1>, scalar_prefetch = 0 : i64, scratch_operands = 0 : i64, tpu.core_type = #tpu.core_type<tc>, window_params = [{transform_indices = @transform_0, window_bounds = array<i64: 128, 108>}, {pipeline_mode = #tpu.pipeline_mode<synchronous>, transform_indices = @transform_1, window_bounds = array<i64: 108, 16>}, {pipeline_mode = #tpu.pipeline_mode<synchronous>, transform_indices = @transform_2, window_bounds = array<i64: 1, 16>}, {transform_indices = @transform_3, window_bounds = array<i64: 128, 16>}]} {
    %c0 = arith.constant 0 : index
    %c0_0 = arith.constant 0 : index
    %0 = vector.load %arg1[%c0, %c0_0] : memref<128x108xbf16, #tpu.memory_space<vmem>>, vector<128x108xbf16>
    %c0_1 = arith.constant 0 : index
    %c0_2 = arith.constant 0 : index
    %1 = vector.load %arg2[%c0_1, %c0_2] : memref<108x16xbf16, #tpu.memory_space<vmem>>, vector<108x16xbf16>
    %cst = arith.constant dense<0.000000e+00> : vector<128x16xf32>
    %2 = tpu.matmul %0, %1, %cst {dimension_numbers = #tpu.dot_dimension_numbers<[1], [0], [0], [1], [0, 0, 1, 1], [], []>} : vector<128x108xbf16>, vector<108x16xbf16>, vector<128x16xf32> -> vector<128x16xf32>
    %c0_3 = arith.constant 0 : index
    %c0_4 = arith.constant 0 : index
    %3 = vector.load %arg3[%c0_3, %c0_4] : memref<1x16xf32, #tpu.memory_space<vmem>>, vector<1x16xf32>
    %4 = vector.broadcast %3 : vector<1x16xf32> to vector<128x16xf32>
    %5 = arith.addf %2, %4 : vector<128x16xf32>
    %6 = arith.negf %5 : vector<128x16xf32>
    %7 = math.exp %6 : vector<128x16xf32>
    %cst_5 = arith.constant 1.000000e+00 : f32
    %8 = vector.broadcast %cst_5 : f32 to vector<128x16xf32>
    %9 = arith.addf %8, %7 : vector<128x16xf32>
    %10 = arith.divf %8, %9 : vector<128x16xf32>
    %11 = arith.mulf %5, %10 : vector<128x16xf32>
    %12 = arith.truncf %11 : vector<128x16xf32> to vector<128x16xbf16>
    %c0_6 = arith.constant 0 : index
    %c0_7 = arith.constant 0 : index
    %13 = vector.load %arg4[%c0_6, %c0_7] : memref<128x16xbf16, #tpu.memory_space<vmem>>, vector<128x16xbf16>
    tpu.vector_store %arg4[%c0_6, %c0_7], %12 {strides = array<i32>} : memref<128x16xbf16, #tpu.memory_space<vmem>>, vector<128x16xbf16>,
    return
  }
  func.func @transform_0(%arg0: i32) -> (i32, i32) {
    %c0_i32 = arith.constant 0 : i32
    %c0_i32_0 = arith.constant 0 : i32
    return %arg0, %c0_i32 : i32, i32
  }
  func.func @transform_1(%arg0: i32) -> (i32, i32) {
    %c0_i32 = arith.constant 0 : i32
    %c0_i32_0 = arith.constant 0 : i32
    %c0_i32_1 = arith.constant 0 : i32
    return %c0_i32, %c0_i32_0 : i32, i32
  }
  func.func @transform_2(%arg0: i32) -> (i32, i32) {
    %c0_i32 = arith.constant 0 : i32
    %c0_i32_0 = arith.constant 0 : i32
    %c0_i32_1 = arith.constant 0 : i32
    return %c0_i32, %c0_i32_0 : i32, i32
  }
  func.func @transform_3(%arg0: i32) -> (i32, i32) {
    %c0_i32 = arith.constant 0 : i32
    %c0_i32_0 = arith.constant 0 : i32
    return %arg0, %c0_i32 : i32, i32
  }
}

module attributes {stable_mosaic.version = 11 : i64} {
  func.func @_matmul_kernel(%arg0: i32, %arg1: memref<32x144xbf16, #tpu.memory_space<vmem>>, %arg2: memref<144x24xbf16, #tpu.memory_space<vmem>>, %arg3: memref<1x24xf32, #tpu.memory_space<vmem>>, %arg4: memref<32x24xbf16, #tpu.memory_space<vmem>>) attributes {dimension_semantics = [#tpu.dimension_semantics<parallel>], iteration_bounds = array<i64: 1>, scalar_prefetch = 0 : i64, scratch_operands = 0 : i64, tpu.core_type = #tpu.core_type<tc>, window_params = [{transform_indices = @transform_0, window_bounds = array<i64: 32, 144>}, {pipeline_mode = #tpu.pipeline_mode<synchronous>, transform_indices = @transform_1, window_bounds = array<i64: 144, 24>}, {pipeline_mode = #tpu.pipeline_mode<synchronous>, transform_indices = @transform_2, window_bounds = array<i64: 1, 24>}, {transform_indices = @transform_3, window_bounds = array<i64: 32, 24>}]} {
    %c0 = arith.constant 0 : index
    %c0_0 = arith.constant 0 : index
    %0 = vector.load %arg1[%c0, %c0_0] : memref<32x144xbf16, #tpu.memory_space<vmem>>, vector<32x144xbf16>
    %c0_1 = arith.constant 0 : index
    %c0_2 = arith.constant 0 : index
    %1 = vector.load %arg2[%c0_1, %c0_2] : memref<144x24xbf16, #tpu.memory_space<vmem>>, vector<144x24xbf16>
    %cst = arith.constant dense<0.000000e+00> : vector<32x24xf32>
    %2 = tpu.matmul %0, %1, %cst {dimension_numbers = #tpu.dot_dimension_numbers<[1], [0], [0], [1], [0, 0, 1, 1], [], []>} : vector<32x144xbf16>, vector<144x24xbf16>, vector<32x24xf32> -> vector<32x24xf32>
    %c0_3 = arith.constant 0 : index
    %c0_4 = arith.constant 0 : index
    %3 = vector.load %arg3[%c0_3, %c0_4] : memref<1x24xf32, #tpu.memory_space<vmem>>, vector<1x24xf32>
    %4 = vector.broadcast %3 : vector<1x24xf32> to vector<32x24xf32>
    %5 = arith.addf %2, %4 : vector<32x24xf32>
    %6 = arith.negf %5 : vector<32x24xf32>
    %7 = math.exp %6 : vector<32x24xf32>
    %cst_5 = arith.constant 1.000000e+00 : f32
    %8 = vector.broadcast %cst_5 : f32 to vector<32x24xf32>
    %9 = arith.addf %8, %7 : vector<32x24xf32>
    %10 = arith.divf %8, %9 : vector<32x24xf32>
    %11 = arith.mulf %5, %10 : vector<32x24xf32>
    %12 = arith.truncf %11 : vector<32x24xf32> to vector<32x24xbf16>
    %c0_6 = arith.constant 0 : index
    %c0_7 = arith.constant 0 : index
    %13 = vector.load %arg4[%c0_6, %c0_7] : memref<32x24xbf16, #tpu.memory_space<vmem>>, vector<32x24xbf16>
    tpu.vector_store %arg4[%c0_6, %c0_7], %12 {strides = array<i32>} : memref<32x24xbf16, #tpu.memory_space<vmem>>, vector<32x24xbf16>,
    return
  }
  func.func @transform_0(%arg0: i32) -> (i32, i32) {
    %c0_i32 = arith.constant 0 : i32
    %c0_i32_0 = arith.constant 0 : i32
    return %arg0, %c0_i32 : i32, i32
  }
  func.func @transform_1(%arg0: i32) -> (i32, i32) {
    %c0_i32 = arith.constant 0 : i32
    %c0_i32_0 = arith.constant 0 : i32
    %c0_i32_1 = arith.constant 0 : i32
    return %c0_i32, %c0_i32_0 : i32, i32
  }
  func.func @transform_2(%arg0: i32) -> (i32, i32) {
    %c0_i32 = arith.constant 0 : i32
    %c0_i32_0 = arith.constant 0 : i32
    %c0_i32_1 = arith.constant 0 : i32
    return %c0_i32, %c0_i32_0 : i32, i32
  }
  func.func @transform_3(%arg0: i32) -> (i32, i32) {
    %c0_i32 = arith.constant 0 : i32
    %c0_i32_0 = arith.constant 0 : i32
    return %arg0, %c0_i32 : i32, i32
  }
}

module attributes {stable_mosaic.version = 11 : i64} {
  func.func @_matmul_kernel(%arg0: i32, %arg1: memref<32x216xbf16, #tpu.memory_space<vmem>>, %arg2: memref<216x32xbf16, #tpu.memory_space<vmem>>, %arg3: memref<1x32xf32, #tpu.memory_space<vmem>>, %arg4: memref<32x32xbf16, #tpu.memory_space<vmem>>) attributes {dimension_semantics = [#tpu.dimension_semantics<parallel>], iteration_bounds = array<i64: 1>, scalar_prefetch = 0 : i64, scratch_operands = 0 : i64, tpu.core_type = #tpu.core_type<tc>, window_params = [{transform_indices = @transform_0, window_bounds = array<i64: 32, 216>}, {pipeline_mode = #tpu.pipeline_mode<synchronous>, transform_indices = @transform_1, window_bounds = array<i64: 216, 32>}, {pipeline_mode = #tpu.pipeline_mode<synchronous>, transform_indices = @transform_2, window_bounds = array<i64: 1, 32>}, {transform_indices = @transform_3, window_bounds = array<i64: 32, 32>}]} {
    %c0 = arith.constant 0 : index
    %c0_0 = arith.constant 0 : index
    %0 = vector.load %arg1[%c0, %c0_0] : memref<32x216xbf16, #tpu.memory_space<vmem>>, vector<32x216xbf16>
    %c0_1 = arith.constant 0 : index
    %c0_2 = arith.constant 0 : index
    %1 = vector.load %arg2[%c0_1, %c0_2] : memref<216x32xbf16, #tpu.memory_space<vmem>>, vector<216x32xbf16>
    %cst = arith.constant dense<0.000000e+00> : vector<32x32xf32>
    %2 = tpu.matmul %0, %1, %cst {dimension_numbers = #tpu.dot_dimension_numbers<[1], [0], [0], [1], [0, 0, 1, 1], [], []>} : vector<32x216xbf16>, vector<216x32xbf16>, vector<32x32xf32> -> vector<32x32xf32>
    %c0_3 = arith.constant 0 : index
    %c0_4 = arith.constant 0 : index
    %3 = vector.load %arg3[%c0_3, %c0_4] : memref<1x32xf32, #tpu.memory_space<vmem>>, vector<1x32xf32>
    %4 = vector.broadcast %3 : vector<1x32xf32> to vector<32x32xf32>
    %5 = arith.addf %2, %4 : vector<32x32xf32>
    %6 = arith.negf %5 : vector<32x32xf32>
    %7 = math.exp %6 : vector<32x32xf32>
    %cst_5 = arith.constant 1.000000e+00 : f32
    %8 = vector.broadcast %cst_5 : f32 to vector<32x32xf32>
    %9 = arith.addf %8, %7 : vector<32x32xf32>
    %10 = arith.divf %8, %9 : vector<32x32xf32>
    %11 = arith.mulf %5, %10 : vector<32x32xf32>
    %12 = arith.truncf %11 : vector<32x32xf32> to vector<32x32xbf16>
    %c0_6 = arith.constant 0 : index
    %c0_7 = arith.constant 0 : index
    %13 = vector.load %arg4[%c0_6, %c0_7] : memref<32x32xbf16, #tpu.memory_space<vmem>>, vector<32x32xbf16>
    tpu.vector_store %arg4[%c0_6, %c0_7], %12 {strides = array<i32>} : memref<32x32xbf16, #tpu.memory_space<vmem>>, vector<32x32xbf16>,
    return
  }
  func.func @transform_0(%arg0: i32) -> (i32, i32) {
    %c0_i32 = arith.constant 0 : i32
    %c0_i32_0 = arith.constant 0 : i32
    return %arg0, %c0_i32 : i32, i32
  }
  func.func @transform_1(%arg0: i32) -> (i32, i32) {
    %c0_i32 = arith.constant 0 : i32
    %c0_i32_0 = arith.constant 0 : i32
    %c0_i32_1 = arith.constant 0 : i32
    return %c0_i32, %c0_i32_0 : i32, i32
  }
  func.func @transform_2(%arg0: i32) -> (i32, i32) {
    %c0_i32 = arith.constant 0 : i32
    %c0_i32_0 = arith.constant 0 : i32
    %c0_i32_1 = arith.constant 0 : i32
    return %c0_i32, %c0_i32_0 : i32, i32
  }
  func.func @transform_3(%arg0: i32) -> (i32, i32) {
    %c0_i32 = arith.constant 0 : i32
    %c0_i32_0 = arith.constant 0 : i32
    return %arg0, %c0_i32 : i32, i32
  }
}

module attributes {stable_mosaic.version = 11 : i64} {
  func.func @_matmul_kernel(%arg0: i32, %arg1: memref<8x288xbf16, #tpu.memory_space<vmem>>, %arg2: memref<288x48xbf16, #tpu.memory_space<vmem>>, %arg3: memref<1x48xf32, #tpu.memory_space<vmem>>, %arg4: memref<8x48xbf16, #tpu.memory_space<vmem>>) attributes {dimension_semantics = [#tpu.dimension_semantics<parallel>], iteration_bounds = array<i64: 1>, scalar_prefetch = 0 : i64, scratch_operands = 0 : i64, tpu.core_type = #tpu.core_type<tc>, window_params = [{transform_indices = @transform_0, window_bounds = array<i64: 8, 288>}, {pipeline_mode = #tpu.pipeline_mode<synchronous>, transform_indices = @transform_1, window_bounds = array<i64: 288, 48>}, {pipeline_mode = #tpu.pipeline_mode<synchronous>, transform_indices = @transform_2, window_bounds = array<i64: 1, 48>}, {transform_indices = @transform_3, window_bounds = array<i64: 8, 48>}]} {
    %c0 = arith.constant 0 : index
    %c0_0 = arith.constant 0 : index
    %0 = vector.load %arg1[%c0, %c0_0] : memref<8x288xbf16, #tpu.memory_space<vmem>>, vector<8x288xbf16>
    %c0_1 = arith.constant 0 : index
    %c0_2 = arith.constant 0 : index
    %1 = vector.load %arg2[%c0_1, %c0_2] : memref<288x48xbf16, #tpu.memory_space<vmem>>, vector<288x48xbf16>
    %cst = arith.constant dense<0.000000e+00> : vector<8x48xf32>
    %2 = tpu.matmul %0, %1, %cst {dimension_numbers = #tpu.dot_dimension_numbers<[1], [0], [0], [1], [0, 0, 1, 1], [], []>} : vector<8x288xbf16>, vector<288x48xbf16>, vector<8x48xf32> -> vector<8x48xf32>
    %c0_3 = arith.constant 0 : index
    %c0_4 = arith.constant 0 : index
    %3 = vector.load %arg3[%c0_3, %c0_4] : memref<1x48xf32, #tpu.memory_space<vmem>>, vector<1x48xf32>
    %4 = vector.broadcast %3 : vector<1x48xf32> to vector<8x48xf32>
    %5 = arith.addf %2, %4 : vector<8x48xf32>
    %6 = arith.negf %5 : vector<8x48xf32>
    %7 = math.exp %6 : vector<8x48xf32>
    %cst_5 = arith.constant 1.000000e+00 : f32
    %8 = vector.broadcast %cst_5 : f32 to vector<8x48xf32>
    %9 = arith.addf %8, %7 : vector<8x48xf32>
    %10 = arith.divf %8, %9 : vector<8x48xf32>
    %11 = arith.mulf %5, %10 : vector<8x48xf32>
    %12 = arith.truncf %11 : vector<8x48xf32> to vector<8x48xbf16>
    %c0_6 = arith.constant 0 : index
    %c0_7 = arith.constant 0 : index
    %13 = vector.load %arg4[%c0_6, %c0_7] : memref<8x48xbf16, #tpu.memory_space<vmem>>, vector<8x48xbf16>
    tpu.vector_store %arg4[%c0_6, %c0_7], %12 {strides = array<i32>} : memref<8x48xbf16, #tpu.memory_space<vmem>>, vector<8x48xbf16>,
    return
  }
  func.func @transform_0(%arg0: i32) -> (i32, i32) {
    %c0_i32 = arith.constant 0 : i32
    %c0_i32_0 = arith.constant 0 : i32
    return %arg0, %c0_i32 : i32, i32
  }
  func.func @transform_1(%arg0: i32) -> (i32, i32) {
    %c0_i32 = arith.constant 0 : i32
    %c0_i32_0 = arith.constant 0 : i32
    %c0_i32_1 = arith.constant 0 : i32
    return %c0_i32, %c0_i32_0 : i32, i32
  }
  func.func @transform_2(%arg0: i32) -> (i32, i32) {
    %c0_i32 = arith.constant 0 : i32
    %c0_i32_0 = arith.constant 0 : i32
    %c0_i32_1 = arith.constant 0 : i32
    return %c0_i32, %c0_i32_0 : i32, i32
  }
  func.func @transform_3(%arg0: i32) -> (i32, i32) {
    %c0_i32 = arith.constant 0 : i32
    %c0_i32_0 = arith.constant 0 : i32
    return %arg0, %c0_i32 : i32, i32
  }
}

module attributes {stable_mosaic.version = 11 : i64} {
  func.func @_matmul_kernel(%arg0: i32, %arg1: memref<8x48xbf16, #tpu.memory_space<vmem>>, %arg2: memref<48x96xbf16, #tpu.memory_space<vmem>>, %arg3: memref<1x96xf32, #tpu.memory_space<vmem>>, %arg4: memref<8x96xbf16, #tpu.memory_space<vmem>>) attributes {dimension_semantics = [#tpu.dimension_semantics<parallel>], iteration_bounds = array<i64: 1>, scalar_prefetch = 0 : i64, scratch_operands = 0 : i64, tpu.core_type = #tpu.core_type<tc>, window_params = [{transform_indices = @transform_0, window_bounds = array<i64: 8, 48>}, {pipeline_mode = #tpu.pipeline_mode<synchronous>, transform_indices = @transform_1, window_bounds = array<i64: 48, 96>}, {pipeline_mode = #tpu.pipeline_mode<synchronous>, transform_indices = @transform_2, window_bounds = array<i64: 1, 96>}, {transform_indices = @transform_3, window_bounds = array<i64: 8, 96>}]} {
    %c0 = arith.constant 0 : index
    %c0_0 = arith.constant 0 : index
    %0 = vector.load %arg1[%c0, %c0_0] : memref<8x48xbf16, #tpu.memory_space<vmem>>, vector<8x48xbf16>
    %c0_1 = arith.constant 0 : index
    %c0_2 = arith.constant 0 : index
    %1 = vector.load %arg2[%c0_1, %c0_2] : memref<48x96xbf16, #tpu.memory_space<vmem>>, vector<48x96xbf16>
    %cst = arith.constant dense<0.000000e+00> : vector<8x96xf32>
    %2 = tpu.matmul %0, %1, %cst {dimension_numbers = #tpu.dot_dimension_numbers<[1], [0], [0], [1], [0, 0, 1, 1], [], []>} : vector<8x48xbf16>, vector<48x96xbf16>, vector<8x96xf32> -> vector<8x96xf32>
    %c0_3 = arith.constant 0 : index
    %c0_4 = arith.constant 0 : index
    %3 = vector.load %arg3[%c0_3, %c0_4] : memref<1x96xf32, #tpu.memory_space<vmem>>, vector<1x96xf32>
    %4 = vector.broadcast %3 : vector<1x96xf32> to vector<8x96xf32>
    %5 = arith.addf %2, %4 : vector<8x96xf32>
    %6 = arith.negf %5 : vector<8x96xf32>
    %7 = math.exp %6 : vector<8x96xf32>
    %cst_5 = arith.constant 1.000000e+00 : f32
    %8 = vector.broadcast %cst_5 : f32 to vector<8x96xf32>
    %9 = arith.addf %8, %7 : vector<8x96xf32>
    %10 = arith.divf %8, %9 : vector<8x96xf32>
    %11 = arith.mulf %5, %10 : vector<8x96xf32>
    %12 = arith.truncf %11 : vector<8x96xf32> to vector<8x96xbf16>
    %c0_6 = arith.constant 0 : index
    %c0_7 = arith.constant 0 : index
    %13 = vector.load %arg4[%c0_6, %c0_7] : memref<8x96xbf16, #tpu.memory_space<vmem>>, vector<8x96xbf16>
    tpu.vector_store %arg4[%c0_6, %c0_7], %12 {strides = array<i32>} : memref<8x96xbf16, #tpu.memory_space<vmem>>, vector<8x96xbf16>,
    return
  }
  func.func @transform_0(%arg0: i32) -> (i32, i32) {
    %c0_i32 = arith.constant 0 : i32
    %c0_i32_0 = arith.constant 0 : i32
    return %arg0, %c0_i32 : i32, i32
  }
  func.func @transform_1(%arg0: i32) -> (i32, i32) {
    %c0_i32 = arith.constant 0 : i32
    %c0_i32_0 = arith.constant 0 : i32
    %c0_i32_1 = arith.constant 0 : i32
    return %c0_i32, %c0_i32_0 : i32, i32
  }
  func.func @transform_2(%arg0: i32) -> (i32, i32) {
    %c0_i32 = arith.constant 0 : i32
    %c0_i32_0 = arith.constant 0 : i32
    %c0_i32_1 = arith.constant 0 : i32
    return %c0_i32, %c0_i32_0 : i32, i32
  }
  func.func @transform_3(%arg0: i32) -> (i32, i32) {
    %c0_i32 = arith.constant 0 : i32
    %c0_i32_0 = arith.constant 0 : i32
    return %arg0, %c0_i32 : i32, i32
  }
}

module attributes {stable_mosaic.version = 11 : i64} {
  func.func @_matmul_kernel(%arg0: i32, %arg1: memref<8x864xbf16, #tpu.memory_space<vmem>>, %arg2: memref<864x128xbf16, #tpu.memory_space<vmem>>, %arg3: memref<1x128xf32, #tpu.memory_space<vmem>>, %arg4: memref<8x128xbf16, #tpu.memory_space<vmem>>) attributes {dimension_semantics = [#tpu.dimension_semantics<parallel>], iteration_bounds = array<i64: 1>, scalar_prefetch = 0 : i64, scratch_operands = 0 : i64, tpu.core_type = #tpu.core_type<tc>, window_params = [{transform_indices = @transform_0, window_bounds = array<i64: 8, 864>}, {pipeline_mode = #tpu.pipeline_mode<synchronous>, transform_indices = @transform_1, window_bounds = array<i64: 864, 128>}, {pipeline_mode = #tpu.pipeline_mode<synchronous>, transform_indices = @transform_2, window_bounds = array<i64: 1, 128>}, {transform_indices = @transform_3, window_bounds = array<i64: 8, 128>}]} {
    %c0 = arith.constant 0 : index
    %c0_0 = arith.constant 0 : index
    %0 = vector.load %arg1[%c0, %c0_0] : memref<8x864xbf16, #tpu.memory_space<vmem>>, vector<8x864xbf16>
    %c0_1 = arith.constant 0 : index
    %c0_2 = arith.constant 0 : index
    %1 = vector.load %arg2[%c0_1, %c0_2] : memref<864x128xbf16, #tpu.memory_space<vmem>>, vector<864x128xbf16>
    %cst = arith.constant dense<0.000000e+00> : vector<8x128xf32>
    %2 = tpu.matmul %0, %1, %cst {dimension_numbers = #tpu.dot_dimension_numbers<[1], [0], [0], [1], [0, 0, 1, 1], [], []>} : vector<8x864xbf16>, vector<864x128xbf16>, vector<8x128xf32> -> vector<8x128xf32>
    %c0_3 = arith.constant 0 : index
    %c0_4 = arith.constant 0 : index
    %3 = vector.load %arg3[%c0_3, %c0_4] : memref<1x128xf32, #tpu.memory_space<vmem>>, vector<1x128xf32>
    %4 = vector.broadcast %3 : vector<1x128xf32> to vector<8x128xf32>
    %5 = arith.addf %2, %4 : vector<8x128xf32>
    %6 = arith.truncf %5 : vector<8x128xf32> to vector<8x128xbf16>
    %c0_5 = arith.constant 0 : index
    %c0_6 = arith.constant 0 : index
    %7 = vector.load %arg4[%c0_5, %c0_6] : memref<8x128xbf16, #tpu.memory_space<vmem>>, vector<8x128xbf16>
    tpu.vector_store %arg4[%c0_5, %c0_6], %6 {strides = array<i32>} : memref<8x128xbf16, #tpu.memory_space<vmem>>, vector<8x128xbf16>,
    return
  }
  func.func @transform_0(%arg0: i32) -> (i32, i32) {
    %c0_i32 = arith.constant 0 : i32
    %c0_i32_0 = arith.constant 0 : i32
    return %arg0, %c0_i32 : i32, i32
  }
  func.func @transform_1(%arg0: i32) -> (i32, i32) {
    %c0_i32 = arith.constant 0 : i32
    %c0_i32_0 = arith.constant 0 : i32
    %c0_i32_1 = arith.constant 0 : i32
    return %c0_i32, %c0_i32_0 : i32, i32
  }
  func.func @transform_2(%arg0: i32) -> (i32, i32) {
    %c0_i32 = arith.constant 0 : i32
    %c0_i32_0 = arith.constant 0 : i32
    %c0_i32_1 = arith.constant 0 : i32
    return %c0_i32, %c0_i32_0 : i32, i32
  }
  func.func @transform_3(%arg0: i32) -> (i32, i32) {
    %c0_i32 = arith.constant 0 : i32
    %c0_i32_0 = arith.constant 0 : i32
    return %arg0, %c0_i32 : i32, i32
  }
}

module attributes {stable_mosaic.version = 11 : i64} {
  func.func @_matmul_kernel(%arg0: i32, %arg1: memref<8x1152xbf16, #tpu.memory_space<vmem>>, %arg2: memref<1152x128xbf16, #tpu.memory_space<vmem>>, %arg3: memref<1x128xf32, #tpu.memory_space<vmem>>, %arg4: memref<8x128xbf16, #tpu.memory_space<vmem>>) attributes {dimension_semantics = [#tpu.dimension_semantics<parallel>], iteration_bounds = array<i64: 1>, scalar_prefetch = 0 : i64, scratch_operands = 0 : i64, tpu.core_type = #tpu.core_type<tc>, window_params = [{transform_indices = @transform_0, window_bounds = array<i64: 8, 1152>}, {pipeline_mode = #tpu.pipeline_mode<synchronous>, transform_indices = @transform_1, window_bounds = array<i64: 1152, 128>}, {pipeline_mode = #tpu.pipeline_mode<synchronous>, transform_indices = @transform_2, window_bounds = array<i64: 1, 128>}, {transform_indices = @transform_3, window_bounds = array<i64: 8, 128>}]} {
    %c0 = arith.constant 0 : index
    %c0_0 = arith.constant 0 : index
    %0 = vector.load %arg1[%c0, %c0_0] : memref<8x1152xbf16, #tpu.memory_space<vmem>>, vector<8x1152xbf16>
    %cst = arith.constant 0.000000e+00 : bf16
    %1 = vector.broadcast %cst : bf16 to vector<8x1152xbf16>
    %2 = arith.maximumf %0, %1 : vector<8x1152xbf16>
    %c0_1 = arith.constant 0 : index
    %c0_2 = arith.constant 0 : index
    %3 = vector.load %arg2[%c0_1, %c0_2] : memref<1152x128xbf16, #tpu.memory_space<vmem>>, vector<1152x128xbf16>
    %cst_3 = arith.constant dense<0.000000e+00> : vector<8x128xf32>
    %4 = tpu.matmul %2, %3, %cst_3 {dimension_numbers = #tpu.dot_dimension_numbers<[1], [0], [0], [1], [0, 0, 1, 1], [], []>} : vector<8x1152xbf16>, vector<1152x128xbf16>, vector<8x128xf32> -> vector<8x128xf32>
    %c0_4 = arith.constant 0 : index
    %c0_5 = arith.constant 0 : index
    %5 = vector.load %arg3[%c0_4, %c0_5] : memref<1x128xf32, #tpu.memory_space<vmem>>, vector<1x128xf32>
    %6 = vector.broadcast %5 : vector<1x128xf32> to vector<8x128xf32>
    %7 = arith.addf %4, %6 : vector<8x128xf32>
    %8 = arith.truncf %7 : vector<8x128xf32> to vector<8x128xbf16>
    %c0_6 = arith.constant 0 : index
    %c0_7 = arith.constant 0 : index
    %9 = vector.load %arg4[%c0_6, %c0_7] : memref<8x128xbf16, #tpu.memory_space<vmem>>, vector<8x128xbf16>
    tpu.vector_store %arg4[%c0_6, %c0_7], %8 {strides = array<i32>} : memref<8x128xbf16, #tpu.memory_space<vmem>>, vector<8x128xbf16>,
    return
  }
  func.func @transform_0(%arg0: i32) -> (i32, i32) {
    %c0_i32 = arith.constant 0 : i32
    %c0_i32_0 = arith.constant 0 : i32
    return %arg0, %c0_i32 : i32, i32
  }
  func.func @transform_1(%arg0: i32) -> (i32, i32) {
    %c0_i32 = arith.constant 0 : i32
    %c0_i32_0 = arith.constant 0 : i32
    %c0_i32_1 = arith.constant 0 : i32
    return %c0_i32, %c0_i32_0 : i32, i32
  }
  func.func @transform_2(%arg0: i32) -> (i32, i32) {
    %c0_i32 = arith.constant 0 : i32
    %c0_i32_0 = arith.constant 0 : i32
    %c0_i32_1 = arith.constant 0 : i32
    return %c0_i32, %c0_i32_0 : i32, i32
  }
  func.func @transform_3(%arg0: i32) -> (i32, i32) {
    %c0_i32 = arith.constant 0 : i32
    %c0_i32_0 = arith.constant 0 : i32
    return %arg0, %c0_i32 : i32, i32
  }
}

module attributes {stable_mosaic.version = 11 : i64} {
  func.func @_matmul_kernel(%arg0: i32, %arg1: memref<8x96xbf16, #tpu.memory_space<vmem>>, %arg2: memref<96x128xbf16, #tpu.memory_space<vmem>>, %arg3: memref<1x128xf32, #tpu.memory_space<vmem>>, %arg4: memref<8x128xbf16, #tpu.memory_space<vmem>>) attributes {dimension_semantics = [#tpu.dimension_semantics<parallel>], iteration_bounds = array<i64: 1>, scalar_prefetch = 0 : i64, scratch_operands = 0 : i64, tpu.core_type = #tpu.core_type<tc>, window_params = [{transform_indices = @transform_0, window_bounds = array<i64: 8, 96>}, {pipeline_mode = #tpu.pipeline_mode<synchronous>, transform_indices = @transform_1, window_bounds = array<i64: 96, 128>}, {pipeline_mode = #tpu.pipeline_mode<synchronous>, transform_indices = @transform_2, window_bounds = array<i64: 1, 128>}, {transform_indices = @transform_3, window_bounds = array<i64: 8, 128>}]} {
    %c0 = arith.constant 0 : index
    %c0_0 = arith.constant 0 : index
    %0 = vector.load %arg1[%c0, %c0_0] : memref<8x96xbf16, #tpu.memory_space<vmem>>, vector<8x96xbf16>
    %c0_1 = arith.constant 0 : index
    %c0_2 = arith.constant 0 : index
    %1 = vector.load %arg2[%c0_1, %c0_2] : memref<96x128xbf16, #tpu.memory_space<vmem>>, vector<96x128xbf16>
    %cst = arith.constant dense<0.000000e+00> : vector<8x128xf32>
    %2 = tpu.matmul %0, %1, %cst {dimension_numbers = #tpu.dot_dimension_numbers<[1], [0], [0], [1], [0, 0, 1, 1], [], []>} : vector<8x96xbf16>, vector<96x128xbf16>, vector<8x128xf32> -> vector<8x128xf32>
    %c0_3 = arith.constant 0 : index
    %c0_4 = arith.constant 0 : index
    %3 = vector.load %arg3[%c0_3, %c0_4] : memref<1x128xf32, #tpu.memory_space<vmem>>, vector<1x128xf32>
    %4 = vector.broadcast %3 : vector<1x128xf32> to vector<8x128xf32>
    %5 = arith.addf %2, %4 : vector<8x128xf32>
    %6 = arith.truncf %5 : vector<8x128xf32> to vector<8x128xbf16>
    %c0_5 = arith.constant 0 : index
    %c0_6 = arith.constant 0 : index
    %7 = vector.load %arg4[%c0_5, %c0_6] : memref<8x128xbf16, #tpu.memory_space<vmem>>, vector<8x128xbf16>
    tpu.vector_store %arg4[%c0_5, %c0_6], %6 {strides = array<i32>} : memref<8x128xbf16, #tpu.memory_space<vmem>>, vector<8x128xbf16>,
    return
  }
  func.func @transform_0(%arg0: i32) -> (i32, i32) {
    %c0_i32 = arith.constant 0 : i32
    %c0_i32_0 = arith.constant 0 : i32
    return %arg0, %c0_i32 : i32, i32
  }
  func.func @transform_1(%arg0: i32) -> (i32, i32) {
    %c0_i32 = arith.constant 0 : i32
    %c0_i32_0 = arith.constant 0 : i32
    %c0_i32_1 = arith.constant 0 : i32
    return %c0_i32, %c0_i32_0 : i32, i32
  }
  func.func @transform_2(%arg0: i32) -> (i32, i32) {
    %c0_i32 = arith.constant 0 : i32
    %c0_i32_0 = arith.constant 0 : i32
    %c0_i32_1 = arith.constant 0 : i32
    return %c0_i32, %c0_i32_0 : i32, i32
  }
  func.func @transform_3(%arg0: i32) -> (i32, i32) {
    %c0_i32 = arith.constant 0 : i32
    %c0_i32_0 = arith.constant 0 : i32
    return %arg0, %c0_i32 : i32, i32
  }
}

module attributes {stable_mosaic.version = 11 : i64} {
  func.func @_matmul_kernel(%arg0: i32, %arg1: memref<8x1152xbf16, #tpu.memory_space<vmem>>, %arg2: memref<1152x128xbf16, #tpu.memory_space<vmem>>, %arg3: memref<1x128xf32, #tpu.memory_space<vmem>>, %arg4: memref<8x128xbf16, #tpu.memory_space<vmem>>) attributes {dimension_semantics = [#tpu.dimension_semantics<parallel>], iteration_bounds = array<i64: 1>, scalar_prefetch = 0 : i64, scratch_operands = 0 : i64, tpu.core_type = #tpu.core_type<tc>, window_params = [{transform_indices = @transform_0, window_bounds = array<i64: 8, 1152>}, {pipeline_mode = #tpu.pipeline_mode<synchronous>, transform_indices = @transform_1, window_bounds = array<i64: 1152, 128>}, {pipeline_mode = #tpu.pipeline_mode<synchronous>, transform_indices = @transform_2, window_bounds = array<i64: 1, 128>}, {transform_indices = @transform_3, window_bounds = array<i64: 8, 128>}]} {
    %c0 = arith.constant 0 : index
    %c0_0 = arith.constant 0 : index
    %0 = vector.load %arg1[%c0, %c0_0] : memref<8x1152xbf16, #tpu.memory_space<vmem>>, vector<8x1152xbf16>
    %c0_1 = arith.constant 0 : index
    %c0_2 = arith.constant 0 : index
    %1 = vector.load %arg2[%c0_1, %c0_2] : memref<1152x128xbf16, #tpu.memory_space<vmem>>, vector<1152x128xbf16>
    %cst = arith.constant dense<0.000000e+00> : vector<8x128xf32>
    %2 = tpu.matmul %0, %1, %cst {dimension_numbers = #tpu.dot_dimension_numbers<[1], [0], [0], [1], [0, 0, 1, 1], [], []>} : vector<8x1152xbf16>, vector<1152x128xbf16>, vector<8x128xf32> -> vector<8x128xf32>
    %c0_3 = arith.constant 0 : index
    %c0_4 = arith.constant 0 : index
    %3 = vector.load %arg3[%c0_3, %c0_4] : memref<1x128xf32, #tpu.memory_space<vmem>>, vector<1x128xf32>
    %4 = vector.broadcast %3 : vector<1x128xf32> to vector<8x128xf32>
    %5 = arith.addf %2, %4 : vector<8x128xf32>
    %6 = arith.truncf %5 : vector<8x128xf32> to vector<8x128xbf16>
    %c0_5 = arith.constant 0 : index
    %c0_6 = arith.constant 0 : index
    %7 = vector.load %arg4[%c0_5, %c0_6] : memref<8x128xbf16, #tpu.memory_space<vmem>>, vector<8x128xbf16>
    tpu.vector_store %arg4[%c0_5, %c0_6], %6 {strides = array<i32>} : memref<8x128xbf16, #tpu.memory_space<vmem>>, vector<8x128xbf16>,
    return
  }
  func.func @transform_0(%arg0: i32) -> (i32, i32) {
    %c0_i32 = arith.constant 0 : i32
    %c0_i32_0 = arith.constant 0 : i32
    return %arg0, %c0_i32 : i32, i32
  }
  func.func @transform_1(%arg0: i32) -> (i32, i32) {
    %c0_i32 = arith.constant 0 : i32
    %c0_i32_0 = arith.constant 0 : i32
    %c0_i32_1 = arith.constant 0 : i32
    return %c0_i32, %c0_i32_0 : i32, i32
  }
  func.func @transform_2(%arg0: i32) -> (i32, i32) {
    %c0_i32 = arith.constant 0 : i32
    %c0_i32_0 = arith.constant 0 : i32
    %c0_i32_1 = arith.constant 0 : i32
    return %c0_i32, %c0_i32_0 : i32, i32
  }
  func.func @transform_3(%arg0: i32) -> (i32, i32) {
    %c0_i32 = arith.constant 0 : i32
    %c0_i32_0 = arith.constant 0 : i32
    return %arg0, %c0_i32 : i32, i32
  }
}

module attributes {stable_mosaic.version = 11 : i64} {
  func.func @_matmul_res_kernel(%arg0: i32, %arg1: memref<8x48xbf16, #tpu.memory_space<vmem>>, %arg2: memref<48x128xbf16, #tpu.memory_space<vmem>>, %arg3: memref<1x128xf32, #tpu.memory_space<vmem>>, %arg4: memref<8x128xbf16, #tpu.memory_space<vmem>>, %arg5: memref<8x128xbf16, #tpu.memory_space<vmem>>) attributes {dimension_semantics = [#tpu.dimension_semantics<parallel>], iteration_bounds = array<i64: 1>, scalar_prefetch = 0 : i64, scratch_operands = 0 : i64, tpu.core_type = #tpu.core_type<tc>, window_params = [{transform_indices = @transform_0, window_bounds = array<i64: 8, 48>}, {pipeline_mode = #tpu.pipeline_mode<synchronous>, transform_indices = @transform_1, window_bounds = array<i64: 48, 128>}, {pipeline_mode = #tpu.pipeline_mode<synchronous>, transform_indices = @transform_2, window_bounds = array<i64: 1, 128>}, {transform_indices = @transform_3, window_bounds = array<i64: 8, 128>}, {transform_indices = @transform_4, window_bounds = array<i64: 8, 128>}]} {
    %c0 = arith.constant 0 : index
    %c0_0 = arith.constant 0 : index
    %0 = vector.load %arg1[%c0, %c0_0] : memref<8x48xbf16, #tpu.memory_space<vmem>>, vector<8x48xbf16>
    %c0_1 = arith.constant 0 : index
    %c0_2 = arith.constant 0 : index
    %1 = vector.load %arg2[%c0_1, %c0_2] : memref<48x128xbf16, #tpu.memory_space<vmem>>, vector<48x128xbf16>
    %cst = arith.constant dense<0.000000e+00> : vector<8x128xf32>
    %2 = tpu.matmul %0, %1, %cst {dimension_numbers = #tpu.dot_dimension_numbers<[1], [0], [0], [1], [0, 0, 1, 1], [], []>} : vector<8x48xbf16>, vector<48x128xbf16>, vector<8x128xf32> -> vector<8x128xf32>
    %c0_3 = arith.constant 0 : index
    %c0_4 = arith.constant 0 : index
    %3 = vector.load %arg3[%c0_3, %c0_4] : memref<1x128xf32, #tpu.memory_space<vmem>>, vector<1x128xf32>
    %4 = vector.broadcast %3 : vector<1x128xf32> to vector<8x128xf32>
    %5 = arith.addf %2, %4 : vector<8x128xf32>
    %c0_5 = arith.constant 0 : index
    %c0_6 = arith.constant 0 : index
    %6 = vector.load %arg4[%c0_5, %c0_6] : memref<8x128xbf16, #tpu.memory_space<vmem>>, vector<8x128xbf16>
    %7 = arith.extf %6 : vector<8x128xbf16> to vector<8x128xf32>
    %8 = arith.addf %5, %7 : vector<8x128xf32>
    %9 = arith.truncf %8 : vector<8x128xf32> to vector<8x128xbf16>
    %c0_7 = arith.constant 0 : index
    %c0_8 = arith.constant 0 : index
    %10 = vector.load %arg5[%c0_7, %c0_8] : memref<8x128xbf16, #tpu.memory_space<vmem>>, vector<8x128xbf16>
    tpu.vector_store %arg5[%c0_7, %c0_8], %9 {strides = array<i32>} : memref<8x128xbf16, #tpu.memory_space<vmem>>, vector<8x128xbf16>,
    return
  }
  func.func @transform_0(%arg0: i32) -> (i32, i32) {
    %c0_i32 = arith.constant 0 : i32
    %c0_i32_0 = arith.constant 0 : i32
    return %arg0, %c0_i32 : i32, i32
  }
  func.func @transform_1(%arg0: i32) -> (i32, i32) {
    %c0_i32 = arith.constant 0 : i32
    %c0_i32_0 = arith.constant 0 : i32
    %c0_i32_1 = arith.constant 0 : i32
    return %c0_i32, %c0_i32_0 : i32, i32
  }
  func.func @transform_2(%arg0: i32) -> (i32, i32) {
    %c0_i32 = arith.constant 0 : i32
    %c0_i32_0 = arith.constant 0 : i32
    %c0_i32_1 = arith.constant 0 : i32
    return %c0_i32, %c0_i32_0 : i32, i32
  }
  func.func @transform_3(%arg0: i32) -> (i32, i32) {
    %c0_i32 = arith.constant 0 : i32
    %c0_i32_0 = arith.constant 0 : i32
    return %arg0, %c0_i32 : i32, i32
  }
  func.func @transform_4(%arg0: i32) -> (i32, i32) {
    %c0_i32 = arith.constant 0 : i32
    %c0_i32_0 = arith.constant 0 : i32
    return %arg0, %c0_i32 : i32, i32
  }
}

module attributes {stable_mosaic.version = 11 : i64} {
  func.func @_matmul_res_kernel(%arg0: i32, %arg1: memref<32x24xbf16, #tpu.memory_space<vmem>>, %arg2: memref<24x128xbf16, #tpu.memory_space<vmem>>, %arg3: memref<1x128xf32, #tpu.memory_space<vmem>>, %arg4: memref<32x128xbf16, #tpu.memory_space<vmem>>, %arg5: memref<32x128xbf16, #tpu.memory_space<vmem>>) attributes {dimension_semantics = [#tpu.dimension_semantics<parallel>], iteration_bounds = array<i64: 1>, scalar_prefetch = 0 : i64, scratch_operands = 0 : i64, tpu.core_type = #tpu.core_type<tc>, window_params = [{transform_indices = @transform_0, window_bounds = array<i64: 32, 24>}, {pipeline_mode = #tpu.pipeline_mode<synchronous>, transform_indices = @transform_1, window_bounds = array<i64: 24, 128>}, {pipeline_mode = #tpu.pipeline_mode<synchronous>, transform_indices = @transform_2, window_bounds = array<i64: 1, 128>}, {transform_indices = @transform_3, window_bounds = array<i64: 32, 128>}, {transform_indices = @transform_4, window_bounds = array<i64: 32, 128>}]} {
    %c0 = arith.constant 0 : index
    %c0_0 = arith.constant 0 : index
    %0 = vector.load %arg1[%c0, %c0_0] : memref<32x24xbf16, #tpu.memory_space<vmem>>, vector<32x24xbf16>
    %c0_1 = arith.constant 0 : index
    %c0_2 = arith.constant 0 : index
    %1 = vector.load %arg2[%c0_1, %c0_2] : memref<24x128xbf16, #tpu.memory_space<vmem>>, vector<24x128xbf16>
    %cst = arith.constant dense<0.000000e+00> : vector<32x128xf32>
    %2 = tpu.matmul %0, %1, %cst {dimension_numbers = #tpu.dot_dimension_numbers<[1], [0], [0], [1], [0, 0, 1, 1], [], []>} : vector<32x24xbf16>, vector<24x128xbf16>, vector<32x128xf32> -> vector<32x128xf32>
    %c0_3 = arith.constant 0 : index
    %c0_4 = arith.constant 0 : index
    %3 = vector.load %arg3[%c0_3, %c0_4] : memref<1x128xf32, #tpu.memory_space<vmem>>, vector<1x128xf32>
    %4 = vector.broadcast %3 : vector<1x128xf32> to vector<32x128xf32>
    %5 = arith.addf %2, %4 : vector<32x128xf32>
    %c0_5 = arith.constant 0 : index
    %c0_6 = arith.constant 0 : index
    %6 = vector.load %arg4[%c0_5, %c0_6] : memref<32x128xbf16, #tpu.memory_space<vmem>>, vector<32x128xbf16>
    %7 = arith.extf %6 : vector<32x128xbf16> to vector<32x128xf32>
    %8 = arith.addf %5, %7 : vector<32x128xf32>
    %9 = arith.truncf %8 : vector<32x128xf32> to vector<32x128xbf16>
    %c0_7 = arith.constant 0 : index
    %c0_8 = arith.constant 0 : index
    %10 = vector.load %arg5[%c0_7, %c0_8] : memref<32x128xbf16, #tpu.memory_space<vmem>>, vector<32x128xbf16>
    tpu.vector_store %arg5[%c0_7, %c0_8], %9 {strides = array<i32>} : memref<32x128xbf16, #tpu.memory_space<vmem>>, vector<32x128xbf16>,
    return
  }
  func.func @transform_0(%arg0: i32) -> (i32, i32) {
    %c0_i32 = arith.constant 0 : i32
    %c0_i32_0 = arith.constant 0 : i32
    return %arg0, %c0_i32 : i32, i32
  }
  func.func @transform_1(%arg0: i32) -> (i32, i32) {
    %c0_i32 = arith.constant 0 : i32
    %c0_i32_0 = arith.constant 0 : i32
    %c0_i32_1 = arith.constant 0 : i32
    return %c0_i32, %c0_i32_0 : i32, i32
  }
  func.func @transform_2(%arg0: i32) -> (i32, i32) {
    %c0_i32 = arith.constant 0 : i32
    %c0_i32_0 = arith.constant 0 : i32
    %c0_i32_1 = arith.constant 0 : i32
    return %c0_i32, %c0_i32_0 : i32, i32
  }
  func.func @transform_3(%arg0: i32) -> (i32, i32) {
    %c0_i32 = arith.constant 0 : i32
    %c0_i32_0 = arith.constant 0 : i32
    return %arg0, %c0_i32 : i32, i32
  }
  func.func @transform_4(%arg0: i32) -> (i32, i32) {
    %c0_i32 = arith.constant 0 : i32
    %c0_i32_0 = arith.constant 0 : i32
    return %arg0, %c0_i32 : i32, i32
  }
}

module attributes {stable_mosaic.version = 11 : i64} {
  func.func @_matmul_kernel(%arg0: i32, %arg1: memref<32x1152xbf16, #tpu.memory_space<vmem>>, %arg2: memref<1152x128xbf16, #tpu.memory_space<vmem>>, %arg3: memref<1x128xf32, #tpu.memory_space<vmem>>, %arg4: memref<32x128xbf16, #tpu.memory_space<vmem>>) attributes {dimension_semantics = [#tpu.dimension_semantics<parallel>], iteration_bounds = array<i64: 1>, scalar_prefetch = 0 : i64, scratch_operands = 0 : i64, tpu.core_type = #tpu.core_type<tc>, window_params = [{transform_indices = @transform_0, window_bounds = array<i64: 32, 1152>}, {pipeline_mode = #tpu.pipeline_mode<synchronous>, transform_indices = @transform_1, window_bounds = array<i64: 1152, 128>}, {pipeline_mode = #tpu.pipeline_mode<synchronous>, transform_indices = @transform_2, window_bounds = array<i64: 1, 128>}, {transform_indices = @transform_3, window_bounds = array<i64: 32, 128>}]} {
    %c0 = arith.constant 0 : index
    %c0_0 = arith.constant 0 : index
    %0 = vector.load %arg1[%c0, %c0_0] : memref<32x1152xbf16, #tpu.memory_space<vmem>>, vector<32x1152xbf16>
    %c0_1 = arith.constant 0 : index
    %c0_2 = arith.constant 0 : index
    %1 = vector.load %arg2[%c0_1, %c0_2] : memref<1152x128xbf16, #tpu.memory_space<vmem>>, vector<1152x128xbf16>
    %cst = arith.constant dense<0.000000e+00> : vector<32x128xf32>
    %2 = tpu.matmul %0, %1, %cst {dimension_numbers = #tpu.dot_dimension_numbers<[1], [0], [0], [1], [0, 0, 1, 1], [], []>} : vector<32x1152xbf16>, vector<1152x128xbf16>, vector<32x128xf32> -> vector<32x128xf32>
    %c0_3 = arith.constant 0 : index
    %c0_4 = arith.constant 0 : index
    %3 = vector.load %arg3[%c0_3, %c0_4] : memref<1x128xf32, #tpu.memory_space<vmem>>, vector<1x128xf32>
    %4 = vector.broadcast %3 : vector<1x128xf32> to vector<32x128xf32>
    %5 = arith.addf %2, %4 : vector<32x128xf32>
    %6 = arith.truncf %5 : vector<32x128xf32> to vector<32x128xbf16>
    %c0_5 = arith.constant 0 : index
    %c0_6 = arith.constant 0 : index
    %7 = vector.load %arg4[%c0_5, %c0_6] : memref<32x128xbf16, #tpu.memory_space<vmem>>, vector<32x128xbf16>
    tpu.vector_store %arg4[%c0_5, %c0_6], %6 {strides = array<i32>} : memref<32x128xbf16, #tpu.memory_space<vmem>>, vector<32x128xbf16>,
    return
  }
  func.func @transform_0(%arg0: i32) -> (i32, i32) {
    %c0_i32 = arith.constant 0 : i32
    %c0_i32_0 = arith.constant 0 : i32
    return %arg0, %c0_i32 : i32, i32
  }
  func.func @transform_1(%arg0: i32) -> (i32, i32) {
    %c0_i32 = arith.constant 0 : i32
    %c0_i32_0 = arith.constant 0 : i32
    %c0_i32_1 = arith.constant 0 : i32
    return %c0_i32, %c0_i32_0 : i32, i32
  }
  func.func @transform_2(%arg0: i32) -> (i32, i32) {
    %c0_i32 = arith.constant 0 : i32
    %c0_i32_0 = arith.constant 0 : i32
    %c0_i32_1 = arith.constant 0 : i32
    return %c0_i32, %c0_i32_0 : i32, i32
  }
  func.func @transform_3(%arg0: i32) -> (i32, i32) {
    %c0_i32 = arith.constant 0 : i32
    %c0_i32_0 = arith.constant 0 : i32
    return %arg0, %c0_i32 : i32, i32
  }
}

module attributes {stable_mosaic.version = 11 : i64} {
  func.func @_matmul_res_kernel(%arg0: i32, %arg1: memref<256x12xbf16, #tpu.memory_space<vmem>>, %arg2: memref<12x128xbf16, #tpu.memory_space<vmem>>, %arg3: memref<1x128xf32, #tpu.memory_space<vmem>>, %arg4: memref<256x128xbf16, #tpu.memory_space<vmem>>, %arg5: memref<256x128xbf16, #tpu.memory_space<vmem>>) attributes {dimension_semantics = [#tpu.dimension_semantics<parallel>], iteration_bounds = array<i64: 2>, scalar_prefetch = 0 : i64, scratch_operands = 0 : i64, tpu.core_type = #tpu.core_type<tc>, window_params = [{transform_indices = @transform_0, window_bounds = array<i64: 256, 12>}, {pipeline_mode = #tpu.pipeline_mode<synchronous>, transform_indices = @transform_1, window_bounds = array<i64: 12, 128>}, {pipeline_mode = #tpu.pipeline_mode<synchronous>, transform_indices = @transform_2, window_bounds = array<i64: 1, 128>}, {transform_indices = @transform_3, window_bounds = array<i64: 256, 128>}, {transform_indices = @transform_4, window_bounds = array<i64: 256, 128>}]} {
    %c0 = arith.constant 0 : index
    %c0_0 = arith.constant 0 : index
    %0 = vector.load %arg1[%c0, %c0_0] : memref<256x12xbf16, #tpu.memory_space<vmem>>, vector<256x12xbf16>
    %c0_1 = arith.constant 0 : index
    %c0_2 = arith.constant 0 : index
    %1 = vector.load %arg2[%c0_1, %c0_2] : memref<12x128xbf16, #tpu.memory_space<vmem>>, vector<12x128xbf16>
    %cst = arith.constant dense<0.000000e+00> : vector<256x128xf32>
    %2 = tpu.matmul %0, %1, %cst {dimension_numbers = #tpu.dot_dimension_numbers<[1], [0], [0], [1], [0, 0, 1, 1], [], []>} : vector<256x12xbf16>, vector<12x128xbf16>, vector<256x128xf32> -> vector<256x128xf32>
    %c0_3 = arith.constant 0 : index
    %c0_4 = arith.constant 0 : index
    %3 = vector.load %arg3[%c0_3, %c0_4] : memref<1x128xf32, #tpu.memory_space<vmem>>, vector<1x128xf32>
    %4 = vector.broadcast %3 : vector<1x128xf32> to vector<256x128xf32>
    %5 = arith.addf %2, %4 : vector<256x128xf32>
    %c0_5 = arith.constant 0 : index
    %c0_6 = arith.constant 0 : index
    %6 = vector.load %arg4[%c0_5, %c0_6] : memref<256x128xbf16, #tpu.memory_space<vmem>>, vector<256x128xbf16>
    %7 = arith.extf %6 : vector<256x128xbf16> to vector<256x128xf32>
    %8 = arith.addf %5, %7 : vector<256x128xf32>
    %9 = arith.truncf %8 : vector<256x128xf32> to vector<256x128xbf16>
    %c0_7 = arith.constant 0 : index
    %c0_8 = arith.constant 0 : index
    %10 = vector.load %arg5[%c0_7, %c0_8] : memref<256x128xbf16, #tpu.memory_space<vmem>>, vector<256x128xbf16>
    tpu.vector_store %arg5[%c0_7, %c0_8], %9 {strides = array<i32>} : memref<256x128xbf16, #tpu.memory_space<vmem>>, vector<256x128xbf16>,
    return
  }
  func.func @transform_0(%arg0: i32) -> (i32, i32) {
    %c0_i32 = arith.constant 0 : i32
    %c0_i32_0 = arith.constant 0 : i32
    return %arg0, %c0_i32 : i32, i32
  }
  func.func @transform_1(%arg0: i32) -> (i32, i32) {
    %c0_i32 = arith.constant 0 : i32
    %c0_i32_0 = arith.constant 0 : i32
    %c0_i32_1 = arith.constant 0 : i32
    return %c0_i32, %c0_i32_0 : i32, i32
  }
  func.func @transform_2(%arg0: i32) -> (i32, i32) {
    %c0_i32 = arith.constant 0 : i32
    %c0_i32_0 = arith.constant 0 : i32
    %c0_i32_1 = arith.constant 0 : i32
    return %c0_i32, %c0_i32_0 : i32, i32
  }
  func.func @transform_3(%arg0: i32) -> (i32, i32) {
    %c0_i32 = arith.constant 0 : i32
    %c0_i32_0 = arith.constant 0 : i32
    return %arg0, %c0_i32 : i32, i32
  }
  func.func @transform_4(%arg0: i32) -> (i32, i32) {
    %c0_i32 = arith.constant 0 : i32
    %c0_i32_0 = arith.constant 0 : i32
    return %arg0, %c0_i32 : i32, i32
  }
}

module attributes {stable_mosaic.version = 11 : i64} {
  func.func @_matmul_kernel(%arg0: i32, %arg1: memref<256x1152xbf16, #tpu.memory_space<vmem>>, %arg2: memref<1152x128xbf16, #tpu.memory_space<vmem>>, %arg3: memref<1x128xf32, #tpu.memory_space<vmem>>, %arg4: memref<256x128xbf16, #tpu.memory_space<vmem>>) attributes {dimension_semantics = [#tpu.dimension_semantics<parallel>], iteration_bounds = array<i64: 2>, scalar_prefetch = 0 : i64, scratch_operands = 0 : i64, tpu.core_type = #tpu.core_type<tc>, window_params = [{transform_indices = @transform_0, window_bounds = array<i64: 256, 1152>}, {pipeline_mode = #tpu.pipeline_mode<synchronous>, transform_indices = @transform_1, window_bounds = array<i64: 1152, 128>}, {pipeline_mode = #tpu.pipeline_mode<synchronous>, transform_indices = @transform_2, window_bounds = array<i64: 1, 128>}, {transform_indices = @transform_3, window_bounds = array<i64: 256, 128>}]} {
    %c0 = arith.constant 0 : index
    %c0_0 = arith.constant 0 : index
    %0 = vector.load %arg1[%c0, %c0_0] : memref<256x1152xbf16, #tpu.memory_space<vmem>>, vector<256x1152xbf16>
    %c0_1 = arith.constant 0 : index
    %c0_2 = arith.constant 0 : index
    %1 = vector.load %arg2[%c0_1, %c0_2] : memref<1152x128xbf16, #tpu.memory_space<vmem>>, vector<1152x128xbf16>
    %cst = arith.constant dense<0.000000e+00> : vector<256x128xf32>
    %2 = tpu.matmul %0, %1, %cst {dimension_numbers = #tpu.dot_dimension_numbers<[1], [0], [0], [1], [0, 0, 1, 1], [], []>} : vector<256x1152xbf16>, vector<1152x128xbf16>, vector<256x128xf32> -> vector<256x128xf32>
    %c0_3 = arith.constant 0 : index
    %c0_4 = arith.constant 0 : index
    %3 = vector.load %arg3[%c0_3, %c0_4] : memref<1x128xf32, #tpu.memory_space<vmem>>, vector<1x128xf32>
    %4 = vector.broadcast %3 : vector<1x128xf32> to vector<256x128xf32>
    %5 = arith.addf %2, %4 : vector<256x128xf32>
    %6 = arith.truncf %5 : vector<256x128xf32> to vector<256x128xbf16>
    %c0_5 = arith.constant 0 : index
    %c0_6 = arith.constant 0 : index
    %7 = vector.load %arg4[%c0_5, %c0_6] : memref<256x128xbf16, #tpu.memory_space<vmem>>, vector<256x128xbf16>
    tpu.vector_store %arg4[%c0_5, %c0_6], %6 {strides = array<i32>} : memref<256x128xbf16, #tpu.memory_space<vmem>>, vector<256x128xbf16>,
    return
  }
  func.func @transform_0(%arg0: i32) -> (i32, i32) {
    %c0_i32 = arith.constant 0 : i32
    %c0_i32_0 = arith.constant 0 : i32
    return %arg0, %c0_i32 : i32, i32
  }
  func.func @transform_1(%arg0: i32) -> (i32, i32) {
    %c0_i32 = arith.constant 0 : i32
    %c0_i32_0 = arith.constant 0 : i32
    %c0_i32_1 = arith.constant 0 : i32
    return %c0_i32, %c0_i32_0 : i32, i32
  }
  func.func @transform_2(%arg0: i32) -> (i32, i32) {
    %c0_i32 = arith.constant 0 : i32
    %c0_i32_0 = arith.constant 0 : i32
    %c0_i32_1 = arith.constant 0 : i32
    return %c0_i32, %c0_i32_0 : i32, i32
  }
  func.func @transform_3(%arg0: i32) -> (i32, i32) {
    %c0_i32 = arith.constant 0 : i32
    %c0_i32_0 = arith.constant 0 : i32
    return %arg0, %c0_i32 : i32, i32
  }
}

module attributes {stable_mosaic.version = 11 : i64} {
  func.func @_matmul_kernel(%arg0: i32, %arg1: memref<128x1152xbf16, #tpu.memory_space<vmem>>, %arg2: memref<1152x128xbf16, #tpu.memory_space<vmem>>, %arg3: memref<1x128xf32, #tpu.memory_space<vmem>>, %arg4: memref<128x128xbf16, #tpu.memory_space<vmem>>) attributes {dimension_semantics = [#tpu.dimension_semantics<parallel>], iteration_bounds = array<i64: 5>, scalar_prefetch = 0 : i64, scratch_operands = 0 : i64, tpu.core_type = #tpu.core_type<tc>, window_params = [{transform_indices = @transform_0, window_bounds = array<i64: 128, 1152>}, {pipeline_mode = #tpu.pipeline_mode<synchronous>, transform_indices = @transform_1, window_bounds = array<i64: 1152, 128>}, {pipeline_mode = #tpu.pipeline_mode<synchronous>, transform_indices = @transform_2, window_bounds = array<i64: 1, 128>}, {transform_indices = @transform_3, window_bounds = array<i64: 128, 128>}]} {
    %c0 = arith.constant 0 : index
    %c0_0 = arith.constant 0 : index
    %0 = vector.load %arg1[%c0, %c0_0] : memref<128x1152xbf16, #tpu.memory_space<vmem>>, vector<128x1152xbf16>
    %c0_1 = arith.constant 0 : index
    %c0_2 = arith.constant 0 : index
    %1 = vector.load %arg2[%c0_1, %c0_2] : memref<1152x128xbf16, #tpu.memory_space<vmem>>, vector<1152x128xbf16>
    %cst = arith.constant dense<0.000000e+00> : vector<128x128xf32>
    %2 = tpu.matmul %0, %1, %cst {dimension_numbers = #tpu.dot_dimension_numbers<[1], [0], [0], [1], [0, 0, 1, 1], [], []>} : vector<128x1152xbf16>, vector<1152x128xbf16>, vector<128x128xf32> -> vector<128x128xf32>
    %c0_3 = arith.constant 0 : index
    %c0_4 = arith.constant 0 : index
    %3 = vector.load %arg3[%c0_3, %c0_4] : memref<1x128xf32, #tpu.memory_space<vmem>>, vector<1x128xf32>
    %4 = vector.broadcast %3 : vector<1x128xf32> to vector<128x128xf32>
    %5 = arith.addf %2, %4 : vector<128x128xf32>
    %cst_5 = arith.constant 0.000000e+00 : f32
    %6 = vector.broadcast %cst_5 : f32 to vector<128x128xf32>
    %7 = arith.maximumf %5, %6 : vector<128x128xf32>
    %8 = arith.truncf %7 : vector<128x128xf32> to vector<128x128xbf16>
    %c0_6 = arith.constant 0 : index
    %c0_7 = arith.constant 0 : index
    %9 = vector.load %arg4[%c0_6, %c0_7] : memref<128x128xbf16, #tpu.memory_space<vmem>>, vector<128x128xbf16>
    tpu.vector_store %arg4[%c0_6, %c0_7], %8 {strides = array<i32>} : memref<128x128xbf16, #tpu.memory_space<vmem>>, vector<128x128xbf16>,
    return
  }
  func.func @transform_0(%arg0: i32) -> (i32, i32) {
    %c0_i32 = arith.constant 0 : i32
    %c0_i32_0 = arith.constant 0 : i32
    return %arg0, %c0_i32 : i32, i32
  }
  func.func @transform_1(%arg0: i32) -> (i32, i32) {
    %c0_i32 = arith.constant 0 : i32
    %c0_i32_0 = arith.constant 0 : i32
    %c0_i32_1 = arith.constant 0 : i32
    return %c0_i32, %c0_i32_0 : i32, i32
  }
  func.func @transform_2(%arg0: i32) -> (i32, i32) {
    %c0_i32 = arith.constant 0 : i32
    %c0_i32_0 = arith.constant 0 : i32
    %c0_i32_1 = arith.constant 0 : i32
    return %c0_i32, %c0_i32_0 : i32, i32
  }
  func.func @transform_3(%arg0: i32) -> (i32, i32) {
    %c0_i32 = arith.constant 0 : i32
    %c0_i32_0 = arith.constant 0 : i32
    return %arg0, %c0_i32 : i32, i32
  }
}

module attributes {stable_mosaic.version = 11 : i64} {
  func.func @_matmul_kernel(%arg0: i32, %arg1: memref<128x1152xbf16, #tpu.memory_space<vmem>>, %arg2: memref<1152x2xbf16, #tpu.memory_space<vmem>>, %arg3: memref<1x2xf32, #tpu.memory_space<vmem>>, %arg4: memref<128x2xf32, #tpu.memory_space<vmem>>) attributes {dimension_semantics = [#tpu.dimension_semantics<parallel>], iteration_bounds = array<i64: 5>, scalar_prefetch = 0 : i64, scratch_operands = 0 : i64, tpu.core_type = #tpu.core_type<tc>, window_params = [{transform_indices = @transform_0, window_bounds = array<i64: 128, 1152>}, {pipeline_mode = #tpu.pipeline_mode<synchronous>, transform_indices = @transform_1, window_bounds = array<i64: 1152, 2>}, {pipeline_mode = #tpu.pipeline_mode<synchronous>, transform_indices = @transform_2, window_bounds = array<i64: 1, 2>}, {transform_indices = @transform_3, window_bounds = array<i64: 128, 2>}]} {
    %c0 = arith.constant 0 : index
    %c0_0 = arith.constant 0 : index
    %0 = vector.load %arg1[%c0, %c0_0] : memref<128x1152xbf16, #tpu.memory_space<vmem>>, vector<128x1152xbf16>
    %c0_1 = arith.constant 0 : index
    %c0_2 = arith.constant 0 : index
    %1 = vector.load %arg2[%c0_1, %c0_2] : memref<1152x2xbf16, #tpu.memory_space<vmem>>, vector<1152x2xbf16>
    %cst = arith.constant dense<0.000000e+00> : vector<128x2xf32>
    %2 = tpu.matmul %0, %1, %cst {dimension_numbers = #tpu.dot_dimension_numbers<[1], [0], [0], [1], [0, 0, 1, 1], [], []>} : vector<128x1152xbf16>, vector<1152x2xbf16>, vector<128x2xf32> -> vector<128x2xf32>
    %c0_3 = arith.constant 0 : index
    %c0_4 = arith.constant 0 : index
    %3 = vector.load %arg3[%c0_3, %c0_4] : memref<1x2xf32, #tpu.memory_space<vmem>>, vector<1x2xf32>
    %4 = vector.broadcast %3 : vector<1x2xf32> to vector<128x2xf32>
    %5 = arith.addf %2, %4 : vector<128x2xf32>
    %c0_5 = arith.constant 0 : index
    %c0_6 = arith.constant 0 : index
    %6 = vector.load %arg4[%c0_5, %c0_6] : memref<128x2xf32, #tpu.memory_space<vmem>>, vector<128x2xf32>
    tpu.vector_store %arg4[%c0_5, %c0_6], %5 {strides = array<i32>} : memref<128x2xf32, #tpu.memory_space<vmem>>, vector<128x2xf32>,
    return
  }
  func.func @transform_0(%arg0: i32) -> (i32, i32) {
    %c0_i32 = arith.constant 0 : i32
    %c0_i32_0 = arith.constant 0 : i32
    return %arg0, %c0_i32 : i32, i32
  }
  func.func @transform_1(%arg0: i32) -> (i32, i32) {
    %c0_i32 = arith.constant 0 : i32
    %c0_i32_0 = arith.constant 0 : i32
    %c0_i32_1 = arith.constant 0 : i32
    return %c0_i32, %c0_i32_0 : i32, i32
  }
  func.func @transform_2(%arg0: i32) -> (i32, i32) {
    %c0_i32 = arith.constant 0 : i32
    %c0_i32_0 = arith.constant 0 : i32
    %c0_i32_1 = arith.constant 0 : i32
    return %c0_i32, %c0_i32_0 : i32, i32
  }
  func.func @transform_3(%arg0: i32) -> (i32, i32) {
    %c0_i32 = arith.constant 0 : i32
    %c0_i32_0 = arith.constant 0 : i32
    return %arg0, %c0_i32 : i32, i32
  }
}

module attributes {stable_mosaic.version = 11 : i64} {
  func.func @_matmul_kernel(%arg0: i32, %arg1: memref<128x1152xbf16, #tpu.memory_space<vmem>>, %arg2: memref<1152x4xbf16, #tpu.memory_space<vmem>>, %arg3: memref<1x4xf32, #tpu.memory_space<vmem>>, %arg4: memref<128x4xf32, #tpu.memory_space<vmem>>) attributes {dimension_semantics = [#tpu.dimension_semantics<parallel>], iteration_bounds = array<i64: 5>, scalar_prefetch = 0 : i64, scratch_operands = 0 : i64, tpu.core_type = #tpu.core_type<tc>, window_params = [{transform_indices = @transform_0, window_bounds = array<i64: 128, 1152>}, {pipeline_mode = #tpu.pipeline_mode<synchronous>, transform_indices = @transform_1, window_bounds = array<i64: 1152, 4>}, {pipeline_mode = #tpu.pipeline_mode<synchronous>, transform_indices = @transform_2, window_bounds = array<i64: 1, 4>}, {transform_indices = @transform_3, window_bounds = array<i64: 128, 4>}]} {
    %c0 = arith.constant 0 : index
    %c0_0 = arith.constant 0 : index
    %0 = vector.load %arg1[%c0, %c0_0] : memref<128x1152xbf16, #tpu.memory_space<vmem>>, vector<128x1152xbf16>
    %c0_1 = arith.constant 0 : index
    %c0_2 = arith.constant 0 : index
    %1 = vector.load %arg2[%c0_1, %c0_2] : memref<1152x4xbf16, #tpu.memory_space<vmem>>, vector<1152x4xbf16>
    %cst = arith.constant dense<0.000000e+00> : vector<128x4xf32>
    %2 = tpu.matmul %0, %1, %cst {dimension_numbers = #tpu.dot_dimension_numbers<[1], [0], [0], [1], [0, 0, 1, 1], [], []>} : vector<128x1152xbf16>, vector<1152x4xbf16>, vector<128x4xf32> -> vector<128x4xf32>
    %c0_3 = arith.constant 0 : index
    %c0_4 = arith.constant 0 : index
    %3 = vector.load %arg3[%c0_3, %c0_4] : memref<1x4xf32, #tpu.memory_space<vmem>>, vector<1x4xf32>
    %4 = vector.broadcast %3 : vector<1x4xf32> to vector<128x4xf32>
    %5 = arith.addf %2, %4 : vector<128x4xf32>
    %c0_5 = arith.constant 0 : index
    %c0_6 = arith.constant 0 : index
    %6 = vector.load %arg4[%c0_5, %c0_6] : memref<128x4xf32, #tpu.memory_space<vmem>>, vector<128x4xf32>
    tpu.vector_store %arg4[%c0_5, %c0_6], %5 {strides = array<i32>} : memref<128x4xf32, #tpu.memory_space<vmem>>, vector<128x4xf32>,
    return
  }
  func.func @transform_0(%arg0: i32) -> (i32, i32) {
    %c0_i32 = arith.constant 0 : i32
    %c0_i32_0 = arith.constant 0 : i32
    return %arg0, %c0_i32 : i32, i32
  }
  func.func @transform_1(%arg0: i32) -> (i32, i32) {
    %c0_i32 = arith.constant 0 : i32
    %c0_i32_0 = arith.constant 0 : i32
    %c0_i32_1 = arith.constant 0 : i32
    return %c0_i32, %c0_i32_0 : i32, i32
  }
  func.func @transform_2(%arg0: i32) -> (i32, i32) {
    %c0_i32 = arith.constant 0 : i32
    %c0_i32_0 = arith.constant 0 : i32
    %c0_i32_1 = arith.constant 0 : i32
    return %c0_i32, %c0_i32_0 : i32, i32
  }
  func.func @transform_3(%arg0: i32) -> (i32, i32) {
    %c0_i32 = arith.constant 0 : i32
    %c0_i32_0 = arith.constant 0 : i32
    return %arg0, %c0_i32 : i32, i32
  }
}

</mosaic_0001>

<bundles_post_ra>
// kernel: retinanet_forward.28
= control target key start
LH: loop header
LB: loop body
LE: loop exit
PB: predicated region body
PF: predicated region fallthrough
CT: control target
= control target key end

     0   :  { %s1351_s12 = smov 0   ;;  %s1667_s0 = inlined_call_operand.vmem [shape: bf16[2048,27], index: 0, kind: input, shape index: {}]   ;;  %s1668_s1 = inlined_call_operand.vmem [shape: bf16[27,8], index: 1, kind: input, shape index: {}]   ;;  %s1669_s2 = inlined_call_operand.vmem [shape: f32[1,8], index: 2, kind: input, shape index: {}]   ;;  %s1670_s3 = inlined_call_operand.vmem [shape: bf16[2048,8], index: 3, kind: output, shape index: {}]  }
   0x1 LB: > { %s967_s13 = sadd.s32 4294967295, %s1328_s12   ;;  %p971_p0 = scmp.ge.s32.totalorder %s1328_s12, 1  ;;  %s1328_s12 = sphi %s1351_s12, %s13_s12  }
   0x2   : > { %p138_p1 = scmp.lt.s32.totalorder %s1328_s12, 9 }
   0x4   : > { %p139_p2 = pnand %p971_p0, %p138_p1 }
   0x5   : > { %v1176_v0 = vld [vmem:[%s1668_s1] sm:$0xff] (!%p139_p2)   ;;  %vm358_vm0 = vcmask (!%p139_p2), 1044480   ;;  %v1177_v1 = vld [vmem:[%s1668_s1 + $0x8] sm:$0x3f] (!%p139_p2)   ;;  %vm359_vm1 = vcmask (!%p139_p2), 1045504   ;;  %s972_s18 = sshll.u32 (!%p139_p2), %s967_s13, 5 }
   0x6   : > { %142 = sbr.rel (%p139_p2) target bundleno = 322 (0x142), region = 32  ;;  %1127 = vmatprep.subr.bf16.mxu0 (!%p139_p2), %v1176_v0  ;;  %1163 = vmatprep.subr.bf16.mxu1 (!%p139_p2), %v1176_v0  ;;  %v1330_v2 = vmov (!%p139_p2), 65535   ;;  %p163_p3 = scmp.lt.s32.totalorder (!%p139_p2), %s972_s18, 255  ;;  %vm309_vm2 = vcmask (!%p139_p2), 220160   ;;  %v1410_v22 = vld [vmem:[%s1669_s2] ss:$0 sm:$0xff] (!%p139_p2) }
   0x7   : > { %1128 = vmatpush3.bf16.msra.mxu0 (!%p139_p2), %v1176_v0  ;;  %1165 = vmatpush3.bf16.msra.mxu1 (!%p139_p2), %v1176_v0  ;;  %v360_v3 = vsel (!%p139_p2), %vm358_vm0, 4294967295, %v1330_v2  ;;  %vm878_vm3 = vcmask (!%p139_p2), 60416  }
   0x8   : > { %v361_v4 = vsel (!%p139_p2), %vm359_vm1, %v360_v3, 0 }
   0x9   : > { %v363_v5 = vand.u32 (!%p139_p2), %v1177_v1, %v361_v4 }
   0xb   : > { %1129 = vmatprep.subr.bf16.mxu0 (!%p139_p2), %v363_v5  ;;  %1164 = vmatprep.subr.bf16.mxu1 (!%p139_p2), %v363_v5 }
   0xc   : > { %1130 = vmatpush3.bf16.msra.mxu0 (!%p139_p2), %v363_v5  ;;  %1166 = vmatpush3.bf16.msra.mxu1 (!%p139_p2), %v363_v5 }
   0xd   : > { %s1672_s18 = smov (!%p163_p3, %s972_s18), 255 }
   0xe   : > { %s973_s19 = sshll.u32 %s1672_s18, 2 }
   0xf   : > { %s1373_s22 = scalar_lea.vmem %s1667_s0, %s973_s19  ;;  %s1517_s27 = scalar_lea.vmem %s1670_s3, %s973_s19 }
  0x10   : > { %v1178_v6 = vld [vmem:[%s1373_s22] sm:$0xff]   ;;  %v1180_v8 = vld [vmem:[%s1373_s22 + $0x8] sm:$0xff]   ;;  %v1182_v10 = vld [vmem:[%s1373_s22 + $0x10] sm:$0xff]  }
  0x11   : > { %v1179_v7 = vld [vmem:[%s1373_s22 + $0x40] sm:$0xff]   ;;  %1131 = vmatprep.mubr.msk.bf16.mxu0 %vm309_vm2, %v1178_v6  ;;  %v1181_v9 = vld [vmem:[%s1373_s22 + $0x48] sm:$0xff]   ;;  %v1183_v11 = vld [vmem:[%s1373_s22 + $0x50] sm:$0xff]  }
  0x12   : > { %1147 = vmatprep.mubr.msk.bf16.mxu1 %vm309_vm2, %v1179_v7  ;;  %1132 = vmatmul.mubr.msk.bf16.vlgmr.msra.gmra.mrb[0].mxu0 %vm309_vm2, %v1180_v8  ;;  %v1184_v12 = vld [vmem:[%s1373_s22 + $0x18] sm:$0xff]   ;;  %v1186_v14 = vld [vmem:[%s1373_s22 + $0x20] sm:$0xff]   ;;  %v1188_v16 = vld [vmem:[%s1373_s22 + $0x28] sm:$0xff]  }
  0x13   : > { %1148 = vmatmul.mubr.msk.bf16.vlgmr.msra.gmra.mrb[0].mxu1 %vm309_vm2, %v1181_v9  ;;  %1135 = vmatprep.mubr.msk.bf16.mxu0 %vm309_vm2, %v1182_v10  ;;  %v1185_v13 = vld [vmem:[%s1373_s22 + $0x58] sm:$0xff]   ;;  %v1187_v15 = vld [vmem:[%s1373_s22 + $0x60] sm:$0xff]   ;;  %v1189_v17 = vld [vmem:[%s1373_s22 + $0x68] sm:$0xff]  }
  0x14   : > { %1151 = vmatprep.mubr.msk.bf16.mxu1 %vm309_vm2, %v1183_v11  ;;  %v1190_v18 = vld [vmem:[%s1373_s22 + $0x30] sm:$0xff]   ;;  %v1192_v20 = vld [vmem:[%s1373_s22 + $0x38] sm:$0xff]  }
  0x15   : > { %v1191_v19 = vld [vmem:[%s1373_s22 + $0x70] sm:$0xff]   ;;  %v1193_v21 = vld [vmem:[%s1373_s22 + $0x78] sm:$0xff]  }
  0x1a   : > { %1136 = vmatmul.mubr.msk.bf16.gmra.mrb[4].mxu0 %vm309_vm2, %v1184_v12 }
  0x1b   : > { %1152 = vmatmul.mubr.msk.bf16.gmra.mrb[4].mxu1 %vm309_vm2, %v1185_v13  ;;  %1139 = vmatprep.mubr.msk.bf16.mxu0 %vm309_vm2, %v1186_v14 }
  0x1c   : > { %1155 = vmatprep.mubr.msk.bf16.mxu1 %vm309_vm2, %v1187_v15 }
  0x22   : > { %1140 = vmatmul.mubr.msk.bf16.gmra.mrb[8].mxu0 %vm309_vm2, %v1188_v16 }
  0x23   : > { %1156 = vmatmul.mubr.msk.bf16.gmra.mrb[8].mxu1 %vm309_vm2, %v1189_v17  ;;  %1143 = vmatprep.mubr.msk.bf16.mxu0 %vm309_vm2, %v1190_v18 }
  0x24   : > { %1159 = vmatprep.mubr.msk.bf16.mxu1 %vm309_vm2, %v1191_v19 }
  0x2a   : > { %1144 = vmatmul.mubr.msk.bf16.gmra.mrb[12].mxu0 %vm309_vm2, %v1192_v20 }
  0x2b   : > { %1160 = vmatmul.mubr.msk.bf16.gmra.mrb[12].mxu1 %vm309_vm2, %v1193_v21 }
  0xe5   : > { %v1133_v23 = vpop.f32.mrb[0].mxu0 }
  0xe6   : > { %v1413_v24 = vadd.f32 %v1133_v23, %v1410_v22  ;;  %v1149_v25 = vpop.f32.mrb[0].mxu1  ;;  %v399_v26 = vpop.f32.mrb[1].mxu0 }
  0xe7   : > { %v1416_v27 = vadd.f32 %v1149_v25, %v1410_v22  ;;  %v1419_v28 = vadd.f32 %v1410_v22, %v399_v26  ;;  %v463_v29 = vpop.f32.mrb[1].mxu1  ;;  %v1134_v30 = vpop.f32.mrb[2].mxu0 }
  0xe8   : > { %v1013_v31 = vmul.f32 -1.442695, %v1413_v24  ;;  %v1423_v32 = vadd.f32 %v1410_v22, %v463_v29  ;;  %v1426_v33 = vadd.f32 %v1134_v30, %v1410_v22  ;;  %v1150_v34 = vpop.f32.mrb[2].mxu1  ;;  %v402_v35 = vpop.f32.mrb[3].mxu0 }
  0xe9   : > { %v1029_v36 = vmul.f32 -1.442695, %v1416_v27  ;;  %v1011_v37 = vmul.f32 -1.442695, %v1419_v28  ;;  %v1431_v38 = vadd.f32 %v1150_v34, %v1410_v22  ;;  %v1434_v39 = vadd.f32 %v1410_v22, %v402_v35  ;;  %v466_v40 = vpop.f32.mrb[3].mxu1 }
  0xea   : > { %1194 = vpow2.f32 %v1013_v31  ;;  %v1027_v41 = vmul.f32 -1.442695, %v1423_v32  ;;  %v1014_v42 = vmul.f32 -1.442695, %v1426_v33  ;;  %v1439_v43 = vadd.f32 %v1410_v22, %v466_v40 }
  0xeb   : > { %1196 = vpow2.f32 %v1029_v36  ;;  %v1030_v44 = vmul.f32 -1.442695, %v1431_v38  ;;  %v1012_v45 = vmul.f32 -1.442695, %v1434_v39 }
  0xec   : > { %1198 = vpow2.f32 %v1011_v37  ;;  %v1028_v46 = vmul.f32 -1.442695, %v1439_v43 }
  0xed   : > { %1200 = vpow2.f32 %v1027_v41  ;;  %v1137_v47 = vpop.f32.mrb[4].mxu0 }
  0xee   : > { %1202 = vpow2.f32 %v1014_v42  ;;  %v1445_v48 = vadd.f32 %v1137_v47, %v1410_v22  ;;  %v1153_v49 = vpop.f32.mrb[4].mxu1  ;;  %v415_v50 = vpop.f32.mrb[5].mxu0 }
  0xef   : > { %1204 = vpow2.f32 %v1030_v44  ;;  %v1448_v51 = vadd.f32 %v1153_v49, %v1410_v22  ;;  %v1451_v52 = vadd.f32 %v1410_v22, %v415_v50  ;;  %v479_v53 = vpop.f32.mrb[5].mxu1  ;;  %v1138_v54 = vpop.f32.mrb[6].mxu0 }
  0xf0   : > { %1206 = vpow2.f32 %v1012_v45  ;;  %v1017_v55 = vmul.f32 -1.442695, %v1445_v48  ;;  %v1455_v56 = vadd.f32 %v1410_v22, %v479_v53  ;;  %v1458_v57 = vadd.f32 %v1138_v54, %v1410_v22  ;;  %v1154_v58 = vpop.f32.mrb[6].mxu1  ;;  %v418_v59 = vpop.f32.mrb[7].mxu0 }
  0xf1   : > { %1208 = vpow2.f32 %v1028_v46  ;;  %v1033_v60 = vmul.f32 -1.442695, %v1448_v51  ;;  %v1015_v61 = vmul.f32 -1.442695, %v1451_v52  ;;  %v482_v62 = vpop.f32.mrb[7].mxu1  ;;  %v1467_v23 = vadd.f32 %v1154_v58, %v1410_v22 }
  0xf2   : > { %1210 = vpow2.f32 %v1017_v55  ;;  %v1031_v63 = vmul.f32 -1.442695, %v1455_v56  ;;  %v1018_v0 = vmul.f32 -1.442695, %v1458_v57  ;;  %v1470_v29 = vadd.f32 %v1410_v22, %v418_v59 }
  0xf3   : > { %1212 = vpow2.f32 %v1033_v60  ;;  %v1473_v34 = vadd.f32 %v1410_v22, %v482_v62  ;;  %v1034_v45 = vmul.f32 -1.442695, %v1467_v23 }
  0xf4   : > { %v1195_v1 = vpop.eup %1194  ;;  %1214 = vpow2.f32 %v1015_v61  ;;  %v1016_v54 = vmul.f32 -1.442695, %v1470_v29 }
  0xf5   : > { %v1197_v2 = vpop.eup %1196  ;;  %v624_v3 = vadd.f32 1.0, %v1195_v1  ;;  %1216 = vpow2.f32 %v1031_v63  ;;  %v1141_v4 = vpop.f32.mrb[8].mxu0  ;;  %v1032_v62 = vmul.f32 -1.442695, %v1473_v34 }
  0xf6   : > { %v1199_v5 = vpop.eup %1198  ;;  %v640_v6 = vadd.f32 1.0, %v1197_v2  ;;  %1218 = vpow2.f32 %v1018_v0  ;;  %v1157_v7 = vpop.f32.mrb[8].mxu1  ;;  %v1476_v37 = vadd.f32 %v1141_v4, %v1410_v22 }
  0xf7   : > { %v431_v8 = vpop.f32.mrb[9].mxu0  ;;  %v1201_v9 = vpop.eup %1200  ;;  %1220 = vrcp.f32 %v624_v3  ;;  %v622_v10 = vadd.f32 1.0, %v1199_v5  ;;  %v1479_v40 = vadd.f32 %v1157_v7, %v1410_v22 }
  0xf8   : > { %v495_v11 = vpop.f32.mrb[9].mxu1  ;;  %v1142_v12 = vpop.f32.mrb[10].mxu0  ;;  %1222 = vrcp.f32 %v640_v6  ;;  %v638_v14 = vadd.f32 1.0, %v1201_v9  ;;  %v1483_v46 = vadd.f32 %v1410_v22, %v431_v8  ;;  %v1021_v4 = vmul.f32 -1.442695, %v1476_v37 }
  0xf9   : > { %v1203_v13 = vpop.eup %1202  ;;  %v1158_v15 = vpop.f32.mrb[10].mxu1  ;;  %1224 = vrcp.f32 %v622_v10  ;;  %v1489_v55 = vadd.f32 %v1410_v22, %v495_v11  ;;  %v1497_v63 = vadd.f32 %v1142_v12, %v1410_v22  ;;  %v1037_v5 = vmul.f32 -1.442695, %v1479_v40 }
  0xfa   : > { %v434_v16 = vpop.f32.mrb[11].mxu0  ;;  %v1205_v17 = vpop.eup %1204  ;;  %v625_v18 = vadd.f32 1.0, %v1203_v13  ;;  %1226 = vrcp.f32 %v638_v14  ;;  %v1019_v9 = vmul.f32 -1.442695, %v1483_v46  ;;  %v1510_v10 = vadd.f32 %v1158_v15, %v1410_v22 }
  0xfb   : > { %v1464_v19 = vpop.f32.mrb[11].mxu1  ;;  %v1207_v20 = vpop.eup %1206  ;;  %v641_v21 = vadd.f32 1.0, %v1205_v17  ;;  %v1035_v13 = vmul.f32 -1.442695, %v1489_v55 }
  0xfc   : > { %v1209_v25 = vpop.eup %1208  ;;  %1228 = vrcp.f32 %v625_v18  ;;  %v623_v26 = vadd.f32 1.0, %v1207_v20  ;;  %v1022_v18 = vmul.f32 -1.442695, %v1497_v63 }
  0xfd   : > { %v1211_v30 = vpop.eup %1210  ;;  %1230 = vrcp.f32 %v641_v21  ;;  %v639_v31 = vadd.f32 1.0, %v1209_v25  ;;  %v1145_v41 = vpop.f32.mrb[12].mxu0 }
  0xfe   : > { %v1213_v35 = vpop.eup %1212  ;;  %1232 = vrcp.f32 %v623_v26  ;;  %v628_v36 = vadd.f32 1.0, %v1211_v30  ;;  %v1161_v47 = vpop.f32.mrb[12].mxu1 }
  0xff   : > { %v1215_v42 = vpop.eup %1214  ;;  %1234 = vrcp.f32 %v639_v31  ;;  %v644_v44 = vadd.f32 1.0, %v1213_v35  ;;  %v1485_v49 = vpop.f32.mrb[13].mxu0 }
 0x100   : > { %v1217_v50 = vpop.eup %1216  ;;  %1236 = vrcp.f32 %v628_v36  ;;  %v626_v53 = vadd.f32 1.0, %v1215_v42  ;;  %v1491_v58 = vpop.f32.mrb[13].mxu1 }
 0x101   : > { %v1493_v59 = vpop.f32.mrb[14].mxu0  ;;  %v1219_v60 = vpop.eup %1218  ;;  %1238 = vrcp.f32 %v644_v44  ;;  %v642_v61 = vadd.f32 1.0, %v1217_v50  ;;  %v1545_v44 = vadd.f32 %v1161_v47, %v1410_v22 }
 0x102   : > { %v1499_v0 = vpop.f32.mrb[14].mxu1  ;;  %v1501_v1 = vpop.f32.mrb[15].mxu0  ;;  %1240 = vrcp.f32 %v626_v53  ;;  %v629_v3 = vadd.f32 1.0, %v1219_v60 }
 0x103   : > { %v1221_v2 = vpop.eup %1220  ;;  %v1505_v6 = vpop.f32.mrb[15].mxu1  ;;  %1242 = vrcp.f32 %v642_v61 }
 0x104   : > { %v1223_v7 = vpop.eup %1222  ;;  %v720_v8 = vmul.f32 %v1221_v2, %v1413_v24  ;;  %1244 = vrcp.f32 %v629_v3  ;;  %v1522_v24 = vadd.f32 %v1410_v22, %v434_v16 }
 0x105   : > { %v1225_v11 = vpop.eup %1224  ;;  %v736_v12 = vmul.f32 %v1223_v7, %v1416_v27  ;;  %1246 = vpow2.f32 %v1034_v45  ;;  %v1529_v27 = vadd.f32 %v1410_v22, %v1464_v19  ;;  %v1539_v19 = vadd.f32 %v1145_v41, %v1410_v22 }
 0x106   : > { %v1227_v14 = vpop.eup %1226  ;;  %v1079_v17 = vpack.c.bf16 %v720_v8, %v720_v8  ;;  %v718_v15 = vmul.f32 %v1225_v11, %v1419_v28  ;;  %1248 = vpow2.f32 %v1016_v54  ;;  %v1038_v28 = vmul.f32 -1.442695, %v1510_v10 }
 0x107   : > { %v1229_v20 = vpop.eup %1228  ;;  %v1095_v21 = vpack.c.bf16 %v736_v12, %v736_v12  ;;  %v734_v25 = vmul.f32 %v1227_v14, %v1423_v32  ;;  %1250 = vpow2.f32 %v1032_v62  ;;  %v1020_v41 = vmul.f32 -1.442695, %v1522_v24 }
 0x108   : > { %v1231_v16 = vpop.eup %1230  ;;  %881 = vst.msk [vmem:[%s1517_s27 + $0x8] sm:$0xf] %vm878_vm3, %v1079_v17  ;;  %v1077_v26 = vpack.c.bf16 %v718_v15, %v718_v15  ;;  %v721_v30 = vmul.f32 %v1229_v20, %v1426_v33  ;;  %1252 = vpow2.f32 %v1021_v4  ;;  %v1036_v47 = vmul.f32 -1.442695, %v1529_v27 }
 0x109   : > { %v1233_v31 = vpop.eup %1232  ;;  %897 = vst.msk [vmem:[%s1517_s27 + $0x48] sm:$0xf] %vm878_vm3, %v1095_v21  ;;  %v1093_v32 = vpack.c.bf16 %v734_v25, %v734_v25  ;;  %v737_v35 = vmul.f32 %v1231_v16, %v1431_v38  ;;  %1254 = vpow2.f32 %v1037_v5  ;;  %v1025_v62 = vmul.f32 -1.442695, %v1539_v19 }
 0x10a   : > { %v1235_v36 = vpop.eup %1234  ;;  %879 = vst.msk [vmem:[%s1517_s27] sm:$0xf] %vm878_vm3, %v1077_v26  ;;  %v1080_v42 = vpack.c.bf16 %v721_v30, %v721_v30  ;;  %v719_v33 = vmul.f32 %v1233_v31, %v1434_v39  ;;  %1256 = vpow2.f32 %v1019_v9  ;;  %v1041_v4 = vmul.f32 -1.442695, %v1545_v44 }
 0x10b   : > { %v1237_v45 = vpop.eup %1236  ;;  %895 = vst.msk [vmem:[%s1517_s27 + $0x40] sm:$0xf] %vm878_vm3, %v1093_v32  ;;  %v1096_v38 = vpack.c.bf16 %v737_v35, %v737_v35  ;;  %v735_v50 = vmul.f32 %v1235_v36, %v1439_v43  ;;  %1258 = vpow2.f32 %v1035_v13  ;;  %v1579_v35 = vadd.f32 %v1410_v22, %v1485_v49 }
 0x10c   : > { %v1239_v53 = vpop.eup %1238  ;;  %882 = vst.msk [vmem:[%s1517_s27 + $0xc] sm:$0xf] %vm878_vm3, %v1080_v42  ;;  %v1078_v54 = vpack.c.bf16 %v719_v33, %v719_v33  ;;  %v724_v39 = vmul.f32 %v1237_v45, %v1445_v48  ;;  %1260 = vpow2.f32 %v1022_v18  ;;  %v1583_v33 = vadd.f32 %v1410_v22, %v1491_v58 }
 0x10d   : > { %v1241_v60 = vpop.eup %1240  ;;  %898 = vst.msk [vmem:[%s1517_s27 + $0x4c] sm:$0xf] %vm878_vm3, %v1096_v38  ;;  %v1094_v61 = vpack.c.bf16 %v735_v50, %v735_v50  ;;  %v740_v43 = vmul.f32 %v1239_v53, %v1448_v51  ;;  %1262 = vpow2.f32 %v1038_v28  ;;  %v1587_v50 = vadd.f32 %v1493_v59, %v1410_v22 }
 0x10e   : > { %v1243_v2 = vpop.eup %1242  ;;  %880 = vst.msk [vmem:[%s1517_s27 + $0x4] sm:$0xf] %vm878_vm3, %v1078_v54  ;;  %v1083_v3 = vpack.c.bf16 %v724_v39, %v724_v39  ;;  %v722_v48 = vmul.f32 %v1241_v60, %v1451_v52  ;;  %1264 = vpow2.f32 %v1020_v41  ;;  %v1591_v49 = vadd.f32 %v1499_v0, %v1410_v22 }
 0x10f   : > { %v1245_v5 = vpop.eup %1244  ;;  %896 = vst.msk [vmem:[%s1517_s27 + $0x44] sm:$0xf] %vm878_vm3, %v1094_v61  ;;  %v1099_v7 = vpack.c.bf16 %v740_v43, %v740_v43  ;;  %v738_v51 = vmul.f32 %v1243_v2, %v1455_v56  ;;  %1266 = vpow2.f32 %v1036_v47  ;;  %v1023_v58 = vmul.f32 -1.442695, %v1579_v35 }
 0x110   : > { %v1247_v8 = vpop.eup %1246  ;;  %885 = vst.msk [vmem:[%s1517_s27 + $0x18] sm:$0xf] %vm878_vm3, %v1083_v3  ;;  %v1081_v9 = vpack.c.bf16 %v722_v48, %v722_v48  ;;  %v725_v11 = vmul.f32 %v1245_v5, %v1458_v57  ;;  %1268 = vpow2.f32 %v1025_v62  ;;  %v1596_v47 = vadd.f32 %v1410_v22, %v1501_v1 }
 0x111   : > { %v1249_v52 = vpop.eup %1248  ;;  %901 = vst.msk [vmem:[%s1517_s27 + $0x58] sm:$0xf] %vm878_vm3, %v1099_v7  ;;  %v1097_v12 = vpack.c.bf16 %v738_v51, %v738_v51  ;;  %v645_v13 = vadd.f32 1.0, %v1247_v8  ;;  %1270 = vpow2.f32 %v1041_v4  ;;  %v1039_v61 = vmul.f32 -1.442695, %v1583_v33 }
 0x112   : > { %v1251_v14 = vpop.eup %1250  ;;  %883 = vst.msk [vmem:[%s1517_s27 + $0x10] sm:$0xf] %vm878_vm3, %v1081_v9  ;;  %v1084_v56 = vpack.c.bf16 %v725_v11, %v725_v11  ;;  %v627_v17 = vadd.f32 1.0, %v1249_v52  ;;  %v1601_v43 = vadd.f32 %v1410_v22, %v1505_v6  ;;  %v1026_v2 = vmul.f32 -1.442695, %v1587_v50 }
 0x113   : > { %v1253_v15 = vpop.eup %1252  ;;  %899 = vst.msk [vmem:[%s1517_s27 + $0x50] sm:$0xf] %vm878_vm3, %v1097_v12  ;;  %1272 = vrcp.f32 %v645_v13  ;;  %v643_v18 = vadd.f32 1.0, %v1251_v14  ;;  %v1042_v48 = vmul.f32 -1.442695, %v1591_v49 }
 0x114   : > { %v1255_v57 = vpop.eup %1254  ;;  %886 = vst.msk [vmem:[%s1517_s27 + $0x1c] sm:$0xf] %vm878_vm3, %v1084_v56  ;;  %1274 = vrcp.f32 %v627_v17  ;;  %v632_v20 = vadd.f32 1.0, %v1253_v15  ;;  %v1024_v22 = vmul.f32 -1.442695, %v1596_v47 }
 0x115   : > { %v1257_v21 = vpop.eup %1256  ;;  %1276 = vrcp.f32 %v643_v18  ;;  %v648_v25 = vadd.f32 1.0, %v1255_v57  ;;  %v1040_v8 = vmul.f32 -1.442695, %v1601_v43 }
 0x116   : > { %v1259_v16 = vpop.eup %1258  ;;  %1278 = vrcp.f32 %v632_v20  ;;  %v630_v26 = vadd.f32 1.0, %v1257_v21 }
 0x117   : > { %v1261_v30 = vpop.eup %1260  ;;  %1280 = vrcp.f32 %v648_v25  ;;  %v646_v28 = vadd.f32 1.0, %v1259_v16 }
 0x118   : > { %v1263_v31 = vpop.eup %1262  ;;  %1282 = vrcp.f32 %v630_v26  ;;  %v633_v32 = vadd.f32 1.0, %v1261_v30 }
 0x119   : > { %v1265_v36 = vpop.eup %1264  ;;  %1284 = vrcp.f32 %v646_v28  ;;  %v649_v42 = vadd.f32 1.0, %v1263_v31 }
 0x11a   : > { %v1267_v45 = vpop.eup %1266  ;;  %1286 = vrcp.f32 %v633_v32  ;;  %v631_v38 = vadd.f32 1.0, %v1265_v36 }
 0x11b   : > { %v1269_v41 = vpop.eup %1268  ;;  %1288 = vrcp.f32 %v649_v42  ;;  %v647_v53 = vadd.f32 1.0, %v1267_v45 }
 0x11c   : > { %v1271_v54 = vpop.eup %1270  ;;  %1290 = vrcp.f32 %v631_v38  ;;  %v636_v39 = vadd.f32 1.0, %v1269_v41 }
 0x11d   : > { %v1273_v60 = vpop.eup %1272  ;;  %1292 = vrcp.f32 %v647_v53  ;;  %v652_v59 = vadd.f32 1.0, %v1271_v54 }
 0x11e   : > { %v1275_v0 = vpop.eup %1274  ;;  %v741_v62 = vmul.f32 %v1273_v60, %v1467_v23  ;;  %1294 = vrcp.f32 %v636_v39 }
 0x11f   : > { %v1277_v3 = vpop.eup %1276  ;;  %v723_v1 = vmul.f32 %v1275_v0, %v1470_v29  ;;  %1296 = vrcp.f32 %v652_v59 }
 0x120   : > { %v1279_v4 = vpop.eup %1278  ;;  %v1100_v5 = vpack.c.bf16 %v741_v62, %v741_v62  ;;  %v739_v7 = vmul.f32 %v1277_v3, %v1473_v34  ;;  %1298 = vpow2.f32 %v1023_v58 }
 0x121   : > { %v1281_v6 = vpop.eup %1280  ;;  %v1082_v23 = vpack.c.bf16 %v723_v1, %v723_v1  ;;  %v728_v51 = vmul.f32 %v1279_v4, %v1476_v37  ;;  %1300 = vpow2.f32 %v1039_v61 }
 0x122   : > { %v1283_v29 = vpop.eup %1282  ;;  %902 = vst.msk [vmem:[%s1517_s27 + $0x5c] sm:$0xf] %vm878_vm3, %v1100_v5  ;;  %v1098_v9 = vpack.c.bf16 %v739_v7, %v739_v7  ;;  %v744_v11 = vmul.f32 %v1281_v6, %v1479_v40  ;;  %1302 = vpow2.f32 %v1026_v2 }
 0x123   : > { %v1285_v34 = vpop.eup %1284  ;;  %884 = vst.msk [vmem:[%s1517_s27 + $0x14] sm:$0xf] %vm878_vm3, %v1082_v23  ;;  %v1087_v52 = vpack.c.bf16 %v728_v51, %v728_v51  ;;  %v726_v12 = vmul.f32 %v1283_v29, %v1483_v46  ;;  %1304 = vpow2.f32 %v1042_v48 }
 0x124   : > { %v1287_v37 = vpop.eup %1286  ;;  %900 = vst.msk [vmem:[%s1517_s27 + $0x54] sm:$0xf] %vm878_vm3, %v1098_v9  ;;  %v1103_v13 = vpack.c.bf16 %v744_v11, %v744_v11  ;;  %v742_v14 = vmul.f32 %v1285_v34, %v1489_v55  ;;  %1306 = vpow2.f32 %v1024_v22 }
 0x125   : > { %v1289_v56 = vpop.eup %1288  ;;  %889 = vst.msk [vmem:[%s1517_s27 + $0x28] sm:$0xf] %vm878_vm3, %v1087_v52  ;;  %v1085_v40 = vpack.c.bf16 %v726_v12, %v726_v12  ;;  %v729_v17 = vmul.f32 %v1287_v37, %v1497_v63  ;;  %1308 = vpow2.f32 %v1040_v8 }
 0x126   : > { %v1291_v15 = vpop.eup %1290  ;;  %905 = vst.msk [vmem:[%s1517_s27 + $0x68] sm:$0xf] %vm878_vm3, %v1103_v13  ;;  %v1101_v46 = vpack.c.bf16 %v742_v14, %v742_v14  ;;  %v745_v18 = vmul.f32 %v1289_v56, %v1510_v10 }
 0x127   : > { %v1293_v57 = vpop.eup %1292  ;;  %887 = vst.msk [vmem:[%s1517_s27 + $0x20] sm:$0xf] %vm878_vm3, %v1085_v40  ;;  %v1088_v55 = vpack.c.bf16 %v729_v17, %v729_v17  ;;  %v727_v20 = vmul.f32 %v1291_v15, %v1522_v24 }
 0x128   : > { %v1295_v21 = vpop.eup %1294  ;;  %903 = vst.msk [vmem:[%s1517_s27 + $0x60] sm:$0xf] %vm878_vm3, %v1101_v46  ;;  %v1104_v63 = vpack.c.bf16 %v745_v18, %v745_v18  ;;  %v743_v25 = vmul.f32 %v1293_v57, %v1529_v27 }
 0x129   : > { %v1297_v16 = vpop.eup %1296  ;;  %890 = vst.msk [vmem:[%s1517_s27 + $0x2c] sm:$0xf] %vm878_vm3, %v1088_v55  ;;  %v1086_v26 = vpack.c.bf16 %v727_v20, %v727_v20  ;;  %v732_v10 = vmul.f32 %v1295_v21, %v1539_v19 }
 0x12a   : > { %v1299_v30 = vpop.eup %1298  ;;  %906 = vst.msk [vmem:[%s1517_s27 + $0x6c] sm:$0xf] %vm878_vm3, %v1104_v63  ;;  %v1102_v28 = vpack.c.bf16 %v743_v25, %v743_v25  ;;  %v748_v24 = vmul.f32 %v1297_v16, %v1545_v44 }
 0x12b   : > { %v1301_v31 = vpop.eup %1300  ;;  %888 = vst.msk [vmem:[%s1517_s27 + $0x24] sm:$0xf] %vm878_vm3, %v1086_v26  ;;  %v1091_v32 = vpack.c.bf16 %v732_v10, %v732_v10  ;;  %v634_v36 = vadd.f32 1.0, %v1299_v30 }
 0x12c   : > { %v1303_v27 = vpop.eup %1302  ;;  %904 = vst.msk [vmem:[%s1517_s27 + $0x64] sm:$0xf] %vm878_vm3, %v1102_v28  ;;  %v1107_v42 = vpack.c.bf16 %v748_v24, %v748_v24  ;;  %v650_v45 = vadd.f32 1.0, %v1301_v31 }
 0x12d   : > { %v1305_v38 = vpop.eup %1304  ;;  %893 = vst.msk [vmem:[%s1517_s27 + $0x38] sm:$0xf] %vm878_vm3, %v1091_v32  ;;  %1310 = vrcp.f32 %v634_v36  ;;  %v637_v19 = vadd.f32 1.0, %v1303_v27 }
 0x12e   : > { %v1307_v41 = vpop.eup %1306  ;;  %909 = vst.msk [vmem:[%s1517_s27 + $0x78] sm:$0xf] %vm878_vm3, %v1107_v42  ;;  %1312 = vrcp.f32 %v650_v45  ;;  %v653_v44 = vadd.f32 1.0, %v1305_v38 }
 0x12f   : > { %v1309_v53 = vpop.eup %1308  ;;  %1314 = vrcp.f32 %v637_v19  ;;  %v635_v54 = vadd.f32 1.0, %v1307_v41 }
 0x130   : > { %1316 = vrcp.f32 %v653_v44  ;;  %v651_v39 = vadd.f32 1.0, %v1309_v53 }
 0x131   : > { %1318 = vrcp.f32 %v635_v54 }
 0x132   : > { %1320 = vrcp.f32 %v651_v39 }
 0x137   : > { %v1311_v58 = vpop.eup %1310 }
 0x138   : > { %v1313_v60 = vpop.eup %1312  ;;  %v730_v59 = vmul.f32 %v1311_v58, %v1579_v35 }
 0x139   : > { %v1315_v61 = vpop.eup %1314  ;;  %v746_v0 = vmul.f32 %v1313_v60, %v1583_v33 }
 0x13a   : > { %v1317_v62 = vpop.eup %1316  ;;  %v1089_v2 = vpack.c.bf16 %v730_v59, %v730_v59  ;;  %v733_v3 = vmul.f32 %v1315_v61, %v1587_v50 }
 0x13b   : > { %v1319_v1 = vpop.eup %1318  ;;  %v1105_v48 = vpack.c.bf16 %v746_v0, %v746_v0  ;;  %v749_v4 = vmul.f32 %v1317_v62, %v1591_v49 }
 0x13c   : > { %v1321_v5 = vpop.eup %1320  ;;  %891 = vst.msk [vmem:[%s1517_s27 + $0x30] sm:$0xf] %vm878_vm3, %v1089_v2  ;;  %v1092_v7 = vpack.c.bf16 %v733_v3, %v733_v3  ;;  %v731_v35 = vmul.f32 %v1319_v1, %v1596_v47 }
 0x13d   : > { %907 = vst.msk [vmem:[%s1517_s27 + $0x70] sm:$0xf] %vm878_vm3, %v1105_v48  ;;  %v1108_v33 = vpack.c.bf16 %v749_v4, %v749_v4  ;;  %v747_v22 = vmul.f32 %v1321_v5, %v1601_v43 }
 0x13e   : > { %894 = vst.msk [vmem:[%s1517_s27 + $0x3c] sm:$0xf] %vm878_vm3, %v1092_v7  ;;  %v1090_v6 = vpack.c.bf16 %v731_v35, %v731_v35 }
 0x13f   : > { %910 = vst.msk [vmem:[%s1517_s27 + $0x7c] sm:$0xf] %vm878_vm3, %v1108_v33  ;;  %v1106_v50 = vpack.c.bf16 %v747_v22, %v747_v22 }
 0x140   : > { %892 = vst.msk [vmem:[%s1517_s27 + $0x34] sm:$0xf] %vm878_vm3, %v1090_v6 }
 0x141   : > { %908 = vst.msk [vmem:[%s1517_s27 + $0x74] sm:$0xf] %vm878_vm3, %v1106_v50 }
 0x142 PF: > { %s13_s12 = sadd.s32 1, %s1328_s12  }
 0x143   : > { %p10_p4 = scmp.ge.s32.totalorder %s13_s12, 10  }
 0x145   :  { %12 = sbr.rel (!%p10_p4) target bundleno = 1 (0x1), region = 62 }

// kernel: retinanet_forward.29
= control target key start
LH: loop header
LB: loop body
LE: loop exit
PB: predicated region body
PF: predicated region fallthrough
CT: control target
= control target key end

     0   :  { %s1390_s12 = smov 0   ;;  %s1712_s0 = inlined_call_operand.vmem [shape: bf16[2048,72], index: 0, kind: input, shape index: {}]   ;;  %s1713_s1 = inlined_call_operand.vmem [shape: bf16[72,8], index: 1, kind: input, shape index: {}]   ;;  %s1714_s2 = inlined_call_operand.vmem [shape: f32[1,8], index: 2, kind: input, shape index: {}]   ;;  %s1715_s3 = inlined_call_operand.vmem [shape: bf16[2048,8], index: 3, kind: output, shape index: {}]  }
   0x1 LB: > { %s985_s13 = sadd.s32 4294967295, %s1368_s12   ;;  %p989_p0 = scmp.ge.s32.totalorder %s1368_s12, 1  ;;  %s1368_s12 = sphi %s1390_s12, %s13_s12  }
   0x2   : > { %p138_p1 = scmp.lt.s32.totalorder %s1368_s12, 9 }
   0x4   : > { %p139_p2 = pnand %p989_p0, %p138_p1 }
   0x5   : > { %v1213_v0 = vld [vmem:[%s1713_s1] sm:$0xff] (!%p139_p2)   ;;  %v1214_v1 = vld [vmem:[%s1713_s1 + $0x8] sm:$0xff] (!%p139_p2)   ;;  %s990_s18 = sshll.u32 (!%p139_p2), %s985_s13, 5  ;;  %v1215_v2 = vld [vmem:[%s1713_s1 + $0x10] sm:$0xff] (!%p139_p2)   ;;  %vm330_vm0 = vcmask (!%p139_p2), 588800   ;;  %vm379_vm1 = vcmask (!%p139_p2), 1043456  }
   0x6   : > { %142 = sbr.rel (%p139_p2) target bundleno = 330 (0x14a), region = 32  ;;  %1151 = vmatprep.subr.bf16.mxu0 (!%p139_p2), %v1213_v0  ;;  %1193 = vmatprep.subr.bf16.mxu1 (!%p139_p2), %v1213_v0  ;;  %p163_p3 = scmp.lt.s32.totalorder (!%p139_p2), %s990_s18, 255  ;;  %v1216_v3 = vld [vmem:[%s1713_s1 + $0x18] sm:$0xff] (!%p139_p2)   ;;  %v1217_v6 = vld [vmem:[%s1713_s1 + $0x20] ss:$0 sps:$4 sm:$0xff] (!%p139_p2)   ;;  %vm896_vm2 = vcmask (!%p139_p2), 60416  }
   0x7   : > { %1152 = vmatpush3.bf16.msra.mxu0 (!%p139_p2), %v1213_v0  ;;  %1198 = vmatpush3.bf16.msra.mxu1 (!%p139_p2), %v1213_v0  ;;  %v381_v7 = vsel (!%p139_p2), %vm379_vm1, %v1217_v6, 0  ;;  %v1458_v22 = vld [vmem:[%s1714_s2] ss:$0 sm:$0xff] (!%p139_p2) }
   0x8   : > { %1153 = vmatprep.subr.bf16.mxu0 (!%p139_p2), %v1214_v1  ;;  %1194 = vmatprep.subr.bf16.mxu1 (!%p139_p2), %v1214_v1 }
   0xb   : > { %1154 = vmatpush3.bf16.msra.mxu0 (!%p139_p2), %v1214_v1  ;;  %1199 = vmatpush3.bf16.msra.mxu1 (!%p139_p2), %v1214_v1 }
   0xc   : > { %1155 = vmatprep.subr.bf16.mxu0 (!%p139_p2), %v1215_v2  ;;  %1195 = vmatprep.subr.bf16.mxu1 (!%p139_p2), %v1215_v2 }
   0xd   : > { %s1717_s18 = smov (!%p163_p3, %s990_s18), 255 }
   0xe   : > { %s991_s21 = sshll.u32 %s1717_s18, 2 }
   0xf   : > { %s1418_s26 = scalar_lea.vmem %s1712_s0, %s991_s21  ;;  %1156 = vmatpush3.bf16.msra.mxu0 %v1215_v2  ;;  %1200 = vmatpush3.bf16.msra.mxu1 %v1215_v2  ;;  %s1563_s6 = scalar_lea.vmem %s1715_s3, %s991_s21 }
  0x10   : > { %v1218_v4 = vld [vmem:[%s1418_s26] sm:$0xff]   ;;  %1157 = vmatprep.subr.bf16.mxu0 %v1216_v3  ;;  %1196 = vmatprep.subr.bf16.mxu1 %v1216_v3  ;;  %v1220_v8 = vld [vmem:[%s1418_s26 + $0x8] sm:$0xff]   ;;  %v1222_v10 = vld [vmem:[%s1418_s26 + $0x10] sm:$0xff]  }
  0x11   : > { %v1219_v5 = vld [vmem:[%s1418_s26 + $0x40] sm:$0xff]   ;;  %1161 = vmatprep.mubr.msk.bf16.mxu0 %vm330_vm0, %v1218_v4  ;;  %v1221_v9 = vld [vmem:[%s1418_s26 + $0x48] sm:$0xff]   ;;  %v1223_v11 = vld [vmem:[%s1418_s26 + $0x50] sm:$0xff]  }
  0x12   : > { %1177 = vmatprep.mubr.msk.bf16.mxu1 %vm330_vm0, %v1219_v5  ;;  %v1224_v12 = vld [vmem:[%s1418_s26 + $0x18] sm:$0xff]   ;;  %v1226_v14 = vld [vmem:[%s1418_s26 + $0x20] sm:$0xff]   ;;  %v1228_v16 = vld [vmem:[%s1418_s26 + $0x28] sm:$0xff]  }
  0x13   : > { %1158 = vmatpush3.bf16.msra.mxu0 %v1216_v3  ;;  %1201 = vmatpush3.bf16.msra.mxu1 %v1216_v3  ;;  %v1225_v13 = vld [vmem:[%s1418_s26 + $0x58] sm:$0xff]   ;;  %v1227_v15 = vld [vmem:[%s1418_s26 + $0x60] sm:$0xff]   ;;  %v1229_v17 = vld [vmem:[%s1418_s26 + $0x68] sm:$0xff]  }
  0x14   : > { %1203 = vmatprep.subr.msk.bf16.mxu0 %vm379_vm1, %v1217_v6  ;;  %1204 = vmatprep.subr.msk.bf16.mxu1 %vm379_vm1, %v1217_v6  ;;  %v1230_v18 = vld [vmem:[%s1418_s26 + $0x30] sm:$0xff]   ;;  %v1232_v20 = vld [vmem:[%s1418_s26 + $0x38] sm:$0xff]  }
  0x15   : > { %v1231_v19 = vld [vmem:[%s1418_s26 + $0x70] sm:$0xff]   ;;  %v1233_v21 = vld [vmem:[%s1418_s26 + $0x78] sm:$0xff]  }
  0x17   : > { %1160 = vmatpush3.bf16.msra.mxu0 %v381_v7  ;;  %1202 = vmatpush3.bf16.msra.mxu1 %v381_v7 }
  0x1a   : > { %1162 = vmatmul.mubr.msk.bf16.vlgmr.msra.gmra.mrb[0].mxu0 %vm330_vm0, %v1220_v8  ;;  %1178 = vmatmul.mubr.msk.bf16.vlgmr.msra.gmra.mrb[0].mxu1 %vm330_vm0, %v1221_v9 }
  0x1b   : > { %1165 = vmatprep.mubr.msk.bf16.mxu0 %vm330_vm0, %v1222_v10  ;;  %1181 = vmatprep.mubr.msk.bf16.mxu1 %vm330_vm0, %v1223_v11 }
  0x22   : > { %1166 = vmatmul.mubr.msk.bf16.gmra.mrb[4].mxu0 %vm330_vm0, %v1224_v12  ;;  %1182 = vmatmul.mubr.msk.bf16.gmra.mrb[4].mxu1 %vm330_vm0, %v1225_v13 }
  0x23   : > { %1169 = vmatprep.mubr.msk.bf16.mxu0 %vm330_vm0, %v1226_v14  ;;  %1185 = vmatprep.mubr.msk.bf16.mxu1 %vm330_vm0, %v1227_v15 }
  0x2a   : > { %1170 = vmatmul.mubr.msk.bf16.gmra.mrb[8].mxu0 %vm330_vm0, %v1228_v16  ;;  %1186 = vmatmul.mubr.msk.bf16.gmra.mrb[8].mxu1 %vm330_vm0, %v1229_v17 }
  0x2b   : > { %1173 = vmatprep.mubr.msk.bf16.mxu0 %vm330_vm0, %v1230_v18  ;;  %1189 = vmatprep.mubr.msk.bf16.mxu1 %vm330_vm0, %v1231_v19 }
  0x32   : > { %1174 = vmatmul.mubr.msk.bf16.gmra.mrb[12].mxu0 %vm330_vm0, %v1232_v20  ;;  %1190 = vmatmul.mubr.msk.bf16.gmra.mrb[12].mxu1 %vm330_vm0, %v1233_v21 }
  0xed   : > { %v1163_v23 = vpop.f32.mrb[0].mxu0  ;;  %v1179_v24 = vpop.f32.mrb[0].mxu1 }
  0xee   : > { %v1461_v25 = vadd.f32 %v1163_v23, %v1458_v22  ;;  %v1464_v26 = vadd.f32 %v1179_v24, %v1458_v22  ;;  %v417_v27 = vpop.f32.mrb[1].mxu0  ;;  %v481_v28 = vpop.f32.mrb[1].mxu1 }
  0xef   : > { %v1467_v29 = vadd.f32 %v1458_v22, %v417_v27  ;;  %v1470_v30 = vadd.f32 %v1458_v22, %v481_v28  ;;  %v1164_v31 = vpop.f32.mrb[2].mxu0  ;;  %v1180_v32 = vpop.f32.mrb[2].mxu1 }
  0xf0   : > { %v1034_v33 = vmul.f32 -1.442695, %v1461_v25  ;;  %v1050_v34 = vmul.f32 -1.442695, %v1464_v26  ;;  %v1475_v35 = vadd.f32 %v1164_v31, %v1458_v22  ;;  %v1478_v36 = vadd.f32 %v1180_v32, %v1458_v22  ;;  %v420_v37 = vpop.f32.mrb[3].mxu0  ;;  %v484_v38 = vpop.f32.mrb[3].mxu1 }
  0xf1   : > { %v1032_v39 = vmul.f32 -1.442695, %v1467_v29  ;;  %v1048_v40 = vmul.f32 -1.442695, %v1470_v30  ;;  %v1483_v41 = vadd.f32 %v1458_v22, %v420_v37  ;;  %v1486_v42 = vadd.f32 %v1458_v22, %v484_v38 }
  0xf2   : > { %1234 = vpow2.f32 %v1034_v33  ;;  %v1035_v43 = vmul.f32 -1.442695, %v1475_v35  ;;  %v1051_v44 = vmul.f32 -1.442695, %v1478_v36 }
  0xf3   : > { %1236 = vpow2.f32 %v1050_v34  ;;  %v1033_v45 = vmul.f32 -1.442695, %v1483_v41  ;;  %v1049_v46 = vmul.f32 -1.442695, %v1486_v42 }
  0xf4   : > { %1238 = vpow2.f32 %v1032_v39 }
  0xf5   : > { %1240 = vpow2.f32 %v1048_v40  ;;  %v1167_v47 = vpop.f32.mrb[4].mxu0  ;;  %v1183_v48 = vpop.f32.mrb[4].mxu1 }
  0xf6   : > { %1242 = vpow2.f32 %v1035_v43  ;;  %v1493_v49 = vadd.f32 %v1167_v47, %v1458_v22  ;;  %v1496_v50 = vadd.f32 %v1183_v48, %v1458_v22  ;;  %v433_v51 = vpop.f32.mrb[5].mxu0  ;;  %v497_v52 = vpop.f32.mrb[5].mxu1 }
  0xf7   : > { %1244 = vpow2.f32 %v1051_v44  ;;  %v1499_v53 = vadd.f32 %v1458_v22, %v433_v51  ;;  %v1502_v54 = vadd.f32 %v1458_v22, %v497_v52  ;;  %v1168_v55 = vpop.f32.mrb[6].mxu0  ;;  %v1184_v56 = vpop.f32.mrb[6].mxu1 }
  0xf8   : > { %1246 = vpow2.f32 %v1033_v45  ;;  %v1038_v57 = vmul.f32 -1.442695, %v1493_v49  ;;  %v1054_v58 = vmul.f32 -1.442695, %v1496_v50  ;;  %v1507_v59 = vadd.f32 %v1168_v55, %v1458_v22  ;;  %v436_v60 = vpop.f32.mrb[7].mxu0  ;;  %v500_v61 = vpop.f32.mrb[7].mxu1 }
  0xf9   : > { %1248 = vpow2.f32 %v1049_v46  ;;  %v1036_v62 = vmul.f32 -1.442695, %v1499_v53  ;;  %v1052_v63 = vmul.f32 -1.442695, %v1502_v54  ;;  %v1513_v19 = vadd.f32 %v1184_v56, %v1458_v22 }
  0xfa   : > { %1250 = vpow2.f32 %v1038_v57  ;;  %v1039_v0 = vmul.f32 -1.442695, %v1507_v59  ;;  %v1516_v24 = vadd.f32 %v1458_v22, %v436_v60  ;;  %v1519_v31 = vadd.f32 %v1458_v22, %v500_v61 }
  0xfb   : > { %1252 = vpow2.f32 %v1054_v58  ;;  %v1055_v39 = vmul.f32 -1.442695, %v1513_v19 }
  0xfc   : > { %v1235_v1 = vpop.eup %1234  ;;  %1254 = vpow2.f32 %v1036_v62  ;;  %v1037_v46 = vmul.f32 -1.442695, %v1516_v24  ;;  %v1053_v56 = vmul.f32 -1.442695, %v1519_v31 }
  0xfd   : > { %v1237_v2 = vpop.eup %1236  ;;  %v642_v3 = vadd.f32 1.0, %v1235_v1  ;;  %1256 = vpow2.f32 %v1052_v63  ;;  %v1171_v4 = vpop.f32.mrb[8].mxu0 }
  0xfe   : > { %v1187_v5 = vpop.f32.mrb[8].mxu1  ;;  %v1239_v6 = vpop.eup %1238  ;;  %v658_v7 = vadd.f32 1.0, %v1237_v2  ;;  %1258 = vpow2.f32 %v1039_v0  ;;  %v1522_v34 = vadd.f32 %v1171_v4, %v1458_v22 }
  0xff   : > { %v449_v8 = vpop.f32.mrb[9].mxu0  ;;  %v513_v9 = vpop.f32.mrb[9].mxu1  ;;  %1260 = vrcp.f32 %v642_v3  ;;  %v640_v11 = vadd.f32 1.0, %v1239_v6  ;;  %v1526_v40 = vadd.f32 %v1187_v5, %v1458_v22 }
 0x100   : > { %v1241_v10 = vpop.eup %1240  ;;  %v1172_v12 = vpop.f32.mrb[10].mxu0  ;;  %1262 = vrcp.f32 %v658_v7  ;;  %v1530_v47 = vadd.f32 %v1458_v22, %v449_v8  ;;  %v1536_v57 = vadd.f32 %v1458_v22, %v513_v9  ;;  %v1042_v63 = vmul.f32 -1.442695, %v1522_v34 }
 0x101   : > { %v1188_v13 = vpop.f32.mrb[10].mxu1  ;;  %v1243_v14 = vpop.eup %1242  ;;  %v656_v15 = vadd.f32 1.0, %v1241_v10  ;;  %1264 = vrcp.f32 %v640_v11  ;;  %v1058_v4 = vmul.f32 -1.442695, %v1526_v40  ;;  %v1549_v5 = vadd.f32 %v1172_v12, %v1458_v22 }
 0x102   : > { %v452_v16 = vpop.f32.mrb[11].mxu0  ;;  %v1245_v17 = vpop.eup %1244  ;;  %v643_v18 = vadd.f32 1.0, %v1243_v14  ;;  %v1040_v9 = vmul.f32 -1.442695, %v1530_v47  ;;  %v1556_v10 = vadd.f32 %v1188_v13, %v1458_v22  ;;  %v1056_v14 = vmul.f32 -1.442695, %v1536_v57 }
 0x103   : > { %v516_v20 = vpop.f32.mrb[11].mxu1  ;;  %v1247_v21 = vpop.eup %1246  ;;  %1266 = vrcp.f32 %v656_v15  ;;  %v659_v23 = vadd.f32 1.0, %v1245_v17 }
 0x104   : > { %v1249_v27 = vpop.eup %1248  ;;  %1268 = vrcp.f32 %v643_v18  ;;  %v641_v28 = vadd.f32 1.0, %v1247_v21  ;;  %v1572_v18 = vadd.f32 %v1458_v22, %v516_v20 }
 0x105   : > { %v1251_v32 = vpop.eup %1250  ;;  %1270 = vrcp.f32 %v659_v23  ;;  %v657_v33 = vadd.f32 1.0, %v1249_v27  ;;  %v1175_v43 = vpop.f32.mrb[12].mxu0 }
 0x106   : > { %v1253_v37 = vpop.eup %1252  ;;  %1272 = vrcp.f32 %v641_v28  ;;  %v646_v38 = vadd.f32 1.0, %v1251_v32  ;;  %v1191_v48 = vpop.f32.mrb[12].mxu1 }
 0x107   : > { %v1255_v44 = vpop.eup %1254  ;;  %1274 = vrcp.f32 %v657_v33  ;;  %v662_v45 = vadd.f32 1.0, %v1253_v37  ;;  %v1532_v51 = vpop.f32.mrb[13].mxu0  ;;  %v1584_v37 = vadd.f32 %v1175_v43, %v1458_v22 }
 0x108   : > { %v1257_v52 = vpop.eup %1256  ;;  %1276 = vrcp.f32 %v646_v38  ;;  %v644_v55 = vadd.f32 1.0, %v1255_v44  ;;  %v1538_v58 = vpop.f32.mrb[13].mxu1  ;;  %v1590_v44 = vadd.f32 %v1191_v48, %v1458_v22  ;;  %v1057_v48 = vmul.f32 -1.442695, %v1572_v18 }
 0x109   : > { %v1540_v60 = vpop.f32.mrb[14].mxu0  ;;  %v1259_v61 = vpop.eup %1258  ;;  %1278 = vrcp.f32 %v662_v45  ;;  %v660_v62 = vadd.f32 1.0, %v1257_v52 }
 0x10a   : > { %v1543_v0 = vpop.f32.mrb[14].mxu1  ;;  %v1545_v1 = vpop.f32.mrb[15].mxu0  ;;  %1280 = vrcp.f32 %v644_v55  ;;  %v647_v3 = vadd.f32 1.0, %v1259_v61 }
 0x10b   : > { %v1261_v2 = vpop.eup %1260  ;;  %v1551_v6 = vpop.f32.mrb[15].mxu1  ;;  %1282 = vrcp.f32 %v660_v62  ;;  %v1046_v62 = vmul.f32 -1.442695, %v1584_v37 }
 0x10c   : > { %v1263_v7 = vpop.eup %1262  ;;  %v738_v8 = vmul.f32 %v1261_v2, %v1461_v25  ;;  %1284 = vrcp.f32 %v647_v3  ;;  %v1568_v25 = vadd.f32 %v1458_v22, %v452_v16  ;;  %v1062_v3 = vmul.f32 -1.442695, %v1590_v44 }
 0x10d   : > { %v1265_v11 = vpop.eup %1264  ;;  %v754_v12 = vmul.f32 %v1263_v7, %v1464_v26  ;;  %1286 = vpow2.f32 %v1055_v39  ;;  %v1043_v26 = vmul.f32 -1.442695, %v1549_v5 }
 0x10e   : > { %v1267_v15 = vpop.eup %1266  ;;  %v1100_v17 = vpack.c.bf16 %v738_v8, %v738_v8  ;;  %v736_v13 = vmul.f32 %v1265_v11, %v1467_v29  ;;  %1288 = vpow2.f32 %v1037_v46  ;;  %v1059_v29 = vmul.f32 -1.442695, %v1556_v10 }
 0x10f   : > { %v1269_v21 = vpop.eup %1268  ;;  %v1116_v23 = vpack.c.bf16 %v754_v12, %v754_v12  ;;  %v752_v27 = vmul.f32 %v1267_v15, %v1470_v30  ;;  %1290 = vpow2.f32 %v1053_v56  ;;  %v1041_v43 = vmul.f32 -1.442695, %v1568_v25 }
 0x110   : > { %v1271_v28 = vpop.eup %1270  ;;  %899 = vst.msk [vmem:[%s1563_s6 + $0x8] sm:$0xf] %vm896_vm2, %v1100_v17  ;;  %v1098_v16 = vpack.c.bf16 %v736_v13, %v736_v13  ;;  %v739_v32 = vmul.f32 %v1269_v21, %v1475_v35  ;;  %1292 = vpow2.f32 %v1042_v63 }
 0x111   : > { %v1273_v20 = vpop.eup %1272  ;;  %915 = vst.msk [vmem:[%s1563_s6 + $0x48] sm:$0xf] %vm896_vm2, %v1116_v23  ;;  %v1114_v33 = vpack.c.bf16 %v752_v27, %v752_v27  ;;  %v755_v30 = vmul.f32 %v1271_v28, %v1478_v36  ;;  %1294 = vpow2.f32 %v1058_v4 }
 0x112   : > { %v1275_v38 = vpop.eup %1274  ;;  %897 = vst.msk [vmem:[%s1563_s6] sm:$0xf] %vm896_vm2, %v1098_v16  ;;  %v1101_v39 = vpack.c.bf16 %v739_v32, %v739_v32  ;;  %v737_v35 = vmul.f32 %v1273_v20, %v1483_v41  ;;  %1296 = vpow2.f32 %v1040_v9 }
 0x113   : > { %v1277_v45 = vpop.eup %1276  ;;  %913 = vst.msk [vmem:[%s1563_s6 + $0x40] sm:$0xf] %vm896_vm2, %v1114_v33  ;;  %v1117_v36 = vpack.c.bf16 %v755_v30, %v755_v30  ;;  %v753_v46 = vmul.f32 %v1275_v38, %v1486_v42  ;;  %1298 = vpow2.f32 %v1056_v14  ;;  %v1624_v30 = vadd.f32 %v1458_v22, %v1532_v51 }
 0x114   : > { %v1279_v52 = vpop.eup %1278  ;;  %900 = vst.msk [vmem:[%s1563_s6 + $0xc] sm:$0xf] %vm896_vm2, %v1101_v39  ;;  %v1099_v55 = vpack.c.bf16 %v737_v35, %v737_v35  ;;  %v742_v41 = vmul.f32 %v1277_v45, %v1493_v49  ;;  %1300 = vpow2.f32 %v1043_v26  ;;  %v1628_v35 = vadd.f32 %v1458_v22, %v1538_v58 }
 0x115   : > { %v1281_v56 = vpop.eup %1280  ;;  %916 = vst.msk [vmem:[%s1563_s6 + $0x4c] sm:$0xf] %vm896_vm2, %v1117_v36  ;;  %v1115_v61 = vpack.c.bf16 %v753_v46, %v753_v46  ;;  %v758_v42 = vmul.f32 %v1279_v52, %v1496_v50  ;;  %1302 = vpow2.f32 %v1059_v29  ;;  %v1632_v46 = vadd.f32 %v1540_v60, %v1458_v22 }
 0x116   : > { %v1283_v63 = vpop.eup %1282  ;;  %898 = vst.msk [vmem:[%s1563_s6 + $0x4] sm:$0xf] %vm896_vm2, %v1099_v55  ;;  %v1104_v2 = vpack.c.bf16 %v742_v41, %v742_v41  ;;  %v740_v49 = vmul.f32 %v1281_v56, %v1499_v53  ;;  %1304 = vpow2.f32 %v1041_v43  ;;  %v1636_v51 = vadd.f32 %v1543_v0, %v1458_v22 }
 0x117   : > { %v1285_v4 = vpop.eup %1284  ;;  %914 = vst.msk [vmem:[%s1563_s6 + $0x44] sm:$0xf] %vm896_vm2, %v1115_v61  ;;  %v1120_v7 = vpack.c.bf16 %v758_v42, %v758_v42  ;;  %v756_v50 = vmul.f32 %v1283_v63, %v1502_v54  ;;  %1306 = vpow2.f32 %v1057_v48  ;;  %v1044_v58 = vmul.f32 -1.442695, %v1624_v30 }
 0x118   : > { %v1287_v8 = vpop.eup %1286  ;;  %903 = vst.msk [vmem:[%s1563_s6 + $0x18] sm:$0xf] %vm896_vm2, %v1104_v2  ;;  %v1102_v9 = vpack.c.bf16 %v740_v49, %v740_v49  ;;  %v743_v11 = vmul.f32 %v1285_v4, %v1507_v59  ;;  %1308 = vpow2.f32 %v1046_v62  ;;  %v1641_v48 = vadd.f32 %v1458_v22, %v1545_v1 }
 0x119   : > { %v1289_v53 = vpop.eup %1288  ;;  %919 = vst.msk [vmem:[%s1563_s6 + $0x58] sm:$0xf] %vm896_vm2, %v1120_v7  ;;  %v1118_v12 = vpack.c.bf16 %v756_v50, %v756_v50  ;;  %v663_v14 = vadd.f32 1.0, %v1287_v8  ;;  %1310 = vpow2.f32 %v1062_v3  ;;  %v1060_v61 = vmul.f32 -1.442695, %v1628_v35 }
 0x11a   : > { %v1291_v15 = vpop.eup %1290  ;;  %901 = vst.msk [vmem:[%s1563_s6 + $0x10] sm:$0xf] %vm896_vm2, %v1102_v9  ;;  %v1105_v54 = vpack.c.bf16 %v743_v11, %v743_v11  ;;  %v645_v17 = vadd.f32 1.0, %v1289_v53  ;;  %v1646_v42 = vadd.f32 %v1458_v22, %v1551_v6  ;;  %v1047_v63 = vmul.f32 -1.442695, %v1632_v46 }
 0x11b   : > { %v1293_v13 = vpop.eup %1292  ;;  %917 = vst.msk [vmem:[%s1563_s6 + $0x50] sm:$0xf] %vm896_vm2, %v1118_v12  ;;  %1312 = vrcp.f32 %v663_v14  ;;  %v661_v21 = vadd.f32 1.0, %v1291_v15  ;;  %v1063_v49 = vmul.f32 -1.442695, %v1636_v51 }
 0x11c   : > { %v1295_v59 = vpop.eup %1294  ;;  %904 = vst.msk [vmem:[%s1563_s6 + $0x1c] sm:$0xf] %vm896_vm2, %v1105_v54  ;;  %1314 = vrcp.f32 %v645_v17  ;;  %v650_v23 = vadd.f32 1.0, %v1293_v13  ;;  %v1045_v22 = vmul.f32 -1.442695, %v1641_v48 }
 0x11d   : > { %v1297_v27 = vpop.eup %1296  ;;  %1316 = vrcp.f32 %v661_v21  ;;  %v666_v26 = vadd.f32 1.0, %v1295_v59  ;;  %v1061_v8 = vmul.f32 -1.442695, %v1646_v42 }
 0x11e   : > { %v1299_v28 = vpop.eup %1298  ;;  %1318 = vrcp.f32 %v650_v23  ;;  %v648_v16 = vadd.f32 1.0, %v1297_v27 }
 0x11f   : > { %v1301_v32 = vpop.eup %1300  ;;  %1320 = vrcp.f32 %v666_v26  ;;  %v664_v29 = vadd.f32 1.0, %v1299_v28 }
 0x120   : > { %v1303_v20 = vpop.eup %1302  ;;  %1322 = vrcp.f32 %v648_v16  ;;  %v651_v33 = vadd.f32 1.0, %v1301_v32 }
 0x121   : > { %v1305_v38 = vpop.eup %1304  ;;  %1324 = vrcp.f32 %v664_v29  ;;  %v667_v39 = vadd.f32 1.0, %v1303_v20 }
 0x122   : > { %v1307_v45 = vpop.eup %1306  ;;  %1326 = vrcp.f32 %v651_v33  ;;  %v649_v36 = vadd.f32 1.0, %v1305_v38 }
 0x123   : > { %v1309_v43 = vpop.eup %1308  ;;  %1328 = vrcp.f32 %v667_v39  ;;  %v665_v52 = vadd.f32 1.0, %v1307_v45 }
 0x124   : > { %v1311_v55 = vpop.eup %1310  ;;  %1330 = vrcp.f32 %v649_v36  ;;  %v654_v41 = vadd.f32 1.0, %v1309_v43 }
 0x125   : > { %v1313_v56 = vpop.eup %1312  ;;  %1332 = vrcp.f32 %v665_v52  ;;  %v670_v60 = vadd.f32 1.0, %v1311_v55 }
 0x126   : > { %v1315_v0 = vpop.eup %1314  ;;  %v759_v62 = vmul.f32 %v1313_v56, %v1513_v19  ;;  %1334 = vrcp.f32 %v654_v41 }
 0x127   : > { %v1317_v2 = vpop.eup %1316  ;;  %v741_v1 = vmul.f32 %v1315_v0, %v1516_v24  ;;  %1336 = vrcp.f32 %v670_v60 }
 0x128   : > { %v1319_v3 = vpop.eup %1318  ;;  %v1121_v4 = vpack.c.bf16 %v759_v62, %v759_v62  ;;  %v757_v7 = vmul.f32 %v1317_v2, %v1519_v31  ;;  %1338 = vpow2.f32 %v1044_v58 }
 0x129   : > { %v1321_v6 = vpop.eup %1320  ;;  %v1103_v19 = vpack.c.bf16 %v741_v1, %v741_v1  ;;  %v746_v50 = vmul.f32 %v1319_v3, %v1522_v34  ;;  %1340 = vpow2.f32 %v1060_v61 }
 0x12a   : > { %v1323_v24 = vpop.eup %1322  ;;  %920 = vst.msk [vmem:[%s1563_s6 + $0x5c] sm:$0xf] %vm896_vm2, %v1121_v4  ;;  %v1119_v9 = vpack.c.bf16 %v757_v7, %v757_v7  ;;  %v762_v11 = vmul.f32 %v1321_v6, %v1526_v40  ;;  %1342 = vpow2.f32 %v1047_v63 }
 0x12b   : > { %v1325_v31 = vpop.eup %1324  ;;  %902 = vst.msk [vmem:[%s1563_s6 + $0x14] sm:$0xf] %vm896_vm2, %v1103_v19  ;;  %v1108_v53 = vpack.c.bf16 %v746_v50, %v746_v50  ;;  %v744_v12 = vmul.f32 %v1323_v24, %v1530_v47  ;;  %1344 = vpow2.f32 %v1063_v49 }
 0x12c   : > { %v1327_v34 = vpop.eup %1326  ;;  %918 = vst.msk [vmem:[%s1563_s6 + $0x54] sm:$0xf] %vm896_vm2, %v1119_v9  ;;  %v1124_v14 = vpack.c.bf16 %v762_v11, %v762_v11  ;;  %v760_v15 = vmul.f32 %v1325_v31, %v1536_v57  ;;  %1346 = vpow2.f32 %v1045_v22 }
 0x12d   : > { %v1329_v54 = vpop.eup %1328  ;;  %907 = vst.msk [vmem:[%s1563_s6 + $0x28] sm:$0xf] %vm896_vm2, %v1108_v53  ;;  %v1106_v40 = vpack.c.bf16 %v744_v12, %v744_v12  ;;  %v747_v17 = vmul.f32 %v1327_v34, %v1549_v5  ;;  %1348 = vpow2.f32 %v1061_v8 }
 0x12e   : > { %v1331_v13 = vpop.eup %1330  ;;  %923 = vst.msk [vmem:[%s1563_s6 + $0x68] sm:$0xf] %vm896_vm2, %v1124_v14  ;;  %v1122_v47 = vpack.c.bf16 %v760_v15, %v760_v15  ;;  %v763_v21 = vmul.f32 %v1329_v54, %v1556_v10 }
 0x12f   : > { %v1333_v59 = vpop.eup %1332  ;;  %905 = vst.msk [vmem:[%s1563_s6 + $0x20] sm:$0xf] %vm896_vm2, %v1106_v40  ;;  %v1109_v57 = vpack.c.bf16 %v747_v17, %v747_v17  ;;  %v745_v23 = vmul.f32 %v1331_v13, %v1568_v25 }
 0x130   : > { %v1335_v27 = vpop.eup %1334  ;;  %921 = vst.msk [vmem:[%s1563_s6 + $0x60] sm:$0xf] %vm896_vm2, %v1122_v47  ;;  %v1125_v5 = vpack.c.bf16 %v763_v21, %v763_v21  ;;  %v761_v26 = vmul.f32 %v1333_v59, %v1572_v18 }
 0x131   : > { %v1337_v28 = vpop.eup %1336  ;;  %908 = vst.msk [vmem:[%s1563_s6 + $0x2c] sm:$0xf] %vm896_vm2, %v1109_v57  ;;  %v1107_v16 = vpack.c.bf16 %v745_v23, %v745_v23  ;;  %v750_v10 = vmul.f32 %v1335_v27, %v1584_v37 }
 0x132   : > { %v1339_v32 = vpop.eup %1338  ;;  %924 = vst.msk [vmem:[%s1563_s6 + $0x6c] sm:$0xf] %vm896_vm2, %v1125_v5  ;;  %v1123_v29 = vpack.c.bf16 %v761_v26, %v761_v26  ;;  %v766_v25 = vmul.f32 %v1337_v28, %v1590_v44 }
 0x133   : > { %v1341_v20 = vpop.eup %1340  ;;  %906 = vst.msk [vmem:[%s1563_s6 + $0x24] sm:$0xf] %vm896_vm2, %v1107_v16  ;;  %v1112_v33 = vpack.c.bf16 %v750_v10, %v750_v10  ;;  %v652_v38 = vadd.f32 1.0, %v1339_v32 }
 0x134   : > { %v1343_v18 = vpop.eup %1342  ;;  %922 = vst.msk [vmem:[%s1563_s6 + $0x64] sm:$0xf] %vm896_vm2, %v1123_v29  ;;  %v1128_v39 = vpack.c.bf16 %v766_v25, %v766_v25  ;;  %v668_v45 = vadd.f32 1.0, %v1341_v20 }
 0x135   : > { %v1345_v36 = vpop.eup %1344  ;;  %911 = vst.msk [vmem:[%s1563_s6 + $0x38] sm:$0xf] %vm896_vm2, %v1112_v33  ;;  %1350 = vrcp.f32 %v652_v38  ;;  %v655_v37 = vadd.f32 1.0, %v1343_v18 }
 0x136   : > { %v1347_v43 = vpop.eup %1346  ;;  %927 = vst.msk [vmem:[%s1563_s6 + $0x78] sm:$0xf] %vm896_vm2, %v1128_v39  ;;  %1352 = vrcp.f32 %v668_v45  ;;  %v671_v44 = vadd.f32 1.0, %v1345_v36 }
 0x137   : > { %v1349_v52 = vpop.eup %1348  ;;  %1354 = vrcp.f32 %v655_v37  ;;  %v653_v55 = vadd.f32 1.0, %v1347_v43 }
 0x138   : > { %1356 = vrcp.f32 %v671_v44  ;;  %v669_v41 = vadd.f32 1.0, %v1349_v52 }
 0x139   : > { %1358 = vrcp.f32 %v653_v55 }
 0x13a   : > { %1360 = vrcp.f32 %v669_v41 }
 0x13f   : > { %v1351_v58 = vpop.eup %1350 }
 0x140   : > { %v1353_v56 = vpop.eup %1352  ;;  %v748_v60 = vmul.f32 %v1351_v58, %v1624_v30 }
 0x141   : > { %v1355_v61 = vpop.eup %1354  ;;  %v764_v0 = vmul.f32 %v1353_v56, %v1628_v35 }
 0x142   : > { %v1357_v62 = vpop.eup %1356  ;;  %v1110_v63 = vpack.c.bf16 %v748_v60, %v748_v60  ;;  %v751_v2 = vmul.f32 %v1355_v61, %v1632_v46 }
 0x143   : > { %v1359_v1 = vpop.eup %1358  ;;  %v1126_v49 = vpack.c.bf16 %v764_v0, %v764_v0  ;;  %v767_v3 = vmul.f32 %v1357_v62, %v1636_v51 }
 0x144   : > { %v1361_v4 = vpop.eup %1360  ;;  %909 = vst.msk [vmem:[%s1563_s6 + $0x30] sm:$0xf] %vm896_vm2, %v1110_v63  ;;  %v1113_v7 = vpack.c.bf16 %v751_v2, %v751_v2  ;;  %v749_v30 = vmul.f32 %v1359_v1, %v1641_v48 }
 0x145   : > { %925 = vst.msk [vmem:[%s1563_s6 + $0x70] sm:$0xf] %vm896_vm2, %v1126_v49  ;;  %v1129_v35 = vpack.c.bf16 %v767_v3, %v767_v3  ;;  %v765_v22 = vmul.f32 %v1361_v4, %v1646_v42 }
 0x146   : > { %912 = vst.msk [vmem:[%s1563_s6 + $0x3c] sm:$0xf] %vm896_vm2, %v1113_v7  ;;  %v1111_v6 = vpack.c.bf16 %v749_v30, %v749_v30 }
 0x147   : > { %928 = vst.msk [vmem:[%s1563_s6 + $0x7c] sm:$0xf] %vm896_vm2, %v1129_v35  ;;  %v1127_v46 = vpack.c.bf16 %v765_v22, %v765_v22 }
 0x148   : > { %910 = vst.msk [vmem:[%s1563_s6 + $0x34] sm:$0xf] %vm896_vm2, %v1111_v6 }
 0x149   : > { %926 = vst.msk [vmem:[%s1563_s6 + $0x74] sm:$0xf] %vm896_vm2, %v1127_v46 }
 0x14a PF: > { %s13_s12 = sadd.s32 1, %s1368_s12  }
 0x14b   : > { %p10_p4 = scmp.ge.s32.totalorder %s13_s12, 10  }
 0x14d   :  { %12 = sbr.rel (!%p10_p4) target bundleno = 1 (0x1), region = 62 }

// kernel: retinanet_forward.30
= control target key start
LH: loop header
LB: loop body
LE: loop exit
PB: predicated region body
PF: predicated region fallthrough
CT: control target
= control target key end

     0   :  { %s1390_s12 = smov 0   ;;  %s1712_s0 = inlined_call_operand.vmem [shape: bf16[512,72], index: 0, kind: input, shape index: {}]   ;;  %s1713_s1 = inlined_call_operand.vmem [shape: bf16[72,12], index: 1, kind: input, shape index: {}]   ;;  %s1714_s2 = inlined_call_operand.vmem [shape: f32[1,12], index: 2, kind: input, shape index: {}]   ;;  %s1715_s3 = inlined_call_operand.vmem [shape: bf16[512,12], index: 3, kind: output, shape index: {}]  }
   0x1 LB: > { %s985_s13 = sadd.s32 4294967295, %s1368_s12   ;;  %p989_p0 = scmp.ge.s32.totalorder %s1368_s12, 1  ;;  %s1368_s12 = sphi %s1390_s12, %s13_s12  }
   0x2   : > { %p138_p1 = scmp.lt.s32.totalorder %s1368_s12, 3 }
   0x4   : > { %p139_p2 = pnand %p989_p0, %p138_p1 }
   0x5   : > { %v1213_v0 = vld [vmem:[%s1713_s1] sm:$0xff] (!%p139_p2)   ;;  %v1214_v1 = vld [vmem:[%s1713_s1 + $0x8] sm:$0xff] (!%p139_p2)   ;;  %s990_s18 = sshll.u32 (!%p139_p2), %s985_s13, 5  ;;  %v1215_v2 = vld [vmem:[%s1713_s1 + $0x10] sm:$0xff] (!%p139_p2)   ;;  %vm330_vm0 = vcmask (!%p139_p2), 588800   ;;  %vm379_vm1 = vcmask (!%p139_p2), 1043456  }
   0x6   : > { %142 = sbr.rel (%p139_p2) target bundleno = 330 (0x14a), region = 32  ;;  %1151 = vmatprep.subr.bf16.mxu0 (!%p139_p2), %v1213_v0  ;;  %1193 = vmatprep.subr.bf16.mxu1 (!%p139_p2), %v1213_v0  ;;  %p163_p3 = scmp.lt.s32.totalorder (!%p139_p2), %s990_s18, 63  ;;  %v1216_v3 = vld [vmem:[%s1713_s1 + $0x18] sm:$0xff] (!%p139_p2)   ;;  %v1217_v6 = vld [vmem:[%s1713_s1 + $0x20] ss:$0 sps:$4 sm:$0xff] (!%p139_p2)   ;;  %vm896_vm2 = vcmask (!%p139_p2), 93184  }
   0x7   : > { %1152 = vmatpush3.bf16.msra.mxu0 (!%p139_p2), %v1213_v0  ;;  %1198 = vmatpush3.bf16.msra.mxu1 (!%p139_p2), %v1213_v0  ;;  %v381_v7 = vsel (!%p139_p2), %vm379_vm1, %v1217_v6, 0  ;;  %v1458_v22 = vld [vmem:[%s1714_s2] ss:$0 sm:$0xff] (!%p139_p2) }
   0x8   : > { %1153 = vmatprep.subr.bf16.mxu0 (!%p139_p2), %v1214_v1  ;;  %1194 = vmatprep.subr.bf16.mxu1 (!%p139_p2), %v1214_v1 }
   0xb   : > { %1154 = vmatpush3.bf16.msra.mxu0 (!%p139_p2), %v1214_v1  ;;  %1199 = vmatpush3.bf16.msra.mxu1 (!%p139_p2), %v1214_v1 }
   0xc   : > { %1155 = vmatprep.subr.bf16.mxu0 (!%p139_p2), %v1215_v2  ;;  %1195 = vmatprep.subr.bf16.mxu1 (!%p139_p2), %v1215_v2 }
   0xd   : > { %s1717_s18 = smov (!%p163_p3, %s990_s18), 63 }
   0xe   : > { %s991_s21 = sshll.u32 %s1717_s18, 2 }
   0xf   : > { %s1418_s26 = scalar_lea.vmem %s1712_s0, %s991_s21  ;;  %1156 = vmatpush3.bf16.msra.mxu0 %v1215_v2  ;;  %1200 = vmatpush3.bf16.msra.mxu1 %v1215_v2  ;;  %s1563_s6 = scalar_lea.vmem %s1715_s3, %s991_s21 }
  0x10   : > { %v1218_v4 = vld [vmem:[%s1418_s26] sm:$0xff]   ;;  %1157 = vmatprep.subr.bf16.mxu0 %v1216_v3  ;;  %1196 = vmatprep.subr.bf16.mxu1 %v1216_v3  ;;  %v1220_v8 = vld [vmem:[%s1418_s26 + $0x8] sm:$0xff]   ;;  %v1222_v10 = vld [vmem:[%s1418_s26 + $0x10] sm:$0xff]  }
  0x11   : > { %v1219_v5 = vld [vmem:[%s1418_s26 + $0x40] sm:$0xff]   ;;  %1161 = vmatprep.mubr.msk.bf16.mxu0 %vm330_vm0, %v1218_v4  ;;  %v1221_v9 = vld [vmem:[%s1418_s26 + $0x48] sm:$0xff]   ;;  %v1223_v11 = vld [vmem:[%s1418_s26 + $0x50] sm:$0xff]  }
  0x12   : > { %1177 = vmatprep.mubr.msk.bf16.mxu1 %vm330_vm0, %v1219_v5  ;;  %v1224_v12 = vld [vmem:[%s1418_s26 + $0x18] sm:$0xff]   ;;  %v1226_v14 = vld [vmem:[%s1418_s26 + $0x20] sm:$0xff]   ;;  %v1228_v16 = vld [vmem:[%s1418_s26 + $0x28] sm:$0xff]  }
  0x13   : > { %1158 = vmatpush3.bf16.msra.mxu0 %v1216_v3  ;;  %1201 = vmatpush3.bf16.msra.mxu1 %v1216_v3  ;;  %v1225_v13 = vld [vmem:[%s1418_s26 + $0x58] sm:$0xff]   ;;  %v1227_v15 = vld [vmem:[%s1418_s26 + $0x60] sm:$0xff]   ;;  %v1229_v17 = vld [vmem:[%s1418_s26 + $0x68] sm:$0xff]  }
  0x14   : > { %1203 = vmatprep.subr.msk.bf16.mxu0 %vm379_vm1, %v1217_v6  ;;  %1204 = vmatprep.subr.msk.bf16.mxu1 %vm379_vm1, %v1217_v6  ;;  %v1230_v18 = vld [vmem:[%s1418_s26 + $0x30] sm:$0xff]   ;;  %v1232_v20 = vld [vmem:[%s1418_s26 + $0x38] sm:$0xff]  }
  0x15   : > { %v1231_v19 = vld [vmem:[%s1418_s26 + $0x70] sm:$0xff]   ;;  %v1233_v21 = vld [vmem:[%s1418_s26 + $0x78] sm:$0xff]  }
  0x17   : > { %1160 = vmatpush3.bf16.msra.mxu0 %v381_v7  ;;  %1202 = vmatpush3.bf16.msra.mxu1 %v381_v7 }
  0x1a   : > { %1162 = vmatmul.mubr.msk.bf16.vlgmr.msra.gmra.mrb[0].mxu0 %vm330_vm0, %v1220_v8  ;;  %1178 = vmatmul.mubr.msk.bf16.vlgmr.msra.gmra.mrb[0].mxu1 %vm330_vm0, %v1221_v9 }
  0x1b   : > { %1165 = vmatprep.mubr.msk.bf16.mxu0 %vm330_vm0, %v1222_v10  ;;  %1181 = vmatprep.mubr.msk.bf16.mxu1 %vm330_vm0, %v1223_v11 }
  0x22   : > { %1166 = vmatmul.mubr.msk.bf16.gmra.mrb[4].mxu0 %vm330_vm0, %v1224_v12  ;;  %1182 = vmatmul.mubr.msk.bf16.gmra.mrb[4].mxu1 %vm330_vm0, %v1225_v13 }
  0x23   : > { %1169 = vmatprep.mubr.msk.bf16.mxu0 %vm330_vm0, %v1226_v14  ;;  %1185 = vmatprep.mubr.msk.bf16.mxu1 %vm330_vm0, %v1227_v15 }
  0x2a   : > { %1170 = vmatmul.mubr.msk.bf16.gmra.mrb[8].mxu0 %vm330_vm0, %v1228_v16  ;;  %1186 = vmatmul.mubr.msk.bf16.gmra.mrb[8].mxu1 %vm330_vm0, %v1229_v17 }
  0x2b   : > { %1173 = vmatprep.mubr.msk.bf16.mxu0 %vm330_vm0, %v1230_v18  ;;  %1189 = vmatprep.mubr.msk.bf16.mxu1 %vm330_vm0, %v1231_v19 }
  0x32   : > { %1174 = vmatmul.mubr.msk.bf16.gmra.mrb[12].mxu0 %vm330_vm0, %v1232_v20  ;;  %1190 = vmatmul.mubr.msk.bf16.gmra.mrb[12].mxu1 %vm330_vm0, %v1233_v21 }
  0xed   : > { %v1163_v23 = vpop.f32.mrb[0].mxu0  ;;  %v1179_v24 = vpop.f32.mrb[0].mxu1 }
  0xee   : > { %v1461_v25 = vadd.f32 %v1163_v23, %v1458_v22  ;;  %v1464_v26 = vadd.f32 %v1179_v24, %v1458_v22  ;;  %v417_v27 = vpop.f32.mrb[1].mxu0  ;;  %v481_v28 = vpop.f32.mrb[1].mxu1 }
  0xef   : > { %v1467_v29 = vadd.f32 %v1458_v22, %v417_v27  ;;  %v1470_v30 = vadd.f32 %v1458_v22, %v481_v28  ;;  %v1164_v31 = vpop.f32.mrb[2].mxu0  ;;  %v1180_v32 = vpop.f32.mrb[2].mxu1 }
  0xf0   : > { %v1034_v33 = vmul.f32 -1.442695, %v1461_v25  ;;  %v1050_v34 = vmul.f32 -1.442695, %v1464_v26  ;;  %v1475_v35 = vadd.f32 %v1164_v31, %v1458_v22  ;;  %v1478_v36 = vadd.f32 %v1180_v32, %v1458_v22  ;;  %v420_v37 = vpop.f32.mrb[3].mxu0  ;;  %v484_v38 = vpop.f32.mrb[3].mxu1 }
  0xf1   : > { %v1032_v39 = vmul.f32 -1.442695, %v1467_v29  ;;  %v1048_v40 = vmul.f32 -1.442695, %v1470_v30  ;;  %v1483_v41 = vadd.f32 %v1458_v22, %v420_v37  ;;  %v1486_v42 = vadd.f32 %v1458_v22, %v484_v38 }
  0xf2   : > { %1234 = vpow2.f32 %v1034_v33  ;;  %v1035_v43 = vmul.f32 -1.442695, %v1475_v35  ;;  %v1051_v44 = vmul.f32 -1.442695, %v1478_v36 }
  0xf3   : > { %1236 = vpow2.f32 %v1050_v34  ;;  %v1033_v45 = vmul.f32 -1.442695, %v1483_v41  ;;  %v1049_v46 = vmul.f32 -1.442695, %v1486_v42 }
  0xf4   : > { %1238 = vpow2.f32 %v1032_v39 }
  0xf5   : > { %1240 = vpow2.f32 %v1048_v40  ;;  %v1167_v47 = vpop.f32.mrb[4].mxu0  ;;  %v1183_v48 = vpop.f32.mrb[4].mxu1 }
  0xf6   : > { %1242 = vpow2.f32 %v1035_v43  ;;  %v1493_v49 = vadd.f32 %v1167_v47, %v1458_v22  ;;  %v1496_v50 = vadd.f32 %v1183_v48, %v1458_v22  ;;  %v433_v51 = vpop.f32.mrb[5].mxu0  ;;  %v497_v52 = vpop.f32.mrb[5].mxu1 }
  0xf7   : > { %1244 = vpow2.f32 %v1051_v44  ;;  %v1499_v53 = vadd.f32 %v1458_v22, %v433_v51  ;;  %v1502_v54 = vadd.f32 %v1458_v22, %v497_v52  ;;  %v1168_v55 = vpop.f32.mrb[6].mxu0  ;;  %v1184_v56 = vpop.f32.mrb[6].mxu1 }
  0xf8   : > { %1246 = vpow2.f32 %v1033_v45  ;;  %v1038_v57 = vmul.f32 -1.442695, %v1493_v49  ;;  %v1054_v58 = vmul.f32 -1.442695, %v1496_v50  ;;  %v1507_v59 = vadd.f32 %v1168_v55, %v1458_v22  ;;  %v436_v60 = vpop.f32.mrb[7].mxu0  ;;  %v500_v61 = vpop.f32.mrb[7].mxu1 }
  0xf9   : > { %1248 = vpow2.f32 %v1049_v46  ;;  %v1036_v62 = vmul.f32 -1.442695, %v1499_v53  ;;  %v1052_v63 = vmul.f32 -1.442695, %v1502_v54  ;;  %v1513_v19 = vadd.f32 %v1184_v56, %v1458_v22 }
  0xfa   : > { %1250 = vpow2.f32 %v1038_v57  ;;  %v1039_v0 = vmul.f32 -1.442695, %v1507_v59  ;;  %v1516_v24 = vadd.f32 %v1458_v22, %v436_v60  ;;  %v1519_v31 = vadd.f32 %v1458_v22, %v500_v61 }
  0xfb   : > { %1252 = vpow2.f32 %v1054_v58  ;;  %v1055_v39 = vmul.f32 -1.442695, %v1513_v19 }
  0xfc   : > { %v1235_v1 = vpop.eup %1234  ;;  %1254 = vpow2.f32 %v1036_v62  ;;  %v1037_v46 = vmul.f32 -1.442695, %v1516_v24  ;;  %v1053_v56 = vmul.f32 -1.442695, %v1519_v31 }
  0xfd   : > { %v1237_v2 = vpop.eup %1236  ;;  %v642_v3 = vadd.f32 1.0, %v1235_v1  ;;  %1256 = vpow2.f32 %v1052_v63  ;;  %v1171_v4 = vpop.f32.mrb[8].mxu0 }
  0xfe   : > { %v1187_v5 = vpop.f32.mrb[8].mxu1  ;;  %v1239_v6 = vpop.eup %1238  ;;  %v658_v7 = vadd.f32 1.0, %v1237_v2  ;;  %1258 = vpow2.f32 %v1039_v0  ;;  %v1522_v34 = vadd.f32 %v1171_v4, %v1458_v22 }
  0xff   : > { %v449_v8 = vpop.f32.mrb[9].mxu0  ;;  %v513_v9 = vpop.f32.mrb[9].mxu1  ;;  %1260 = vrcp.f32 %v642_v3  ;;  %v640_v11 = vadd.f32 1.0, %v1239_v6  ;;  %v1526_v40 = vadd.f32 %v1187_v5, %v1458_v22 }
 0x100   : > { %v1241_v10 = vpop.eup %1240  ;;  %v1172_v12 = vpop.f32.mrb[10].mxu0  ;;  %1262 = vrcp.f32 %v658_v7  ;;  %v1530_v47 = vadd.f32 %v1458_v22, %v449_v8  ;;  %v1536_v57 = vadd.f32 %v1458_v22, %v513_v9  ;;  %v1042_v63 = vmul.f32 -1.442695, %v1522_v34 }
 0x101   : > { %v1188_v13 = vpop.f32.mrb[10].mxu1  ;;  %v1243_v14 = vpop.eup %1242  ;;  %v656_v15 = vadd.f32 1.0, %v1241_v10  ;;  %1264 = vrcp.f32 %v640_v11  ;;  %v1058_v4 = vmul.f32 -1.442695, %v1526_v40  ;;  %v1549_v5 = vadd.f32 %v1172_v12, %v1458_v22 }
 0x102   : > { %v452_v16 = vpop.f32.mrb[11].mxu0  ;;  %v1245_v17 = vpop.eup %1244  ;;  %v643_v18 = vadd.f32 1.0, %v1243_v14  ;;  %v1040_v9 = vmul.f32 -1.442695, %v1530_v47  ;;  %v1556_v10 = vadd.f32 %v1188_v13, %v1458_v22  ;;  %v1056_v14 = vmul.f32 -1.442695, %v1536_v57 }
 0x103   : > { %v516_v20 = vpop.f32.mrb[11].mxu1  ;;  %v1247_v21 = vpop.eup %1246  ;;  %1266 = vrcp.f32 %v656_v15  ;;  %v659_v23 = vadd.f32 1.0, %v1245_v17 }
 0x104   : > { %v1249_v27 = vpop.eup %1248  ;;  %1268 = vrcp.f32 %v643_v18  ;;  %v641_v28 = vadd.f32 1.0, %v1247_v21  ;;  %v1572_v18 = vadd.f32 %v1458_v22, %v516_v20 }
 0x105   : > { %v1251_v32 = vpop.eup %1250  ;;  %1270 = vrcp.f32 %v659_v23  ;;  %v657_v33 = vadd.f32 1.0, %v1249_v27  ;;  %v1175_v43 = vpop.f32.mrb[12].mxu0 }
 0x106   : > { %v1253_v37 = vpop.eup %1252  ;;  %1272 = vrcp.f32 %v641_v28  ;;  %v646_v38 = vadd.f32 1.0, %v1251_v32  ;;  %v1191_v48 = vpop.f32.mrb[12].mxu1 }
 0x107   : > { %v1255_v44 = vpop.eup %1254  ;;  %1274 = vrcp.f32 %v657_v33  ;;  %v662_v45 = vadd.f32 1.0, %v1253_v37  ;;  %v1532_v51 = vpop.f32.mrb[13].mxu0  ;;  %v1584_v37 = vadd.f32 %v1175_v43, %v1458_v22 }
 0x108   : > { %v1257_v52 = vpop.eup %1256  ;;  %1276 = vrcp.f32 %v646_v38  ;;  %v644_v55 = vadd.f32 1.0, %v1255_v44  ;;  %v1538_v58 = vpop.f32.mrb[13].mxu1  ;;  %v1590_v44 = vadd.f32 %v1191_v48, %v1458_v22  ;;  %v1057_v48 = vmul.f32 -1.442695, %v1572_v18 }
 0x109   : > { %v1540_v60 = vpop.f32.mrb[14].mxu0  ;;  %v1259_v61 = vpop.eup %1258  ;;  %1278 = vrcp.f32 %v662_v45  ;;  %v660_v62 = vadd.f32 1.0, %v1257_v52 }
 0x10a   : > { %v1543_v0 = vpop.f32.mrb[14].mxu1  ;;  %v1545_v1 = vpop.f32.mrb[15].mxu0  ;;  %1280 = vrcp.f32 %v644_v55  ;;  %v647_v3 = vadd.f32 1.0, %v1259_v61 }
 0x10b   : > { %v1261_v2 = vpop.eup %1260  ;;  %v1551_v6 = vpop.f32.mrb[15].mxu1  ;;  %1282 = vrcp.f32 %v660_v62  ;;  %v1046_v62 = vmul.f32 -1.442695, %v1584_v37 }
 0x10c   : > { %v1263_v7 = vpop.eup %1262  ;;  %v738_v8 = vmul.f32 %v1261_v2, %v1461_v25  ;;  %1284 = vrcp.f32 %v647_v3  ;;  %v1568_v25 = vadd.f32 %v1458_v22, %v452_v16  ;;  %v1062_v3 = vmul.f32 -1.442695, %v1590_v44 }
 0x10d   : > { %v1265_v11 = vpop.eup %1264  ;;  %v754_v12 = vmul.f32 %v1263_v7, %v1464_v26  ;;  %1286 = vpow2.f32 %v1055_v39  ;;  %v1043_v26 = vmul.f32 -1.442695, %v1549_v5 }
 0x10e   : > { %v1267_v15 = vpop.eup %1266  ;;  %v1100_v17 = vpack.c.bf16 %v738_v8, %v738_v8  ;;  %v736_v13 = vmul.f32 %v1265_v11, %v1467_v29  ;;  %1288 = vpow2.f32 %v1037_v46  ;;  %v1059_v29 = vmul.f32 -1.442695, %v1556_v10 }
 0x10f   : > { %v1269_v21 = vpop.eup %1268  ;;  %v1116_v23 = vpack.c.bf16 %v754_v12, %v754_v12  ;;  %v752_v27 = vmul.f32 %v1267_v15, %v1470_v30  ;;  %1290 = vpow2.f32 %v1053_v56  ;;  %v1041_v43 = vmul.f32 -1.442695, %v1568_v25 }
 0x110   : > { %v1271_v28 = vpop.eup %1270  ;;  %899 = vst.msk [vmem:[%s1563_s6 + $0x8] sm:$0xf] %vm896_vm2, %v1100_v17  ;;  %v1098_v16 = vpack.c.bf16 %v736_v13, %v736_v13  ;;  %v739_v32 = vmul.f32 %v1269_v21, %v1475_v35  ;;  %1292 = vpow2.f32 %v1042_v63 }
 0x111   : > { %v1273_v20 = vpop.eup %1272  ;;  %915 = vst.msk [vmem:[%s1563_s6 + $0x48] sm:$0xf] %vm896_vm2, %v1116_v23  ;;  %v1114_v33 = vpack.c.bf16 %v752_v27, %v752_v27  ;;  %v755_v30 = vmul.f32 %v1271_v28, %v1478_v36  ;;  %1294 = vpow2.f32 %v1058_v4 }
 0x112   : > { %v1275_v38 = vpop.eup %1274  ;;  %897 = vst.msk [vmem:[%s1563_s6] sm:$0xf] %vm896_vm2, %v1098_v16  ;;  %v1101_v39 = vpack.c.bf16 %v739_v32, %v739_v32  ;;  %v737_v35 = vmul.f32 %v1273_v20, %v1483_v41  ;;  %1296 = vpow2.f32 %v1040_v9 }
 0x113   : > { %v1277_v45 = vpop.eup %1276  ;;  %913 = vst.msk [vmem:[%s1563_s6 + $0x40] sm:$0xf] %vm896_vm2, %v1114_v33  ;;  %v1117_v36 = vpack.c.bf16 %v755_v30, %v755_v30  ;;  %v753_v46 = vmul.f32 %v1275_v38, %v1486_v42  ;;  %1298 = vpow2.f32 %v1056_v14  ;;  %v1624_v30 = vadd.f32 %v1458_v22, %v1532_v51 }
 0x114   : > { %v1279_v52 = vpop.eup %1278  ;;  %900 = vst.msk [vmem:[%s1563_s6 + $0xc] sm:$0xf] %vm896_vm2, %v1101_v39  ;;  %v1099_v55 = vpack.c.bf16 %v737_v35, %v737_v35  ;;  %v742_v41 = vmul.f32 %v1277_v45, %v1493_v49  ;;  %1300 = vpow2.f32 %v1043_v26  ;;  %v1628_v35 = vadd.f32 %v1458_v22, %v1538_v58 }
 0x115   : > { %v1281_v56 = vpop.eup %1280  ;;  %916 = vst.msk [vmem:[%s1563_s6 + $0x4c] sm:$0xf] %vm896_vm2, %v1117_v36  ;;  %v1115_v61 = vpack.c.bf16 %v753_v46, %v753_v46  ;;  %v758_v42 = vmul.f32 %v1279_v52, %v1496_v50  ;;  %1302 = vpow2.f32 %v1059_v29  ;;  %v1632_v46 = vadd.f32 %v1540_v60, %v1458_v22 }
 0x116   : > { %v1283_v63 = vpop.eup %1282  ;;  %898 = vst.msk [vmem:[%s1563_s6 + $0x4] sm:$0xf] %vm896_vm2, %v1099_v55  ;;  %v1104_v2 = vpack.c.bf16 %v742_v41, %v742_v41  ;;  %v740_v49 = vmul.f32 %v1281_v56, %v1499_v53  ;;  %1304 = vpow2.f32 %v1041_v43  ;;  %v1636_v51 = vadd.f32 %v1543_v0, %v1458_v22 }
 0x117   : > { %v1285_v4 = vpop.eup %1284  ;;  %914 = vst.msk [vmem:[%s1563_s6 + $0x44] sm:$0xf] %vm896_vm2, %v1115_v61  ;;  %v1120_v7 = vpack.c.bf16 %v758_v42, %v758_v42  ;;  %v756_v50 = vmul.f32 %v1283_v63, %v1502_v54  ;;  %1306 = vpow2.f32 %v1057_v48  ;;  %v1044_v58 = vmul.f32 -1.442695, %v1624_v30 }
 0x118   : > { %v1287_v8 = vpop.eup %1286  ;;  %903 = vst.msk [vmem:[%s1563_s6 + $0x18] sm:$0xf] %vm896_vm2, %v1104_v2  ;;  %v1102_v9 = vpack.c.bf16 %v740_v49, %v740_v49  ;;  %v743_v11 = vmul.f32 %v1285_v4, %v1507_v59  ;;  %1308 = vpow2.f32 %v1046_v62  ;;  %v1641_v48 = vadd.f32 %v1458_v22, %v1545_v1 }
 0x119   : > { %v1289_v53 = vpop.eup %1288  ;;  %919 = vst.msk [vmem:[%s1563_s6 + $0x58] sm:$0xf] %vm896_vm2, %v1120_v7  ;;  %v1118_v12 = vpack.c.bf16 %v756_v50, %v756_v50  ;;  %v663_v14 = vadd.f32 1.0, %v1287_v8  ;;  %1310 = vpow2.f32 %v1062_v3  ;;  %v1060_v61 = vmul.f32 -1.442695, %v1628_v35 }
 0x11a   : > { %v1291_v15 = vpop.eup %1290  ;;  %901 = vst.msk [vmem:[%s1563_s6 + $0x10] sm:$0xf] %vm896_vm2, %v1102_v9  ;;  %v1105_v54 = vpack.c.bf16 %v743_v11, %v743_v11  ;;  %v645_v17 = vadd.f32 1.0, %v1289_v53  ;;  %v1646_v42 = vadd.f32 %v1458_v22, %v1551_v6  ;;  %v1047_v63 = vmul.f32 -1.442695, %v1632_v46 }
 0x11b   : > { %v1293_v13 = vpop.eup %1292  ;;  %917 = vst.msk [vmem:[%s1563_s6 + $0x50] sm:$0xf] %vm896_vm2, %v1118_v12  ;;  %1312 = vrcp.f32 %v663_v14  ;;  %v661_v21 = vadd.f32 1.0, %v1291_v15  ;;  %v1063_v49 = vmul.f32 -1.442695, %v1636_v51 }
 0x11c   : > { %v1295_v59 = vpop.eup %1294  ;;  %904 = vst.msk [vmem:[%s1563_s6 + $0x1c] sm:$0xf] %vm896_vm2, %v1105_v54  ;;  %1314 = vrcp.f32 %v645_v17  ;;  %v650_v23 = vadd.f32 1.0, %v1293_v13  ;;  %v1045_v22 = vmul.f32 -1.442695, %v1641_v48 }
 0x11d   : > { %v1297_v27 = vpop.eup %1296  ;;  %1316 = vrcp.f32 %v661_v21  ;;  %v666_v26 = vadd.f32 1.0, %v1295_v59  ;;  %v1061_v8 = vmul.f32 -1.442695, %v1646_v42 }
 0x11e   : > { %v1299_v28 = vpop.eup %1298  ;;  %1318 = vrcp.f32 %v650_v23  ;;  %v648_v16 = vadd.f32 1.0, %v1297_v27 }
 0x11f   : > { %v1301_v32 = vpop.eup %1300  ;;  %1320 = vrcp.f32 %v666_v26  ;;  %v664_v29 = vadd.f32 1.0, %v1299_v28 }
 0x120   : > { %v1303_v20 = vpop.eup %1302  ;;  %1322 = vrcp.f32 %v648_v16  ;;  %v651_v33 = vadd.f32 1.0, %v1301_v32 }
 0x121   : > { %v1305_v38 = vpop.eup %1304  ;;  %1324 = vrcp.f32 %v664_v29  ;;  %v667_v39 = vadd.f32 1.0, %v1303_v20 }
 0x122   : > { %v1307_v45 = vpop.eup %1306  ;;  %1326 = vrcp.f32 %v651_v33  ;;  %v649_v36 = vadd.f32 1.0, %v1305_v38 }
 0x123   : > { %v1309_v43 = vpop.eup %1308  ;;  %1328 = vrcp.f32 %v667_v39  ;;  %v665_v52 = vadd.f32 1.0, %v1307_v45 }
 0x124   : > { %v1311_v55 = vpop.eup %1310  ;;  %1330 = vrcp.f32 %v649_v36  ;;  %v654_v41 = vadd.f32 1.0, %v1309_v43 }
 0x125   : > { %v1313_v56 = vpop.eup %1312  ;;  %1332 = vrcp.f32 %v665_v52  ;;  %v670_v60 = vadd.f32 1.0, %v1311_v55 }
 0x126   : > { %v1315_v0 = vpop.eup %1314  ;;  %v759_v62 = vmul.f32 %v1313_v56, %v1513_v19  ;;  %1334 = vrcp.f32 %v654_v41 }
 0x127   : > { %v1317_v2 = vpop.eup %1316  ;;  %v741_v1 = vmul.f32 %v1315_v0, %v1516_v24  ;;  %1336 = vrcp.f32 %v670_v60 }
 0x128   : > { %v1319_v3 = vpop.eup %1318  ;;  %v1121_v4 = vpack.c.bf16 %v759_v62, %v759_v62  ;;  %v757_v7 = vmul.f32 %v1317_v2, %v1519_v31  ;;  %1338 = vpow2.f32 %v1044_v58 }
 0x129   : > { %v1321_v6 = vpop.eup %1320  ;;  %v1103_v19 = vpack.c.bf16 %v741_v1, %v741_v1  ;;  %v746_v50 = vmul.f32 %v1319_v3, %v1522_v34  ;;  %1340 = vpow2.f32 %v1060_v61 }
 0x12a   : > { %v1323_v24 = vpop.eup %1322  ;;  %920 = vst.msk [vmem:[%s1563_s6 + $0x5c] sm:$0xf] %vm896_vm2, %v1121_v4  ;;  %v1119_v9 = vpack.c.bf16 %v757_v7, %v757_v7  ;;  %v762_v11 = vmul.f32 %v1321_v6, %v1526_v40  ;;  %1342 = vpow2.f32 %v1047_v63 }
 0x12b   : > { %v1325_v31 = vpop.eup %1324  ;;  %902 = vst.msk [vmem:[%s1563_s6 + $0x14] sm:$0xf] %vm896_vm2, %v1103_v19  ;;  %v1108_v53 = vpack.c.bf16 %v746_v50, %v746_v50  ;;  %v744_v12 = vmul.f32 %v1323_v24, %v1530_v47  ;;  %1344 = vpow2.f32 %v1063_v49 }
 0x12c   : > { %v1327_v34 = vpop.eup %1326  ;;  %918 = vst.msk [vmem:[%s1563_s6 + $0x54] sm:$0xf] %vm896_vm2, %v1119_v9  ;;  %v1124_v14 = vpack.c.bf16 %v762_v11, %v762_v11  ;;  %v760_v15 = vmul.f32 %v1325_v31, %v1536_v57  ;;  %1346 = vpow2.f32 %v1045_v22 }
 0x12d   : > { %v1329_v54 = vpop.eup %1328  ;;  %907 = vst.msk [vmem:[%s1563_s6 + $0x28] sm:$0xf] %vm896_vm2, %v1108_v53  ;;  %v1106_v40 = vpack.c.bf16 %v744_v12, %v744_v12  ;;  %v747_v17 = vmul.f32 %v1327_v34, %v1549_v5  ;;  %1348 = vpow2.f32 %v1061_v8 }
 0x12e   : > { %v1331_v13 = vpop.eup %1330  ;;  %923 = vst.msk [vmem:[%s1563_s6 + $0x68] sm:$0xf] %vm896_vm2, %v1124_v14  ;;  %v1122_v47 = vpack.c.bf16 %v760_v15, %v760_v15  ;;  %v763_v21 = vmul.f32 %v1329_v54, %v1556_v10 }
 0x12f   : > { %v1333_v59 = vpop.eup %1332  ;;  %905 = vst.msk [vmem:[%s1563_s6 + $0x20] sm:$0xf] %vm896_vm2, %v1106_v40  ;;  %v1109_v57 = vpack.c.bf16 %v747_v17, %v747_v17  ;;  %v745_v23 = vmul.f32 %v1331_v13, %v1568_v25 }
 0x130   : > { %v1335_v27 = vpop.eup %1334  ;;  %921 = vst.msk [vmem:[%s1563_s6 + $0x60] sm:$0xf] %vm896_vm2, %v1122_v47  ;;  %v1125_v5 = vpack.c.bf16 %v763_v21, %v763_v21  ;;  %v761_v26 = vmul.f32 %v1333_v59, %v1572_v18 }
 0x131   : > { %v1337_v28 = vpop.eup %1336  ;;  %908 = vst.msk [vmem:[%s1563_s6 + $0x2c] sm:$0xf] %vm896_vm2, %v1109_v57  ;;  %v1107_v16 = vpack.c.bf16 %v745_v23, %v745_v23  ;;  %v750_v10 = vmul.f32 %v1335_v27, %v1584_v37 }
 0x132   : > { %v1339_v32 = vpop.eup %1338  ;;  %924 = vst.msk [vmem:[%s1563_s6 + $0x6c] sm:$0xf] %vm896_vm2, %v1125_v5  ;;  %v1123_v29 = vpack.c.bf16 %v761_v26, %v761_v26  ;;  %v766_v25 = vmul.f32 %v1337_v28, %v1590_v44 }
 0x133   : > { %v1341_v20 = vpop.eup %1340  ;;  %906 = vst.msk [vmem:[%s1563_s6 + $0x24] sm:$0xf] %vm896_vm2, %v1107_v16  ;;  %v1112_v33 = vpack.c.bf16 %v750_v10, %v750_v10  ;;  %v652_v38 = vadd.f32 1.0, %v1339_v32 }
 0x134   : > { %v1343_v18 = vpop.eup %1342  ;;  %922 = vst.msk [vmem:[%s1563_s6 + $0x64] sm:$0xf] %vm896_vm2, %v1123_v29  ;;  %v1128_v39 = vpack.c.bf16 %v766_v25, %v766_v25  ;;  %v668_v45 = vadd.f32 1.0, %v1341_v20 }
 0x135   : > { %v1345_v36 = vpop.eup %1344  ;;  %911 = vst.msk [vmem:[%s1563_s6 + $0x38] sm:$0xf] %vm896_vm2, %v1112_v33  ;;  %1350 = vrcp.f32 %v652_v38  ;;  %v655_v37 = vadd.f32 1.0, %v1343_v18 }
 0x136   : > { %v1347_v43 = vpop.eup %1346  ;;  %927 = vst.msk [vmem:[%s1563_s6 + $0x78] sm:$0xf] %vm896_vm2, %v1128_v39  ;;  %1352 = vrcp.f32 %v668_v45  ;;  %v671_v44 = vadd.f32 1.0, %v1345_v36 }
 0x137   : > { %v1349_v52 = vpop.eup %1348  ;;  %1354 = vrcp.f32 %v655_v37  ;;  %v653_v55 = vadd.f32 1.0, %v1347_v43 }
 0x138   : > { %1356 = vrcp.f32 %v671_v44  ;;  %v669_v41 = vadd.f32 1.0, %v1349_v52 }
 0x139   : > { %1358 = vrcp.f32 %v653_v55 }
 0x13a   : > { %1360 = vrcp.f32 %v669_v41 }
 0x13f   : > { %v1351_v58 = vpop.eup %1350 }
 0x140   : > { %v1353_v56 = vpop.eup %1352  ;;  %v748_v60 = vmul.f32 %v1351_v58, %v1624_v30 }
 0x141   : > { %v1355_v61 = vpop.eup %1354  ;;  %v764_v0 = vmul.f32 %v1353_v56, %v1628_v35 }
 0x142   : > { %v1357_v62 = vpop.eup %1356  ;;  %v1110_v63 = vpack.c.bf16 %v748_v60, %v748_v60  ;;  %v751_v2 = vmul.f32 %v1355_v61, %v1632_v46 }
 0x143   : > { %v1359_v1 = vpop.eup %1358  ;;  %v1126_v49 = vpack.c.bf16 %v764_v0, %v764_v0  ;;  %v767_v3 = vmul.f32 %v1357_v62, %v1636_v51 }
 0x144   : > { %v1361_v4 = vpop.eup %1360  ;;  %909 = vst.msk [vmem:[%s1563_s6 + $0x30] sm:$0xf] %vm896_vm2, %v1110_v63  ;;  %v1113_v7 = vpack.c.bf16 %v751_v2, %v751_v2  ;;  %v749_v30 = vmul.f32 %v1359_v1, %v1641_v48 }
 0x145   : > { %925 = vst.msk [vmem:[%s1563_s6 + $0x70] sm:$0xf] %vm896_vm2, %v1126_v49  ;;  %v1129_v35 = vpack.c.bf16 %v767_v3, %v767_v3  ;;  %v765_v22 = vmul.f32 %v1361_v4, %v1646_v42 }
 0x146   : > { %912 = vst.msk [vmem:[%s1563_s6 + $0x3c] sm:$0xf] %vm896_vm2, %v1113_v7  ;;  %v1111_v6 = vpack.c.bf16 %v749_v30, %v749_v30 }
 0x147   : > { %928 = vst.msk [vmem:[%s1563_s6 + $0x7c] sm:$0xf] %vm896_vm2, %v1129_v35  ;;  %v1127_v46 = vpack.c.bf16 %v765_v22, %v765_v22 }
 0x148   : > { %910 = vst.msk [vmem:[%s1563_s6 + $0x34] sm:$0xf] %vm896_vm2, %v1111_v6 }
 0x149   : > { %926 = vst.msk [vmem:[%s1563_s6 + $0x74] sm:$0xf] %vm896_vm2, %v1127_v46 }
 0x14a PF: > { %s13_s12 = sadd.s32 1, %s1368_s12  }
 0x14b   : > { %p10_p4 = scmp.ge.s32.totalorder %s13_s12, 4  }
 0x14d   :  { %12 = sbr.rel (!%p10_p4) target bundleno = 1 (0x1), region = 62 }

// kernel: retinanet_forward.31
= control target key start
LH: loop header
LB: loop body
LE: loop exit
PB: predicated region body
PF: predicated region fallthrough
CT: control target
= control target key end

     0   :  { %vm133_vm0 = vcmask 883712   ;;  %vm158_vm1 = vcmask 1045504   ;;  %vm435_vm2 = vcmask 125952   ;;  %s890_s1 = inlined_call_operand.vmem [shape: bf16[108,16], index: 1, kind: input, shape index: {}]   ;;  %s891_s0 = inlined_call_operand.vmem [shape: bf16[128,108], index: 0, kind: input, shape index: {}]   ;;  %s892_s2 = inlined_call_operand.vmem [shape: f32[1,16], index: 2, kind: input, shape index: {}]   ;;  %s893_s3 = inlined_call_operand.vmem [shape: bf16[128,16], index: 3, kind: output, shape index: {}]  }
   0x1   :  { %v589_v0 = vld [vmem:[%s890_s1] sm:$0xff]   ;;  %v590_v1 = vld [vmem:[%s890_s1 + $0x8] sm:$0xff]   ;;  %v591_v2 = vld [vmem:[%s890_s1 + $0x10] sm:$0xff]  }
   0x2   :  { %543 = vmatprep.subr.bf16.mxu0 %v589_v0  ;;  %573 = vmatprep.subr.bf16.mxu1 %v589_v0  ;;  %v592_v3 = vld [vmem:[%s890_s1 + $0x18] sm:$0xff]   ;;  %v596_v4 = vld [vmem:[%s891_s0] sm:$0xff]   ;;  %v594_v7 = vld [vmem:[%s890_s1 + $0x28] sm:$0xff]  }
   0x3   :  { %544 = vmatpush3.bf16.msra.mxu0 %v589_v0  ;;  %580 = vmatpush3.bf16.msra.mxu1 %v589_v0  ;;  %v597_v5 = vld [vmem:[%s891_s0 + $0x20] sm:$0xff]   ;;  %v595_v8 = vld [vmem:[%s890_s1 + $0x30] sm:$0x3f]   ;;  %v598_v10 = vld [vmem:[%s891_s0 + $0x8] sm:$0xff]  }
   0x4   :  { %545 = vmatprep.subr.bf16.mxu0 %v590_v1  ;;  %574 = vmatprep.subr.bf16.mxu1 %v590_v1  ;;  %v593_v6 = vld [vmem:[%s890_s1 + $0x20] sm:$0xff]   ;;  %v160_v9 = vsel %vm158_vm1, %v595_v8, 0  ;;  %v599_v11 = vld [vmem:[%s891_s0 + $0x28] sm:$0xff]   ;;  %v600_v12 = vld [vmem:[%s891_s0 + $0x10] sm:$0xff]  }
   0x5   :  { %557 = vmatprep.mubr.msk.bf16.mxu0 %vm133_vm0, %v596_v4  ;;  %565 = vmatprep.mubr.msk.bf16.mxu1 %vm133_vm0, %v597_v5  ;;  %v601_v13 = vld [vmem:[%s891_s0 + $0x30] sm:$0xff]   ;;  %v602_v14 = vld [vmem:[%s891_s0 + $0x18] sm:$0xff]   ;;  %v744_v16 = vld [vmem:[%s892_s2] ss:$0 sm:$0xff] }
   0x6   :  { %v603_v15 = vld [vmem:[%s891_s0 + $0x38] sm:$0xff]  }
   0x7   :  { %546 = vmatpush3.bf16.msra.mxu0 %v590_v1  ;;  %581 = vmatpush3.bf16.msra.mxu1 %v590_v1 }
   0x8   :  { %547 = vmatprep.subr.bf16.mxu0 %v591_v2  ;;  %575 = vmatprep.subr.bf16.mxu1 %v591_v2 }
   0xb   :  { %548 = vmatpush3.bf16.msra.mxu0 %v591_v2  ;;  %582 = vmatpush3.bf16.msra.mxu1 %v591_v2 }
   0xc   :  { %549 = vmatprep.subr.bf16.mxu0 %v592_v3  ;;  %576 = vmatprep.subr.bf16.mxu1 %v592_v3 }
   0xf   :  { %550 = vmatpush3.bf16.msra.mxu0 %v592_v3  ;;  %583 = vmatpush3.bf16.msra.mxu1 %v592_v3 }
  0x10   :  { %551 = vmatprep.subr.bf16.mxu0 %v593_v6  ;;  %577 = vmatprep.subr.bf16.mxu1 %v593_v6 }
  0x13   :  { %552 = vmatpush3.bf16.msra.mxu0 %v593_v6  ;;  %584 = vmatpush3.bf16.msra.mxu1 %v593_v6 }
  0x14   :  { %553 = vmatprep.subr.bf16.mxu0 %v594_v7  ;;  %578 = vmatprep.subr.bf16.mxu1 %v594_v7 }
  0x17   :  { %554 = vmatpush3.bf16.msra.mxu0 %v594_v7  ;;  %585 = vmatpush3.bf16.msra.mxu1 %v594_v7 }
  0x18   :  { %587 = vmatprep.subr.msk.bf16.mxu0 %vm158_vm1, %v595_v8  ;;  %588 = vmatprep.subr.msk.bf16.mxu1 %vm158_vm1, %v595_v8 }
  0x1b   :  { %556 = vmatpush3.bf16.msra.mxu0 %v160_v9  ;;  %586 = vmatpush3.bf16.msra.mxu1 %v160_v9 }
  0x1e   :  { %558 = vmatmul.mubr.msk.bf16.vlgmr.msra.gmra.mrb[0].mxu0 %vm133_vm0, %v598_v10  ;;  %566 = vmatmul.mubr.msk.bf16.vlgmr.msra.gmra.mrb[0].mxu1 %vm133_vm0, %v599_v11 }
  0x1f   :  { %561 = vmatprep.mubr.msk.bf16.mxu0 %vm133_vm0, %v600_v12  ;;  %569 = vmatprep.mubr.msk.bf16.mxu1 %vm133_vm0, %v601_v13 }
  0x26   :  { %562 = vmatmul.mubr.msk.bf16.gmra.mrb[4].mxu0 %vm133_vm0, %v602_v14  ;;  %570 = vmatmul.mubr.msk.bf16.gmra.mrb[4].mxu1 %vm133_vm0, %v603_v15 }
  0xf1   :  { %v559_v17 = vpop.f32.mrb[0].mxu0  ;;  %v567_v18 = vpop.f32.mrb[0].mxu1 }
  0xf2   :  { %v747_v19 = vadd.f32 %v559_v17, %v744_v16  ;;  %v750_v20 = vadd.f32 %v567_v18, %v744_v16  ;;  %v196_v21 = vpop.f32.mrb[1].mxu0  ;;  %v228_v22 = vpop.f32.mrb[1].mxu1 }
  0xf3   :  { %v753_v23 = vadd.f32 %v744_v16, %v196_v21  ;;  %v756_v24 = vadd.f32 %v744_v16, %v228_v22  ;;  %v560_v25 = vpop.f32.mrb[2].mxu0  ;;  %v568_v26 = vpop.f32.mrb[2].mxu1 }
  0xf4   :  { %v482_v27 = vmul.f32 -1.442695, %v747_v19  ;;  %v490_v28 = vmul.f32 -1.442695, %v750_v20  ;;  %v761_v29 = vadd.f32 %v560_v25, %v744_v16  ;;  %v764_v30 = vadd.f32 %v568_v26, %v744_v16  ;;  %v199_v31 = vpop.f32.mrb[3].mxu0  ;;  %v231_v32 = vpop.f32.mrb[3].mxu1 }
  0xf5   :  { %v480_v33 = vmul.f32 -1.442695, %v753_v23  ;;  %v488_v34 = vmul.f32 -1.442695, %v756_v24  ;;  %v769_v35 = vadd.f32 %v744_v16, %v199_v31  ;;  %v772_v36 = vadd.f32 %v744_v16, %v231_v32 }
  0xf6   :  { %604 = vpow2.f32 %v482_v27  ;;  %v483_v37 = vmul.f32 -1.442695, %v761_v29  ;;  %v491_v38 = vmul.f32 -1.442695, %v764_v30 }
  0xf7   :  { %606 = vpow2.f32 %v490_v28  ;;  %v481_v39 = vmul.f32 -1.442695, %v769_v35  ;;  %v489_v40 = vmul.f32 -1.442695, %v772_v36 }
  0xf8   :  { %608 = vpow2.f32 %v480_v33 }
  0xf9   :  { %610 = vpow2.f32 %v488_v34  ;;  %v563_v41 = vpop.f32.mrb[4].mxu0  ;;  %v571_v42 = vpop.f32.mrb[4].mxu1 }
  0xfa   :  { %612 = vpow2.f32 %v483_v37  ;;  %v779_v43 = vadd.f32 %v563_v41, %v744_v16  ;;  %v782_v44 = vadd.f32 %v571_v42, %v744_v16  ;;  %v212_v45 = vpop.f32.mrb[5].mxu0  ;;  %v244_v46 = vpop.f32.mrb[5].mxu1 }
  0xfb   :  { %614 = vpow2.f32 %v491_v38  ;;  %v785_v47 = vadd.f32 %v744_v16, %v212_v45  ;;  %v788_v48 = vadd.f32 %v744_v16, %v244_v46  ;;  %v564_v49 = vpop.f32.mrb[6].mxu0  ;;  %v572_v50 = vpop.f32.mrb[6].mxu1 }
  0xfc   :  { %616 = vpow2.f32 %v481_v39  ;;  %v486_v51 = vmul.f32 -1.442695, %v779_v43  ;;  %v494_v52 = vmul.f32 -1.442695, %v782_v44  ;;  %v793_v53 = vadd.f32 %v564_v49, %v744_v16  ;;  %v215_v54 = vpop.f32.mrb[7].mxu0  ;;  %v247_v55 = vpop.f32.mrb[7].mxu1 }
  0xfd   :  { %618 = vpow2.f32 %v489_v40  ;;  %v484_v56 = vmul.f32 -1.442695, %v785_v47  ;;  %v492_v57 = vmul.f32 -1.442695, %v788_v48  ;;  %v799_v12 = vadd.f32 %v572_v50, %v744_v16 }
  0xfe   :  { %620 = vpow2.f32 %v486_v51  ;;  %v487_v58 = vmul.f32 -1.442695, %v793_v53  ;;  %v802_v15 = vadd.f32 %v744_v16, %v215_v54  ;;  %v805_v21 = vadd.f32 %v744_v16, %v247_v55 }
  0xff   :  { %622 = vpow2.f32 %v494_v52  ;;  %v495_v28 = vmul.f32 -1.442695, %v799_v12 }
 0x100   :  { %v605_v59 = vpop.eup %604  ;;  %624 = vpow2.f32 %v484_v56  ;;  %v485_v33 = vmul.f32 -1.442695, %v802_v15  ;;  %v493_v16 = vmul.f32 -1.442695, %v805_v21 }
 0x101   :  { %v607_v60 = vpop.eup %606  ;;  %v309_v61 = vadd.f32 1.0, %v605_v59  ;;  %626 = vpow2.f32 %v492_v57 }
 0x102   :  { %v609_v62 = vpop.eup %608  ;;  %v317_v63 = vadd.f32 1.0, %v607_v60  ;;  %628 = vpow2.f32 %v487_v58 }
 0x103   :  { %v611_v0 = vpop.eup %610  ;;  %630 = vrcp.f32 %v309_v61  ;;  %v307_v1 = vadd.f32 1.0, %v609_v62 }
 0x104   :  { %v613_v2 = vpop.eup %612  ;;  %632 = vrcp.f32 %v317_v63  ;;  %v315_v3 = vadd.f32 1.0, %v611_v0 }
 0x105   :  { %v615_v4 = vpop.eup %614  ;;  %634 = vrcp.f32 %v307_v1  ;;  %v310_v5 = vadd.f32 1.0, %v613_v2 }
 0x106   :  { %v617_v6 = vpop.eup %616  ;;  %636 = vrcp.f32 %v315_v3  ;;  %v318_v7 = vadd.f32 1.0, %v615_v4 }
 0x107   :  { %v619_v8 = vpop.eup %618  ;;  %638 = vrcp.f32 %v310_v5  ;;  %v308_v9 = vadd.f32 1.0, %v617_v6 }
 0x108   :  { %v621_v10 = vpop.eup %620  ;;  %640 = vrcp.f32 %v318_v7  ;;  %v316_v11 = vadd.f32 1.0, %v619_v8 }
 0x109   :  { %v623_v13 = vpop.eup %622  ;;  %642 = vrcp.f32 %v308_v9  ;;  %v313_v14 = vadd.f32 1.0, %v621_v10 }
 0x10a   :  { %v625_v17 = vpop.eup %624  ;;  %644 = vrcp.f32 %v316_v11  ;;  %v321_v18 = vadd.f32 1.0, %v623_v13 }
 0x10b   :  { %v627_v22 = vpop.eup %626  ;;  %646 = vrcp.f32 %v313_v14  ;;  %v311_v25 = vadd.f32 1.0, %v625_v17 }
 0x10c   :  { %v629_v26 = vpop.eup %628  ;;  %648 = vrcp.f32 %v321_v18  ;;  %v319_v27 = vadd.f32 1.0, %v627_v22 }
 0x10d   :  { %v631_v31 = vpop.eup %630  ;;  %650 = vrcp.f32 %v311_v25  ;;  %v314_v32 = vadd.f32 1.0, %v629_v26 }
 0x10e   :  { %v633_v34 = vpop.eup %632  ;;  %v357_v37 = vmul.f32 %v631_v31, %v747_v19  ;;  %652 = vrcp.f32 %v319_v27 }
 0x10f   :  { %v635_v38 = vpop.eup %634  ;;  %v365_v39 = vmul.f32 %v633_v34, %v750_v20  ;;  %654 = vrcp.f32 %v314_v32 }
 0x110   :  { %v637_v40 = vpop.eup %636  ;;  %v514_v41 = vpack.c.bf16 %v357_v37, %v357_v37  ;;  %v355_v42 = vmul.f32 %v635_v38, %v753_v23  ;;  %656 = vpow2.f32 %v495_v28 }
 0x111   :  { %v639_v45 = vpop.eup %638  ;;  %v522_v46 = vpack.c.bf16 %v365_v39, %v365_v39  ;;  %v363_v49 = vmul.f32 %v637_v40, %v756_v24  ;;  %658 = vpow2.f32 %v485_v33 }
 0x112   :  { %v641_v50 = vpop.eup %640  ;;  %438 = vst.msk [vmem:[%s893_s3 + $0x8] sm:$0xf] %vm435_vm2, %v514_v41  ;;  %v512_v19 = vpack.c.bf16 %v355_v42, %v355_v42  ;;  %v358_v20 = vmul.f32 %v639_v45, %v761_v29  ;;  %660 = vpow2.f32 %v493_v16 }
 0x113   :  { %v643_v51 = vpop.eup %642  ;;  %446 = vst.msk [vmem:[%s893_s3 + $0x28] sm:$0xf] %vm435_vm2, %v522_v46  ;;  %v520_v23 = vpack.c.bf16 %v363_v49, %v363_v49  ;;  %v366_v24 = vmul.f32 %v641_v50, %v764_v30 }
 0x114   :  { %v645_v52 = vpop.eup %644  ;;  %436 = vst.msk [vmem:[%s893_s3] sm:$0xf] %vm435_vm2, %v512_v19  ;;  %v515_v54 = vpack.c.bf16 %v358_v20, %v358_v20  ;;  %v356_v55 = vmul.f32 %v643_v51, %v769_v35 }
 0x115   :  { %v647_v29 = vpop.eup %646  ;;  %444 = vst.msk [vmem:[%s893_s3 + $0x20] sm:$0xf] %vm435_vm2, %v520_v23  ;;  %v523_v56 = vpack.c.bf16 %v366_v24, %v366_v24  ;;  %v364_v57 = vmul.f32 %v645_v52, %v772_v36 }
 0x116   :  { %v649_v58 = vpop.eup %648  ;;  %439 = vst.msk [vmem:[%s893_s3 + $0xc] sm:$0xf] %vm435_vm2, %v515_v54  ;;  %v513_v30 = vpack.c.bf16 %v356_v55, %v356_v55  ;;  %v361_v59 = vmul.f32 %v647_v29, %v779_v43 }
 0x117   :  { %v651_v60 = vpop.eup %650  ;;  %447 = vst.msk [vmem:[%s893_s3 + $0x2c] sm:$0xf] %vm435_vm2, %v523_v56  ;;  %v521_v35 = vpack.c.bf16 %v364_v57, %v364_v57  ;;  %v369_v61 = vmul.f32 %v649_v58, %v782_v44 }
 0x118   :  { %v653_v62 = vpop.eup %652  ;;  %437 = vst.msk [vmem:[%s893_s3 + $0x4] sm:$0xf] %vm435_vm2, %v513_v30  ;;  %v518_v36 = vpack.c.bf16 %v361_v59, %v361_v59  ;;  %v359_v63 = vmul.f32 %v651_v60, %v785_v47 }
 0x119   :  { %v655_v0 = vpop.eup %654  ;;  %445 = vst.msk [vmem:[%s893_s3 + $0x24] sm:$0xf] %vm435_vm2, %v521_v35  ;;  %v526_v43 = vpack.c.bf16 %v369_v61, %v369_v61  ;;  %v367_v1 = vmul.f32 %v653_v62, %v788_v48 }
 0x11a   :  { %v657_v2 = vpop.eup %656  ;;  %442 = vst.msk [vmem:[%s893_s3 + $0x18] sm:$0xf] %vm435_vm2, %v518_v36  ;;  %v516_v44 = vpack.c.bf16 %v359_v63, %v359_v63  ;;  %v362_v3 = vmul.f32 %v655_v0, %v793_v53 }
 0x11b   :  { %v659_v4 = vpop.eup %658  ;;  %450 = vst.msk [vmem:[%s893_s3 + $0x38] sm:$0xf] %vm435_vm2, %v526_v43  ;;  %v524_v47 = vpack.c.bf16 %v367_v1, %v367_v1  ;;  %v322_v5 = vadd.f32 1.0, %v657_v2 }
 0x11c   :  { %v661_v6 = vpop.eup %660  ;;  %440 = vst.msk [vmem:[%s893_s3 + $0x10] sm:$0xf] %vm435_vm2, %v516_v44  ;;  %v519_v48 = vpack.c.bf16 %v362_v3, %v362_v3  ;;  %v312_v7 = vadd.f32 1.0, %v659_v4 }
 0x11d   :  { %448 = vst.msk [vmem:[%s893_s3 + $0x30] sm:$0xf] %vm435_vm2, %v524_v47  ;;  %662 = vrcp.f32 %v322_v5  ;;  %v320_v53 = vadd.f32 1.0, %v661_v6 }
 0x11e   :  { %443 = vst.msk [vmem:[%s893_s3 + $0x1c] sm:$0xf] %vm435_vm2, %v519_v48  ;;  %664 = vrcp.f32 %v312_v7 }
 0x11f   :  { %666 = vrcp.f32 %v320_v53 }
 0x127   :  { %v663_v8 = vpop.eup %662 }
 0x128   :  { %v665_v9 = vpop.eup %664  ;;  %v370_v10 = vmul.f32 %v663_v8, %v799_v12 }
 0x129   :  { %v667_v11 = vpop.eup %666  ;;  %v360_v13 = vmul.f32 %v665_v9, %v802_v15 }
 0x12a   :  { %v527_v14 = vpack.c.bf16 %v370_v10, %v370_v10  ;;  %v368_v17 = vmul.f32 %v667_v11, %v805_v21 }
 0x12b   :  { %v517_v18 = vpack.c.bf16 %v360_v13, %v360_v13 }
 0x12c   :  { %451 = vst.msk [vmem:[%s893_s3 + $0x3c] sm:$0xf] %vm435_vm2, %v527_v14  ;;  %v525_v22 = vpack.c.bf16 %v368_v17, %v368_v17 }
 0x12d   :  { %441 = vst.msk [vmem:[%s893_s3 + $0x14] sm:$0xf] %vm435_vm2, %v517_v18 }
 0x12e   :  { %449 = vst.msk [vmem:[%s893_s3 + $0x34] sm:$0xf] %vm435_vm2, %v525_v22 }

// kernel: retinanet_forward.32
= control target key start
LH: loop header
LB: loop body
LE: loop exit
PB: predicated region body
PF: predicated region fallthrough
CT: control target
= control target key end

     0   :  { %v303_v0 = vmov 0   ;;  %vm116_vm0 = vcmask 130048   ;;  %vm216_vm1 = vcmask 191488   ;;  %s378_s1 = inlined_call_operand.vmem [shape: bf16[144,24], index: 1, kind: input, shape index: {}]   ;;  %s379_s0 = inlined_call_operand.vmem [shape: bf16[32,144], index: 0, kind: input, shape index: {}]   ;;  %s380_s2 = inlined_call_operand.vmem [shape: f32[1,24], index: 2, kind: input, shape index: {}]   ;;  %s381_s3 = inlined_call_operand.vmem [shape: bf16[32,24], index: 3, kind: output, shape index: {}]  }
   0x1   :  { %123 = vmatprep.subr.bf16.mxu0 %v303_v0  ;;  %253 = vmatprep.subr.bf16.mxu1 %v303_v0  ;;  %v272_v1 = vld [vmem:[%s378_s1] sm:$0xff]   ;;  %v273_v2 = vld [vmem:[%s378_s1 + $0x8] sm:$0xff]   ;;  %v274_v3 = vld [vmem:[%s378_s1 + $0x10] sm:$0xff]  }
   0x2   :  { %124 = vmatpush1.bf16.msra.mxu0 %v272_v1  ;;  %262 = vmatpush1.bf16.msra.mxu1 %v272_v1  ;;  %v275_v4 = vld [vmem:[%s378_s1 + $0x18] sm:$0xff]   ;;  %v283_v5 = vld [vmem:[%s379_s0 + $0x4] ss:$8 sps:$4 sm:$0xff]   ;;  %v278_v9 = vld [vmem:[%s378_s1 + $0x30] sm:$0xff]  }
   0x3   :  { %125 = vmatprep.subr.bf16.mxu0 %v303_v0  ;;  %254 = vmatprep.subr.bf16.mxu1 %v303_v0  ;;  %v286_v6 = vld [vmem:[%s379_s0 + $0x14] ss:$8 sps:$4 sm:$0xff]   ;;  %v276_v7 = vld [vmem:[%s378_s1 + $0x20] sm:$0xff]   ;;  %v277_v8 = vld [vmem:[%s378_s1 + $0x28] sm:$0xff]  }
   0x4   :  { %239 = vmatprep.mubr.msk.bf16.mxu0 %vm116_vm0, %v283_v5  ;;  %240 = vmatprep.mubr.msk.bf16.mxu1 %vm116_vm0, %v286_v6  ;;  %v279_v10 = vld [vmem:[%s378_s1 + $0x38] sm:$0xff]   ;;  %v280_v11 = vld [vmem:[%s378_s1 + $0x40] sm:$0xff]  }
   0x5   :  { %v281_v12 = vld [vmem:[%s379_s0] ss:$8 sps:$4 sm:$0xff]   ;;  %v284_v13 = vld [vmem:[%s379_s0 + $0x10] ss:$8 sps:$4 sm:$0xff]  }
   0x6   :  { %126 = vmatpush1.bf16.msra.mxu0 %v273_v2  ;;  %263 = vmatpush1.bf16.msra.mxu1 %v273_v2  ;;  %v225_v14 = vld [vmem:[%s380_s2] ss:$0 sm:$0xff] }
   0x7   :  { %127 = vmatprep.subr.bf16.mxu0 %v303_v0  ;;  %255 = vmatprep.subr.bf16.mxu1 %v303_v0 }
   0xa   :  { %128 = vmatpush1.bf16.msra.mxu0 %v274_v3  ;;  %264 = vmatpush1.bf16.msra.mxu1 %v274_v3 }
   0xb   :  { %129 = vmatprep.subr.bf16.mxu0 %v303_v0  ;;  %256 = vmatprep.subr.bf16.mxu1 %v303_v0 }
   0xe   :  { %130 = vmatpush1.bf16.msra.mxu0 %v275_v4  ;;  %265 = vmatpush1.bf16.msra.mxu1 %v275_v4 }
   0xf   :  { %131 = vmatprep.subr.bf16.mxu0 %v303_v0  ;;  %257 = vmatprep.subr.bf16.mxu1 %v303_v0 }
  0x12   :  { %132 = vmatpush1.bf16.msra.mxu0 %v276_v7  ;;  %266 = vmatpush1.bf16.msra.mxu1 %v276_v7 }
  0x13   :  { %133 = vmatprep.subr.bf16.mxu0 %v303_v0  ;;  %258 = vmatprep.subr.bf16.mxu1 %v303_v0 }
  0x16   :  { %134 = vmatpush1.bf16.msra.mxu0 %v277_v8  ;;  %267 = vmatpush1.bf16.msra.mxu1 %v277_v8 }
  0x17   :  { %135 = vmatprep.subr.bf16.mxu0 %v303_v0  ;;  %259 = vmatprep.subr.bf16.mxu1 %v303_v0 }
  0x1a   :  { %136 = vmatpush1.bf16.msra.mxu0 %v278_v9  ;;  %268 = vmatpush1.bf16.msra.mxu1 %v278_v9 }
  0x1b   :  { %137 = vmatprep.subr.bf16.mxu0 %v303_v0  ;;  %260 = vmatprep.subr.bf16.mxu1 %v303_v0 }
  0x1e   :  { %138 = vmatpush1.bf16.msra.mxu0 %v279_v10  ;;  %269 = vmatpush1.bf16.msra.mxu1 %v279_v10 }
  0x1f   :  { %139 = vmatprep.subr.bf16.mxu0 %v303_v0  ;;  %261 = vmatprep.subr.bf16.mxu1 %v303_v0 }
  0x22   :  { %140 = vmatpush1.bf16.msra.mxu0 %v280_v11  ;;  %270 = vmatpush1.bf16.msra.mxu1 %v280_v11 }
  0x25   :  { %156 = vmatmul.mubr.bf16.vlgmr.msra.gmra.mrb[0].mxu0 %v281_v12  ;;  %164 = vmatmul.mubr.bf16.vlgmr.msra.gmra.mrb[0].mxu1 %v284_v13 }
  0xf8   :  { %v157_v15 = vpop.f32.mrb[0].mxu0  ;;  %v165_v16 = vpop.f32.mrb[0].mxu1 }
  0xf9   :  { %v158_v17 = vadd.f32 %v225_v14, %v157_v15  ;;  %v166_v18 = vadd.f32 %v225_v14, %v165_v16  ;;  %v159_v19 = vpop.f32.mrb[1].mxu0  ;;  %v167_v20 = vpop.f32.mrb[1].mxu1 }
  0xfa   :  { %v160_v21 = vpop.f32.mrb[2].mxu0  ;;  %v168_v22 = vpop.f32.mrb[2].mxu1 }
  0xfb   :  { %v241_v23 = vmul.f32 -1.442695, %v158_v17  ;;  %v243_v24 = vmul.f32 -1.442695, %v166_v18  ;;  %v161_v25 = vadd.f32 %v225_v14, %v160_v21  ;;  %v169_v26 = vadd.f32 %v225_v14, %v168_v22  ;;  %v162_v27 = vpop.f32.mrb[3].mxu0  ;;  %v170_v28 = vpop.f32.mrb[3].mxu1 }
  0xfd   :  { %287 = vpow2.f32 %v241_v23  ;;  %v242_v29 = vmul.f32 -1.442695, %v161_v25  ;;  %v244_v30 = vmul.f32 -1.442695, %v169_v26 }
  0xfe   :  { %289 = vpow2.f32 %v243_v24 }
  0xff   :  { %291 = vpow2.f32 %v242_v29 }
 0x100   :  { %293 = vpow2.f32 %v244_v30 }
 0x107   :  { %v288_v31 = vpop.eup %287 }
 0x108   :  { %v290_v32 = vpop.eup %289  ;;  %v184_v33 = vadd.f32 1.0, %v288_v31 }
 0x109   :  { %v292_v34 = vpop.eup %291  ;;  %v186_v35 = vadd.f32 1.0, %v290_v32 }
 0x10a   :  { %v294_v36 = vpop.eup %293  ;;  %295 = vrcp.f32 %v184_v33  ;;  %v185_v37 = vadd.f32 1.0, %v292_v34 }
 0x10b   :  { %297 = vrcp.f32 %v186_v35  ;;  %v187_v38 = vadd.f32 1.0, %v294_v36 }
 0x10c   :  { %299 = vrcp.f32 %v185_v37 }
 0x10d   :  { %301 = vrcp.f32 %v187_v38 }
 0x114   :  { %v296_v39 = vpop.eup %295 }
 0x115   :  { %v298_v40 = vpop.eup %297  ;;  %v196_v41 = vmul.f32 %v296_v39, %v158_v17 }
 0x116   :  { %v300_v42 = vpop.eup %299  ;;  %v198_v43 = vmul.f32 %v298_v40, %v166_v18 }
 0x117   :  { %v302_v44 = vpop.eup %301  ;;  %v249_v45 = vpack.c.bf16 %v196_v41, %v196_v41  ;;  %v197_v46 = vmul.f32 %v300_v42, %v161_v25 }
 0x118   :  { %v251_v47 = vpack.c.bf16 %v198_v43, %v198_v43  ;;  %v199_v48 = vmul.f32 %v302_v44, %v169_v26 }
 0x119   :  { %217 = vst.msk [vmem:[%s381_s3] sm:$0xf] %vm216_vm1, %v249_v45  ;;  %v250_v49 = vpack.c.bf16 %v197_v46, %v197_v46 }
 0x11a   :  { %219 = vst.msk [vmem:[%s381_s3 + $0x8] sm:$0xf] %vm216_vm1, %v251_v47  ;;  %v252_v50 = vpack.c.bf16 %v199_v48, %v199_v48 }
 0x11b   :  { %218 = vst.msk [vmem:[%s381_s3 + $0x4] sm:$0xf] %vm216_vm1, %v250_v49 }
 0x11c   :  { %220 = vst.msk [vmem:[%s381_s3 + $0xc] sm:$0xf] %vm216_vm1, %v252_v50 }

// kernel: retinanet_forward.33
= control target key start
LH: loop header
LB: loop body
LE: loop exit
PB: predicated region body
PF: predicated region fallthrough
CT: control target
= control target key end

     0   :  { %v363_v0 = vmov 0   ;;  %vm152_vm0 = vcmask 719872   ;;  %vm159_vm1 = vcmask 1043456   ;;  %vm256_vm2 = vcmask 257024   ;;  %s481_s1 = inlined_call_operand.vmem [shape: bf16[216,32], index: 1, kind: input, shape index: {}]   ;;  %s482_s0 = inlined_call_operand.vmem [shape: bf16[32,216], index: 0, kind: input, shape index: {}]   ;;  %s483_s2 = inlined_call_operand.vmem [shape: f32[1,32], index: 2, kind: input, shape index: {}]   ;;  %s484_s3 = inlined_call_operand.vmem [shape: bf16[32,32], index: 3, kind: output, shape index: {}]  }
   0x1   :  { %163 = vmatprep.subr.bf16.mxu0 %v363_v0  ;;  %298 = vmatprep.subr.bf16.mxu1 %v363_v0  ;;  %v327_v1 = vld [vmem:[%s481_s1] sm:$0xff]   ;;  %v328_v2 = vld [vmem:[%s481_s1 + $0x8] sm:$0xff]   ;;  %v329_v3 = vld [vmem:[%s481_s1 + $0x10] sm:$0xff]  }
   0x2   :  { %164 = vmatpush1.bf16.msra.mxu0 %v327_v1  ;;  %312 = vmatpush1.bf16.msra.mxu1 %v327_v1  ;;  %v330_v4 = vld [vmem:[%s481_s1 + $0x18] sm:$0xff]   ;;  %v331_v5 = vld [vmem:[%s481_s1 + $0x20] sm:$0xff]   ;;  %v332_v8 = vld [vmem:[%s481_s1 + $0x28] sm:$0xff]  }
   0x3   :  { %165 = vmatprep.subr.bf16.mxu0 %v363_v0  ;;  %299 = vmatprep.subr.bf16.mxu1 %v363_v0  ;;  %v343_v6 = vld [vmem:[%s482_s0 + $0x4] ss:$8 sps:$4 sm:$0xff]   ;;  %v346_v7 = vld [vmem:[%s482_s0 + $0x14] ss:$8 sps:$4 sm:$0xff]   ;;  %v340_v16 = vld [vmem:[%s481_s1 + $0x68] ss:$0 sps:$4 sm:$0xff]  }
   0x4   :  { %284 = vmatprep.mubr.msk.bf16.mxu0 %vm152_vm0, %v343_v6  ;;  %285 = vmatprep.mubr.msk.bf16.mxu1 %vm152_vm0, %v346_v7  ;;  %v333_v9 = vld [vmem:[%s481_s1 + $0x30] sm:$0xff]   ;;  %v334_v10 = vld [vmem:[%s481_s1 + $0x38] sm:$0xff]   ;;  %v335_v11 = vld [vmem:[%s481_s1 + $0x40] sm:$0xff]   ;;  %v161_v17 = vsel %vm159_vm1, %v340_v16, 0 }
   0x5   :  { %v336_v12 = vld [vmem:[%s481_s1 + $0x48] sm:$0xff]   ;;  %v337_v13 = vld [vmem:[%s481_s1 + $0x50] sm:$0xff]   ;;  %v338_v14 = vld [vmem:[%s481_s1 + $0x58] sm:$0xff]  }
   0x6   :  { %166 = vmatpush1.bf16.msra.mxu0 %v328_v2  ;;  %313 = vmatpush1.bf16.msra.mxu1 %v328_v2  ;;  %v339_v15 = vld [vmem:[%s481_s1 + $0x60] sm:$0xff]   ;;  %v344_v19 = vld [vmem:[%s482_s0 + $0x10] ss:$8 sps:$4 sm:$0xff]  }
   0x7   :  { %167 = vmatprep.subr.bf16.mxu0 %v363_v0  ;;  %300 = vmatprep.subr.bf16.mxu1 %v363_v0  ;;  %v341_v18 = vld [vmem:[%s482_s0] ss:$8 sps:$4 sm:$0xff]  }
   0x8   :  { %v265_v20 = vld [vmem:[%s483_s2] ss:$0 sm:$0xff] }
   0xa   :  { %168 = vmatpush1.bf16.msra.mxu0 %v329_v3  ;;  %314 = vmatpush1.bf16.msra.mxu1 %v329_v3 }
   0xb   :  { %169 = vmatprep.subr.bf16.mxu0 %v363_v0  ;;  %301 = vmatprep.subr.bf16.mxu1 %v363_v0 }
   0xe   :  { %170 = vmatpush1.bf16.msra.mxu0 %v330_v4  ;;  %315 = vmatpush1.bf16.msra.mxu1 %v330_v4 }
   0xf   :  { %171 = vmatprep.subr.bf16.mxu0 %v363_v0  ;;  %302 = vmatprep.subr.bf16.mxu1 %v363_v0 }
  0x12   :  { %172 = vmatpush1.bf16.msra.mxu0 %v331_v5  ;;  %316 = vmatpush1.bf16.msra.mxu1 %v331_v5 }
  0x13   :  { %173 = vmatprep.subr.bf16.mxu0 %v363_v0  ;;  %303 = vmatprep.subr.bf16.mxu1 %v363_v0 }
  0x16   :  { %174 = vmatpush1.bf16.msra.mxu0 %v332_v8  ;;  %317 = vmatpush1.bf16.msra.mxu1 %v332_v8 }
  0x17   :  { %175 = vmatprep.subr.bf16.mxu0 %v363_v0  ;;  %304 = vmatprep.subr.bf16.mxu1 %v363_v0 }
  0x1a   :  { %176 = vmatpush1.bf16.msra.mxu0 %v333_v9  ;;  %318 = vmatpush1.bf16.msra.mxu1 %v333_v9 }
  0x1b   :  { %177 = vmatprep.subr.bf16.mxu0 %v363_v0  ;;  %305 = vmatprep.subr.bf16.mxu1 %v363_v0 }
  0x1e   :  { %178 = vmatpush1.bf16.msra.mxu0 %v334_v10  ;;  %319 = vmatpush1.bf16.msra.mxu1 %v334_v10 }
  0x1f   :  { %179 = vmatprep.subr.bf16.mxu0 %v363_v0  ;;  %306 = vmatprep.subr.bf16.mxu1 %v363_v0 }
  0x22   :  { %180 = vmatpush1.bf16.msra.mxu0 %v335_v11  ;;  %320 = vmatpush1.bf16.msra.mxu1 %v335_v11 }
  0x23   :  { %181 = vmatprep.subr.bf16.mxu0 %v363_v0  ;;  %307 = vmatprep.subr.bf16.mxu1 %v363_v0 }
  0x26   :  { %182 = vmatpush1.bf16.msra.mxu0 %v336_v12  ;;  %321 = vmatpush1.bf16.msra.mxu1 %v336_v12 }
  0x27   :  { %183 = vmatprep.subr.bf16.mxu0 %v363_v0  ;;  %308 = vmatprep.subr.bf16.mxu1 %v363_v0 }
  0x2a   :  { %184 = vmatpush1.bf16.msra.mxu0 %v337_v13  ;;  %322 = vmatpush1.bf16.msra.mxu1 %v337_v13 }
  0x2b   :  { %185 = vmatprep.subr.bf16.mxu0 %v363_v0  ;;  %309 = vmatprep.subr.bf16.mxu1 %v363_v0 }
  0x2e   :  { %186 = vmatpush1.bf16.msra.mxu0 %v338_v14  ;;  %323 = vmatpush1.bf16.msra.mxu1 %v338_v14 }
  0x2f   :  { %187 = vmatprep.subr.bf16.mxu0 %v363_v0  ;;  %310 = vmatprep.subr.bf16.mxu1 %v363_v0 }
  0x32   :  { %188 = vmatpush1.bf16.msra.mxu0 %v339_v15  ;;  %324 = vmatpush1.bf16.msra.mxu1 %v339_v15 }
  0x33   :  { %189 = vmatprep.subr.bf16.mxu0 %v363_v0  ;;  %311 = vmatprep.subr.bf16.mxu1 %v363_v0 }
  0x36   :  { %190 = vmatpush1.bf16.msra.mxu0 %v161_v17  ;;  %325 = vmatpush1.bf16.msra.mxu1 %v161_v17 }
  0x39   :  { %196 = vmatmul.mubr.bf16.vlgmr.msra.gmra.mrb[0].mxu0 %v341_v18  ;;  %204 = vmatmul.mubr.bf16.vlgmr.msra.gmra.mrb[0].mxu1 %v344_v19 }
 0x10c   :  { %v197_v21 = vpop.f32.mrb[0].mxu0  ;;  %v205_v22 = vpop.f32.mrb[0].mxu1 }
 0x10d   :  { %v198_v23 = vadd.f32 %v265_v20, %v197_v21  ;;  %v206_v24 = vadd.f32 %v265_v20, %v205_v22  ;;  %v199_v25 = vpop.f32.mrb[1].mxu0  ;;  %v207_v26 = vpop.f32.mrb[1].mxu1 }
 0x10e   :  { %v200_v27 = vpop.f32.mrb[2].mxu0  ;;  %v208_v28 = vpop.f32.mrb[2].mxu1 }
 0x10f   :  { %v286_v29 = vmul.f32 -1.442695, %v198_v23  ;;  %v288_v30 = vmul.f32 -1.442695, %v206_v24  ;;  %v201_v31 = vadd.f32 %v265_v20, %v200_v27  ;;  %v209_v32 = vadd.f32 %v265_v20, %v208_v28  ;;  %v202_v33 = vpop.f32.mrb[3].mxu0  ;;  %v210_v34 = vpop.f32.mrb[3].mxu1 }
 0x111   :  { %347 = vpow2.f32 %v286_v29  ;;  %v287_v35 = vmul.f32 -1.442695, %v201_v31  ;;  %v289_v36 = vmul.f32 -1.442695, %v209_v32 }
 0x112   :  { %349 = vpow2.f32 %v288_v30 }
 0x113   :  { %351 = vpow2.f32 %v287_v35 }
 0x114   :  { %353 = vpow2.f32 %v289_v36 }
 0x11b   :  { %v348_v37 = vpop.eup %347 }
 0x11c   :  { %v350_v38 = vpop.eup %349  ;;  %v224_v39 = vadd.f32 1.0, %v348_v37 }
 0x11d   :  { %v352_v40 = vpop.eup %351  ;;  %v226_v41 = vadd.f32 1.0, %v350_v38 }
 0x11e   :  { %v354_v42 = vpop.eup %353  ;;  %355 = vrcp.f32 %v224_v39  ;;  %v225_v43 = vadd.f32 1.0, %v352_v40 }
 0x11f   :  { %357 = vrcp.f32 %v226_v41  ;;  %v227_v44 = vadd.f32 1.0, %v354_v42 }
 0x120   :  { %359 = vrcp.f32 %v225_v43 }
 0x121   :  { %361 = vrcp.f32 %v227_v44 }
 0x128   :  { %v356_v45 = vpop.eup %355 }
 0x129   :  { %v358_v46 = vpop.eup %357  ;;  %v236_v47 = vmul.f32 %v356_v45, %v198_v23 }
 0x12a   :  { %v360_v48 = vpop.eup %359  ;;  %v238_v49 = vmul.f32 %v358_v46, %v206_v24 }
 0x12b   :  { %v362_v50 = vpop.eup %361  ;;  %v294_v51 = vpack.c.bf16 %v236_v47, %v236_v47  ;;  %v237_v52 = vmul.f32 %v360_v48, %v201_v31 }
 0x12c   :  { %v296_v53 = vpack.c.bf16 %v238_v49, %v238_v49  ;;  %v239_v54 = vmul.f32 %v362_v50, %v209_v32 }
 0x12d   :  { %257 = vst.msk [vmem:[%s484_s3] sm:$0xf] %vm256_vm2, %v294_v51  ;;  %v295_v55 = vpack.c.bf16 %v237_v52, %v237_v52 }
 0x12e   :  { %259 = vst.msk [vmem:[%s484_s3 + $0x8] sm:$0xf] %vm256_vm2, %v296_v53  ;;  %v297_v56 = vpack.c.bf16 %v239_v54, %v239_v54 }
 0x12f   :  { %258 = vst.msk [vmem:[%s484_s3 + $0x4] sm:$0xf] %vm256_vm2, %v295_v55 }
 0x130   :  { %260 = vst.msk [vmem:[%s484_s3 + $0xc] sm:$0xf] %vm256_vm2, %v297_v56 }

// kernel: retinanet_forward.35
= control target key start
LH: loop header
LB: loop body
LE: loop exit
PB: predicated region body
PF: predicated region fallthrough
CT: control target
= control target key end

     0   :  { %v134_v0 = vmov 0.0   ;;  %vm135_vm0 = vmmov 0   ;;  %vm47_vm1 = vcmask 392192   ;;  %vm99_vm2 = vcmask 781312   ;;  %s174_s1 = inlined_call_operand.vmem [shape: bf16[48,96], index: 1, kind: input, shape index: {}]   ;;  %s175_s0 = inlined_call_operand.vmem [shape: bf16[8,48], index: 0, kind: input, shape index: {}]   ;;  %s176_s2 = inlined_call_operand.vmem [shape: f32[1,96], index: 2, kind: input, shape index: {}]   ;;  %s177_s3 = inlined_call_operand.vmem [shape: bf16[8,96], index: 3, kind: output, shape index: {}]  }
   0x1   :  { %115 = vmatprep.subr.bf16.mxu0 %v134_v0  ;;  %v127_v1 = vld [vmem:[%s174_s1] sm:$0xff]   ;;  %121 = vmatprep.mubr.msk.bf16.mxu0 %vm135_vm0, %v134_v0  ;;  %v128_v2 = vld [vmem:[%s174_s1 + $0x8] sm:$0xff]   ;;  %v129_v3 = vld [vmem:[%s174_s1 + $0x10] sm:$0xff]  }
   0x2   :  { %116 = vmatpush3.bf16.msra.mxu0 %v127_v1  ;;  %v15_v4 = vld [vmem:[%s175_s0] sm:$0xf] }
   0x3   :  { %117 = vmatprep.subr.bf16.mxu0 %v134_v0  ;;  %v105_v5 = vld [vmem:[%s176_s2] ss:$0 sm:$0xff] }
   0x6   :  { %118 = vmatpush3.bf16.msra.mxu0 %v128_v2 }
   0x7   :  { %119 = vmatprep.subr.bf16.mxu0 %v134_v0 }
   0xa   :  { %120 = vmatpush3.bf16.msra.mxu0 %v129_v3 }
   0xd   :  { %122 = vmatmul.mubr.msk.bf16.vlgmr.msra.gmra.mrb[0].mxu0 %vm47_vm1, %v15_v4 }
  0xe0   :  { %v85_v6 = vpop.f32.mrb[0].mxu0 }
  0xe1   :  { %v86_v7 = vadd.f32 %v105_v5, %v85_v6  ;;  %v123_v8 = vpop.f32.mrb[1].mxu0 }
  0xe2   :  { %v88_v9 = vpop.f32.mrb[2].mxu0 }
  0xe3   :  { %v110_v10 = vmul.f32 -1.442695, %v86_v7  ;;  %v124_v11 = vpop.f32.mrb[3].mxu0 }
  0xe5   :  { %130 = vpow2.f32 %v110_v10 }
  0xef   :  { %v131_v12 = vpop.eup %130 }
  0xf0   :  { %v94_v13 = vadd.f32 1.0, %v131_v12 }
  0xf2   :  { %132 = vrcp.f32 %v94_v13 }
  0xfc   :  { %v133_v14 = vpop.eup %132 }
  0xfd   :  { %v97_v15 = vmul.f32 %v133_v14, %v86_v7 }
  0xff   :  { %v98_v16 = vpack.c.bf16 %v97_v15, %v97_v15 }
 0x101   :  { %100 = vst.msk [vmem:[%s177_s3] sm:$0xf] %vm99_vm2, %v98_v16 }

// kernel: retinanet_forward.34
= control target key start
LH: loop header
LB: loop body
LE: loop exit
PB: predicated region body
PF: predicated region fallthrough
CT: control target
= control target key end

     0   :  { %v360_v1 = vmov 0.0   ;;  %vm361_vm0 = vmmov 0   ;;  %vm178_vm1 = vcmask 261120   ;;  %vm270_vm2 = vcmask 388096   ;;  %s448_s1 = inlined_call_operand.vmem [shape: bf16[288,48], index: 1, kind: input, shape index: {}]   ;;  %s449_s0 = inlined_call_operand.vmem [shape: bf16[8,288], index: 0, kind: input, shape index: {}]   ;;  %s450_s2 = inlined_call_operand.vmem [shape: f32[1,48], index: 2, kind: input, shape index: {}]   ;;  %s451_s3 = inlined_call_operand.vmem [shape: bf16[8,48], index: 3, kind: output, shape index: {}]  }
   0x1   :  { %v335_v0 = vld [vmem:[%s448_s1 + $0x40] sm:$0xff]   ;;  %325 = vmatprep.subr.bf16.mxu1 %v360_v1  ;;  %329 = vmatprep.mubr.msk.bf16.mxu1 %vm361_vm0, %v360_v1  ;;  %v337_v3 = vld [vmem:[%s448_s1 + $0x48] sm:$0xff]   ;;  %v339_v5 = vld [vmem:[%s448_s1 + $0x50] sm:$0xff]  }
   0x2   :  { %v336_v2 = vld [vmem:[%s448_s1] sm:$0xff]   ;;  %300 = vmatprep.subr.bf16.mxu0 %v335_v0  ;;  %v338_v4 = vld [vmem:[%s448_s1 + $0x8] sm:$0xff]   ;;  %v340_v6 = vld [vmem:[%s448_s1 + $0x10] sm:$0xff]  }
   0x3   :  { %301 = vmatpush3.bf16.msra.mxu0 %v336_v2  ;;  %v341_v7 = vld [vmem:[%s448_s1 + $0x58] sm:$0xff]   ;;  %v343_v9 = vld [vmem:[%s448_s1 + $0x60] sm:$0xff]   ;;  %v345_v12 = vld [vmem:[%s448_s1 + $0x68] sm:$0xff]  }
   0x4   :  { %302 = vmatprep.subr.bf16.mxu0 %v337_v3  ;;  %v342_v8 = vld [vmem:[%s448_s1 + $0x18] sm:$0xff]   ;;  %v349_v10 = vld [vmem:[%s448_s1 + $0x80] sm:$0xff]   ;;  %v355_v15 = vld [vmem:[%s448_s1 + $0x88] sm:$0xff]  }
   0x5   :  { %v344_v11 = vld [vmem:[%s448_s1 + $0x20] sm:$0xff]   ;;  %326 = vmatpush3.bf16.msra.mxu1 %v349_v10  ;;  %v346_v16 = vld [vmem:[%s448_s1 + $0x28] sm:$0xff]   ;;  %v347_v17 = vld [vmem:[%s448_s1 + $0x70] sm:$0xff]  }
   0x6   :  { %327 = vmatprep.subr.bf16.mxu1 %v360_v1  ;;  %v15_v13 = vld [vmem:[%s449_s0] sm:$0xff]  ;;  %v354_v18 = vld [vmem:[%s449_s0 + $0x8] ss:$0 sps:$4 sm:$0xff]   ;;  %v348_v19 = vld [vmem:[%s448_s1 + $0x30] sm:$0xff]  }
   0x7   :  { %303 = vmatpush3.bf16.msra.mxu0 %v338_v4  ;;  %v278_v14 = vcombine.high %v15_v13, %v15_v13  ;;  %v350_v20 = vld [vmem:[%s448_s1 + $0x78] sm:$0xff]   ;;  %v277_v22 = vcombine.low %v15_v13, %v15_v13  ;;  %v276_v29 = vld [vmem:[%s450_s2] ss:$0 sm:$0xff] }
   0x8   :  { %304 = vmatprep.subr.bf16.mxu0 %v339_v5  ;;  %v351_v21 = vld [vmem:[%s448_s1 + $0x38] sm:$0xff]  }
   0x9   :  { %214 = vmatprep.mubr.bf16.mxu0 %v278_v14  ;;  %328 = vmatpush3.bf16.msra.mxu1 %v355_v15 }
   0xb   :  { %305 = vmatpush3.bf16.msra.mxu0 %v340_v6 }
   0xc   :  { %306 = vmatprep.subr.bf16.mxu0 %v341_v7  ;;  %330 = vmatmul.mubr.msk.bf16.vlgmr.msra.gmra.mrb[0].mxu1 %vm178_vm1, %v354_v18 }
   0xf   :  { %307 = vmatpush3.bf16.msra.mxu0 %v342_v8 }
  0x10   :  { %308 = vmatprep.subr.bf16.mxu0 %v343_v9 }
  0x13   :  { %309 = vmatpush3.bf16.msra.mxu0 %v344_v11 }
  0x14   :  { %310 = vmatprep.subr.bf16.mxu0 %v345_v12 }
  0x17   :  { %311 = vmatpush3.bf16.msra.mxu0 %v346_v16 }
  0x18   :  { %312 = vmatprep.subr.bf16.mxu0 %v347_v17 }
  0x1b   :  { %313 = vmatpush3.bf16.msra.mxu0 %v348_v19 }
  0x1c   :  { %314 = vmatprep.subr.bf16.mxu0 %v350_v20 }
  0x1f   :  { %315 = vmatpush3.bf16.msra.mxu0 %v351_v21 }
  0x22   :  { %215 = vmatmul.mubr.bf16.vlgmr.msra.gmra.mrb[0].mxu0 %v277_v22 }
  0xdf   :  { %v256_v23 = vpop.f32.mrb[0].mxu1 }
  0xe0   :  { %v331_v24 = vpop.f32.mrb[1].mxu1 }
  0xe1   :  { %v259_v25 = vpop.f32.mrb[2].mxu1 }
  0xe2   :  { %v332_v26 = vpop.f32.mrb[3].mxu1 }
  0xf5   :  { %v316_v27 = vpop.f32.mrb[0].mxu0 }
  0xf6   :  { %v317_v28 = vpop.f32.mrb[1].mxu0 }
  0xf7   :  { %v318_v30 = vadd.f32 %v317_v28, %v316_v27  ;;  %v319_v31 = vpop.f32.mrb[2].mxu0 }
  0xf8   :  { %v320_v32 = vpop.f32.mrb[3].mxu0 }
  0xf9   :  { %v217_v33 = vadd.f32 %v318_v30, %v276_v29 }
  0xfb   :  { %v257_v34 = vadd.f32 %v256_v23, %v217_v33 }
  0xfd   :  { %v299_v35 = vmul.f32 -1.442695, %v257_v34 }
  0xff   :  { %356 = vpow2.f32 %v299_v35 }
 0x109   :  { %v357_v36 = vpop.eup %356 }
 0x10a   :  { %v265_v37 = vadd.f32 1.0, %v357_v36 }
 0x10c   :  { %358 = vrcp.f32 %v265_v37 }
 0x116   :  { %v359_v38 = vpop.eup %358 }
 0x117   :  { %v268_v39 = vmul.f32 %v359_v38, %v257_v34 }
 0x119   :  { %v269_v40 = vpack.c.bf16 %v268_v39, %v268_v39 }
 0x11b   :  { %271 = vst.msk [vmem:[%s451_s3] sm:$0xf] %vm270_vm2, %v269_v40 }

// kernel: retinanet_forward.44
= control target key start
LH: loop header
LB: loop body
LE: loop exit
PB: predicated region body
PF: predicated region fallthrough
CT: control target
= control target key end

     0   :  { %v867_v41 = vmov 0.0   ;;  %vm868_vm0 = vmmov 0   ;;  %vm482_vm1 = vcmask 785408   ;;  %s1069_s1 = inlined_call_operand.vmem [shape: bf16[864,128], index: 1, kind: input, shape index: {}]   ;;  %s1070_s0 = inlined_call_operand.vmem [shape: bf16[8,864], index: 0, kind: input, shape index: {}]   ;;  %s1071_s2 = inlined_call_operand.vmem [shape: f32[1,128], index: 2, kind: input, shape index: {}]   ;;  %s1072_s3 = inlined_call_operand.vmem [shape: bf16[8,128], index: 3, kind: output, shape index: {}]  }
   0x1   :  { %v806_v0 = vld [vmem:[%s1069_s1 + $0x40] sm:$0xff]   ;;  %v810_v4 = vld [vmem:[%s1069_s1 + $0x48] sm:$0xff]   ;;  %v814_v8 = vld [vmem:[%s1069_s1 + $0x50] sm:$0xff]  }
   0x2   :  { %v807_v1 = vld [vmem:[%s1069_s1] sm:$0xff]   ;;  %715 = vmatprep.subr.bf16.mxu0 %v806_v0  ;;  %v811_v5 = vld [vmem:[%s1069_s1 + $0x8] sm:$0xff]   ;;  %v815_v9 = vld [vmem:[%s1069_s1 + $0x10] sm:$0xff]  }
   0x3   :  { %v808_v2 = vld [vmem:[%s1069_s1 + $0xc0] sm:$0xff]   ;;  %716 = vmatpush3.bf16.msra.mxu0 %v807_v1  ;;  %v812_v6 = vld [vmem:[%s1069_s1 + $0xc8] sm:$0xff]   ;;  %v816_v10 = vld [vmem:[%s1069_s1 + $0xd0] sm:$0xff]  }
   0x4   :  { %v809_v3 = vld [vmem:[%s1069_s1 + $0x80] sm:$0xff]   ;;  %737 = vmatprep.subr.bf16.mxu1 %v808_v2  ;;  %717 = vmatprep.subr.bf16.mxu0 %v810_v4  ;;  %v813_v7 = vld [vmem:[%s1069_s1 + $0x88] sm:$0xff]   ;;  %v817_v11 = vld [vmem:[%s1069_s1 + $0x90] sm:$0xff]  }
   0x5   :  { %738 = vmatpush3.bf16.msra.mxu1 %v809_v3  ;;  %v818_v12 = vld [vmem:[%s1069_s1 + $0x58] sm:$0xff]   ;;  %v822_v16 = vld [vmem:[%s1069_s1 + $0x60] sm:$0xff]   ;;  %v826_v20 = vld [vmem:[%s1069_s1 + $0x68] sm:$0xff]  }
   0x6   :  { %739 = vmatprep.subr.bf16.mxu1 %v812_v6  ;;  %v819_v13 = vld [vmem:[%s1069_s1 + $0x18] sm:$0xff]   ;;  %v823_v17 = vld [vmem:[%s1069_s1 + $0x20] sm:$0xff]   ;;  %v827_v21 = vld [vmem:[%s1069_s1 + $0x28] sm:$0xff]  }
   0x7   :  { %718 = vmatpush3.bf16.msra.mxu0 %v811_v5  ;;  %v820_v14 = vld [vmem:[%s1069_s1 + $0xd8] sm:$0xff]   ;;  %v824_v18 = vld [vmem:[%s1069_s1 + $0xe0] sm:$0xff]   ;;  %v828_v22 = vld [vmem:[%s1069_s1 + $0xe8] sm:$0xff]  }
   0x8   :  { %719 = vmatprep.subr.bf16.mxu0 %v814_v8  ;;  %v821_v15 = vld [vmem:[%s1069_s1 + $0x98] sm:$0xff]   ;;  %v825_v19 = vld [vmem:[%s1069_s1 + $0xa0] sm:$0xff]   ;;  %v829_v23 = vld [vmem:[%s1069_s1 + $0xa8] sm:$0xff]  }
   0x9   :  { %740 = vmatpush3.bf16.msra.mxu1 %v813_v7  ;;  %v830_v24 = vld [vmem:[%s1069_s1 + $0x70] sm:$0xff]   ;;  %v834_v28 = vld [vmem:[%s1069_s1 + $0x78] sm:$0xff]   ;;  %v15_v31 = vld [vmem:[%s1070_s0] sm:$0xff] }
   0xa   :  { %741 = vmatprep.subr.bf16.mxu1 %v816_v10  ;;  %v831_v25 = vld [vmem:[%s1069_s1 + $0x30] sm:$0xff]   ;;  %v835_v29 = vld [vmem:[%s1069_s1 + $0x38] sm:$0xff]   ;;  %v653_v32 = vcombine.low %v15_v31, %v15_v31  ;;  %v654_v33 = vcombine.high %v15_v31, %v15_v31  ;;  %v841_v35 = vld [vmem:[%s1069_s1 + $0x140] sm:$0xff]  }
   0xb   :  { %720 = vmatpush3.bf16.msra.mxu0 %v815_v9  ;;  %v832_v26 = vld [vmem:[%s1069_s1 + $0xf0] sm:$0xff]   ;;  %v836_v30 = vld [vmem:[%s1069_s1 + $0xf8] sm:$0xff]   ;;  %v16_v36 = vld [vmem:[%s1070_s0 + $0x8] sm:$0xff] }
   0xc   :  { %721 = vmatprep.subr.bf16.mxu0 %v818_v12  ;;  %v833_v27 = vld [vmem:[%s1069_s1 + $0xb0] sm:$0xff]   ;;  %v840_v34 = vld [vmem:[%s1069_s1 + $0xb8] sm:$0xff]   ;;  %518 = vmatprep.mubr.bf16.mxu0 %v654_v33  ;;  %v655_v37 = vcombine.low %v16_v36, %v16_v36  ;;  %v656_v38 = vcombine.high %v16_v36, %v16_v36  ;;  %v844_v39 = vld [vmem:[%s1069_s1 + $0x100] sm:$0xff]  }
   0xd   :  { %742 = vmatpush3.bf16.msra.mxu1 %v817_v11  ;;  %v845_v40 = vld [vmem:[%s1069_s1 + $0x148] sm:$0xff]   ;;  %v847_v43 = vld [vmem:[%s1069_s1 + $0x150] sm:$0xff]   ;;  %v849_v44 = vld [vmem:[%s1069_s1 + $0x180] sm:$0xff]  }
   0xe   :  { %743 = vmatprep.subr.bf16.mxu1 %v820_v14  ;;  %558 = vmatprep.mubr.bf16.mxu1 %v656_v38  ;;  %v846_v42 = vld [vmem:[%s1069_s1 + $0x108] sm:$0xff]   ;;  %v848_v45 = vld [vmem:[%s1069_s1 + $0x110] sm:$0xff]   ;;  %v850_v46 = vld [vmem:[%s1069_s1 + $0x158] sm:$0xff]  }
   0xf   :  { %722 = vmatpush3.bf16.msra.mxu0 %v819_v13  ;;  %v852_v47 = vld [vmem:[%s1069_s1 + $0x188] sm:$0xff]   ;;  %v851_v48 = vld [vmem:[%s1069_s1 + $0x118] sm:$0xff]   ;;  %v853_v49 = vld [vmem:[%s1069_s1 + $0x160] sm:$0xff]  }
  0x10   :  { %723 = vmatprep.subr.bf16.mxu0 %v822_v16  ;;  %v855_v50 = vld [vmem:[%s1069_s1 + $0x190] sm:$0xff]   ;;  %v854_v51 = vld [vmem:[%s1069_s1 + $0x120] sm:$0xff]   ;;  %v856_v52 = vld [vmem:[%s1069_s1 + $0x168] sm:$0xff]  }
  0x11   :  { %744 = vmatpush3.bf16.msra.mxu1 %v821_v15  ;;  %v858_v53 = vld [vmem:[%s1069_s1 + $0x198] sm:$0xff]   ;;  %v857_v54 = vld [vmem:[%s1069_s1 + $0x128] sm:$0xff]   ;;  %v859_v55 = vld [vmem:[%s1069_s1 + $0x170] sm:$0xff]  }
  0x12   :  { %745 = vmatprep.subr.bf16.mxu1 %v824_v18  ;;  %v861_v56 = vld [vmem:[%s1069_s1 + $0x1a0] sm:$0xff]   ;;  %v17_v57 = vld [vmem:[%s1070_s0 + $0x10] sm:$0xff]  ;;  %v862_v60 = vld [vmem:[%s1069_s1 + $0x178] sm:$0xff]  }
  0x13   :  { %724 = vmatpush3.bf16.msra.mxu0 %v823_v17  ;;  %v658_v58 = vcombine.high %v17_v57, %v17_v57  ;;  %v860_v59 = vld [vmem:[%s1069_s1 + $0x130] sm:$0xff]   ;;  %v866_v61 = vld [vmem:[%s1069_s1 + $0x1a8] sm:$0xff]   ;;  %v839_v62 = vld [vmem:[%s1070_s0 + $0x18] ss:$0 sps:$4 sm:$0xff]   ;;  %v657_v0 = vcombine.low %v17_v57, %v17_v57 }
  0x14   :  { %725 = vmatprep.subr.bf16.mxu0 %v826_v20  ;;  %v863_v63 = vld [vmem:[%s1069_s1 + $0x138] sm:$0xff]   ;;  %v652_v2 = vld [vmem:[%s1071_s2] ss:$0 sm:$0xff] }
  0x15   :  { %746 = vmatpush3.bf16.msra.mxu1 %v825_v19 }
  0x16   :  { %747 = vmatprep.subr.bf16.mxu1 %v828_v22 }
  0x17   :  { %726 = vmatpush3.bf16.msra.mxu0 %v827_v21 }
  0x18   :  { %727 = vmatprep.subr.bf16.mxu0 %v830_v24 }
  0x19   :  { %748 = vmatpush3.bf16.msra.mxu1 %v829_v23 }
  0x1a   :  { %749 = vmatprep.subr.bf16.mxu1 %v832_v26 }
  0x1b   :  { %728 = vmatpush3.bf16.msra.mxu0 %v831_v25 }
  0x1c   :  { %729 = vmatprep.subr.bf16.mxu0 %v834_v28 }
  0x1d   :  { %750 = vmatpush3.bf16.msra.mxu1 %v833_v27 }
  0x1e   :  { %751 = vmatprep.subr.bf16.mxu1 %v836_v30 }
  0x1f   :  { %730 = vmatpush3.bf16.msra.mxu0 %v835_v29 }
  0x20   :  { %759 = vmatprep.subr.bf16.mxu0 %v841_v35 }
  0x21   :  { %752 = vmatpush3.bf16.msra.mxu1 %v840_v34 }
  0x22   :  { %519 = vmatmul.mubr.bf16.vlgmr.msra.gmra.mrb[0].mxu0 %v653_v32  ;;  %788 = vmatprep.subr.bf16.mxu1 %v867_v41 }
  0x23   :  { %760 = vmatpush3.bf16.msra.mxu0 %v844_v39  ;;  %598 = vmatprep.mubr.bf16.mxu0 %v658_v58 }
  0x24   :  { %559 = vmatmul.mubr.bf16.vlgmr.msra.gmra.mrb[0].mxu1 %v655_v37  ;;  %761 = vmatprep.subr.bf16.mxu0 %v845_v40 }
  0x25   :  { %800 = vmatprep.mubr.msk.bf16.mxu1 %vm868_vm0, %v867_v41  ;;  %789 = vmatpush3.bf16.msra.mxu1 %v849_v44 }
  0x26   :  { %790 = vmatprep.subr.bf16.mxu1 %v867_v41 }
  0x27   :  { %762 = vmatpush3.bf16.msra.mxu0 %v846_v42 }
  0x28   :  { %763 = vmatprep.subr.bf16.mxu0 %v847_v43 }
  0x29   :  { %791 = vmatpush3.bf16.msra.mxu1 %v852_v47 }
  0x2a   :  { %792 = vmatprep.subr.bf16.mxu1 %v867_v41 }
  0x2b   :  { %764 = vmatpush3.bf16.msra.mxu0 %v848_v45 }
  0x2c   :  { %765 = vmatprep.subr.bf16.mxu0 %v850_v46 }
  0x2d   :  { %793 = vmatpush3.bf16.msra.mxu1 %v855_v50 }
  0x2e   :  { %794 = vmatprep.subr.bf16.mxu1 %v867_v41 }
  0x2f   :  { %766 = vmatpush3.bf16.msra.mxu0 %v851_v48 }
  0x30   :  { %767 = vmatprep.subr.bf16.mxu0 %v853_v49 }
  0x31   :  { %795 = vmatpush3.bf16.msra.mxu1 %v858_v53 }
  0x32   :  { %796 = vmatprep.subr.bf16.mxu1 %v867_v41 }
  0x33   :  { %768 = vmatpush3.bf16.msra.mxu0 %v854_v51 }
  0x34   :  { %769 = vmatprep.subr.bf16.mxu0 %v856_v52 }
  0x35   :  { %797 = vmatpush3.bf16.msra.mxu1 %v861_v56 }
  0x36   :  { %798 = vmatprep.subr.bf16.mxu1 %v867_v41 }
  0x37   :  { %770 = vmatpush3.bf16.msra.mxu0 %v857_v54 }
  0x38   :  { %771 = vmatprep.subr.bf16.mxu0 %v859_v55 }
  0x39   :  { %799 = vmatpush3.bf16.msra.mxu1 %v866_v61 }
  0x3b   :  { %772 = vmatpush3.bf16.msra.mxu0 %v860_v59 }
  0x3c   :  { %773 = vmatprep.subr.bf16.mxu0 %v862_v60  ;;  %801 = vmatmul.mubr.msk.bf16.vlgmr.msra.gmra.mrb[4].mxu1 %vm482_vm1, %v839_v62 }
  0x3f   :  { %774 = vmatpush3.bf16.msra.mxu0 %v863_v63 }
  0x42   :  { %599 = vmatmul.mubr.bf16.vlgmr.msra.gmra.mrb[4].mxu0 %v657_v0 }
  0xf5   :  { %v731_v1 = vpop.f32.mrb[0].mxu0 }
  0xf6   :  { %v732_v3 = vpop.f32.mrb[1].mxu0 }
  0xf7   :  { %v733_v4 = vadd.f32 %v732_v3, %v731_v1  ;;  %v734_v5 = vpop.f32.mrb[2].mxu0  ;;  %v753_v6 = vpop.f32.mrb[0].mxu1 }
  0xf8   :  { %v735_v7 = vpop.f32.mrb[3].mxu0  ;;  %v754_v9 = vpop.f32.mrb[1].mxu1 }
  0xf9   :  { %v521_v8 = vadd.f32 %v733_v4, %v652_v2  ;;  %v755_v10 = vadd.f32 %v754_v9, %v753_v6  ;;  %v756_v11 = vpop.f32.mrb[2].mxu1 }
  0xfa   :  { %v757_v12 = vpop.f32.mrb[3].mxu1 }
  0xfb   :  { %v561_v13 = vadd.f32 %v755_v10, %v521_v8 }
 0x10f   :  { %v640_v14 = vpop.f32.mrb[4].mxu1 }
 0x110   :  { %v802_v15 = vpop.f32.mrb[5].mxu1 }
 0x111   :  { %v643_v16 = vpop.f32.mrb[6].mxu1 }
 0x112   :  { %v803_v18 = vpop.f32.mrb[7].mxu1 }
 0x115   :  { %v775_v17 = vpop.f32.mrb[4].mxu0 }
 0x116   :  { %v776_v19 = vpop.f32.mrb[5].mxu0 }
 0x117   :  { %v777_v20 = vadd.f32 %v776_v19, %v775_v17  ;;  %v778_v21 = vpop.f32.mrb[6].mxu0 }
 0x118   :  { %v779_v22 = vpop.f32.mrb[7].mxu0 }
 0x119   :  { %v601_v23 = vadd.f32 %v777_v20, %v561_v13 }
 0x11b   :  { %v641_v24 = vadd.f32 %v640_v14, %v601_v23 }
 0x11d   :  { %v646_v25 = vpack.c.bf16 %v641_v24, %v641_v24 }
 0x11f   :  { %647 = vst [vmem:[%s1072_s3] sm:$0xf] %v646_v25 }

// kernel: retinanet_forward.36
= control target key start
LH: loop header
LB: loop body
LE: loop exit
PB: predicated region body
PF: predicated region fallthrough
CT: control target
= control target key end

     0   :  { %v160_v0 = vmov 0.0   ;;  %vm161_vm0 = vmmov 0   ;;  %vm71_vm1 = vcmask 785408   ;;  %s209_s1 = inlined_call_operand.vmem [shape: bf16[96,128], index: 1, kind: input, shape index: {}]   ;;  %s210_s0 = inlined_call_operand.vmem [shape: bf16[8,96], index: 0, kind: input, shape index: {}]   ;;  %s211_s2 = inlined_call_operand.vmem [shape: f32[1,128], index: 2, kind: input, shape index: {}]   ;;  %s212_s3 = inlined_call_operand.vmem [shape: bf16[8,128], index: 3, kind: output, shape index: {}]  }
   0x1   :  { %136 = vmatprep.subr.bf16.mxu0 %v160_v0  ;;  %v154_v1 = vld [vmem:[%s209_s1] sm:$0xff]   ;;  %148 = vmatprep.mubr.msk.bf16.mxu0 %vm161_vm0, %v160_v0  ;;  %v155_v2 = vld [vmem:[%s209_s1 + $0x8] sm:$0xff]   ;;  %v156_v3 = vld [vmem:[%s209_s1 + $0x10] sm:$0xff]  }
   0x2   :  { %137 = vmatpush3.bf16.msra.mxu0 %v154_v1  ;;  %v157_v4 = vld [vmem:[%s209_s1 + $0x18] sm:$0xff]   ;;  %v158_v5 = vld [vmem:[%s209_s1 + $0x20] sm:$0xff]   ;;  %v159_v6 = vld [vmem:[%s209_s1 + $0x28] sm:$0xff]  }
   0x3   :  { %138 = vmatprep.subr.bf16.mxu0 %v160_v0  ;;  %v15_v7 = vld [vmem:[%s210_s0] sm:$0xf] }
   0x4   :  { %v121_v8 = vld [vmem:[%s211_s2] ss:$0 sm:$0xff] }
   0x6   :  { %139 = vmatpush3.bf16.msra.mxu0 %v155_v2 }
   0x7   :  { %140 = vmatprep.subr.bf16.mxu0 %v160_v0 }
   0xa   :  { %141 = vmatpush3.bf16.msra.mxu0 %v156_v3 }
   0xb   :  { %142 = vmatprep.subr.bf16.mxu0 %v160_v0 }
   0xe   :  { %143 = vmatpush3.bf16.msra.mxu0 %v157_v4 }
   0xf   :  { %144 = vmatprep.subr.bf16.mxu0 %v160_v0 }
  0x12   :  { %145 = vmatpush3.bf16.msra.mxu0 %v158_v5 }
  0x13   :  { %146 = vmatprep.subr.bf16.mxu0 %v160_v0 }
  0x16   :  { %147 = vmatpush3.bf16.msra.mxu0 %v159_v6 }
  0x19   :  { %149 = vmatmul.mubr.msk.bf16.vlgmr.msra.gmra.mrb[0].mxu0 %vm71_vm1, %v15_v7 }
  0xec   :  { %v109_v9 = vpop.f32.mrb[0].mxu0 }
  0xed   :  { %v110_v10 = vadd.f32 %v121_v8, %v109_v9  ;;  %v150_v11 = vpop.f32.mrb[1].mxu0 }
  0xee   :  { %v112_v12 = vpop.f32.mrb[2].mxu0 }
  0xef   :  { %v115_v13 = vpack.c.bf16 %v110_v10, %v110_v10  ;;  %v151_v14 = vpop.f32.mrb[3].mxu0 }
  0xf1   :  { %116 = vst [vmem:[%s212_s3] sm:$0xf] %v115_v13 }

// kernel: retinanet_forward.45
= control target key start
LH: loop header
LB: loop body
LE: loop exit
PB: predicated region body
PF: predicated region fallthrough
CT: control target
= control target key end

     0   :  { %v1120_v32 = vmov 0   ;;  %vm1122_vm0 = vmmov 0   ;;  %s1385_s1 = inlined_call_operand.vmem [shape: bf16[1152,128], index: 1, kind: input, shape index: {}]   ;;  %s1386_s0 = inlined_call_operand.vmem [shape: bf16[8,1152], index: 0, kind: input, shape index: {}]   ;;  %s1387_s2 = inlined_call_operand.vmem [shape: f32[1,128], index: 2, kind: input, shape index: {}]   ;;  %s1388_s3 = inlined_call_operand.vmem [shape: bf16[8,128], index: 3, kind: output, shape index: {}]  }
   0x1   :  { %v1048_v0 = vld [vmem:[%s1385_s1 + $0x40] sm:$0xff]   ;;  %v1052_v4 = vld [vmem:[%s1385_s1 + $0x48] sm:$0xff]   ;;  %v1056_v8 = vld [vmem:[%s1385_s1 + $0x50] sm:$0xff]  }
   0x2   :  { %v1049_v1 = vld [vmem:[%s1385_s1] sm:$0xff]   ;;  %928 = vmatprep.subr.bf16.mxu0 %v1048_v0  ;;  %v1053_v5 = vld [vmem:[%s1385_s1 + $0x8] sm:$0xff]   ;;  %v1057_v9 = vld [vmem:[%s1385_s1 + $0x10] sm:$0xff]  }
   0x3   :  { %v1050_v2 = vld [vmem:[%s1385_s1 + $0xc0] sm:$0xff]   ;;  %929 = vmatpush3.bf16.msra.mxu0 %v1049_v1  ;;  %v1054_v6 = vld [vmem:[%s1385_s1 + $0xc8] sm:$0xff]   ;;  %v1058_v10 = vld [vmem:[%s1385_s1 + $0xd0] sm:$0xff]  }
   0x4   :  { %v1051_v3 = vld [vmem:[%s1385_s1 + $0x80] sm:$0xff]   ;;  %950 = vmatprep.subr.bf16.mxu1 %v1050_v2  ;;  %930 = vmatprep.subr.bf16.mxu0 %v1052_v4  ;;  %v1055_v7 = vld [vmem:[%s1385_s1 + $0x88] sm:$0xff]   ;;  %v1059_v11 = vld [vmem:[%s1385_s1 + $0x90] sm:$0xff]  }
   0x5   :  { %951 = vmatpush3.bf16.msra.mxu1 %v1051_v3  ;;  %v1060_v12 = vld [vmem:[%s1385_s1 + $0x58] sm:$0xff]   ;;  %v1064_v16 = vld [vmem:[%s1385_s1 + $0x60] sm:$0xff]   ;;  %v1068_v20 = vld [vmem:[%s1385_s1 + $0x68] sm:$0xff]  }
   0x6   :  { %952 = vmatprep.subr.bf16.mxu1 %v1054_v6  ;;  %v1061_v13 = vld [vmem:[%s1385_s1 + $0x18] sm:$0xff]   ;;  %v1065_v17 = vld [vmem:[%s1385_s1 + $0x20] sm:$0xff]   ;;  %v1069_v21 = vld [vmem:[%s1385_s1 + $0x28] sm:$0xff]  }
   0x7   :  { %931 = vmatpush3.bf16.msra.mxu0 %v1053_v5  ;;  %v1062_v14 = vld [vmem:[%s1385_s1 + $0xd8] sm:$0xff]   ;;  %v1066_v18 = vld [vmem:[%s1385_s1 + $0xe0] sm:$0xff]   ;;  %v1070_v22 = vld [vmem:[%s1385_s1 + $0xe8] sm:$0xff]  }
   0x8   :  { %932 = vmatprep.subr.bf16.mxu0 %v1056_v8  ;;  %v1063_v15 = vld [vmem:[%s1385_s1 + $0x98] sm:$0xff]   ;;  %v1067_v19 = vld [vmem:[%s1385_s1 + $0xa0] sm:$0xff]   ;;  %v1071_v23 = vld [vmem:[%s1385_s1 + $0xa8] sm:$0xff]  }
   0x9   :  { %953 = vmatpush3.bf16.msra.mxu1 %v1055_v7  ;;  %v1072_v24 = vld [vmem:[%s1385_s1 + $0x70] sm:$0xff]   ;;  %v1076_v28 = vld [vmem:[%s1385_s1 + $0x78] sm:$0xff]   ;;  %v15_v31 = vld [vmem:[%s1386_s0] sm:$0xff] }
   0xa   :  { %954 = vmatprep.subr.bf16.mxu1 %v1058_v10  ;;  %v1073_v25 = vld [vmem:[%s1385_s1 + $0x30] sm:$0xff]   ;;  %v1077_v29 = vld [vmem:[%s1385_s1 + $0x38] sm:$0xff]   ;;  %v20_v33 = vmax.bf16 %v1120_v32, %v15_v31  ;;  %v1080_v35 = vld [vmem:[%s1385_s1 + $0x140] sm:$0xff]  }
   0xb   :  { %933 = vmatpush3.bf16.msra.mxu0 %v1057_v9  ;;  %v1074_v26 = vld [vmem:[%s1385_s1 + $0xf0] sm:$0xff]   ;;  %v1078_v30 = vld [vmem:[%s1385_s1 + $0xf8] sm:$0xff]   ;;  %v16_v36 = vld [vmem:[%s1386_s0 + $0x8] sm:$0xff] }
   0xc   :  { %934 = vmatprep.subr.bf16.mxu0 %v1060_v12  ;;  %v1075_v27 = vld [vmem:[%s1385_s1 + $0xb0] sm:$0xff]   ;;  %v1079_v34 = vld [vmem:[%s1385_s1 + $0xb8] sm:$0xff]   ;;  %v848_v37 = vcombine.high %v20_v33, %v20_v33  ;;  %v847_v38 = vcombine.low %v20_v33, %v20_v33  ;;  %v21_v39 = vmax.bf16 %v1120_v32, %v16_v36  ;;  %v1081_v40 = vld [vmem:[%s1385_s1 + $0x100] sm:$0xff]  }
   0xd   :  { %955 = vmatpush3.bf16.msra.mxu1 %v1059_v11  ;;  %v1082_v41 = vld [vmem:[%s1385_s1 + $0x1c0] sm:$0xff]   ;;  %v1084_v45 = vld [vmem:[%s1385_s1 + $0x148] sm:$0xff]   ;;  %v1088_v49 = vld [vmem:[%s1385_s1 + $0x150] sm:$0xff]  }
   0xe   :  { %956 = vmatprep.subr.bf16.mxu1 %v1062_v14  ;;  %672 = vmatprep.mubr.bf16.mxu0 %v848_v37  ;;  %v850_v42 = vcombine.high %v21_v39, %v21_v39  ;;  %v849_v43 = vcombine.low %v21_v39, %v21_v39  ;;  %v1083_v44 = vld [vmem:[%s1385_s1 + $0x180] sm:$0xff]   ;;  %v1085_v46 = vld [vmem:[%s1385_s1 + $0x108] sm:$0xff]   ;;  %v1089_v50 = vld [vmem:[%s1385_s1 + $0x110] sm:$0xff]  }
   0xf   :  { %935 = vmatpush3.bf16.msra.mxu0 %v1061_v13  ;;  %v1086_v47 = vld [vmem:[%s1385_s1 + $0x1c8] sm:$0xff]   ;;  %v1090_v51 = vld [vmem:[%s1385_s1 + $0x1d0] sm:$0xff]   ;;  %v1092_v53 = vld [vmem:[%s1385_s1 + $0x158] sm:$0xff]  }
  0x10   :  { %936 = vmatprep.subr.bf16.mxu0 %v1064_v16  ;;  %712 = vmatprep.mubr.bf16.mxu1 %v850_v42  ;;  %v1087_v48 = vld [vmem:[%s1385_s1 + $0x188] sm:$0xff]   ;;  %v1091_v52 = vld [vmem:[%s1385_s1 + $0x190] sm:$0xff]   ;;  %v1093_v54 = vld [vmem:[%s1385_s1 + $0x118] sm:$0xff]   ;;  %v1121_v16 = vmov 0.0  }
  0x11   :  { %957 = vmatpush3.bf16.msra.mxu1 %v1063_v15  ;;  %v1094_v55 = vld [vmem:[%s1385_s1 + $0x1d8] sm:$0xff]   ;;  %v1096_v57 = vld [vmem:[%s1385_s1 + $0x160] sm:$0xff]   ;;  %v1100_v61 = vld [vmem:[%s1385_s1 + $0x168] sm:$0xff]  }
  0x12   :  { %958 = vmatprep.subr.bf16.mxu1 %v1066_v18  ;;  %v1095_v56 = vld [vmem:[%s1385_s1 + $0x198] sm:$0xff]   ;;  %v1097_v58 = vld [vmem:[%s1385_s1 + $0x120] sm:$0xff]   ;;  %v1101_v62 = vld [vmem:[%s1385_s1 + $0x128] sm:$0xff]  }
  0x13   :  { %937 = vmatpush3.bf16.msra.mxu0 %v1065_v17  ;;  %v1098_v59 = vld [vmem:[%s1385_s1 + $0x1e0] sm:$0xff]   ;;  %v1102_v63 = vld [vmem:[%s1385_s1 + $0x1e8] sm:$0xff]   ;;  %v1104_v1 = vld [vmem:[%s1385_s1 + $0x170] sm:$0xff]  }
  0x14   :  { %938 = vmatprep.subr.bf16.mxu0 %v1068_v20  ;;  %v1099_v60 = vld [vmem:[%s1385_s1 + $0x1a0] sm:$0xff]   ;;  %v1103_v0 = vld [vmem:[%s1385_s1 + $0x1a8] sm:$0xff]   ;;  %v1105_v2 = vld [vmem:[%s1385_s1 + $0x130] sm:$0xff]  }
  0x15   :  { %959 = vmatpush3.bf16.msra.mxu1 %v1067_v19  ;;  %v1106_v3 = vld [vmem:[%s1385_s1 + $0x1f0] sm:$0xff]   ;;  %v1108_v5 = vld [vmem:[%s1385_s1 + $0x178] sm:$0xff]   ;;  %v1112_v15 = vld [vmem:[%s1385_s1 + $0x200] sm:$0xff]  }
  0x16   :  { %960 = vmatprep.subr.bf16.mxu1 %v1070_v22  ;;  %v1107_v4 = vld [vmem:[%s1385_s1 + $0x1b0] sm:$0xff]   ;;  %v1109_v6 = vld [vmem:[%s1385_s1 + $0x138] sm:$0xff]   ;;  %v1113_v19 = vld [vmem:[%s1385_s1 + $0x208] sm:$0xff]  }
  0x17   :  { %939 = vmatpush3.bf16.msra.mxu0 %v1069_v21  ;;  %v1110_v7 = vld [vmem:[%s1385_s1 + $0x1f8] sm:$0xff]   ;;  %v17_v8 = vld [vmem:[%s1386_s0 + $0x10] sm:$0xff]  ;;  %v19_v20 = vld [vmem:[%s1386_s0 + $0x20] sm:$0xf] }
  0x18   :  { %940 = vmatprep.subr.bf16.mxu0 %v1072_v24  ;;  %v22_v9 = vmax.bf16 %v1120_v32, %v17_v8  ;;  %v1111_v10 = vld [vmem:[%s1385_s1 + $0x1b8] sm:$0xff]   ;;  %v1114_v21 = vld [vmem:[%s1385_s1 + $0x210] sm:$0xff]   ;;  %v24_v22 = vmax.bf16 %v1120_v32, %v19_v20  ;;  %v1116_v24 = vld [vmem:[%s1385_s1 + $0x220] sm:$0xff]  }
  0x19   :  { %961 = vmatpush3.bf16.msra.mxu1 %v1071_v23  ;;  %v18_v11 = vld [vmem:[%s1386_s0 + $0x18] sm:$0xff] }
  0x1a   :  { %962 = vmatprep.subr.bf16.mxu1 %v1074_v26  ;;  %v852_v12 = vcombine.high %v22_v9, %v22_v9  ;;  %v851_v13 = vcombine.low %v22_v9, %v22_v9  ;;  %v23_v14 = vmax.bf16 %v1120_v32, %v18_v11  ;;  %v1115_v23 = vld [vmem:[%s1385_s1 + $0x218] sm:$0xff]   ;;  %v1118_v26 = vld [vmem:[%s1385_s1 + $0x230] sm:$0xff]  }
  0x1b   :  { %941 = vmatpush3.bf16.msra.mxu0 %v1073_v25  ;;  %v1117_v25 = vld [vmem:[%s1385_s1 + $0x228] sm:$0xff]  }
  0x1c   :  { %942 = vmatprep.subr.bf16.mxu0 %v1076_v28  ;;  %v854_v17 = vcombine.high %v23_v14, %v23_v14  ;;  %v853_v18 = vcombine.low %v23_v14, %v23_v14  ;;  %v855_v28 = vcombine.low %v24_v22, %v24_v22 }
  0x1d   :  { %963 = vmatpush3.bf16.msra.mxu1 %v1075_v27  ;;  %v1119_v27 = vld [vmem:[%s1385_s1 + $0x238] sm:$0xff]  }
  0x1e   :  { %964 = vmatprep.subr.bf16.mxu1 %v1078_v30  ;;  %v846_v30 = vld [vmem:[%s1387_s2] ss:$0 sm:$0xff] }
  0x1f   :  { %943 = vmatpush3.bf16.msra.mxu0 %v1077_v29 }
  0x20   :  { %972 = vmatprep.subr.bf16.mxu0 %v1080_v35 }
  0x21   :  { %965 = vmatpush3.bf16.msra.mxu1 %v1079_v34 }
  0x22   :  { %673 = vmatmul.mubr.bf16.vlgmr.msra.gmra.mrb[0].mxu0 %v847_v38  ;;  %994 = vmatprep.subr.bf16.mxu1 %v1082_v41 }
  0x23   :  { %973 = vmatpush3.bf16.msra.mxu0 %v1081_v40  ;;  %752 = vmatprep.mubr.bf16.mxu0 %v852_v12 }
  0x24   :  { %713 = vmatmul.mubr.bf16.vlgmr.msra.gmra.mrb[0].mxu1 %v849_v43  ;;  %974 = vmatprep.subr.bf16.mxu0 %v1084_v45 }
  0x25   :  { %995 = vmatpush3.bf16.msra.mxu1 %v1083_v44  ;;  %792 = vmatprep.mubr.bf16.mxu1 %v854_v17 }
  0x26   :  { %996 = vmatprep.subr.bf16.mxu1 %v1086_v47 }
  0x27   :  { %975 = vmatpush3.bf16.msra.mxu0 %v1085_v46 }
  0x28   :  { %976 = vmatprep.subr.bf16.mxu0 %v1088_v49 }
  0x29   :  { %997 = vmatpush3.bf16.msra.mxu1 %v1087_v48 }
  0x2a   :  { %998 = vmatprep.subr.bf16.mxu1 %v1090_v51 }
  0x2b   :  { %977 = vmatpush3.bf16.msra.mxu0 %v1089_v50 }
  0x2c   :  { %978 = vmatprep.subr.bf16.mxu0 %v1092_v53 }
  0x2d   :  { %999 = vmatpush3.bf16.msra.mxu1 %v1091_v52 }
  0x2e   :  { %1000 = vmatprep.subr.bf16.mxu1 %v1094_v55 }
  0x2f   :  { %979 = vmatpush3.bf16.msra.mxu0 %v1093_v54 }
  0x30   :  { %980 = vmatprep.subr.bf16.mxu0 %v1096_v57 }
  0x31   :  { %1001 = vmatpush3.bf16.msra.mxu1 %v1095_v56 }
  0x32   :  { %1002 = vmatprep.subr.bf16.mxu1 %v1098_v59 }
  0x33   :  { %981 = vmatpush3.bf16.msra.mxu0 %v1097_v58 }
  0x34   :  { %982 = vmatprep.subr.bf16.mxu0 %v1100_v61 }
  0x35   :  { %1003 = vmatpush3.bf16.msra.mxu1 %v1099_v60 }
  0x36   :  { %1004 = vmatprep.subr.bf16.mxu1 %v1102_v63 }
  0x37   :  { %983 = vmatpush3.bf16.msra.mxu0 %v1101_v62 }
  0x38   :  { %984 = vmatprep.subr.bf16.mxu0 %v1104_v1 }
  0x39   :  { %1005 = vmatpush3.bf16.msra.mxu1 %v1103_v0 }
  0x3a   :  { %1006 = vmatprep.subr.bf16.mxu1 %v1106_v3 }
  0x3b   :  { %985 = vmatpush3.bf16.msra.mxu0 %v1105_v2 }
  0x3c   :  { %986 = vmatprep.subr.bf16.mxu0 %v1108_v5 }
  0x3d   :  { %1007 = vmatpush3.bf16.msra.mxu1 %v1107_v4 }
  0x3e   :  { %1008 = vmatprep.subr.bf16.mxu1 %v1110_v7 }
  0x3f   :  { %987 = vmatpush3.bf16.msra.mxu0 %v1109_v6 }
  0x40   :  { %1025 = vmatprep.subr.bf16.mxu0 %v1121_v16 }
  0x41   :  { %1009 = vmatpush3.bf16.msra.mxu1 %v1111_v10 }
  0x42   :  { %753 = vmatmul.mubr.bf16.vlgmr.msra.gmra.mrb[4].mxu0 %v851_v13 }
  0x43   :  { %1026 = vmatpush3.bf16.msra.mxu0 %v1112_v15  ;;  %1041 = vmatprep.mubr.msk.bf16.mxu0 %vm1122_vm0, %v1121_v16 }
  0x44   :  { %793 = vmatmul.mubr.bf16.vlgmr.msra.gmra.mrb[4].mxu1 %v853_v18  ;;  %1027 = vmatprep.subr.bf16.mxu0 %v1121_v16 }
  0x47   :  { %1028 = vmatpush3.bf16.msra.mxu0 %v1113_v19 }
  0x48   :  { %1029 = vmatprep.subr.bf16.mxu0 %v1121_v16 }
  0x4b   :  { %1030 = vmatpush3.bf16.msra.mxu0 %v1114_v21 }
  0x4c   :  { %1031 = vmatprep.subr.bf16.mxu0 %v1121_v16 }
  0x4f   :  { %1032 = vmatpush3.bf16.msra.mxu0 %v1115_v23 }
  0x50   :  { %1033 = vmatprep.subr.bf16.mxu0 %v1121_v16 }
  0x53   :  { %1034 = vmatpush3.bf16.msra.mxu0 %v1116_v24 }
  0x54   :  { %1035 = vmatprep.subr.bf16.mxu0 %v1121_v16 }
  0x57   :  { %1036 = vmatpush3.bf16.msra.mxu0 %v1117_v25 }
  0x58   :  { %1037 = vmatprep.subr.bf16.mxu0 %v1121_v16 }
  0x5b   :  { %1038 = vmatpush3.bf16.msra.mxu0 %v1118_v26 }
  0x5c   :  { %1039 = vmatprep.subr.bf16.mxu0 %v1121_v16 }
  0x5f   :  { %1040 = vmatpush3.bf16.msra.mxu0 %v1119_v27 }
  0x62   :  { %1042 = vmatmul.mubr.bf16.vlgmr.msra.gmra.mrb[8].mxu0 %v855_v28 }
  0xf5   :  { %v944_v29 = vpop.f32.mrb[0].mxu0 }
  0xf6   :  { %v945_v31 = vpop.f32.mrb[1].mxu0 }
  0xf7   :  { %v946_v32 = vadd.f32 %v945_v31, %v944_v29  ;;  %v947_v33 = vpop.f32.mrb[2].mxu0  ;;  %v966_v34 = vpop.f32.mrb[0].mxu1 }
  0xf8   :  { %v948_v35 = vpop.f32.mrb[3].mxu0  ;;  %v967_v36 = vpop.f32.mrb[1].mxu1 }
  0xf9   :  { %v675_v37 = vadd.f32 %v946_v32, %v846_v30  ;;  %v968_v38 = vadd.f32 %v967_v36, %v966_v34  ;;  %v969_v39 = vpop.f32.mrb[2].mxu1 }
  0xfa   :  { %v970_v40 = vpop.f32.mrb[3].mxu1 }
  0xfb   :  { %v715_v41 = vadd.f32 %v968_v38, %v675_v37 }
 0x115   :  { %v988_v42 = vpop.f32.mrb[4].mxu0 }
 0x116   :  { %v989_v43 = vpop.f32.mrb[5].mxu0 }
 0x117   :  { %v990_v44 = vadd.f32 %v989_v43, %v988_v42  ;;  %v991_v45 = vpop.f32.mrb[6].mxu0  ;;  %v1010_v46 = vpop.f32.mrb[4].mxu1 }
 0x118   :  { %v992_v47 = vpop.f32.mrb[7].mxu0  ;;  %v1011_v48 = vpop.f32.mrb[5].mxu1 }
 0x119   :  { %v755_v49 = vadd.f32 %v990_v44, %v715_v41  ;;  %v1012_v50 = vadd.f32 %v1011_v48, %v1010_v46  ;;  %v1013_v51 = vpop.f32.mrb[6].mxu1 }
 0x11a   :  { %v1014_v52 = vpop.f32.mrb[7].mxu1 }
 0x11b   :  { %v795_v53 = vadd.f32 %v1012_v50, %v755_v49 }
 0x135   :  { %v834_v54 = vpop.f32.mrb[8].mxu0 }
 0x136   :  { %v835_v55 = vadd.f32 %v834_v54, %v795_v53  ;;  %v1043_v56 = vpop.f32.mrb[9].mxu0 }
 0x137   :  { %v837_v57 = vpop.f32.mrb[10].mxu0 }
 0x138   :  { %v840_v58 = vpack.c.bf16 %v835_v55, %v835_v55  ;;  %v1044_v59 = vpop.f32.mrb[11].mxu0 }
 0x13a   :  { %841 = vst [vmem:[%s1388_s3] sm:$0xf] %v840_v58 }

// kernel: retinanet_forward.38
= control target key start
LH: loop header
LB: loop body
LE: loop exit
PB: predicated region body
PF: predicated region fallthrough
CT: control target
= control target key end

     0   :  { %v127_v0 = vmov 0.0   ;;  %vm128_vm0 = vmmov 0   ;;  %vm50_vm1 = vcmask 392192   ;;  %s175_s1 = inlined_call_operand.vmem [shape: bf16[48,128], index: 1, kind: input, shape index: {}]   ;;  %s176_s0 = inlined_call_operand.vmem [shape: bf16[8,48], index: 0, kind: input, shape index: {}]   ;;  %s177_s3 = inlined_call_operand.vmem [shape: bf16[8,128], index: 3, kind: input, shape index: {}]   ;;  %s178_s2 = inlined_call_operand.vmem [shape: f32[1,128], index: 2, kind: input, shape index: {}]   ;;  %s179_s4 = inlined_call_operand.vmem [shape: bf16[8,128], index: 4, kind: output, shape index: {}]  }
   0x1   :  { %112 = vmatprep.subr.bf16.mxu0 %v127_v0  ;;  %v124_v1 = vld [vmem:[%s175_s1] sm:$0xff]   ;;  %118 = vmatprep.mubr.msk.bf16.mxu0 %vm128_vm0, %v127_v0  ;;  %v125_v2 = vld [vmem:[%s175_s1 + $0x8] sm:$0xff]   ;;  %v126_v3 = vld [vmem:[%s175_s1 + $0x10] sm:$0xff]  }
   0x2   :  { %113 = vmatpush3.bf16.msra.mxu0 %v124_v1  ;;  %v18_v4 = vld [vmem:[%s176_s0] sm:$0xf] }
   0x3   :  { %114 = vmatprep.subr.bf16.mxu0 %v127_v0  ;;  %v94_v5 = vld [vmem:[%s177_s3] sm:$0xf] }
   0x4   :  { %v103_v6 = vld [vmem:[%s178_s2] ss:$0 sm:$0xff]  ;;  %v95_v7 = vunpack.c.l.bf16 %v94_v5 }
   0x6   :  { %115 = vmatpush3.bf16.msra.mxu0 %v125_v2 }
   0x7   :  { %116 = vmatprep.subr.bf16.mxu0 %v127_v0 }
   0xa   :  { %117 = vmatpush3.bf16.msra.mxu0 %v126_v3 }
   0xd   :  { %119 = vmatmul.mubr.msk.bf16.vlgmr.msra.gmra.mrb[0].mxu0 %vm50_vm1, %v18_v4 }
  0xe0   :  { %v88_v8 = vpop.f32.mrb[0].mxu0 }
  0xe1   :  { %v89_v9 = vadd.f32 %v103_v6, %v88_v8  ;;  %v120_v10 = vpop.f32.mrb[1].mxu0 }
  0xe2   :  { %v91_v11 = vpop.f32.mrb[2].mxu0 }
  0xe3   :  { %v96_v12 = vadd.f32 %v95_v7, %v89_v9  ;;  %v121_v13 = vpop.f32.mrb[3].mxu0 }
  0xe5   :  { %v97_v14 = vpack.c.bf16 %v96_v12, %v96_v12 }
  0xe7   :  { %98 = vst [vmem:[%s179_s4] sm:$0xf] %v97_v14 }

// kernel: retinanet_forward.37
= control target key start
LH: loop header
LB: loop body
LE: loop exit
PB: predicated region body
PF: predicated region fallthrough
CT: control target
= control target key end

     0   :  { %vm1124_vm0 = vmmov 0   ;;  %s1382_s1 = inlined_call_operand.vmem [shape: bf16[1152,128], index: 1, kind: input, shape index: {}]   ;;  %s1383_s0 = inlined_call_operand.vmem [shape: bf16[8,1152], index: 0, kind: input, shape index: {}]   ;;  %s1384_s2 = inlined_call_operand.vmem [shape: f32[1,128], index: 2, kind: input, shape index: {}]   ;;  %s1385_s3 = inlined_call_operand.vmem [shape: bf16[8,128], index: 3, kind: output, shape index: {}]  }
   0x1   :  { %v1042_v0 = vld [vmem:[%s1382_s1 + $0x40] sm:$0xff]   ;;  %v1046_v4 = vld [vmem:[%s1382_s1 + $0x48] sm:$0xff]   ;;  %v1050_v8 = vld [vmem:[%s1382_s1 + $0x50] sm:$0xff]  }
   0x2   :  { %v1043_v1 = vld [vmem:[%s1382_s1] sm:$0xff]   ;;  %923 = vmatprep.subr.bf16.mxu0 %v1042_v0  ;;  %v1047_v5 = vld [vmem:[%s1382_s1 + $0x8] sm:$0xff]   ;;  %v1051_v9 = vld [vmem:[%s1382_s1 + $0x10] sm:$0xff]  }
   0x3   :  { %v1044_v2 = vld [vmem:[%s1382_s1 + $0xc0] sm:$0xff]   ;;  %924 = vmatpush3.bf16.msra.mxu0 %v1043_v1  ;;  %v1048_v6 = vld [vmem:[%s1382_s1 + $0xc8] sm:$0xff]   ;;  %v1052_v10 = vld [vmem:[%s1382_s1 + $0xd0] sm:$0xff]  }
   0x4   :  { %v1045_v3 = vld [vmem:[%s1382_s1 + $0x80] sm:$0xff]   ;;  %945 = vmatprep.subr.bf16.mxu1 %v1044_v2  ;;  %925 = vmatprep.subr.bf16.mxu0 %v1046_v4  ;;  %v1049_v7 = vld [vmem:[%s1382_s1 + $0x88] sm:$0xff]   ;;  %v1053_v11 = vld [vmem:[%s1382_s1 + $0x90] sm:$0xff]  }
   0x5   :  { %946 = vmatpush3.bf16.msra.mxu1 %v1045_v3  ;;  %v1054_v12 = vld [vmem:[%s1382_s1 + $0x58] sm:$0xff]   ;;  %v1058_v16 = vld [vmem:[%s1382_s1 + $0x60] sm:$0xff]   ;;  %v1062_v20 = vld [vmem:[%s1382_s1 + $0x68] sm:$0xff]  }
   0x6   :  { %947 = vmatprep.subr.bf16.mxu1 %v1048_v6  ;;  %v1055_v13 = vld [vmem:[%s1382_s1 + $0x18] sm:$0xff]   ;;  %v1059_v17 = vld [vmem:[%s1382_s1 + $0x20] sm:$0xff]   ;;  %v1063_v21 = vld [vmem:[%s1382_s1 + $0x28] sm:$0xff]  }
   0x7   :  { %926 = vmatpush3.bf16.msra.mxu0 %v1047_v5  ;;  %v1056_v14 = vld [vmem:[%s1382_s1 + $0xd8] sm:$0xff]   ;;  %v1060_v18 = vld [vmem:[%s1382_s1 + $0xe0] sm:$0xff]   ;;  %v1064_v22 = vld [vmem:[%s1382_s1 + $0xe8] sm:$0xff]  }
   0x8   :  { %927 = vmatprep.subr.bf16.mxu0 %v1050_v8  ;;  %v1057_v15 = vld [vmem:[%s1382_s1 + $0x98] sm:$0xff]   ;;  %v1061_v19 = vld [vmem:[%s1382_s1 + $0xa0] sm:$0xff]   ;;  %v1065_v23 = vld [vmem:[%s1382_s1 + $0xa8] sm:$0xff]  }
   0x9   :  { %948 = vmatpush3.bf16.msra.mxu1 %v1049_v7  ;;  %v1066_v24 = vld [vmem:[%s1382_s1 + $0x70] sm:$0xff]   ;;  %v1070_v28 = vld [vmem:[%s1382_s1 + $0x78] sm:$0xff]   ;;  %v15_v31 = vld [vmem:[%s1383_s0] sm:$0xff] }
   0xa   :  { %949 = vmatprep.subr.bf16.mxu1 %v1052_v10  ;;  %v1067_v25 = vld [vmem:[%s1382_s1 + $0x30] sm:$0xff]   ;;  %v1071_v29 = vld [vmem:[%s1382_s1 + $0x38] sm:$0xff]   ;;  %v842_v32 = vcombine.low %v15_v31, %v15_v31  ;;  %v843_v33 = vcombine.high %v15_v31, %v15_v31  ;;  %v1076_v35 = vld [vmem:[%s1382_s1 + $0x140] sm:$0xff]  }
   0xb   :  { %928 = vmatpush3.bf16.msra.mxu0 %v1051_v9  ;;  %v1068_v26 = vld [vmem:[%s1382_s1 + $0xf0] sm:$0xff]   ;;  %v1072_v30 = vld [vmem:[%s1382_s1 + $0xf8] sm:$0xff]   ;;  %v16_v36 = vld [vmem:[%s1383_s0 + $0x8] sm:$0xff]  ;;  %v1123_v9 = vmov 0.0  }
   0xc   :  { %929 = vmatprep.subr.bf16.mxu0 %v1054_v12  ;;  %v1069_v27 = vld [vmem:[%s1382_s1 + $0xb0] sm:$0xff]   ;;  %v1075_v34 = vld [vmem:[%s1382_s1 + $0xb8] sm:$0xff]   ;;  %667 = vmatprep.mubr.bf16.mxu0 %v843_v33  ;;  %v844_v37 = vcombine.low %v16_v36, %v16_v36  ;;  %v845_v38 = vcombine.high %v16_v36, %v16_v36  ;;  %v1079_v39 = vld [vmem:[%s1382_s1 + $0x100] sm:$0xff]  }
   0xd   :  { %950 = vmatpush3.bf16.msra.mxu1 %v1053_v11  ;;  %v1080_v40 = vld [vmem:[%s1382_s1 + $0x1c0] sm:$0xff]   ;;  %v1082_v42 = vld [vmem:[%s1382_s1 + $0x148] sm:$0xff]   ;;  %v1086_v46 = vld [vmem:[%s1382_s1 + $0x150] sm:$0xff]  }
   0xe   :  { %951 = vmatprep.subr.bf16.mxu1 %v1056_v14  ;;  %707 = vmatprep.mubr.bf16.mxu1 %v845_v38  ;;  %v1081_v41 = vld [vmem:[%s1382_s1 + $0x180] sm:$0xff]   ;;  %v1083_v43 = vld [vmem:[%s1382_s1 + $0x108] sm:$0xff]   ;;  %v1087_v47 = vld [vmem:[%s1382_s1 + $0x110] sm:$0xff]  }
   0xf   :  { %930 = vmatpush3.bf16.msra.mxu0 %v1055_v13  ;;  %v1084_v44 = vld [vmem:[%s1382_s1 + $0x1c8] sm:$0xff]   ;;  %v1088_v48 = vld [vmem:[%s1382_s1 + $0x1d0] sm:$0xff]   ;;  %v1090_v50 = vld [vmem:[%s1382_s1 + $0x158] sm:$0xff]  }
  0x10   :  { %931 = vmatprep.subr.bf16.mxu0 %v1058_v16  ;;  %v1085_v45 = vld [vmem:[%s1382_s1 + $0x188] sm:$0xff]   ;;  %v1089_v49 = vld [vmem:[%s1382_s1 + $0x190] sm:$0xff]   ;;  %v1091_v51 = vld [vmem:[%s1382_s1 + $0x118] sm:$0xff]  }
  0x11   :  { %952 = vmatpush3.bf16.msra.mxu1 %v1057_v15  ;;  %v1092_v52 = vld [vmem:[%s1382_s1 + $0x1d8] sm:$0xff]   ;;  %v1094_v54 = vld [vmem:[%s1382_s1 + $0x160] sm:$0xff]   ;;  %v1098_v58 = vld [vmem:[%s1382_s1 + $0x168] sm:$0xff]  }
  0x12   :  { %953 = vmatprep.subr.bf16.mxu1 %v1060_v18  ;;  %v1093_v53 = vld [vmem:[%s1382_s1 + $0x198] sm:$0xff]   ;;  %v1095_v55 = vld [vmem:[%s1382_s1 + $0x120] sm:$0xff]   ;;  %v1099_v59 = vld [vmem:[%s1382_s1 + $0x128] sm:$0xff]  }
  0x13   :  { %932 = vmatpush3.bf16.msra.mxu0 %v1059_v17  ;;  %v1096_v56 = vld [vmem:[%s1382_s1 + $0x1e0] sm:$0xff]   ;;  %v1100_v60 = vld [vmem:[%s1382_s1 + $0x1e8] sm:$0xff]   ;;  %v1102_v62 = vld [vmem:[%s1382_s1 + $0x170] sm:$0xff]  }
  0x14   :  { %933 = vmatprep.subr.bf16.mxu0 %v1062_v20  ;;  %v1097_v57 = vld [vmem:[%s1382_s1 + $0x1a0] sm:$0xff]   ;;  %v1101_v61 = vld [vmem:[%s1382_s1 + $0x1a8] sm:$0xff]   ;;  %v1103_v63 = vld [vmem:[%s1382_s1 + $0x130] sm:$0xff]  }
  0x15   :  { %954 = vmatpush3.bf16.msra.mxu1 %v1061_v19  ;;  %v1104_v0 = vld [vmem:[%s1382_s1 + $0x1f0] sm:$0xff]   ;;  %v1106_v2 = vld [vmem:[%s1382_s1 + $0x178] sm:$0xff]   ;;  %v1114_v13 = vld [vmem:[%s1382_s1 + $0x200] sm:$0xff]  }
  0x16   :  { %955 = vmatprep.subr.bf16.mxu1 %v1064_v22  ;;  %v1105_v1 = vld [vmem:[%s1382_s1 + $0x1b0] sm:$0xff]   ;;  %v1107_v3 = vld [vmem:[%s1382_s1 + $0x138] sm:$0xff]   ;;  %v1115_v14 = vld [vmem:[%s1382_s1 + $0x208] sm:$0xff]  }
  0x17   :  { %934 = vmatpush3.bf16.msra.mxu0 %v1063_v21  ;;  %v1108_v4 = vld [vmem:[%s1382_s1 + $0x1f8] sm:$0xff]   ;;  %v17_v5 = vld [vmem:[%s1383_s0 + $0x10] sm:$0xff]  ;;  %v1118_v17 = vld [vmem:[%s1382_s1 + $0x220] sm:$0xff]  }
  0x18   :  { %935 = vmatprep.subr.bf16.mxu0 %v1066_v24  ;;  %v846_v6 = vcombine.low %v17_v5, %v17_v5  ;;  %v847_v7 = vcombine.high %v17_v5, %v17_v5  ;;  %v1111_v8 = vld [vmem:[%s1382_s1 + $0x1b8] sm:$0xff]   ;;  %v1116_v15 = vld [vmem:[%s1382_s1 + $0x210] sm:$0xff]   ;;  %v1119_v18 = vld [vmem:[%s1382_s1 + $0x228] sm:$0xff]  }
  0x19   :  { %956 = vmatpush3.bf16.msra.mxu1 %v1065_v23  ;;  %v18_v10 = vld [vmem:[%s1383_s0 + $0x18] sm:$0xff]  ;;  %v1120_v19 = vld [vmem:[%s1382_s1 + $0x230] sm:$0xff]   ;;  %v1122_v21 = vld [vmem:[%s1383_s0 + $0x20] ss:$0 sps:$4 sm:$0xff]  }
  0x1a   :  { %957 = vmatprep.subr.bf16.mxu1 %v1068_v26  ;;  %v848_v11 = vcombine.low %v18_v10, %v18_v10  ;;  %v849_v12 = vcombine.high %v18_v10, %v18_v10  ;;  %v1117_v16 = vld [vmem:[%s1382_s1 + $0x218] sm:$0xff]   ;;  %v841_v23 = vld [vmem:[%s1384_s2] ss:$0 sm:$0xff] }
  0x1b   :  { %936 = vmatpush3.bf16.msra.mxu0 %v1067_v25  ;;  %v1121_v20 = vld [vmem:[%s1382_s1 + $0x238] sm:$0xff]  }
  0x1c   :  { %937 = vmatprep.subr.bf16.mxu0 %v1070_v28 }
  0x1d   :  { %958 = vmatpush3.bf16.msra.mxu1 %v1069_v27 }
  0x1e   :  { %959 = vmatprep.subr.bf16.mxu1 %v1072_v30 }
  0x1f   :  { %938 = vmatpush3.bf16.msra.mxu0 %v1071_v29 }
  0x20   :  { %967 = vmatprep.subr.bf16.mxu0 %v1076_v35 }
  0x21   :  { %960 = vmatpush3.bf16.msra.mxu1 %v1075_v34 }
  0x22   :  { %668 = vmatmul.mubr.bf16.vlgmr.msra.gmra.mrb[0].mxu0 %v842_v32  ;;  %989 = vmatprep.subr.bf16.mxu1 %v1080_v40 }
  0x23   :  { %968 = vmatpush3.bf16.msra.mxu0 %v1079_v39  ;;  %747 = vmatprep.mubr.bf16.mxu0 %v847_v7 }
  0x24   :  { %708 = vmatmul.mubr.bf16.vlgmr.msra.gmra.mrb[0].mxu1 %v844_v37  ;;  %969 = vmatprep.subr.bf16.mxu0 %v1082_v42 }
  0x25   :  { %990 = vmatpush3.bf16.msra.mxu1 %v1081_v41  ;;  %787 = vmatprep.mubr.bf16.mxu1 %v849_v12 }
  0x26   :  { %991 = vmatprep.subr.bf16.mxu1 %v1084_v44 }
  0x27   :  { %970 = vmatpush3.bf16.msra.mxu0 %v1083_v43 }
  0x28   :  { %971 = vmatprep.subr.bf16.mxu0 %v1086_v46 }
  0x29   :  { %992 = vmatpush3.bf16.msra.mxu1 %v1085_v45 }
  0x2a   :  { %993 = vmatprep.subr.bf16.mxu1 %v1088_v48 }
  0x2b   :  { %972 = vmatpush3.bf16.msra.mxu0 %v1087_v47 }
  0x2c   :  { %973 = vmatprep.subr.bf16.mxu0 %v1090_v50 }
  0x2d   :  { %994 = vmatpush3.bf16.msra.mxu1 %v1089_v49 }
  0x2e   :  { %995 = vmatprep.subr.bf16.mxu1 %v1092_v52 }
  0x2f   :  { %974 = vmatpush3.bf16.msra.mxu0 %v1091_v51 }
  0x30   :  { %975 = vmatprep.subr.bf16.mxu0 %v1094_v54 }
  0x31   :  { %996 = vmatpush3.bf16.msra.mxu1 %v1093_v53 }
  0x32   :  { %997 = vmatprep.subr.bf16.mxu1 %v1096_v56 }
  0x33   :  { %976 = vmatpush3.bf16.msra.mxu0 %v1095_v55 }
  0x34   :  { %977 = vmatprep.subr.bf16.mxu0 %v1098_v58 }
  0x35   :  { %998 = vmatpush3.bf16.msra.mxu1 %v1097_v57 }
  0x36   :  { %999 = vmatprep.subr.bf16.mxu1 %v1100_v60 }
  0x37   :  { %978 = vmatpush3.bf16.msra.mxu0 %v1099_v59 }
  0x38   :  { %979 = vmatprep.subr.bf16.mxu0 %v1102_v62 }
  0x39   :  { %1000 = vmatpush3.bf16.msra.mxu1 %v1101_v61 }
  0x3a   :  { %1001 = vmatprep.subr.bf16.mxu1 %v1104_v0 }
  0x3b   :  { %980 = vmatpush3.bf16.msra.mxu0 %v1103_v63 }
  0x3c   :  { %981 = vmatprep.subr.bf16.mxu0 %v1106_v2 }
  0x3d   :  { %1002 = vmatpush3.bf16.msra.mxu1 %v1105_v1 }
  0x3e   :  { %1003 = vmatprep.subr.bf16.mxu1 %v1108_v4 }
  0x3f   :  { %982 = vmatpush3.bf16.msra.mxu0 %v1107_v3 }
  0x40   :  { %1020 = vmatprep.subr.bf16.mxu0 %v1123_v9 }
  0x41   :  { %1004 = vmatpush3.bf16.msra.mxu1 %v1111_v8 }
  0x42   :  { %748 = vmatmul.mubr.bf16.vlgmr.msra.gmra.mrb[4].mxu0 %v846_v6 }
  0x43   :  { %1021 = vmatpush3.bf16.msra.mxu0 %v1114_v13  ;;  %1036 = vmatprep.mubr.msk.bf16.mxu0 %vm1124_vm0, %v1123_v9 }
  0x44   :  { %788 = vmatmul.mubr.bf16.vlgmr.msra.gmra.mrb[4].mxu1 %v848_v11  ;;  %1022 = vmatprep.subr.bf16.mxu0 %v1123_v9 }
  0x47   :  { %1023 = vmatpush3.bf16.msra.mxu0 %v1115_v14 }
  0x48   :  { %1024 = vmatprep.subr.bf16.mxu0 %v1123_v9 }
  0x4b   :  { %1025 = vmatpush3.bf16.msra.mxu0 %v1116_v15 }
  0x4c   :  { %1026 = vmatprep.subr.bf16.mxu0 %v1123_v9 }
  0x4f   :  { %1027 = vmatpush3.bf16.msra.mxu0 %v1117_v16 }
  0x50   :  { %1028 = vmatprep.subr.bf16.mxu0 %v1123_v9 }
  0x53   :  { %1029 = vmatpush3.bf16.msra.mxu0 %v1118_v17 }
  0x54   :  { %1030 = vmatprep.subr.bf16.mxu0 %v1123_v9 }
  0x57   :  { %1031 = vmatpush3.bf16.msra.mxu0 %v1119_v18 }
  0x58   :  { %1032 = vmatprep.subr.bf16.mxu0 %v1123_v9 }
  0x5b   :  { %1033 = vmatpush3.bf16.msra.mxu0 %v1120_v19 }
  0x5c   :  { %1034 = vmatprep.subr.bf16.mxu0 %v1123_v9 }
  0x5f   :  { %1035 = vmatpush3.bf16.msra.mxu0 %v1121_v20 }
  0x62   :  { %1037 = vmatmul.mubr.bf16.vlgmr.msra.gmra.mrb[8].mxu0 %v1122_v21 }
  0xf5   :  { %v939_v22 = vpop.f32.mrb[0].mxu0 }
  0xf6   :  { %v940_v24 = vpop.f32.mrb[1].mxu0 }
  0xf7   :  { %v941_v25 = vadd.f32 %v940_v24, %v939_v22  ;;  %v942_v26 = vpop.f32.mrb[2].mxu0  ;;  %v961_v27 = vpop.f32.mrb[0].mxu1 }
  0xf8   :  { %v943_v28 = vpop.f32.mrb[3].mxu0  ;;  %v962_v29 = vpop.f32.mrb[1].mxu1 }
  0xf9   :  { %v670_v30 = vadd.f32 %v941_v25, %v841_v23  ;;  %v963_v31 = vadd.f32 %v962_v29, %v961_v27  ;;  %v964_v32 = vpop.f32.mrb[2].mxu1 }
  0xfa   :  { %v965_v33 = vpop.f32.mrb[3].mxu1 }
  0xfb   :  { %v710_v34 = vadd.f32 %v963_v31, %v670_v30 }
 0x115   :  { %v983_v35 = vpop.f32.mrb[4].mxu0 }
 0x116   :  { %v984_v36 = vpop.f32.mrb[5].mxu0 }
 0x117   :  { %v985_v37 = vadd.f32 %v984_v36, %v983_v35  ;;  %v986_v38 = vpop.f32.mrb[6].mxu0  ;;  %v1005_v39 = vpop.f32.mrb[4].mxu1 }
 0x118   :  { %v987_v40 = vpop.f32.mrb[7].mxu0  ;;  %v1006_v41 = vpop.f32.mrb[5].mxu1 }
 0x119   :  { %v750_v42 = vadd.f32 %v985_v37, %v710_v34  ;;  %v1007_v43 = vadd.f32 %v1006_v41, %v1005_v39  ;;  %v1008_v44 = vpop.f32.mrb[6].mxu1 }
 0x11a   :  { %v1009_v45 = vpop.f32.mrb[7].mxu1 }
 0x11b   :  { %v790_v46 = vadd.f32 %v1007_v43, %v750_v42 }
 0x135   :  { %v829_v47 = vpop.f32.mrb[8].mxu0 }
 0x136   :  { %v830_v48 = vadd.f32 %v829_v47, %v790_v46  ;;  %v1038_v49 = vpop.f32.mrb[9].mxu0 }
 0x137   :  { %v832_v50 = vpop.f32.mrb[10].mxu0 }
 0x138   :  { %v835_v51 = vpack.c.bf16 %v830_v48, %v830_v48  ;;  %v1039_v52 = vpop.f32.mrb[11].mxu0 }
 0x13a   :  { %836 = vst [vmem:[%s1385_s3] sm:$0xf] %v835_v51 }

// kernel: retinanet_forward.40
= control target key start
LH: loop header
LB: loop body
LE: loop exit
PB: predicated region body
PF: predicated region fallthrough
CT: control target
= control target key end

     0   :  { %vm51_vm0 = vcmask 195584   ;;  %vm58_vm1 = vcmask 1043456   ;;  %s251_s1 = inlined_call_operand.vmem [shape: bf16[24,128], index: 1, kind: input, shape index: {}]   ;;  %s252_s0 = inlined_call_operand.vmem [shape: bf16[32,24], index: 0, kind: input, shape index: {}]   ;;  %s253_s2 = inlined_call_operand.vmem [shape: f32[1,128], index: 2, kind: input, shape index: {}]   ;;  %s254_s3 = inlined_call_operand.vmem [shape: bf16[32,128], index: 3, kind: input, shape index: {}]   ;;  %s255_s4 = inlined_call_operand.vmem [shape: bf16[32,128], index: 4, kind: output, shape index: {}]  }
   0x1   :  { %v195_v0 = vld [vmem:[%s251_s1] sm:$0xff]   ;;  %v196_v1 = vld [vmem:[%s251_s1 + $0x8] ss:$0 sps:$4 sm:$0xff]  }
   0x2   :  { %v197_v2 = vld [vmem:[%s252_s0] sm:$0xff]   ;;  %186 = vmatprep.subr.bf16.mxu0 %v195_v0  ;;  %v60_v3 = vsel %vm58_vm1, %v196_v1, 0  ;;  %v198_v4 = vld [vmem:[%s252_s0 + $0x8] sm:$0xff]  }
   0x3   :  { %187 = vmatpush3.bf16.msra.mxu0 %v195_v0  ;;  %190 = vmatprep.mubr.msk.bf16.mxu0 %vm51_vm0, %v197_v2  ;;  %v147_v5 = vld [vmem:[%s253_s2] ss:$0 sm:$0xff]  ;;  %v180_v6 = vld [vmem:[%s254_s3 + $0x8] sm:$0xff]  }
   0x4   :  { %194 = vmatprep.subr.msk.bf16.mxu0 %vm58_vm1, %v196_v1  ;;  %v163_v7 = vld [vmem:[%s254_s3] sm:$0xff]   ;;  %v168_v10 = vunpack.c.l.bf16 %v180_v6  ;;  %v169_v12 = vunpack.c.h.bf16 %v180_v6 }
   0x5   :  { %v164_v14 = vunpack.c.l.bf16 %v163_v7  ;;  %v165_v16 = vunpack.c.h.bf16 %v163_v7 }
   0x7   :  { %189 = vmatpush3.bf16.msra.mxu0 %v60_v3 }
   0xa   :  { %191 = vmatmul.mubr.msk.bf16.vlgmr.msra.gmra.mrb[0].mxu0 %vm51_vm0, %v198_v4 }
  0xdd   :  { %v192_v8 = vpop.f32.mrb[0].mxu0 }
  0xde   :  { %v105_v9 = vadd.f32 %v192_v8, %v147_v5  ;;  %v96_v11 = vpop.f32.mrb[1].mxu0 }
  0xdf   :  { %v97_v13 = vadd.f32 %v147_v5, %v96_v11  ;;  %v193_v15 = vpop.f32.mrb[2].mxu0 }
  0xe0   :  { %v108_v17 = vadd.f32 %v193_v15, %v147_v5  ;;  %v99_v18 = vpop.f32.mrb[3].mxu0  ;;  %v121_v20 = vadd.f32 %v168_v10, %v105_v9 }
  0xe1   :  { %v100_v19 = vadd.f32 %v147_v5, %v99_v18  ;;  %v119_v22 = vadd.f32 %v164_v14, %v97_v13 }
  0xe2   :  { %v122_v21 = vadd.f32 %v169_v12, %v108_v17 }
  0xe3   :  { %v120_v23 = vadd.f32 %v165_v16, %v100_v19 }
  0xe4   :  { %v178_v24 = vpack.c.bf16 %v122_v21, %v121_v20 }
  0xe5   :  { %v173_v25 = vpack.c.bf16 %v120_v23, %v119_v22 }
  0xe6   :  { %181 = vst [vmem:[%s255_s4 + $0x8] sm:$0xff] %v178_v24  }
  0xe7   :  { %174 = vst [vmem:[%s255_s4] sm:$0xff] %v173_v25  }

// kernel: retinanet_forward.42
= control target key start
LH: loop header
LB: loop body
LE: loop exit
PB: predicated region body
PF: predicated region fallthrough
CT: control target
= control target key end

     0   :  { %s1286_s15 = smov 0   ;;  %s1421_s0 = inlined_call_operand.vmem [shape: bf16[512,12], index: 0, kind: input, shape index: {}]   ;;  %s1422_s1 = inlined_call_operand.vmem [shape: bf16[12,128], index: 1, kind: input, shape index: {}]   ;;  %s1423_s2 = inlined_call_operand.vmem [shape: f32[1,128], index: 2, kind: input, shape index: {}]   ;;  %s1424_s3 = inlined_call_operand.vmem [shape: bf16[512,128], index: 3, kind: input, shape index: {}]   ;;  %s1425_s4 = inlined_call_operand.vmem [shape: bf16[512,128], index: 4, kind: output, shape index: {}]  }
   0x1 LB: > { %s888_s16 = sadd.s32 4294967295, %s1259_s15   ;;  %p892_p0 = scmp.ge.s32.totalorder %s1259_s15, 1  ;;  %s1259_s15 = sphi %s1286_s15, %s14_s15  }
   0x2   : > { %p174_p1 = scmp.lt.s32.totalorder %s1259_s15, 3 }
   0x4   : > { %p175_p2 = pnand %p892_p0, %p174_p1 }
   0x5   : > { %v1236_v0 = vld [vmem:[%s1422_s1] sm:$0x3f] (!%p175_p2)   ;;  %vm399_vm0 = vcmask (!%p175_p2), 1045504   ;;  %s893_s19 = sshll.u32 (!%p175_p2), %s888_s16, 5  ;;  %vm350_vm1 = vcmask (!%p175_p2), 97280  }
   0x6   : > { %178 = sbr.rel (%p175_p2) target bundleno = 265 (0x109), region = 36  ;;  %1226 = vmatprep.subr.msk.bf16.mxu0 (!%p175_p2), %vm399_vm0, %v1236_v0  ;;  %1227 = vmatprep.subr.msk.bf16.mxu1 (!%p175_p2), %vm399_vm0, %v1236_v0  ;;  %v401_v1 = vsel (!%p175_p2), %vm399_vm0, %v1236_v0, 0  ;;  %p206_p3 = scmp.lt.s32.totalorder (!%p175_p2), %s893_s19, 63  ;;  %v1347_v19 = vld [vmem:[%s1423_s2] ss:$0 sm:$0xff] (!%p175_p2) }
   0x7   : > { %1191 = vmatpush3.bf16.msra.mxu0 (!%p175_p2), %v401_v1  ;;  %1225 = vmatpush3.bf16.msra.mxu1 (!%p175_p2), %v401_v1 }
   0xd   : > { %s1427_s19 = smov (!%p206_p3, %s893_s19), 63 }
   0xe   : > { %s1297_s20 = sshll.u32 %s1427_s19, 2 }
   0xf   : > { %s1303_s23 = scalar_lea.vmem %s1421_s0, %s1297_s20  ;;  %s1341_s26 = scalar_lea.vmem %s1424_s3, %s1297_s20 }
  0x10   : > { %v1237_v2 = vld [vmem:[%s1303_s23] sm:$0xff]   ;;  %v1239_v4 = vld [vmem:[%s1303_s23 + $0x8] sm:$0xff]   ;;  %v1241_v6 = vld [vmem:[%s1303_s23 + $0x10] sm:$0xff]   ;;  %s1366_s5 = scalar_lea.vmem %s1425_s4, %s1297_s20 }
  0x11   : > { %v1238_v3 = vld [vmem:[%s1303_s23 + $0x40] sm:$0xff]   ;;  %1192 = vmatprep.mubr.msk.bf16.mxu0 %vm350_vm1, %v1237_v2  ;;  %v1240_v5 = vld [vmem:[%s1303_s23 + $0x48] sm:$0xff]   ;;  %v1242_v7 = vld [vmem:[%s1303_s23 + $0x50] sm:$0xff]  }
  0x12   : > { %1208 = vmatprep.mubr.msk.bf16.mxu1 %vm350_vm1, %v1238_v3  ;;  %1193 = vmatmul.mubr.msk.bf16.vlgmr.msra.gmra.mrb[0].mxu0 %vm350_vm1, %v1239_v4  ;;  %v1243_v8 = vld [vmem:[%s1303_s23 + $0x18] sm:$0xff]   ;;  %v1245_v10 = vld [vmem:[%s1303_s23 + $0x20] sm:$0xff]   ;;  %v1247_v12 = vld [vmem:[%s1303_s23 + $0x28] sm:$0xff]  }
  0x13   : > { %1209 = vmatmul.mubr.msk.bf16.vlgmr.msra.gmra.mrb[0].mxu1 %vm350_vm1, %v1240_v5  ;;  %1196 = vmatprep.mubr.msk.bf16.mxu0 %vm350_vm1, %v1241_v6  ;;  %v1244_v9 = vld [vmem:[%s1303_s23 + $0x58] sm:$0xff]   ;;  %v1246_v11 = vld [vmem:[%s1303_s23 + $0x60] sm:$0xff]   ;;  %v1248_v13 = vld [vmem:[%s1303_s23 + $0x68] sm:$0xff]  }
  0x14   : > { %1212 = vmatprep.mubr.msk.bf16.mxu1 %vm350_vm1, %v1242_v7  ;;  %v1249_v14 = vld [vmem:[%s1303_s23 + $0x30] sm:$0xff]   ;;  %v1251_v16 = vld [vmem:[%s1303_s23 + $0x38] sm:$0xff]   ;;  %v1143_v18 = vld [vmem:[%s1341_s26 + $0x8] sm:$0xff]  }
  0x15   : > { %v1250_v15 = vld [vmem:[%s1303_s23 + $0x70] sm:$0xff]   ;;  %v1252_v17 = vld [vmem:[%s1303_s23 + $0x78] sm:$0xff]   ;;  %v1151_v20 = vld [vmem:[%s1341_s26 + $0x48] sm:$0xff]   ;;  %v1005_v23 = vunpack.c.l.bf16 %v1143_v18  ;;  %v1006_v30 = vunpack.c.h.bf16 %v1143_v18 }
  0x16   : > { %v1000_v21 = vld [vmem:[%s1341_s26] sm:$0xff]   ;;  %v1037_v27 = vunpack.c.l.bf16 %v1151_v20  ;;  %v1038_v35 = vunpack.c.h.bf16 %v1151_v20  ;;  %v1145_v49 = vld [vmem:[%s1341_s26 + $0x18] sm:$0xff]   ;;  %v1144_v55 = vld [vmem:[%s1341_s26 + $0x10] sm:$0xff]  }
  0x17   : > { %v1150_v24 = vld [vmem:[%s1341_s26 + $0x40] sm:$0xff]   ;;  %v1001_v29 = vunpack.c.l.bf16 %v1000_v21  ;;  %v1002_v36 = vunpack.c.h.bf16 %v1000_v21  ;;  %v1153_v50 = vld [vmem:[%s1341_s26 + $0x58] sm:$0xff]   ;;  %v1013_v62 = vunpack.c.l.bf16 %v1145_v49  ;;  %v1152_v0 = vld [vmem:[%s1341_s26 + $0x50] sm:$0xff]   ;;  %v1009_v5 = vunpack.c.l.bf16 %v1144_v55 }
  0x18   : > { %v1033_v38 = vunpack.c.l.bf16 %v1150_v24  ;;  %v1034_v42 = vunpack.c.h.bf16 %v1150_v24  ;;  %v1045_v63 = vunpack.c.l.bf16 %v1153_v50  ;;  %v1014_v6 = vunpack.c.h.bf16 %v1145_v49 }
  0x19   : > { %v1042_v18 = vunpack.c.h.bf16 %v1152_v0 }
  0x1a   : > { %1197 = vmatmul.mubr.msk.bf16.gmra.mrb[4].mxu0 %vm350_vm1, %v1243_v8 }
  0x1b   : > { %1213 = vmatmul.mubr.msk.bf16.gmra.mrb[4].mxu1 %vm350_vm1, %v1244_v9  ;;  %1200 = vmatprep.mubr.msk.bf16.mxu0 %vm350_vm1, %v1245_v10 }
  0x1c   : > { %1216 = vmatprep.mubr.msk.bf16.mxu1 %vm350_vm1, %v1246_v11  ;;  %v1046_v11 = vunpack.c.h.bf16 %v1153_v50 }
  0x22   : > { %1201 = vmatmul.mubr.msk.bf16.gmra.mrb[8].mxu0 %vm350_vm1, %v1247_v12  ;;  %v1010_v12 = vunpack.c.h.bf16 %v1144_v55 }
  0x23   : > { %1217 = vmatmul.mubr.msk.bf16.gmra.mrb[8].mxu1 %vm350_vm1, %v1248_v13  ;;  %1204 = vmatprep.mubr.msk.bf16.mxu0 %vm350_vm1, %v1249_v14  ;;  %v1041_v14 = vunpack.c.l.bf16 %v1152_v0 }
  0x24   : > { %1220 = vmatprep.mubr.msk.bf16.mxu1 %vm350_vm1, %v1250_v15 }
  0x2a   : > { %1205 = vmatmul.mubr.msk.bf16.gmra.mrb[12].mxu0 %vm350_vm1, %v1251_v16 }
  0x2b   : > { %1221 = vmatmul.mubr.msk.bf16.gmra.mrb[12].mxu1 %vm350_vm1, %v1252_v17 }
  0xe5   : > { %v1194_v22 = vpop.f32.mrb[0].mxu0 }
  0xe6   : > { %v446_v25 = vadd.f32 %v1194_v22, %v1347_v19  ;;  %v1210_v26 = vpop.f32.mrb[0].mxu1  ;;  %v437_v28 = vpop.f32.mrb[1].mxu0 }
  0xe7   : > { %v510_v31 = vadd.f32 %v1210_v26, %v1347_v19  ;;  %v438_v32 = vadd.f32 %v1347_v19, %v437_v28  ;;  %v501_v33 = vpop.f32.mrb[1].mxu1  ;;  %v1195_v34 = vpop.f32.mrb[2].mxu0  ;;  %v1147_v26 = vld [vmem:[%s1341_s26 + $0x28] sm:$0xff]  }
  0xe8   : > { %v502_v37 = vadd.f32 %v1347_v19, %v501_v33  ;;  %v449_v39 = vadd.f32 %v1195_v34, %v1347_v19  ;;  %v1211_v40 = vpop.f32.mrb[2].mxu1  ;;  %v440_v41 = vpop.f32.mrb[3].mxu0  ;;  %v630_v46 = vadd.f32 %v1005_v23, %v446_v25 }
  0xe9   : > { %v513_v43 = vadd.f32 %v1211_v40, %v1347_v19  ;;  %v441_v44 = vadd.f32 %v1347_v19, %v440_v41  ;;  %v504_v45 = vpop.f32.mrb[3].mxu1  ;;  %v646_v51 = vadd.f32 %v1037_v27, %v510_v31  ;;  %v628_v52 = vadd.f32 %v1001_v29, %v438_v32  ;;  %v1155_v27 = vld [vmem:[%s1341_s26 + $0x68] sm:$0xff]   ;;  %v1146_v32 = vld [vmem:[%s1341_s26 + $0x20] sm:$0xff]  }
  0xea   : > { %v631_v47 = vadd.f32 %v1006_v30, %v449_v39  ;;  %v505_v48 = vadd.f32 %v1347_v19, %v504_v45  ;;  %v644_v56 = vadd.f32 %v1033_v38, %v502_v37  ;;  %v1021_v39 = vunpack.c.l.bf16 %v1147_v26  ;;  %v1154_v41 = vld [vmem:[%s1341_s26 + $0x60] sm:$0xff]  }
  0xeb   : > { %v647_v53 = vadd.f32 %v1038_v35, %v513_v43  ;;  %v629_v54 = vadd.f32 %v1002_v36, %v441_v44  ;;  %v1053_v40 = vunpack.c.l.bf16 %v1155_v27  ;;  %v1049_v55 = vunpack.c.l.bf16 %v1154_v41 }
  0xec   : > { %v1071_v57 = vpack.c.bf16 %v631_v47, %v630_v46  ;;  %v645_v58 = vadd.f32 %v1034_v42, %v505_v48  ;;  %v1017_v46 = vunpack.c.l.bf16 %v1146_v32  ;;  %v1022_v47 = vunpack.c.h.bf16 %v1147_v26 }
  0xed   : > { %v1111_v59 = vpack.c.bf16 %v647_v53, %v646_v51  ;;  %v1066_v60 = vpack.c.bf16 %v629_v54, %v628_v52  ;;  %v1198_v61 = vpop.f32.mrb[4].mxu0  ;;  %v1054_v52 = vunpack.c.h.bf16 %v1155_v27  ;;  %v1018_v53 = vunpack.c.h.bf16 %v1146_v32 }
  0xee   : > { %1158 = vst [vmem:[%s1366_s5 + $0x8] sm:$0xff] %v1071_v57   ;;  %v1106_v1 = vpack.c.bf16 %v645_v58, %v644_v56  ;;  %v462_v2 = vadd.f32 %v1198_v61, %v1347_v19  ;;  %v1214_v3 = vpop.f32.mrb[4].mxu1  ;;  %v453_v4 = vpop.f32.mrb[5].mxu0 }
  0xef   : > { %1166 = vst [vmem:[%s1366_s5 + $0x48] sm:$0xff] %v1111_v59   ;;  %1067 = vst [vmem:[%s1366_s5] sm:$0xff] %v1066_v60   ;;  %v526_v7 = vadd.f32 %v1214_v3, %v1347_v19  ;;  %v454_v8 = vadd.f32 %v1347_v19, %v453_v4  ;;  %v517_v9 = vpop.f32.mrb[5].mxu1  ;;  %v1199_v10 = vpop.f32.mrb[6].mxu0  ;;  %v1050_v59 = vunpack.c.h.bf16 %v1154_v41  ;;  %v1157_v3 = vld [vmem:[%s1341_s26 + $0x78] sm:$0xff]  }
  0xf0   : > { %1165 = vst [vmem:[%s1366_s5 + $0x40] sm:$0xff] %v1106_v1   ;;  %v518_v13 = vadd.f32 %v1347_v19, %v517_v9  ;;  %v465_v15 = vadd.f32 %v1199_v10, %v1347_v19  ;;  %v1215_v16 = vpop.f32.mrb[6].mxu1  ;;  %v456_v17 = vpop.f32.mrb[7].mxu0  ;;  %v634_v23 = vadd.f32 %v1013_v62, %v462_v2  ;;  %v1149_v2 = vld [vmem:[%s1341_s26 + $0x38] sm:$0xff]  }
  0xf1   : > { %v529_v20 = vadd.f32 %v1215_v16, %v1347_v19  ;;  %v457_v21 = vadd.f32 %v1347_v19, %v456_v17  ;;  %v520_v22 = vpop.f32.mrb[7].mxu1  ;;  %v650_v28 = vadd.f32 %v1045_v63, %v526_v7  ;;  %v632_v29 = vadd.f32 %v1009_v5, %v454_v8  ;;  %v1148_v8 = vld [vmem:[%s1341_s26 + $0x30] sm:$0xff]  }
  0xf2   : > { %v635_v24 = vadd.f32 %v1014_v6, %v465_v15  ;;  %v521_v25 = vadd.f32 %v1347_v19, %v520_v22  ;;  %v648_v33 = vadd.f32 %v1041_v14, %v518_v13  ;;  %v1029_v15 = vunpack.c.l.bf16 %v1149_v2  ;;  %v1156_v17 = vld [vmem:[%s1341_s26 + $0x70] sm:$0xff]  }
  0xf3   : > { %v651_v30 = vadd.f32 %v1046_v11, %v529_v20  ;;  %v633_v31 = vadd.f32 %v1010_v12, %v457_v21  ;;  %v1061_v16 = vunpack.c.l.bf16 %v1157_v3  ;;  %v1057_v32 = vunpack.c.l.bf16 %v1156_v17 }
  0xf4   : > { %v1081_v34 = vpack.c.bf16 %v635_v24, %v634_v23  ;;  %v649_v35 = vadd.f32 %v1042_v18, %v521_v25  ;;  %v1025_v23 = vunpack.c.l.bf16 %v1148_v8  ;;  %v1030_v24 = vunpack.c.h.bf16 %v1149_v2 }
  0xf5   : > { %v1121_v36 = vpack.c.bf16 %v651_v30, %v650_v28  ;;  %v1076_v37 = vpack.c.bf16 %v633_v31, %v632_v29  ;;  %v1202_v38 = vpop.f32.mrb[8].mxu0  ;;  %v1062_v29 = vunpack.c.h.bf16 %v1157_v3  ;;  %v1026_v30 = vunpack.c.h.bf16 %v1148_v8 }
  0xf6   : > { %1160 = vst [vmem:[%s1366_s5 + $0x18] sm:$0xff] %v1081_v34   ;;  %v1116_v42 = vpack.c.bf16 %v649_v35, %v648_v33  ;;  %v478_v43 = vadd.f32 %v1202_v38, %v1347_v19  ;;  %v1218_v44 = vpop.f32.mrb[8].mxu1  ;;  %v469_v45 = vpop.f32.mrb[9].mxu0 }
  0xf7   : > { %1168 = vst [vmem:[%s1366_s5 + $0x58] sm:$0xff] %v1121_v36   ;;  %1159 = vst [vmem:[%s1366_s5 + $0x10] sm:$0xff] %v1076_v37   ;;  %v542_v48 = vadd.f32 %v1218_v44, %v1347_v19  ;;  %v470_v49 = vadd.f32 %v1347_v19, %v469_v45  ;;  %v533_v50 = vpop.f32.mrb[9].mxu1  ;;  %v1203_v51 = vpop.f32.mrb[10].mxu0  ;;  %v1058_v36 = vunpack.c.h.bf16 %v1156_v17 }
  0xf8   : > { %1167 = vst [vmem:[%s1366_s5 + $0x50] sm:$0xff] %v1116_v42   ;;  %v534_v54 = vadd.f32 %v1347_v19, %v533_v50  ;;  %v481_v56 = vadd.f32 %v1203_v51, %v1347_v19  ;;  %v1219_v57 = vpop.f32.mrb[10].mxu1  ;;  %v472_v58 = vpop.f32.mrb[11].mxu0  ;;  %v638_v63 = vadd.f32 %v1021_v39, %v478_v43 }
  0xf9   : > { %v545_v60 = vadd.f32 %v1219_v57, %v1347_v19  ;;  %v473_v61 = vadd.f32 %v1347_v19, %v472_v58  ;;  %v536_v62 = vpop.f32.mrb[11].mxu1  ;;  %v654_v4 = vadd.f32 %v1053_v40, %v542_v48  ;;  %v636_v5 = vadd.f32 %v1017_v46, %v470_v49 }
  0xfa   : > { %v639_v0 = vadd.f32 %v1022_v47, %v481_v56  ;;  %v537_v1 = vadd.f32 %v1347_v19, %v536_v62  ;;  %v652_v9 = vadd.f32 %v1049_v55, %v534_v54 }
  0xfb   : > { %v655_v6 = vadd.f32 %v1054_v52, %v545_v60  ;;  %v637_v7 = vadd.f32 %v1018_v53, %v473_v61 }
  0xfc   : > { %v1091_v10 = vpack.c.bf16 %v639_v0, %v638_v63  ;;  %v653_v11 = vadd.f32 %v1050_v59, %v537_v1 }
  0xfd   : > { %v1131_v12 = vpack.c.bf16 %v655_v6, %v654_v4  ;;  %v1086_v13 = vpack.c.bf16 %v637_v7, %v636_v5  ;;  %v1206_v14 = vpop.f32.mrb[12].mxu0 }
  0xfe   : > { %1162 = vst [vmem:[%s1366_s5 + $0x28] sm:$0xff] %v1091_v10   ;;  %v1126_v18 = vpack.c.bf16 %v653_v11, %v652_v9  ;;  %v494_v20 = vadd.f32 %v1206_v14, %v1347_v19  ;;  %v1222_v21 = vpop.f32.mrb[12].mxu1  ;;  %v485_v22 = vpop.f32.mrb[13].mxu0 }
  0xff   : > { %1170 = vst [vmem:[%s1366_s5 + $0x68] sm:$0xff] %v1131_v12   ;;  %1161 = vst [vmem:[%s1366_s5 + $0x20] sm:$0xff] %v1086_v13   ;;  %v558_v25 = vadd.f32 %v1222_v21, %v1347_v19  ;;  %v486_v26 = vadd.f32 %v1347_v19, %v485_v22  ;;  %v549_v27 = vpop.f32.mrb[13].mxu1  ;;  %v1207_v28 = vpop.f32.mrb[14].mxu0 }
 0x100   : > { %1169 = vst [vmem:[%s1366_s5 + $0x60] sm:$0xff] %v1126_v18   ;;  %v550_v31 = vadd.f32 %v1347_v19, %v549_v27  ;;  %v497_v33 = vadd.f32 %v1207_v28, %v1347_v19  ;;  %v1223_v34 = vpop.f32.mrb[14].mxu1  ;;  %v488_v35 = vpop.f32.mrb[15].mxu0  ;;  %v642_v40 = vadd.f32 %v1029_v15, %v494_v20 }
 0x101   : > { %v561_v37 = vadd.f32 %v1223_v34, %v1347_v19  ;;  %v489_v38 = vadd.f32 %v1347_v19, %v488_v35  ;;  %v552_v39 = vpop.f32.mrb[15].mxu1  ;;  %v658_v43 = vadd.f32 %v1061_v16, %v558_v25  ;;  %v640_v44 = vadd.f32 %v1025_v23, %v486_v26 }
 0x102   : > { %v643_v41 = vadd.f32 %v1030_v24, %v497_v33  ;;  %v553_v42 = vadd.f32 %v1347_v19, %v552_v39  ;;  %v656_v47 = vadd.f32 %v1057_v32, %v550_v31 }
 0x103   : > { %v659_v45 = vadd.f32 %v1062_v29, %v561_v37  ;;  %v641_v46 = vadd.f32 %v1026_v30, %v489_v38 }
 0x104   : > { %v1101_v48 = vpack.c.bf16 %v643_v41, %v642_v40  ;;  %v657_v49 = vadd.f32 %v1058_v36, %v553_v42 }
 0x105   : > { %v1141_v50 = vpack.c.bf16 %v659_v45, %v658_v43  ;;  %v1096_v51 = vpack.c.bf16 %v641_v46, %v640_v44 }
 0x106   : > { %1164 = vst [vmem:[%s1366_s5 + $0x38] sm:$0xff] %v1101_v48   ;;  %v1136_v52 = vpack.c.bf16 %v657_v49, %v656_v47 }
 0x107   : > { %1172 = vst [vmem:[%s1366_s5 + $0x78] sm:$0xff] %v1141_v50   ;;  %1163 = vst [vmem:[%s1366_s5 + $0x30] sm:$0xff] %v1096_v51  }
 0x108   : > { %1171 = vst [vmem:[%s1366_s5 + $0x70] sm:$0xff] %v1136_v52  }
 0x109 PF: > { %s14_s15 = sadd.s32 1, %s1259_s15  }
 0x10a   : > { %p11_p4 = scmp.ge.s32.totalorder %s14_s15, 4  }
 0x10c   :  { %13 = sbr.rel (!%p11_p4) target bundleno = 1 (0x1), region = 69 }

// kernel: retinanet_forward.41
= control target key start
LH: loop header
LB: loop body
LE: loop exit
PB: predicated region body
PF: predicated region fallthrough
CT: control target
= control target key end

     0   :  { %s1628_s1 = inlined_call_operand.vmem [shape: bf16[1152,128], index: 1, kind: input, shape index: {}]   ;;  %s1629_s0 = inlined_call_operand.vmem [shape: bf16[32,1152], index: 0, kind: input, shape index: {}]   ;;  %s1630_s2 = inlined_call_operand.vmem [shape: f32[1,128], index: 2, kind: input, shape index: {}]   ;;  %s1631_s3 = inlined_call_operand.vmem [shape: bf16[32,128], index: 3, kind: output, shape index: {}]  }
   0x1   :  { %v1231_v0 = vld [vmem:[%s1628_s1 + $0x40] sm:$0xff]   ;;  %v1235_v4 = vld [vmem:[%s1628_s1 + $0x48] sm:$0xff]   ;;  %v1239_v8 = vld [vmem:[%s1628_s1 + $0x50] sm:$0xff]  }
   0x2   :  { %v1232_v1 = vld [vmem:[%s1628_s1] sm:$0xff]   ;;  %1089 = vmatprep.subr.bf16.mxu0 %v1231_v0  ;;  %v1236_v5 = vld [vmem:[%s1628_s1 + $0x8] sm:$0xff]   ;;  %v1240_v9 = vld [vmem:[%s1628_s1 + $0x10] sm:$0xff]  }
   0x3   :  { %v1233_v2 = vld [vmem:[%s1628_s1 + $0xc0] sm:$0xff]   ;;  %1090 = vmatpush3.bf16.msra.mxu0 %v1232_v1  ;;  %v1237_v6 = vld [vmem:[%s1628_s1 + $0xc8] sm:$0xff]   ;;  %v1241_v10 = vld [vmem:[%s1628_s1 + $0xd0] sm:$0xff]  }
   0x4   :  { %v1234_v3 = vld [vmem:[%s1628_s1 + $0x80] sm:$0xff]   ;;  %1117 = vmatprep.subr.bf16.mxu1 %v1233_v2  ;;  %1091 = vmatprep.subr.bf16.mxu0 %v1235_v4  ;;  %v1238_v7 = vld [vmem:[%s1628_s1 + $0x88] sm:$0xff]   ;;  %v1242_v11 = vld [vmem:[%s1628_s1 + $0x90] sm:$0xff]  }
   0x5   :  { %1118 = vmatpush3.bf16.msra.mxu1 %v1234_v3  ;;  %v1243_v12 = vld [vmem:[%s1628_s1 + $0x58] sm:$0xff]   ;;  %v1247_v16 = vld [vmem:[%s1628_s1 + $0x60] sm:$0xff]   ;;  %v1251_v20 = vld [vmem:[%s1628_s1 + $0x68] sm:$0xff]  }
   0x6   :  { %1119 = vmatprep.subr.bf16.mxu1 %v1237_v6  ;;  %v1244_v13 = vld [vmem:[%s1628_s1 + $0x18] sm:$0xff]   ;;  %v1248_v17 = vld [vmem:[%s1628_s1 + $0x20] sm:$0xff]   ;;  %v1252_v21 = vld [vmem:[%s1628_s1 + $0x28] sm:$0xff]  }
   0x7   :  { %1092 = vmatpush3.bf16.msra.mxu0 %v1236_v5  ;;  %v1245_v14 = vld [vmem:[%s1628_s1 + $0xd8] sm:$0xff]   ;;  %v1249_v18 = vld [vmem:[%s1628_s1 + $0xe0] sm:$0xff]   ;;  %v1253_v22 = vld [vmem:[%s1628_s1 + $0xe8] sm:$0xff]  }
   0x8   :  { %1093 = vmatprep.subr.bf16.mxu0 %v1239_v8  ;;  %v1246_v15 = vld [vmem:[%s1628_s1 + $0x98] sm:$0xff]   ;;  %v1250_v19 = vld [vmem:[%s1628_s1 + $0xa0] sm:$0xff]   ;;  %v1254_v23 = vld [vmem:[%s1628_s1 + $0xa8] sm:$0xff]  }
   0x9   :  { %1120 = vmatpush3.bf16.msra.mxu1 %v1238_v7  ;;  %v1255_v24 = vld [vmem:[%s1628_s1 + $0x70] sm:$0xff]   ;;  %v1259_v28 = vld [vmem:[%s1628_s1 + $0x78] sm:$0xff]   ;;  %v1262_v31 = vld [vmem:[%s1629_s0] ss:$36 sps:$4 sm:$0xff]  }
   0xa   :  { %1121 = vmatprep.subr.bf16.mxu1 %v1241_v10  ;;  %v1256_v25 = vld [vmem:[%s1628_s1 + $0x30] sm:$0xff]   ;;  %v1260_v29 = vld [vmem:[%s1628_s1 + $0x38] sm:$0xff]   ;;  %v1264_v32 = vld [vmem:[%s1629_s0 + $0x4] ss:$36 sps:$4 sm:$0xff]  }
   0xb   :  { %1094 = vmatpush3.bf16.msra.mxu0 %v1240_v9  ;;  %v1257_v26 = vld [vmem:[%s1628_s1 + $0xf0] sm:$0xff]   ;;  %v1261_v30 = vld [vmem:[%s1628_s1 + $0xf8] sm:$0xff]   ;;  %742 = vmatprep.mubr.bf16.mxu0 %v1264_v32  ;;  %v1266_v34 = vld [vmem:[%s1628_s1 + $0x140] sm:$0xff]  }
   0xc   :  { %1095 = vmatprep.subr.bf16.mxu0 %v1243_v12  ;;  %v1258_v27 = vld [vmem:[%s1628_s1 + $0xb0] sm:$0xff]   ;;  %v1265_v33 = vld [vmem:[%s1628_s1 + $0xb8] sm:$0xff]   ;;  %v1267_v35 = vld [vmem:[%s1629_s0 + $0x8] ss:$36 sps:$4 sm:$0xff]  }
   0xd   :  { %1122 = vmatpush3.bf16.msra.mxu1 %v1242_v11  ;;  %v1269_v36 = vld [vmem:[%s1629_s0 + $0xc] ss:$36 sps:$4 sm:$0xff]   ;;  %v1270_v37 = vld [vmem:[%s1628_s1 + $0x100] sm:$0xff]   ;;  %v1281_v48 = vld [vmem:[%s1628_s1 + $0x158] sm:$0xff]  }
   0xe   :  { %1123 = vmatprep.subr.bf16.mxu1 %v1245_v14  ;;  %791 = vmatprep.mubr.bf16.mxu1 %v1269_v36  ;;  %v1271_v38 = vld [vmem:[%s1628_s1 + $0x1c0] sm:$0xff]   ;;  %v1273_v40 = vld [vmem:[%s1628_s1 + $0x148] sm:$0xff]   ;;  %v1277_v44 = vld [vmem:[%s1628_s1 + $0x150] sm:$0xff]  }
   0xf   :  { %1096 = vmatpush3.bf16.msra.mxu0 %v1244_v13  ;;  %v1272_v39 = vld [vmem:[%s1628_s1 + $0x180] sm:$0xff]   ;;  %v1274_v41 = vld [vmem:[%s1628_s1 + $0x108] sm:$0xff]   ;;  %v1278_v45 = vld [vmem:[%s1628_s1 + $0x110] sm:$0xff]  }
  0x10   :  { %1097 = vmatprep.subr.bf16.mxu0 %v1247_v16  ;;  %v1275_v42 = vld [vmem:[%s1628_s1 + $0x1c8] sm:$0xff]   ;;  %v1279_v46 = vld [vmem:[%s1628_s1 + $0x1d0] sm:$0xff]   ;;  %v1282_v49 = vld [vmem:[%s1628_s1 + $0x118] sm:$0xff]  }
  0x11   :  { %1124 = vmatpush3.bf16.msra.mxu1 %v1246_v15  ;;  %v1276_v43 = vld [vmem:[%s1628_s1 + $0x188] sm:$0xff]   ;;  %v1280_v47 = vld [vmem:[%s1628_s1 + $0x190] sm:$0xff]   ;;  %v1283_v50 = vld [vmem:[%s1628_s1 + $0x1d8] sm:$0xff]  }
  0x12   :  { %1125 = vmatprep.subr.bf16.mxu1 %v1249_v18  ;;  %v1284_v51 = vld [vmem:[%s1628_s1 + $0x198] sm:$0xff]   ;;  %v1285_v52 = vld [vmem:[%s1628_s1 + $0x160] sm:$0xff]   ;;  %v1289_v56 = vld [vmem:[%s1628_s1 + $0x168] sm:$0xff]  }
  0x13   :  { %1098 = vmatpush3.bf16.msra.mxu0 %v1248_v17  ;;  %v1286_v53 = vld [vmem:[%s1628_s1 + $0x120] sm:$0xff]   ;;  %v1290_v57 = vld [vmem:[%s1629_s0 + $0x4c] ss:$36 sps:$4 sm:$0xff]   ;;  %v1295_v61 = vld [vmem:[%s1629_s0 + $0x54] ss:$36 sps:$4 sm:$0xff]  }
  0x14   :  { %1099 = vmatprep.subr.bf16.mxu0 %v1251_v20  ;;  %v1287_v54 = vld [vmem:[%s1628_s1 + $0x1e0] sm:$0xff]   ;;  %v1292_v58 = vld [vmem:[%s1628_s1 + $0x128] sm:$0xff]   ;;  %v1298_v63 = vld [vmem:[%s1629_s0 + $0x50] ss:$36 sps:$4 sm:$0xff]  }
  0x15   :  { %1126 = vmatpush3.bf16.msra.mxu1 %v1250_v19  ;;  %v1288_v55 = vld [vmem:[%s1628_s1 + $0x1a0] sm:$0xff]   ;;  %v1293_v59 = vld [vmem:[%s1629_s0 + $0x48] ss:$36 sps:$4 sm:$0xff]   ;;  %v1299_v0 = vld [vmem:[%s1628_s1 + $0x170] sm:$0xff]  }
  0x16   :  { %1127 = vmatprep.subr.bf16.mxu1 %v1253_v22  ;;  %v1294_v60 = vld [vmem:[%s1628_s1 + $0x1e8] sm:$0xff]   ;;  %v1300_v1 = vld [vmem:[%s1628_s1 + $0x130] sm:$0xff]   ;;  %v1303_v4 = vld [vmem:[%s1628_s1 + $0x178] sm:$0xff]  }
  0x17   :  { %1100 = vmatpush3.bf16.msra.mxu0 %v1252_v21  ;;  %v1297_v62 = vld [vmem:[%s1628_s1 + $0x1a8] sm:$0xff]   ;;  %v1301_v2 = vld [vmem:[%s1628_s1 + $0x1f0] sm:$0xff]   ;;  %v1304_v5 = vld [vmem:[%s1628_s1 + $0x138] sm:$0xff]  }
  0x18   :  { %1101 = vmatprep.subr.bf16.mxu0 %v1255_v24  ;;  %v1302_v3 = vld [vmem:[%s1628_s1 + $0x1b0] sm:$0xff]   ;;  %v1305_v6 = vld [vmem:[%s1628_s1 + $0x1f8] sm:$0xff]   ;;  %v1310_v10 = vld [vmem:[%s1628_s1 + $0x200] sm:$0xff]  }
  0x19   :  { %1128 = vmatpush3.bf16.msra.mxu1 %v1254_v23  ;;  %v1306_v7 = vld [vmem:[%s1629_s0 + $0x10] ss:$36 sps:$4 sm:$0xff]   ;;  %v1309_v9 = vld [vmem:[%s1628_s1 + $0x1b8] sm:$0xff]   ;;  %v1314_v13 = vld [vmem:[%s1628_s1 + $0x208] sm:$0xff]  }
  0x1a   :  { %1129 = vmatprep.subr.bf16.mxu1 %v1257_v26  ;;  %v1308_v8 = vld [vmem:[%s1629_s0 + $0x14] ss:$36 sps:$4 sm:$0xff]   ;;  %v1313_v12 = vld [vmem:[%s1629_s0 + $0x1c] ss:$36 sps:$4 sm:$0xff]   ;;  %v1319_v17 = vld [vmem:[%s1629_s0 + $0x64] ss:$36 sps:$4 sm:$0xff]  }
  0x1b   :  { %1102 = vmatpush3.bf16.msra.mxu0 %v1256_v25  ;;  %v1311_v11 = vld [vmem:[%s1629_s0 + $0x18] ss:$36 sps:$4 sm:$0xff]   ;;  %v1318_v16 = vld [vmem:[%s1628_s1 + $0x210] sm:$0xff]   ;;  %v1321_v18 = vld [vmem:[%s1629_s0 + $0x60] ss:$36 sps:$4 sm:$0xff]  }
  0x1c   :  { %1103 = vmatprep.subr.bf16.mxu0 %v1259_v28  ;;  %v1315_v14 = vld [vmem:[%s1629_s0 + $0x5c] ss:$36 sps:$4 sm:$0xff]   ;;  %v1324_v22 = vld [vmem:[%s1628_s1 + $0x228] sm:$0xff]   ;;  %v1325_v23 = vld [vmem:[%s1628_s1 + $0x230] sm:$0xff]  }
  0x1d   :  { %1130 = vmatpush3.bf16.msra.mxu1 %v1258_v27  ;;  %v1317_v15 = vld [vmem:[%s1629_s0 + $0x58] ss:$36 sps:$4 sm:$0xff]   ;;  %v1323_v20 = vld [vmem:[%s1628_s1 + $0x220] sm:$0xff]   ;;  %v1328_v25 = vld [vmem:[%s1629_s0 + $0x68] ss:$36 sps:$4 sm:$0xff]  }
  0x1e   :  { %1131 = vmatprep.subr.bf16.mxu1 %v1261_v30  ;;  %v1322_v19 = vld [vmem:[%s1628_s1 + $0x218] sm:$0xff]   ;;  %v1327_v21 = vld [vmem:[%s1629_s0 + $0x20] ss:$36 sps:$4 sm:$0xff]  }
  0x1f   :  { %1104 = vmatpush3.bf16.msra.mxu0 %v1260_v29  ;;  %v1326_v24 = vld [vmem:[%s1628_s1 + $0x238] sm:$0xff]   ;;  %v979_v27 = vld [vmem:[%s1630_s2] ss:$0 sm:$0xff] }
  0x20   :  { %1145 = vmatprep.subr.bf16.mxu0 %v1266_v34 }
  0x21   :  { %1132 = vmatpush3.bf16.msra.mxu1 %v1265_v33 }
  0x22   :  { %743 = vmatmul.mubr.bf16.vlgmr.msra.gmra.mrb[0].mxu0 %v1262_v31  ;;  %1173 = vmatprep.subr.bf16.mxu1 %v1271_v38 }
  0x23   :  { %1146 = vmatpush3.bf16.msra.mxu0 %v1270_v37  ;;  %750 = vmatprep.mubr.bf16.mxu0 %v1290_v57 }
  0x24   :  { %792 = vmatmul.mubr.bf16.vlgmr.msra.gmra.mrb[0].mxu1 %v1267_v35  ;;  %1147 = vmatprep.subr.bf16.mxu0 %v1273_v40 }
  0x25   :  { %1174 = vmatpush3.bf16.msra.mxu1 %v1272_v39  ;;  %799 = vmatprep.mubr.bf16.mxu1 %v1295_v61 }
  0x26   :  { %1175 = vmatprep.subr.bf16.mxu1 %v1275_v42 }
  0x27   :  { %1148 = vmatpush3.bf16.msra.mxu0 %v1274_v41 }
  0x28   :  { %1149 = vmatprep.subr.bf16.mxu0 %v1277_v44 }
  0x29   :  { %1176 = vmatpush3.bf16.msra.mxu1 %v1276_v43 }
  0x2a   :  { %1177 = vmatprep.subr.bf16.mxu1 %v1279_v46  ;;  %751 = vmatmul.mubr.bf16.gmra.mrb[4].mxu0 %v1293_v59 }
  0x2b   :  { %1150 = vmatpush3.bf16.msra.mxu0 %v1278_v45  ;;  %840 = vmatprep.mubr.bf16.mxu0 %v1308_v8 }
  0x2c   :  { %1151 = vmatprep.subr.bf16.mxu0 %v1281_v48  ;;  %800 = vmatmul.mubr.bf16.gmra.mrb[4].mxu1 %v1298_v63 }
  0x2d   :  { %1178 = vmatpush3.bf16.msra.mxu1 %v1280_v47  ;;  %889 = vmatprep.mubr.bf16.mxu1 %v1313_v12 }
  0x2e   :  { %1179 = vmatprep.subr.bf16.mxu1 %v1283_v50 }
  0x2f   :  { %1152 = vmatpush3.bf16.msra.mxu0 %v1282_v49 }
  0x30   :  { %1153 = vmatprep.subr.bf16.mxu0 %v1285_v52 }
  0x31   :  { %1180 = vmatpush3.bf16.msra.mxu1 %v1284_v51 }
  0x32   :  { %1181 = vmatprep.subr.bf16.mxu1 %v1287_v54 }
  0x33   :  { %1154 = vmatpush3.bf16.msra.mxu0 %v1286_v53 }
  0x34   :  { %1155 = vmatprep.subr.bf16.mxu0 %v1289_v56 }
  0x35   :  { %1182 = vmatpush3.bf16.msra.mxu1 %v1288_v55 }
  0x36   :  { %1183 = vmatprep.subr.bf16.mxu1 %v1294_v60 }
  0x37   :  { %1156 = vmatpush3.bf16.msra.mxu0 %v1292_v58 }
  0x38   :  { %1157 = vmatprep.subr.bf16.mxu0 %v1299_v0 }
  0x39   :  { %1184 = vmatpush3.bf16.msra.mxu1 %v1297_v62 }
  0x3a   :  { %1185 = vmatprep.subr.bf16.mxu1 %v1301_v2 }
  0x3b   :  { %1158 = vmatpush3.bf16.msra.mxu0 %v1300_v1 }
  0x3c   :  { %1159 = vmatprep.subr.bf16.mxu0 %v1303_v4 }
  0x3d   :  { %1186 = vmatpush3.bf16.msra.mxu1 %v1302_v3 }
  0x3e   :  { %1187 = vmatprep.subr.bf16.mxu1 %v1305_v6 }
  0x3f   :  { %1160 = vmatpush3.bf16.msra.mxu0 %v1304_v5 }
  0x40   :  { %1211 = vmatprep.subr.bf16.mxu0 %v1310_v10 }
  0x41   :  { %1188 = vmatpush3.bf16.msra.mxu1 %v1309_v9 }
  0x42   :  { %841 = vmatmul.mubr.bf16.vlgmr.msra.gmra.mrb[8].mxu0 %v1306_v7 }
  0x43   :  { %1212 = vmatpush3.bf16.msra.mxu0 %v1310_v10  ;;  %848 = vmatprep.mubr.bf16.mxu0 %v1315_v14 }
  0x44   :  { %890 = vmatmul.mubr.bf16.vlgmr.msra.gmra.mrb[8].mxu1 %v1311_v11  ;;  %1213 = vmatprep.subr.bf16.mxu0 %v1314_v13 }
  0x45   :  { %897 = vmatprep.mubr.bf16.mxu1 %v1319_v17 }
  0x47   :  { %1214 = vmatpush3.bf16.msra.mxu0 %v1314_v13 }
  0x48   :  { %1215 = vmatprep.subr.bf16.mxu0 %v1318_v16 }
  0x4a   :  { %849 = vmatmul.mubr.bf16.gmra.mrb[12].mxu0 %v1317_v15 }
  0x4b   :  { %1216 = vmatpush3.bf16.msra.mxu0 %v1318_v16  ;;  %1227 = vmatprep.mubr.bf16.mxu0 %v1327_v21 }
  0x4c   :  { %898 = vmatmul.mubr.bf16.gmra.mrb[12].mxu1 %v1321_v18  ;;  %1217 = vmatprep.subr.bf16.mxu0 %v1322_v19 }
  0x4f   :  { %1218 = vmatpush3.bf16.msra.mxu0 %v1322_v19 }
  0x50   :  { %1219 = vmatprep.subr.bf16.mxu0 %v1323_v20 }
  0x53   :  { %1220 = vmatpush3.bf16.msra.mxu0 %v1323_v20 }
  0x54   :  { %1221 = vmatprep.subr.bf16.mxu0 %v1324_v22 }
  0x57   :  { %1222 = vmatpush3.bf16.msra.mxu0 %v1324_v22 }
  0x58   :  { %1223 = vmatprep.subr.bf16.mxu0 %v1325_v23 }
  0x5b   :  { %1224 = vmatpush3.bf16.msra.mxu0 %v1325_v23 }
  0x5c   :  { %1225 = vmatprep.subr.bf16.mxu0 %v1326_v24 }
  0x5f   :  { %1226 = vmatpush3.bf16.msra.mxu0 %v1326_v24 }
  0x62   :  { %1228 = vmatmul.mubr.bf16.vlgmr.msra.gmra.mrb[16].mxu0 %v1328_v25 }
  0xf5   :  { %v1105_v26 = vpop.f32.mrb[0].mxu0 }
  0xf6   :  { %v1106_v28 = vpop.f32.mrb[1].mxu0 }
  0xf7   :  { %v1107_v29 = vadd.f32 %v1106_v28, %v1105_v26  ;;  %v1108_v30 = vpop.f32.mrb[2].mxu0  ;;  %v1133_v31 = vpop.f32.mrb[0].mxu1 }
  0xf8   :  { %v1109_v32 = vpop.f32.mrb[3].mxu0  ;;  %v1134_v35 = vpop.f32.mrb[1].mxu1 }
  0xf9   :  { %v745_v33 = vadd.f32 %v1107_v29, %v979_v27  ;;  %v1110_v34 = vadd.f32 %v1109_v32, %v1108_v30  ;;  %v1135_v36 = vadd.f32 %v1134_v35, %v1133_v31  ;;  %v1136_v37 = vpop.f32.mrb[2].mxu1 }
  0xfa   :  { %v1137_v39 = vpop.f32.mrb[3].mxu1 }
  0xfb   :  { %v748_v38 = vadd.f32 %v1110_v34, %v979_v27  ;;  %v794_v40 = vadd.f32 %v1135_v36, %v745_v33  ;;  %v1138_v41 = vadd.f32 %v1137_v39, %v1136_v37 }
  0xfd   :  { %v797_v42 = vadd.f32 %v1138_v41, %v748_v38  ;;  %v1111_v43 = vpop.f32.mrb[4].mxu0 }
  0xfe   :  { %v1112_v44 = vpop.f32.mrb[5].mxu0 }
  0xff   :  { %v1113_v45 = vadd.f32 %v1112_v44, %v1111_v43  ;;  %v1114_v46 = vpop.f32.mrb[6].mxu0  ;;  %v1139_v47 = vpop.f32.mrb[4].mxu1 }
 0x100   :  { %v1115_v48 = vpop.f32.mrb[7].mxu0  ;;  %v1140_v51 = vpop.f32.mrb[5].mxu1 }
 0x101   :  { %v753_v49 = vadd.f32 %v1113_v45, %v979_v27  ;;  %v1116_v50 = vadd.f32 %v1115_v48, %v1114_v46  ;;  %v1141_v52 = vadd.f32 %v1140_v51, %v1139_v47  ;;  %v1142_v53 = vpop.f32.mrb[6].mxu1 }
 0x102   :  { %v1143_v55 = vpop.f32.mrb[7].mxu1 }
 0x103   :  { %v756_v54 = vadd.f32 %v1116_v50, %v979_v27  ;;  %v802_v56 = vadd.f32 %v1141_v52, %v753_v49  ;;  %v1144_v57 = vadd.f32 %v1143_v55, %v1142_v53 }
 0x105   :  { %v805_v58 = vadd.f32 %v1144_v57, %v756_v54 }
 0x115   :  { %v1161_v59 = vpop.f32.mrb[8].mxu0 }
 0x116   :  { %v1162_v60 = vpop.f32.mrb[9].mxu0 }
 0x117   :  { %v1163_v61 = vadd.f32 %v1162_v60, %v1161_v59  ;;  %v1164_v62 = vpop.f32.mrb[10].mxu0  ;;  %v1189_v63 = vpop.f32.mrb[8].mxu1 }
 0x118   :  { %v1165_v0 = vpop.f32.mrb[11].mxu0  ;;  %v1190_v3 = vpop.f32.mrb[9].mxu1 }
 0x119   :  { %v843_v1 = vadd.f32 %v1163_v61, %v794_v40  ;;  %v1166_v2 = vadd.f32 %v1165_v0, %v1164_v62  ;;  %v1191_v4 = vadd.f32 %v1190_v3, %v1189_v63  ;;  %v1192_v5 = vpop.f32.mrb[10].mxu1 }
 0x11a   :  { %v1193_v7 = vpop.f32.mrb[11].mxu1 }
 0x11b   :  { %v846_v6 = vadd.f32 %v1166_v2, %v797_v42  ;;  %v1194_v8 = vadd.f32 %v1193_v7, %v1192_v5  ;;  %v892_v9 = vadd.f32 %v1191_v4, %v843_v1 }
 0x11d   :  { %v1167_v10 = vpop.f32.mrb[12].mxu0  ;;  %v895_v12 = vadd.f32 %v1194_v8, %v846_v6 }
 0x11e   :  { %v1168_v11 = vpop.f32.mrb[13].mxu0 }
 0x11f   :  { %v1169_v13 = vadd.f32 %v1168_v11, %v1167_v10  ;;  %v1170_v14 = vpop.f32.mrb[14].mxu0  ;;  %v1195_v15 = vpop.f32.mrb[12].mxu1 }
 0x120   :  { %v1171_v16 = vpop.f32.mrb[15].mxu0  ;;  %v1196_v19 = vpop.f32.mrb[13].mxu1 }
 0x121   :  { %v851_v17 = vadd.f32 %v1169_v13, %v802_v56  ;;  %v1172_v18 = vadd.f32 %v1171_v16, %v1170_v14  ;;  %v1197_v20 = vadd.f32 %v1196_v19, %v1195_v15  ;;  %v1198_v21 = vpop.f32.mrb[14].mxu1 }
 0x122   :  { %v1199_v23 = vpop.f32.mrb[15].mxu1 }
 0x123   :  { %v854_v22 = vadd.f32 %v1172_v18, %v805_v58  ;;  %v1200_v24 = vadd.f32 %v1199_v23, %v1198_v21  ;;  %v900_v25 = vadd.f32 %v1197_v20, %v851_v17 }
 0x125   :  { %v903_v26 = vadd.f32 %v1200_v24, %v854_v22 }
 0x135   :  { %v1229_v27 = vpop.f32.mrb[16].mxu0 }
 0x136   :  { %v949_v28 = vadd.f32 %v1229_v27, %v900_v25  ;;  %v940_v29 = vpop.f32.mrb[17].mxu0 }
 0x137   :  { %v941_v30 = vadd.f32 %v940_v29, %v892_v9  ;;  %v1230_v31 = vpop.f32.mrb[18].mxu0 }
 0x138   :  { %v952_v32 = vadd.f32 %v1230_v31, %v903_v26  ;;  %v943_v33 = vpop.f32.mrb[19].mxu0 }
 0x139   :  { %v944_v34 = vadd.f32 %v943_v33, %v895_v12 }
 0x13a   :  { %v1086_v35 = vpack.c.bf16 %v952_v32, %v949_v28 }
 0x13b   :  { %v1081_v36 = vpack.c.bf16 %v944_v34, %v941_v30 }
 0x13c   :  { %1088 = vst [vmem:[%s1631_s3 + $0x8] sm:$0xff] %v1086_v35  }
 0x13d   :  { %1082 = vst [vmem:[%s1631_s3] sm:$0xff] %v1081_v36  }

// kernel: retinanet_forward.43
= control target key start
LH: loop header
LB: loop body
LE: loop exit
PB: predicated region body
PF: predicated region fallthrough
CT: control target
= control target key end

     0   :  { %s3918_s12 = smov 0   ;;  %s4692_s0 = inlined_call_operand.vmem [shape: bf16[512,1152], index: 0, kind: input, shape index: {}]   ;;  %s4693_s1 = inlined_call_operand.vmem [shape: bf16[1152,128], index: 1, kind: input, shape index: {}]   ;;  %s4694_s2 = inlined_call_operand.vmem [shape: f32[1,128], index: 2, kind: input, shape index: {}]   ;;  %s4695_s3 = inlined_call_operand.vmem [shape: bf16[512,128], index: 3, kind: output, shape index: {}]  }
   0x1 LB: > { %s2678_s13 = sadd.s32 4294967295, %s3896_s12   ;;  %p2682_p0 = scmp.ge.s32.totalorder %s3896_s12, 1  ;;  %s3896_s12 = sphi %s3918_s12, %s13_s12  }
   0x2   : > { %p139_p1 = scmp.lt.s32.totalorder %s3896_s12, 3 }
   0x4   : > { %p140_p2 = pnand %p2682_p0, %p139_p1 }
   0x5   : > { %v3610_v0 = vld [vmem:[%s4693_s1 + $0x40] sm:$0xff] (!%p140_p2)   ;;  %s2683_s16 = sshll.u32 (!%p140_p2), %s2678_s13, 5  ;;  %v3612_v2 = vld [vmem:[%s4693_s1 + $0x48] sm:$0xff] (!%p140_p2)   ;;  %v3614_v4 = vld [vmem:[%s4693_s1 + $0x50] sm:$0xff] (!%p140_p2)  }
   0x6   : > { %143 = sbr.rel (%p140_p2) target bundleno = 542 (0x21e), region = 32  ;;  %v3611_v1 = vld [vmem:[%s4693_s1] sm:$0xff] (!%p140_p2)   ;;  %3065 = vmatprep.subr.bf16.mxu0 (!%p140_p2), %v3610_v0  ;;  %3585 = vmatprep.subr.bf16.mxu1 (!%p140_p2), %v3610_v0  ;;  %p165_p3 = scmp.lt.s32.totalorder (!%p140_p2), %s2683_s16, 63  ;;  %v3613_v3 = vld [vmem:[%s4693_s1 + $0x8] sm:$0xff] (!%p140_p2)   ;;  %v3615_v5 = vld [vmem:[%s4693_s1 + $0x10] sm:$0xff] (!%p140_p2)  }
   0x7   : > { %3066 = vmatpush3.bf16.msra.mxu0 (!%p140_p2), %v3611_v1  ;;  %3593 = vmatpush3.bf16.msra.mxu1 (!%p140_p2), %v3611_v1  ;;  %v3616_v6 = vld [vmem:[%s4693_s1 + $0x58] sm:$0xff] (!%p140_p2)   ;;  %v3618_v8 = vld [vmem:[%s4693_s1 + $0x60] sm:$0xff] (!%p140_p2)   ;;  %v3620_v10 = vld [vmem:[%s4693_s1 + $0x68] sm:$0xff] (!%p140_p2)  }
   0x8   : > { %3067 = vmatprep.subr.bf16.mxu0 (!%p140_p2), %v3612_v2  ;;  %3586 = vmatprep.subr.bf16.mxu1 (!%p140_p2), %v3612_v2  ;;  %v3617_v7 = vld [vmem:[%s4693_s1 + $0x18] sm:$0xff] (!%p140_p2)   ;;  %v3619_v9 = vld [vmem:[%s4693_s1 + $0x20] sm:$0xff] (!%p140_p2)   ;;  %v3621_v13 = vld [vmem:[%s4693_s1 + $0x28] sm:$0xff] (!%p140_p2)  }
   0x9   : > { %v3622_v14 = vld [vmem:[%s4693_s1 + $0x70] sm:$0xff] (!%p140_p2)   ;;  %v3624_v16 = vld [vmem:[%s4693_s1 + $0x78] sm:$0xff] (!%p140_p2)   ;;  %v3632_v18 = vld [vmem:[%s4693_s1 + $0xc0] sm:$0xff] (!%p140_p2)  }
   0xa   : > { %v3623_v15 = vld [vmem:[%s4693_s1 + $0x30] sm:$0xff] (!%p140_p2)   ;;  %v3625_v17 = vld [vmem:[%s4693_s1 + $0x38] sm:$0xff] (!%p140_p2)   ;;  %v3635_v21 = vld [vmem:[%s4693_s1 + $0x140] sm:$0xff] (!%p140_p2)  }
   0xb   : > { %3068 = vmatpush3.bf16.msra.mxu0 (!%p140_p2), %v3613_v3  ;;  %3594 = vmatpush3.bf16.msra.mxu1 (!%p140_p2), %v3613_v3  ;;  %v3633_v22 = vld [vmem:[%s4693_s1 + $0x80] sm:$0xff] (!%p140_p2)   ;;  %v3634_v23 = vld [vmem:[%s4693_s1 + $0xc8] sm:$0xff] (!%p140_p2)   ;;  %v3644_v31 = vld [vmem:[%s4693_s1 + $0xd0] sm:$0xff] (!%p140_p2)  }
   0xc   : > { %3069 = vmatprep.subr.bf16.mxu0 (!%p140_p2), %v3614_v4  ;;  %3587 = vmatprep.subr.bf16.mxu1 (!%p140_p2), %v3614_v4  ;;  %v3637_v24 = vld [vmem:[%s4693_s1 + $0x100] sm:$0xff] (!%p140_p2)   ;;  %v3636_v27 = vld [vmem:[%s4693_s1 + $0x88] sm:$0xff] (!%p140_p2)   ;;  %v3645_v32 = vld [vmem:[%s4693_s1 + $0x90] sm:$0xff] (!%p140_p2)  }
   0xd   : > { %s4697_s16 = smov (!%p165_p3, %s2683_s16), 63  ;;  %v3655_v28 = vld [vmem:[%s4693_s1 + $0x148] sm:$0xff]   ;;  %v3646_v34 = vld [vmem:[%s4693_s1 + $0xd8] sm:$0xff]   ;;  %v3654_v40 = vld [vmem:[%s4693_s1 + $0xe0] sm:$0xff]  }
   0xe   : > { %s3601_s29 = smul.u32 36, %s4697_s16  ;;  %v3657_v33 = vld [vmem:[%s4693_s1 + $0x108] sm:$0xff]   ;;  %v3647_v37 = vld [vmem:[%s4693_s1 + $0x98] sm:$0xff]   ;;  %v3656_v41 = vld [vmem:[%s4693_s1 + $0xa0] sm:$0xff]  }
   0xf   : > { %3070 = vmatpush3.bf16.msra.mxu0 %v3615_v5  ;;  %3595 = vmatpush3.bf16.msra.mxu1 %v3615_v5  ;;  %v3658_v42 = vld [vmem:[%s4693_s1 + $0xe8] sm:$0xff]   ;;  %v3669_v43 = vld [vmem:[%s4693_s1 + $0x150] sm:$0xff]   ;;  %v3668_v52 = vld [vmem:[%s4693_s1 + $0xf8] sm:$0xff]  }
  0x10   : > { %3071 = vmatprep.subr.bf16.mxu0 %v3616_v6  ;;  %3588 = vmatprep.subr.bf16.mxu1 %v3616_v6  ;;  %s3959_s9 = scalar_lea.vmem %s4692_s0, %s3601_s29  ;;  %v3671_v46 = vld [vmem:[%s4693_s1 + $0x110] sm:$0xff]   ;;  %v3659_v47 = vld [vmem:[%s4693_s1 + $0xa8] sm:$0xff]   ;;  %v3686_v55 = vld [vmem:[%s4693_s1 + $0x158] sm:$0xff]  }
  0x11   : > { %v3628_v11 = vld [vmem:[%s3959_s9 + $0x4] ss:$36 sps:$4 sm:$0xff]   ;;  %v3638_v25 = vld [vmem:[%s3959_s9 + $0x4c] ss:$36 sps:$4 sm:$0xff]   ;;  %v3648_v35 = vld [vmem:[%s3959_s9 + $0x94] ss:$36 sps:$4 sm:$0xff]  }
  0x12   : > { %v3631_v12 = vld [vmem:[%s3959_s9 + $0x364] ss:$36 sps:$4 sm:$0xff]   ;;  %1689 = vmatprep.mubr.bf16.mxu0 %v3628_v11  ;;  %v3640_v26 = vld [vmem:[%s3959_s9 + $0x3ac] ss:$36 sps:$4 sm:$0xff]   ;;  %v3650_v36 = vld [vmem:[%s3959_s9 + $0x3f4] ss:$36 sps:$4 sm:$0xff]  }
  0x13   : > { %3072 = vmatpush3.bf16.msra.mxu0 %v3617_v7  ;;  %3596 = vmatpush3.bf16.msra.mxu1 %v3617_v7  ;;  %v3626_v19 = vld [vmem:[%s3959_s9] ss:$36 sps:$4 sm:$0xff]   ;;  %v3642_v29 = vld [vmem:[%s3959_s9 + $0x48] ss:$36 sps:$4 sm:$0xff]   ;;  %v3652_v38 = vld [vmem:[%s3959_s9 + $0x90] ss:$36 sps:$4 sm:$0xff]  }
  0x14   : > { %3073 = vmatprep.subr.bf16.mxu0 %v3618_v8  ;;  %3589 = vmatprep.subr.bf16.mxu1 %v3618_v8  ;;  %v3629_v20 = vld [vmem:[%s3959_s9 + $0x360] ss:$36 sps:$4 sm:$0xff]   ;;  %v3643_v30 = vld [vmem:[%s3959_s9 + $0x3a8] ss:$36 sps:$4 sm:$0xff]   ;;  %v3653_v39 = vld [vmem:[%s3959_s9 + $0x3f0] ss:$36 sps:$4 sm:$0xff]  }
  0x15   : > { %1785 = vmatprep.mubr.bf16.mxu1 %v3631_v12  ;;  %v3660_v44 = vld [vmem:[%s3959_s9 + $0xdc] ss:$36 sps:$4 sm:$0xff]   ;;  %v3666_v48 = vld [vmem:[%s4693_s1 + $0xf0] sm:$0xff]   ;;  %v3672_v53 = vld [vmem:[%s3959_s9 + $0x124] ss:$36 sps:$4 sm:$0xff]  }
  0x16   : > { %v3662_v45 = vld [vmem:[%s3959_s9 + $0x43c] ss:$36 sps:$4 sm:$0xff]   ;;  %v3667_v51 = vld [vmem:[%s4693_s1 + $0xb0] sm:$0xff]   ;;  %v3674_v58 = vld [vmem:[%s3959_s9 + $0x8] ss:$36 sps:$4 sm:$0xff]  }
  0x17   : > { %3074 = vmatpush3.bf16.msra.mxu0 %v3619_v9  ;;  %3597 = vmatpush3.bf16.msra.mxu1 %v3619_v9  ;;  %v3664_v49 = vld [vmem:[%s3959_s9 + $0xd8] ss:$36 sps:$4 sm:$0xff]   ;;  %v3676_v54 = vld [vmem:[%s3959_s9 + $0xc] ss:$36 sps:$4 sm:$0xff]   ;;  %v3677_v59 = vld [vmem:[%s3959_s9 + $0x120] ss:$36 sps:$4 sm:$0xff]  }
  0x18   : > { %3075 = vmatprep.subr.bf16.mxu0 %v3620_v10  ;;  %3590 = vmatprep.subr.bf16.mxu1 %v3620_v10  ;;  %v3665_v50 = vld [vmem:[%s3959_s9 + $0x438] ss:$36 sps:$4 sm:$0xff]   ;;  %v3678_v60 = vld [vmem:[%s4693_s1 + $0x1c0] sm:$0xff]   ;;  %v3680_v62 = vld [vmem:[%s3959_s9 + $0x16c] ss:$36 sps:$4 sm:$0xff]  }
  0x19   : > { %v3687_v56 = vld [vmem:[%s4693_s1 + $0x118] sm:$0xff]   ;;  %v3679_v61 = vld [vmem:[%s4693_s1 + $0x180] sm:$0xff]   ;;  %v3694_v1 = vld [vmem:[%s4693_s1 + $0x1c8] sm:$0xff]  }
  0x1a   : > { %v3670_v57 = vld [vmem:[%s4693_s1 + $0xb8] sm:$0xff]   ;;  %v3696_v0 = vld [vmem:[%s4693_s1 + $0x160] sm:$0xff]   ;;  %v3695_v3 = vld [vmem:[%s4693_s1 + $0x188] sm:$0xff]  }
  0x1b   : > { %3076 = vmatpush3.bf16.msra.mxu0 %v3621_v13  ;;  %3598 = vmatpush3.bf16.msra.mxu1 %v3621_v13  ;;  %v3682_v63 = vld [vmem:[%s3959_s9 + $0x54] ss:$36 sps:$4 sm:$0xff]   ;;  %v3697_v2 = vld [vmem:[%s4693_s1 + $0x120] sm:$0xff]   ;;  %v3684_v4 = vld [vmem:[%s3959_s9 + $0x168] ss:$36 sps:$4 sm:$0xff]  }
  0x1c   : > { %3077 = vmatprep.subr.bf16.mxu0 %v3622_v14  ;;  %3591 = vmatprep.subr.bf16.mxu1 %v3622_v14  ;;  %v3685_v5 = vld [vmem:[%s3959_s9 + $0x50] ss:$36 sps:$4 sm:$0xff]   ;;  %v3690_v7 = vld [vmem:[%s3959_s9 + $0x9c] ss:$36 sps:$4 sm:$0xff]   ;;  %v3710_v8 = vld [vmem:[%s4693_s1 + $0x168] sm:$0xff]  }
  0x1d   : > { %v3688_v6 = vld [vmem:[%s3959_s9 + $0x1b4] ss:$36 sps:$4 sm:$0xff]   ;;  %v3712_v10 = vld [vmem:[%s4693_s1 + $0x128] sm:$0xff]   ;;  %v3698_v14 = vld [vmem:[%s3959_s9 + $0x1fc] ss:$36 sps:$4 sm:$0xff]  }
  0x1e   : > { %v3711_v9 = vld [vmem:[%s4693_s1 + $0x1d0] sm:$0xff]   ;;  %v3693_v13 = vld [vmem:[%s3959_s9 + $0x98] ss:$36 sps:$4 sm:$0xff]  }
  0x1f   : > { %3078 = vmatpush3.bf16.msra.mxu0 %v3623_v15  ;;  %3599 = vmatpush3.bf16.msra.mxu1 %v3623_v15  ;;  %v3713_v11 = vld [vmem:[%s4693_s1 + $0x190] sm:$0xff]  }
  0x20   : > { %3079 = vmatprep.subr.bf16.mxu0 %v3624_v16  ;;  %3592 = vmatprep.subr.bf16.mxu1 %v3624_v16  ;;  %v3692_v12 = vld [vmem:[%s3959_s9 + $0x1b0] ss:$36 sps:$4 sm:$0xff]  }
  0x21   : > { %v3720_v15 = vld [vmem:[%s4693_s1 + $0x170] sm:$0xff]  }
  0x22   : > { %v3721_v16 = vld [vmem:[%s4693_s1 + $0x130] sm:$0xff]  }
  0x23   : > { %3080 = vmatpush3.bf16.msra.mxu0 %v3625_v17  ;;  %3600 = vmatpush3.bf16.msra.mxu1 %v3625_v17  ;;  %v3700_v17 = vld [vmem:[%s3959_s9 + $0xe4] ss:$36 sps:$4 sm:$0xff]  }
  0x24   : > { %3177 = vmatprep.subr.bf16.mxu1 %v3632_v18  ;;  %3289 = vmatprep.subr.bf16.mxu0 %v3635_v21  ;;  %v3728_v18 = vld [vmem:[%s4693_s1 + $0x1d8] sm:$0xff]   ;;  %v3703_v21 = vld [vmem:[%s3959_s9 + $0xe0] ss:$36 sps:$4 sm:$0xff]  }
  0x26   : > { %1690 = vmatmul.mubr.bf16.vlgmr.msra.gmra.mrb[0].mxu0 %v3626_v19  ;;  %1786 = vmatmul.mubr.bf16.vlgmr.msra.gmra.mrb[0].mxu1 %v3629_v20  ;;  %v3729_v19 = vld [vmem:[%s4693_s1 + $0x198] sm:$0xff]  }
  0x27   : > { %3178 = vmatpush3.bf16.msra.mxu1 %v3633_v22  ;;  %3290 = vmatpush3.bf16.msra.mxu0 %v3637_v24  ;;  %v3702_v20 = vld [vmem:[%s3959_s9 + $0x1f8] ss:$36 sps:$4 sm:$0xff]   ;;  %v3704_v22 = vld [vmem:[%s3959_s9 + $0x244] ss:$36 sps:$4 sm:$0xff]  }
  0x28   : > { %3179 = vmatprep.subr.bf16.mxu1 %v3634_v23  ;;  %1697 = vmatprep.mubr.bf16.mxu0 %v3638_v25  ;;  %v3706_v23 = vld [vmem:[%s3959_s9 + $0x12c] ss:$36 sps:$4 sm:$0xff]   ;;  %v3736_v24 = vld [vmem:[%s4693_s1 + $0x178] sm:$0xff]  }
  0x29   : > { %1793 = vmatprep.mubr.bf16.mxu1 %v3640_v26  ;;  %3291 = vmatprep.subr.bf16.mxu0 %v3655_v28  ;;  %v3737_v25 = vld [vmem:[%s4693_s1 + $0x138] sm:$0xff]   ;;  %v3744_v26 = vld [vmem:[%s4693_s1 + $0x1e0] sm:$0xff]  }
  0x2a   : > { %v3745_v28 = vld [vmem:[%s4693_s1 + $0x1a0] sm:$0xff]  }
  0x2b   : > { %3180 = vmatpush3.bf16.msra.mxu1 %v3636_v27  ;;  %3292 = vmatpush3.bf16.msra.mxu0 %v3657_v33  ;;  %v3708_v27 = vld [vmem:[%s3959_s9 + $0x240] ss:$36 sps:$4 sm:$0xff]   ;;  %v3759_v33 = vld [vmem:[%s4693_s1 + $0x1e8] sm:$0xff]  }
  0x2c   : > { %3181 = vmatprep.subr.bf16.mxu1 %v3644_v31  ;;  %3293 = vmatprep.subr.bf16.mxu0 %v3669_v43  ;;  %v3714_v31 = vld [vmem:[%s3959_s9 + $0x28c] ss:$36 sps:$4 sm:$0xff]   ;;  %v3730_v43 = vld [vmem:[%s3959_s9 + $0x31c] ss:$36 sps:$4 sm:$0xff]  }
  0x2e   : > { %1698 = vmatmul.mubr.bf16.gmra.mrb[4].mxu0 %v3642_v29  ;;  %1794 = vmatmul.mubr.bf16.gmra.mrb[4].mxu1 %v3643_v30  ;;  %v3746_v29 = vld [vmem:[%s4693_s1 + $0x200] sm:$0xff]   ;;  %v3709_v30 = vld [vmem:[%s3959_s9 + $0x128] ss:$36 sps:$4 sm:$0xff]  }
  0x2f   : > { %3182 = vmatpush3.bf16.msra.mxu1 %v3645_v32  ;;  %1705 = vmatprep.mubr.bf16.mxu0 %v3648_v35  ;;  %v3716_v32 = vld [vmem:[%s3959_s9 + $0x174] ss:$36 sps:$4 sm:$0xff]   ;;  %v3760_v35 = vld [vmem:[%s4693_s1 + $0x1a8] sm:$0xff]  }
  0x30   : > { %3183 = vmatprep.subr.bf16.mxu1 %v3646_v34  ;;  %1801 = vmatprep.mubr.bf16.mxu1 %v3650_v36  ;;  %v3718_v34 = vld [vmem:[%s3959_s9 + $0x288] ss:$36 sps:$4 sm:$0xff]   ;;  %v3719_v36 = vld [vmem:[%s3959_s9 + $0x170] ss:$36 sps:$4 sm:$0xff]  }
  0x31   : > { %3294 = vmatpush3.bf16.msra.mxu0 %v3671_v46  ;;  %v3735_v46 = vld [vmem:[%s3959_s9 + $0x200] ss:$36 sps:$4 sm:$0xff]  }
  0x32   : > { %3295 = vmatprep.subr.bf16.mxu0 %v3686_v55  ;;  %v3761_v55 = vld [vmem:[%s4693_s1 + $0x208] sm:$0xff]  }
  0x33   : > { %3184 = vmatpush3.bf16.msra.mxu1 %v3647_v37  ;;  %v3722_v37 = vld [vmem:[%s3959_s9 + $0x2d4] ss:$36 sps:$4 sm:$0xff]  }
  0x34   : > { %3185 = vmatprep.subr.bf16.mxu1 %v3654_v40  ;;  %v3727_v40 = vld [vmem:[%s3959_s9 + $0x1b8] ss:$36 sps:$4 sm:$0xff]  }
  0x35   : > { %3296 = vmatpush3.bf16.msra.mxu0 %v3687_v56  ;;  %v3776_v56 = vld [vmem:[%s4693_s1 + $0x210] sm:$0xff]  }
  0x36   : > { %1706 = vmatmul.mubr.bf16.gmra.mrb[8].mxu0 %v3652_v38  ;;  %1802 = vmatmul.mubr.bf16.gmra.mrb[8].mxu1 %v3653_v39  ;;  %v3724_v38 = vld [vmem:[%s3959_s9 + $0x1bc] ss:$36 sps:$4 sm:$0xff]   ;;  %v3726_v39 = vld [vmem:[%s3959_s9 + $0x2d0] ss:$36 sps:$4 sm:$0xff]  }
  0x37   : > { %3186 = vmatpush3.bf16.msra.mxu1 %v3656_v41  ;;  %1713 = vmatprep.mubr.bf16.mxu0 %v3660_v44  ;;  %v3774_v41 = vld [vmem:[%s4693_s1 + $0x1f0] sm:$0xff]   ;;  %v3732_v44 = vld [vmem:[%s3959_s9 + $0x204] ss:$36 sps:$4 sm:$0xff]  }
  0x38   : > { %3187 = vmatprep.subr.bf16.mxu1 %v3658_v42  ;;  %1809 = vmatprep.mubr.bf16.mxu1 %v3662_v45  ;;  %v3775_v42 = vld [vmem:[%s4693_s1 + $0x1b0] sm:$0xff]   ;;  %v3734_v45 = vld [vmem:[%s3959_s9 + $0x318] ss:$36 sps:$4 sm:$0xff]  }
  0x39   : > { %3297 = vmatprep.subr.bf16.mxu0 %v3696_v0  ;;  %v3758_v0 = vld [vmem:[%s3959_s9 + $0xa0] ss:$36 sps:$4 sm:$0xff]  }
  0x3a   : > { %3298 = vmatpush3.bf16.msra.mxu0 %v3697_v2  ;;  %v3764_v2 = vld [vmem:[%s3959_s9 + $0xec] ss:$36 sps:$4 sm:$0xff]  }
  0x3b   : > { %3188 = vmatpush3.bf16.msra.mxu1 %v3659_v47  ;;  %3299 = vmatprep.subr.bf16.mxu0 %v3710_v8  ;;  %v3789_v47 = vld [vmem:[%s4693_s1 + $0x1f8] sm:$0xff]  }
  0x3c   : > { %3189 = vmatprep.subr.bf16.mxu1 %v3666_v48  ;;  %v3790_v48 = vld [vmem:[%s4693_s1 + $0x1b8] sm:$0xff]  }
  0x3d   : > { %v3770_v8 = vld [vmem:[%s3959_s9 + $0x134] ss:$36 sps:$4 sm:$0xff]  }
  0x3e   : > { %1714 = vmatmul.mubr.bf16.gmra.mrb[12].mxu0 %v3664_v49  ;;  %1810 = vmatmul.mubr.bf16.gmra.mrb[12].mxu1 %v3665_v50  ;;  %v3738_v49 = vld [vmem:[%s3959_s9 + $0x24c] ss:$36 sps:$4 sm:$0xff]   ;;  %v3742_v50 = vld [vmem:[%s3959_s9 + $0x14] ss:$36 sps:$4 sm:$0xff]  }
  0x3f   : > { %3190 = vmatpush3.bf16.msra.mxu1 %v3667_v51  ;;  %1721 = vmatprep.mubr.bf16.mxu0 %v3672_v53  ;;  %v3740_v51 = vld [vmem:[%s3959_s9 + $0x10] ss:$36 sps:$4 sm:$0xff]  }
  0x40   : > { %3191 = vmatprep.subr.bf16.mxu1 %v3668_v52  ;;  %1850 = vmatprep.mubr.bf16.mxu1 %v3676_v54  ;;  %v3743_v52 = vld [vmem:[%s3959_s9 + $0x248] ss:$36 sps:$4 sm:$0xff]   ;;  %v3747_v53 = vld [vmem:[%s3959_s9 + $0x294] ss:$36 sps:$4 sm:$0xff]   ;;  %v3749_v54 = vld [vmem:[%s3959_s9 + $0x5c] ss:$36 sps:$4 sm:$0xff]  }
  0x41   : > { %3300 = vmatpush3.bf16.msra.mxu0 %v3712_v10  ;;  %v3772_v10 = vld [vmem:[%s3959_s9 + $0x368] ss:$36 sps:$4 sm:$0xff]  }
  0x42   : > { %3301 = vmatprep.subr.bf16.mxu0 %v3720_v15  ;;  %v3782_v15 = vld [vmem:[%s3959_s9 + $0x178] ss:$36 sps:$4 sm:$0xff]  }
  0x43   : > { %3192 = vmatpush3.bf16.msra.mxu1 %v3670_v57  ;;  %v3751_v57 = vld [vmem:[%s3959_s9 + $0x290] ss:$36 sps:$4 sm:$0xff]  }
  0x44   : > { %3401 = vmatprep.subr.bf16.mxu1 %v3678_v60  ;;  %v3755_v60 = vld [vmem:[%s3959_s9 + $0xa4] ss:$36 sps:$4 sm:$0xff]  }
  0x45   : > { %3302 = vmatpush3.bf16.msra.mxu0 %v3721_v16  ;;  %v3783_v16 = vld [vmem:[%s3959_s9 + $0x3fc] ss:$36 sps:$4 sm:$0xff]  }
  0x46   : > { %1722 = vmatmul.mubr.bf16.gmra.mrb[16].mxu0 %v3677_v59  ;;  %1851 = vmatmul.mubr.bf16.vlgmr.msra.gmra.mrb[16].mxu1 %v3674_v58  ;;  %v3752_v58 = vld [vmem:[%s3959_s9 + $0x58] ss:$36 sps:$4 sm:$0xff]  }
  0x47   : > { %3402 = vmatpush3.bf16.msra.mxu1 %v3679_v61  ;;  %1729 = vmatprep.mubr.bf16.mxu0 %v3680_v62  ;;  %v3753_v59 = vld [vmem:[%s3959_s9 + $0x2dc] ss:$36 sps:$4 sm:$0xff]  }
  0x48   : > { %1858 = vmatprep.mubr.bf16.mxu1 %v3682_v63  ;;  %3403 = vmatprep.subr.bf16.mxu1 %v3694_v1  ;;  %v3791_v61 = vld [vmem:[%s4693_s1 + $0x218] sm:$0xff]   ;;  %v3804_v62 = vld [vmem:[%s4693_s1 + $0x220] sm:$0xff]  }
  0x49   : > { %3303 = vmatprep.subr.bf16.mxu0 %v3736_v24  ;;  %v3757_v63 = vld [vmem:[%s3959_s9 + $0x2d8] ss:$36 sps:$4 sm:$0xff]   ;;  %v3762_v1 = vld [vmem:[%s3959_s9 + $0x324] ss:$36 sps:$4 sm:$0xff]  }
  0x4a   : > { %3304 = vmatpush3.bf16.msra.mxu0 %v3737_v25  ;;  %v3798_v24 = vld [vmem:[%s3959_s9 + $0x254] ss:$36 sps:$4 sm:$0xff]   ;;  %v3802_v25 = vld [vmem:[%s3959_s9 + $0x1c] ss:$36 sps:$4 sm:$0xff]  }
  0x4b   : > { %3404 = vmatpush3.bf16.msra.mxu1 %v3695_v3  ;;  %3537 = vmatprep.subr.bf16.mxu0 %v3746_v29  ;;  %v3817_v3 = vld [vmem:[%s4693_s1 + $0x228] sm:$0xff]  }
  0x4c   : > { %3405 = vmatprep.subr.bf16.mxu1 %v3711_v9  ;;  %v3843_v9 = vld [vmem:[%s4693_s1 + $0x238] sm:$0xff]  }
  0x4e   : > { %1730 = vmatmul.mubr.bf16.gmra.mrb[20].mxu0 %v3684_v4  ;;  %1859 = vmatmul.mubr.bf16.gmra.mrb[20].mxu1 %v3685_v5  ;;  %v3766_v4 = vld [vmem:[%s3959_s9 + $0x320] ss:$36 sps:$4 sm:$0xff]   ;;  %v3767_v5 = vld [vmem:[%s3959_s9 + $0xe8] ss:$36 sps:$4 sm:$0xff]  }
  0x4f   : > { %1737 = vmatprep.mubr.bf16.mxu0 %v3688_v6  ;;  %1866 = vmatprep.mubr.bf16.mxu1 %v3690_v7  ;;  %v3830_v6 = vld [vmem:[%s4693_s1 + $0x230] sm:$0xff]  }
  0x50   : > { %3406 = vmatpush3.bf16.msra.mxu1 %v3713_v11  ;;  %v3768_v7 = vld [vmem:[%s3959_s9 + $0x36c] ss:$36 sps:$4 sm:$0xff]  }
  0x51   : > { %3407 = vmatprep.subr.bf16.mxu1 %v3728_v18  ;;  %v3773_v11 = vld [vmem:[%s3959_s9 + $0x130] ss:$36 sps:$4 sm:$0xff]   ;;  %v3787_v18 = vld [vmem:[%s3959_s9 + $0x3f8] ss:$36 sps:$4 sm:$0xff]  }
  0x54   : > { %3408 = vmatpush3.bf16.msra.mxu1 %v3729_v19  ;;  %v3788_v19 = vld [vmem:[%s3959_s9 + $0x1c0] ss:$36 sps:$4 sm:$0xff]  }
  0x55   : > { %3409 = vmatprep.subr.bf16.mxu1 %v3744_v26  ;;  %v3800_v26 = vld [vmem:[%s3959_s9 + $0x18] ss:$36 sps:$4 sm:$0xff]  }
  0x56   : > { %1738 = vmatmul.mubr.bf16.gmra.mrb[24].mxu0 %v3692_v12  ;;  %1867 = vmatmul.mubr.bf16.gmra.mrb[24].mxu1 %v3693_v13  ;;  %v3777_v12 = vld [vmem:[%s3959_s9 + $0x3b4] ss:$36 sps:$4 sm:$0xff]   ;;  %v3779_v13 = vld [vmem:[%s3959_s9 + $0x17c] ss:$36 sps:$4 sm:$0xff]  }
  0x57   : > { %1745 = vmatprep.mubr.bf16.mxu0 %v3698_v14  ;;  %1874 = vmatprep.mubr.bf16.mxu1 %v3700_v17  ;;  %v3781_v14 = vld [vmem:[%s3959_s9 + $0x3b0] ss:$36 sps:$4 sm:$0xff]   ;;  %v3785_v17 = vld [vmem:[%s3959_s9 + $0x1c4] ss:$36 sps:$4 sm:$0xff]  }
  0x58   : > { %3410 = vmatpush3.bf16.msra.mxu1 %v3745_v28  ;;  %v3805_v28 = vld [vmem:[%s3959_s9 + $0x29c] ss:$36 sps:$4 sm:$0xff]  }
  0x59   : > { %3411 = vmatprep.subr.bf16.mxu1 %v3759_v33  ;;  %v3813_v33 = vld [vmem:[%s3959_s9 + $0xac] ss:$36 sps:$4 sm:$0xff]  }
  0x5c   : > { %3412 = vmatpush3.bf16.msra.mxu1 %v3760_v35  ;;  %v3816_v35 = vld [vmem:[%s3959_s9 + $0xa8] ss:$36 sps:$4 sm:$0xff]  }
  0x5d   : > { %3413 = vmatprep.subr.bf16.mxu1 %v3774_v41  ;;  %v3826_v41 = vld [vmem:[%s3959_s9 + $0x13c] ss:$36 sps:$4 sm:$0xff]  }
  0x5e   : > { %1746 = vmatmul.mubr.bf16.gmra.mrb[28].mxu0 %v3702_v20  ;;  %1875 = vmatmul.mubr.bf16.gmra.mrb[28].mxu1 %v3703_v21  ;;  %v3792_v20 = vld [vmem:[%s3959_s9 + $0x444] ss:$36 sps:$4 sm:$0xff]   ;;  %v3794_v21 = vld [vmem:[%s3959_s9 + $0x20c] ss:$36 sps:$4 sm:$0xff]  }
  0x5f   : > { %1753 = vmatprep.mubr.bf16.mxu0 %v3704_v22  ;;  %1882 = vmatprep.mubr.bf16.mxu1 %v3706_v23  ;;  %v3796_v22 = vld [vmem:[%s3959_s9 + $0x440] ss:$36 sps:$4 sm:$0xff]   ;;  %v3797_v23 = vld [vmem:[%s3959_s9 + $0x208] ss:$36 sps:$4 sm:$0xff]  }
  0x60   : > { %3414 = vmatpush3.bf16.msra.mxu1 %v3775_v42  ;;  %v3828_v42 = vld [vmem:[%s3959_s9 + $0x370] ss:$36 sps:$4 sm:$0xff]  }
  0x61   : > { %3415 = vmatprep.subr.bf16.mxu1 %v3789_v47  ;;  %v3836_v47 = vld [vmem:[%s3959_s9 + $0x180] ss:$36 sps:$4 sm:$0xff]  }
  0x64   : > { %3416 = vmatpush3.bf16.msra.mxu1 %v3790_v48  ;;  %v3837_v48 = vld [vmem:[%s3959_s9 + $0x404] ss:$36 sps:$4 sm:$0xff]  }
  0x66   : > { %1754 = vmatmul.mubr.bf16.gmra.mrb[32].mxu0 %v3708_v27  ;;  %1883 = vmatmul.mubr.bf16.gmra.mrb[32].mxu1 %v3709_v30  ;;  %v3803_v27 = vld [vmem:[%s3959_s9 + $0x250] ss:$36 sps:$4 sm:$0xff]   ;;  %v3809_v30 = vld [vmem:[%s3959_s9 + $0x298] ss:$36 sps:$4 sm:$0xff]  }
  0x67   : > { %1761 = vmatprep.mubr.bf16.mxu0 %v3714_v31  ;;  %1890 = vmatprep.mubr.bf16.mxu1 %v3716_v32  ;;  %v3810_v31 = vld [vmem:[%s3959_s9 + $0x60] ss:$36 sps:$4 sm:$0xff]  }
  0x68   : > { %v3811_v32 = vld [vmem:[%s3959_s9 + $0x2e4] ss:$36 sps:$4 sm:$0xff]  }
  0x6e   : > { %1762 = vmatmul.mubr.bf16.gmra.mrb[36].mxu0 %v3718_v34  ;;  %1891 = vmatmul.mubr.bf16.gmra.mrb[36].mxu1 %v3719_v36  ;;  %v3815_v34 = vld [vmem:[%s3959_s9 + $0x2e0] ss:$36 sps:$4 sm:$0xff]   ;;  %v3818_v36 = vld [vmem:[%s3959_s9 + $0x32c] ss:$36 sps:$4 sm:$0xff]  }
  0x6f   : > { %1769 = vmatprep.mubr.bf16.mxu0 %v3722_v37  ;;  %1898 = vmatprep.mubr.bf16.mxu1 %v3724_v38  ;;  %v3820_v37 = vld [vmem:[%s3959_s9 + $0xf4] ss:$36 sps:$4 sm:$0xff]   ;;  %v3822_v38 = vld [vmem:[%s3959_s9 + $0x328] ss:$36 sps:$4 sm:$0xff]  }
  0x76   : > { %1770 = vmatmul.mubr.bf16.gmra.mrb[40].mxu0 %v3726_v39  ;;  %1899 = vmatmul.mubr.bf16.gmra.mrb[40].mxu1 %v3727_v40  ;;  %v3823_v39 = vld [vmem:[%s3959_s9 + $0xf0] ss:$36 sps:$4 sm:$0xff]  }
  0x77   : > { %1777 = vmatprep.mubr.bf16.mxu0 %v3730_v43  ;;  %1906 = vmatprep.mubr.bf16.mxu1 %v3732_v44  ;;  %v3824_v40 = vld [vmem:[%s3959_s9 + $0x374] ss:$36 sps:$4 sm:$0xff]   ;;  %v3831_v44 = vld [vmem:[%s3959_s9 + $0x3bc] ss:$36 sps:$4 sm:$0xff]  }
  0x78   : > { %v3829_v43 = vld [vmem:[%s3959_s9 + $0x138] ss:$36 sps:$4 sm:$0xff]  }
  0x7e   : > { %1778 = vmatmul.mubr.bf16.gmra.mrb[44].mxu0 %v3734_v45  ;;  %1907 = vmatmul.mubr.bf16.gmra.mrb[44].mxu1 %v3735_v46  ;;  %v3833_v45 = vld [vmem:[%s3959_s9 + $0x184] ss:$36 sps:$4 sm:$0xff]   ;;  %v3835_v46 = vld [vmem:[%s3959_s9 + $0x3b8] ss:$36 sps:$4 sm:$0xff]  }
  0x7f   : > { %1914 = vmatprep.mubr.bf16.mxu1 %v3738_v49  ;;  %2011 = vmatprep.mubr.bf16.mxu0 %v3742_v50  ;;  %v3839_v49 = vld [vmem:[%s3959_s9 + $0x1cc] ss:$36 sps:$4 sm:$0xff]   ;;  %v3841_v50 = vld [vmem:[%s3959_s9 + $0x400] ss:$36 sps:$4 sm:$0xff]  }
  0x86   : > { %1915 = vmatmul.mubr.bf16.gmra.mrb[48].mxu1 %v3743_v52  ;;  %2012 = vmatmul.mubr.bf16.vlgmr.msra.gmra.mrb[48].mxu0 %v3740_v51  ;;  %v3842_v51 = vld [vmem:[%s3959_s9 + $0x1c8] ss:$36 sps:$4 sm:$0xff]  }
  0x87   : > { %3538 = vmatpush3.bf16.msra.mxu0 %v3746_v29  ;;  %1922 = vmatprep.mubr.bf16.mxu1 %v3747_v53  ;;  %v3807_v29 = vld [vmem:[%s3959_s9 + $0x64] ss:$36 sps:$4 sm:$0xff]   ;;  %v3844_v52 = vld [vmem:[%s3959_s9 + $0x44c] ss:$36 sps:$4 sm:$0xff]   ;;  %v3846_v53 = vld [vmem:[%s3959_s9 + $0x214] ss:$36 sps:$4 sm:$0xff]  }
  0x88   : > { %2019 = vmatprep.mubr.bf16.mxu0 %v3749_v54  ;;  %3539 = vmatprep.subr.bf16.mxu0 %v3761_v55 }
  0x8b   : > { %3540 = vmatpush3.bf16.msra.mxu0 %v3761_v55 }
  0x8c   : > { %3541 = vmatprep.subr.bf16.mxu0 %v3776_v56 }
  0x8e   : > { %1923 = vmatmul.mubr.bf16.gmra.mrb[52].mxu1 %v3751_v57  ;;  %2020 = vmatmul.mubr.bf16.gmra.mrb[52].mxu0 %v3752_v58  ;;  %v3848_v58 = vld [vmem:[%s3959_s9 + $0x448] ss:$36 sps:$4 sm:$0xff]  }
  0x8f   : > { %1930 = vmatprep.mubr.bf16.mxu1 %v3753_v59  ;;  %2027 = vmatprep.mubr.bf16.mxu0 %v3755_v60  ;;  %v3849_v59 = vld [vmem:[%s3959_s9 + $0x210] ss:$36 sps:$4 sm:$0xff]  }
  0x90   : > { %3542 = vmatpush3.bf16.msra.mxu0 %v3776_v56 }
  0x91   : > { %3543 = vmatprep.subr.bf16.mxu0 %v3791_v61 }
  0x94   : > { %3544 = vmatpush3.bf16.msra.mxu0 %v3791_v61 }
  0x95   : > { %3545 = vmatprep.subr.bf16.mxu0 %v3804_v62 }
  0x96   : > { %1931 = vmatmul.mubr.bf16.gmra.mrb[56].mxu1 %v3757_v63  ;;  %2028 = vmatmul.mubr.bf16.gmra.mrb[56].mxu0 %v3758_v0  ;;  %v3850_v0 = vld [vmem:[%s3959_s9 + $0x25c] ss:$36 sps:$4 sm:$0xff]  }
  0x97   : > { %1938 = vmatprep.mubr.bf16.mxu1 %v3762_v1  ;;  %2035 = vmatprep.mubr.bf16.mxu0 %v3764_v2  ;;  %v3852_v1 = vld [vmem:[%s3959_s9 + $0x20] ss:$36 sps:$4 sm:$0xff]  }
  0x98   : > { %3546 = vmatpush3.bf16.msra.mxu0 %v3804_v62 }
  0x99   : > { %3547 = vmatprep.subr.bf16.mxu0 %v3817_v3 }
  0x9c   : > { %3548 = vmatpush3.bf16.msra.mxu0 %v3817_v3 }
  0x9d   : > { %3549 = vmatprep.subr.bf16.mxu0 %v3830_v6 }
  0x9e   : > { %1939 = vmatmul.mubr.bf16.gmra.mrb[60].mxu1 %v3766_v4  ;;  %2036 = vmatmul.mubr.bf16.gmra.mrb[60].mxu0 %v3767_v5 }
  0x9f   : > { %1946 = vmatprep.mubr.bf16.mxu1 %v3768_v7  ;;  %2043 = vmatprep.mubr.bf16.mxu0 %v3770_v8 }
  0xa0   : > { %3550 = vmatpush3.bf16.msra.mxu0 %v3830_v6 }
  0xa1   : > { %3551 = vmatprep.subr.bf16.mxu0 %v3843_v9 }
  0xa4   : > { %3552 = vmatpush3.bf16.msra.mxu0 %v3843_v9 }
  0xa6   : > { %1947 = vmatmul.mubr.bf16.gmra.mrb[64].mxu1 %v3772_v10  ;;  %2044 = vmatmul.mubr.bf16.gmra.mrb[64].mxu0 %v3773_v11  ;;  %v3853_v10 = vld [vmem:[%s3959_s9 + $0x258] ss:$36 sps:$4 sm:$0xff]   ;;  %v3854_v11 = vld [vmem:[%s3959_s9 + $0x68] ss:$36 sps:$4 sm:$0xff]  }
  0xa7   : > { %1954 = vmatprep.mubr.bf16.mxu1 %v3777_v12  ;;  %2051 = vmatprep.mubr.bf16.mxu0 %v3779_v13 }
  0xae   : > { %1955 = vmatmul.mubr.bf16.gmra.mrb[68].mxu1 %v3781_v14  ;;  %2052 = vmatmul.mubr.bf16.gmra.mrb[68].mxu0 %v3782_v15 }
  0xaf   : > { %1962 = vmatprep.mubr.bf16.mxu1 %v3783_v16  ;;  %2059 = vmatprep.mubr.bf16.mxu0 %v3785_v17  ;;  %v3855_v16 = vld [vmem:[%s3959_s9 + $0x2a4] ss:$36 sps:$4 sm:$0xff]   ;;  %v3857_v17 = vld [vmem:[%s3959_s9 + $0xb0] ss:$36 sps:$4 sm:$0xff]  }
  0xb6   : > { %1963 = vmatmul.mubr.bf16.gmra.mrb[72].mxu1 %v3787_v18  ;;  %2060 = vmatmul.mubr.bf16.gmra.mrb[72].mxu0 %v3788_v19 }
  0xb7   : > { %1970 = vmatprep.mubr.bf16.mxu1 %v3792_v20  ;;  %2067 = vmatprep.mubr.bf16.mxu0 %v3794_v21 }
  0xbe   : > { %1971 = vmatmul.mubr.bf16.gmra.mrb[76].mxu1 %v3796_v22  ;;  %2068 = vmatmul.mubr.bf16.gmra.mrb[76].mxu0 %v3797_v23 }
  0xbf   : > { %2075 = vmatprep.mubr.bf16.mxu0 %v3798_v24  ;;  %2172 = vmatprep.mubr.bf16.mxu1 %v3802_v25 }
  0xc6   : > { %2076 = vmatmul.mubr.bf16.gmra.mrb[80].mxu0 %v3803_v27  ;;  %2173 = vmatmul.mubr.bf16.vlgmr.msra.gmra.mrb[80].mxu1 %v3800_v26  ;;  %v3858_v26 = vld [vmem:[%s3959_s9 + $0x2a0] ss:$36 sps:$4 sm:$0xff]   ;;  %v3859_v27 = vld [vmem:[%s3959_s9 + $0xf8] ss:$36 sps:$4 sm:$0xff]  }
  0xc7   : > { %2083 = vmatprep.mubr.bf16.mxu0 %v3805_v28  ;;  %2180 = vmatprep.mubr.bf16.mxu1 %v3807_v29 }
  0xce   : > { %2084 = vmatmul.mubr.bf16.gmra.mrb[84].mxu0 %v3809_v30  ;;  %2181 = vmatmul.mubr.bf16.gmra.mrb[84].mxu1 %v3810_v31 }
  0xcf   : > { %2091 = vmatprep.mubr.bf16.mxu0 %v3811_v32  ;;  %2188 = vmatprep.mubr.bf16.mxu1 %v3813_v33  ;;  %v3860_v32 = vld [vmem:[%s3959_s9 + $0x2ec] ss:$36 sps:$4 sm:$0xff]   ;;  %v3862_v33 = vld [vmem:[%s3959_s9 + $0x140] ss:$36 sps:$4 sm:$0xff]  }
  0xd6   : > { %2092 = vmatmul.mubr.bf16.gmra.mrb[88].mxu0 %v3815_v34  ;;  %2189 = vmatmul.mubr.bf16.gmra.mrb[88].mxu1 %v3816_v35 }
  0xd7   : > { %2099 = vmatprep.mubr.bf16.mxu0 %v3818_v36  ;;  %2196 = vmatprep.mubr.bf16.mxu1 %v3820_v37 }
  0xde   : > { %2100 = vmatmul.mubr.bf16.gmra.mrb[92].mxu0 %v3822_v38  ;;  %2197 = vmatmul.mubr.bf16.gmra.mrb[92].mxu1 %v3823_v39 }
  0xdf   : > { %2107 = vmatprep.mubr.bf16.mxu0 %v3824_v40  ;;  %2204 = vmatprep.mubr.bf16.mxu1 %v3826_v41 }
  0xe6   : > { %2108 = vmatmul.mubr.bf16.gmra.mrb[96].mxu0 %v3828_v42  ;;  %2205 = vmatmul.mubr.bf16.gmra.mrb[96].mxu1 %v3829_v43  ;;  %v3863_v42 = vld [vmem:[%s3959_s9 + $0x2e8] ss:$36 sps:$4 sm:$0xff]  }
  0xe7   : > { %2115 = vmatprep.mubr.bf16.mxu0 %v3831_v44  ;;  %2212 = vmatprep.mubr.bf16.mxu1 %v3833_v45  ;;  %v3864_v43 = vld [vmem:[%s3959_s9 + $0x188] ss:$36 sps:$4 sm:$0xff]  }
  0xee   : > { %2116 = vmatmul.mubr.bf16.gmra.mrb[100].mxu0 %v3835_v46  ;;  %2213 = vmatmul.mubr.bf16.gmra.mrb[100].mxu1 %v3836_v47 }
  0xef   : > { %2123 = vmatprep.mubr.bf16.mxu0 %v3837_v48  ;;  %2220 = vmatprep.mubr.bf16.mxu1 %v3839_v49  ;;  %v3865_v48 = vld [vmem:[%s3959_s9 + $0x334] ss:$36 sps:$4 sm:$0xff]  }
  0xf0   : > { %v3867_v49 = vld [vmem:[%s3959_s9 + $0x1d0] ss:$36 sps:$4 sm:$0xff]  }
  0xf6   : > { %2124 = vmatmul.mubr.bf16.gmra.mrb[104].mxu0 %v3841_v50  ;;  %2221 = vmatmul.mubr.bf16.gmra.mrb[104].mxu1 %v3842_v51 }
  0xf7   : > { %2131 = vmatprep.mubr.bf16.mxu0 %v3844_v52  ;;  %2228 = vmatprep.mubr.bf16.mxu1 %v3846_v53 }
  0xf9   : > { %v3153_v54 = vpop.f32.mrb[0].mxu1  ;;  %v3081_v55 = vpop.f32.mrb[0].mxu0 }
  0xfa   : > { %v3154_v56 = vpop.f32.mrb[1].mxu1  ;;  %v3082_v57 = vpop.f32.mrb[1].mxu0 }
  0xfb   : > { %v4262_v60 = vadd.f32 %v3154_v56, %v3153_v54  ;;  %v3156_v61 = vpop.f32.mrb[2].mxu1  ;;  %v4264_v62 = vadd.f32 %v3082_v57, %v3081_v55  ;;  %v3084_v63 = vpop.f32.mrb[2].mxu0  ;;  %v4311_v54 = vld [vmem:[%s4694_s2] ss:$0 sm:$0xff] }
  0xfc   : > { %v3157_v2 = vpop.f32.mrb[3].mxu1  ;;  %v3085_v3 = vpop.f32.mrb[3].mxu0 }
  0xfd   : > { %v4268_v4 = vadd.f32 %v3157_v2, %v3156_v61  ;;  %v4270_v5 = vadd.f32 %v3085_v3, %v3084_v63  ;;  %v3869_v61 = vld [vmem:[%s3959_s9 + $0x218] ss:$36 sps:$4 sm:$0xff]   ;;  %v1692_v63 = vadd.f32 %v4264_v62, %v4311_v54 }
  0xfe   : > { %2132 = vmatmul.mubr.bf16.gmra.mrb[108].mxu0 %v3848_v58  ;;  %2229 = vmatmul.mubr.bf16.gmra.mrb[108].mxu1 %v3849_v59  ;;  %v3868_v59 = vld [vmem:[%s3959_s9 + $0x330] ss:$36 sps:$4 sm:$0xff]  }
  0xff   : > { %2236 = vmatprep.mubr.bf16.mxu1 %v3850_v0  ;;  %3553 = vmatprep.mubr.bf16.mxu0 %v3852_v1 }
 0x101   : > { %v3159_v6 = vpop.f32.mrb[4].mxu1  ;;  %v3087_v7 = vpop.f32.mrb[4].mxu0 }
 0x102   : > { %v3160_v8 = vpop.f32.mrb[5].mxu1  ;;  %v3088_v9 = vpop.f32.mrb[5].mxu0 }
 0x103   : > { %v4274_v12 = vadd.f32 %v3160_v8, %v3159_v6  ;;  %v3162_v13 = vpop.f32.mrb[6].mxu1  ;;  %v4276_v14 = vadd.f32 %v3088_v9, %v3087_v7  ;;  %v3090_v15 = vpop.f32.mrb[6].mxu0  ;;  %v3870_v6 = vld [vmem:[%s3959_s9 + $0x37c] ss:$36 sps:$4 sm:$0xff]  }
 0x104   : > { %v3163_v18 = vpop.f32.mrb[7].mxu1  ;;  %v3091_v19 = vpop.f32.mrb[7].mxu0  ;;  %v3872_v7 = vld [vmem:[%s3959_s9 + $0x260] ss:$36 sps:$4 sm:$0xff]  }
 0x105   : > { %v4280_v20 = vadd.f32 %v3163_v18, %v3162_v13  ;;  %v4282_v21 = vadd.f32 %v3091_v19, %v3090_v15 }
 0x106   : > { %2237 = vmatmul.mubr.bf16.gmra.mrb[112].mxu1 %v3853_v10  ;;  %3554 = vmatmul.mubr.bf16.vlgmr.msra.gmra.mrb[112].mxu0 %v3854_v11  ;;  %v1695_v10 = vadd.f32 %v4270_v5, %v4311_v54  ;;  %v1700_v5 = vadd.f32 %v4276_v14, %v4311_v54 }
 0x107   : > { %2244 = vmatprep.mubr.bf16.mxu1 %v3855_v16  ;;  %3557 = vmatprep.mubr.bf16.mxu0 %v3857_v17 }
 0x109   : > { %v3165_v22 = vpop.f32.mrb[8].mxu1  ;;  %v3093_v23 = vpop.f32.mrb[8].mxu0 }
 0x10a   : > { %v3166_v24 = vpop.f32.mrb[9].mxu1  ;;  %v3094_v25 = vpop.f32.mrb[9].mxu0 }
 0x10b   : > { %v4286_v28 = vadd.f32 %v3166_v24, %v3165_v22  ;;  %v3168_v29 = vpop.f32.mrb[10].mxu1  ;;  %v4288_v30 = vadd.f32 %v3094_v25, %v3093_v23  ;;  %v3096_v31 = vpop.f32.mrb[10].mxu0  ;;  %v3873_v22 = vld [vmem:[%s3959_s9 + $0x378] ss:$36 sps:$4 sm:$0xff]   ;;  %v3874_v23 = vld [vmem:[%s3959_s9 + $0x2a8] ss:$36 sps:$4 sm:$0xff]  }
 0x10c   : > { %v3169_v34 = vpop.f32.mrb[11].mxu1  ;;  %v3097_v35 = vpop.f32.mrb[11].mxu0 }
 0x10d   : > { %v4292_v36 = vadd.f32 %v3169_v34, %v3168_v29  ;;  %v4294_v37 = vadd.f32 %v3097_v35, %v3096_v31  ;;  %v3875_v29 = vld [vmem:[%s3959_s9 + $0x3c4] ss:$36 sps:$4 sm:$0xff]   ;;  %v3877_v31 = vld [vmem:[%s3959_s9 + $0x2f0] ss:$36 sps:$4 sm:$0xff]   ;;  %v1703_v34 = vadd.f32 %v4282_v21, %v4311_v54  ;;  %v1708_v21 = vadd.f32 %v4288_v30, %v4311_v54 }
 0x10e   : > { %2245 = vmatmul.mubr.bf16.gmra.mrb[116].mxu1 %v3858_v26  ;;  %3558 = vmatmul.mubr.bf16.gmra.mrb[116].mxu0 %v3859_v27 }
 0x10f   : > { %2252 = vmatprep.mubr.bf16.mxu1 %v3860_v32  ;;  %3561 = vmatprep.mubr.bf16.mxu0 %v3862_v33 }
 0x111   : > { %v3171_v38 = vpop.f32.mrb[12].mxu1  ;;  %v3099_v39 = vpop.f32.mrb[12].mxu0 }
 0x112   : > { %v3172_v40 = vpop.f32.mrb[13].mxu1  ;;  %v3100_v41 = vpop.f32.mrb[13].mxu0 }
 0x113   : > { %v4298_v44 = vadd.f32 %v3172_v40, %v3171_v38  ;;  %v3174_v45 = vpop.f32.mrb[14].mxu1  ;;  %v4300_v46 = vadd.f32 %v3100_v41, %v3099_v39  ;;  %v3102_v47 = vpop.f32.mrb[14].mxu0 }
 0x114   : > { %v3175_v50 = vpop.f32.mrb[15].mxu1  ;;  %v3103_v51 = vpop.f32.mrb[15].mxu0 }
 0x115   : > { %v4304_v52 = vadd.f32 %v3175_v50, %v3174_v45  ;;  %v4306_v53 = vadd.f32 %v3103_v51, %v3102_v47  ;;  %v3878_v45 = vld [vmem:[%s3959_s9 + $0x3c0] ss:$36 sps:$4 sm:$0xff]   ;;  %v3879_v47 = vld [vmem:[%s3959_s9 + $0x338] ss:$36 sps:$4 sm:$0xff]  }
 0x116   : > { %2253 = vmatmul.mubr.bf16.gmra.mrb[120].mxu1 %v3863_v42  ;;  %3562 = vmatmul.mubr.bf16.gmra.mrb[120].mxu0 %v3864_v43 }
 0x117   : > { %2260 = vmatprep.mubr.bf16.mxu1 %v3865_v48  ;;  %3565 = vmatprep.mubr.bf16.mxu0 %v3867_v49 }
 0x119   : > { %v3193_v55 = vpop.f32.mrb[16].mxu1  ;;  %v3105_v56 = vpop.f32.mrb[16].mxu0 }
 0x11a   : > { %v3194_v57 = vpop.f32.mrb[17].mxu1  ;;  %v3106_v58 = vpop.f32.mrb[17].mxu0 }
 0x11b   : > { %v3195_v0 = vadd.f32 %v3194_v57, %v3193_v55  ;;  %v3196_v1 = vpop.f32.mrb[18].mxu1  ;;  %v4317_v2 = vadd.f32 %v3106_v58, %v3105_v56  ;;  %v3108_v3 = vpop.f32.mrb[18].mxu0  ;;  %v3880_v55 = vld [vmem:[%s3959_s9 + $0x40c] ss:$36 sps:$4 sm:$0xff]   ;;  %v3882_v56 = vld [vmem:[%s3959_s9 + $0x380] ss:$36 sps:$4 sm:$0xff]  }
 0x11c   : > { %v3197_v8 = vpop.f32.mrb[19].mxu1  ;;  %v3109_v9 = vpop.f32.mrb[19].mxu0 }
 0x11d   : > { %v4323_v11 = vadd.f32 %v3195_v0, %v1692_v63  ;;  %v3198_v13 = vadd.f32 %v3197_v8, %v3196_v1  ;;  %v4325_v15 = vadd.f32 %v3109_v9, %v3108_v3  ;;  %v3883_v8 = vld [vmem:[%s3959_s9 + $0x408] ss:$36 sps:$4 sm:$0xff]  }
 0x11e   : > { %2261 = vmatmul.mubr.bf16.gmra.mrb[124].mxu1 %v3868_v59  ;;  %3566 = vmatmul.mubr.bf16.gmra.mrb[124].mxu0 %v3869_v61  ;;  %v1711_v59 = vadd.f32 %v4294_v37, %v4311_v54  ;;  %v3884_v9 = vld [vmem:[%s3959_s9 + $0x3c8] ss:$36 sps:$4 sm:$0xff]   ;;  %v1716_v37 = vadd.f32 %v4300_v46, %v4311_v54 }
 0x11f   : > { %v4327_v62 = vadd.f32 %v3198_v13, %v1695_v10  ;;  %2268 = vmatprep.mubr.bf16.mxu1 %v3870_v6  ;;  %3569 = vmatprep.mubr.bf16.mxu0 %v3872_v7 }
 0x121   : > { %v3199_v16 = vpop.f32.mrb[20].mxu1  ;;  %v3111_v17 = vpop.f32.mrb[20].mxu0 }
 0x122   : > { %v3200_v18 = vpop.f32.mrb[21].mxu1  ;;  %v3112_v19 = vpop.f32.mrb[21].mxu0 }
 0x123   : > { %v3201_v24 = vadd.f32 %v3200_v18, %v3199_v16  ;;  %v3202_v25 = vpop.f32.mrb[22].mxu1  ;;  %v4333_v26 = vadd.f32 %v3112_v19, %v3111_v17  ;;  %v3114_v27 = vpop.f32.mrb[22].mxu0  ;;  %v3885_v18 = vld [vmem:[%s3959_s9 + $0x454] ss:$36 sps:$4 sm:$0xff]  }
 0x124   : > { %v3203_v32 = vpop.f32.mrb[23].mxu1  ;;  %v3115_v33 = vpop.f32.mrb[23].mxu0  ;;  %v3887_v19 = vld [vmem:[%s3959_s9 + $0x410] ss:$36 sps:$4 sm:$0xff]  }
 0x125   : > { %v4339_v35 = vadd.f32 %v3201_v24, %v1700_v5  ;;  %v3204_v38 = vadd.f32 %v3203_v32, %v3202_v25  ;;  %v4341_v39 = vadd.f32 %v3115_v33, %v3114_v27  ;;  %v1719_v5 = vadd.f32 %v4306_v53, %v4311_v54 }
 0x126   : > { %2269 = vmatmul.mubr.bf16.gmra.mrb[128].mxu1 %v3873_v22  ;;  %3570 = vmatmul.mubr.bf16.gmra.mrb[128].mxu0 %v3874_v23  ;;  %v1724_v53 = vadd.f32 %v4317_v2, %v4311_v54 }
 0x127   : > { %v4343_v14 = vadd.f32 %v3204_v38, %v1703_v34  ;;  %2276 = vmatprep.mubr.bf16.mxu1 %v3875_v29  ;;  %3573 = vmatprep.mubr.bf16.mxu0 %v3877_v31  ;;  %v3888_v34 = vld [vmem:[%s3959_s9 + $0x450] ss:$36 sps:$4 sm:$0xff]   ;;  %v3889_v38 = vld [vmem:[%s3959_s9 + $0x458] ss:$36 sps:$4 sm:$0xff]   ;;  %s2686_s9 = sshll.u32 %s4697_s16, 2 }
 0x128   : > { %s4636_s22 = scalar_lea.vmem %s4695_s3, %s2686_s9 }
 0x129   : > { %v3205_v40 = vpop.f32.mrb[24].mxu1  ;;  %v3117_v41 = vpop.f32.mrb[24].mxu0 }
 0x12a   : > { %v3206_v42 = vpop.f32.mrb[25].mxu1  ;;  %v3118_v43 = vpop.f32.mrb[25].mxu0 }
 0x12b   : > { %v3207_v48 = vadd.f32 %v3206_v42, %v3205_v40  ;;  %v3208_v49 = vpop.f32.mrb[26].mxu1  ;;  %v4349_v50 = vadd.f32 %v3118_v43, %v3117_v41  ;;  %v3120_v51 = vpop.f32.mrb[26].mxu0 }
 0x12c   : > { %v3209_v57 = vpop.f32.mrb[27].mxu1  ;;  %v3121_v58 = vpop.f32.mrb[27].mxu0 }
 0x12d   : > { %v4355_v61 = vadd.f32 %v3207_v48, %v1708_v21  ;;  %v3210_v63 = vadd.f32 %v3209_v57, %v3208_v49  ;;  %v4357_v0 = vadd.f32 %v3121_v58, %v3120_v51  ;;  %v1727_v21 = vadd.f32 %v4325_v15, %v4311_v54 }
 0x12e   : > { %2277 = vmatmul.mubr.bf16.gmra.mrb[132].mxu1 %v3878_v45  ;;  %3574 = vmatmul.mubr.bf16.gmra.mrb[132].mxu0 %v3879_v47 }
 0x12f   : > { %v4359_v30 = vadd.f32 %v3210_v63, %v1711_v59  ;;  %2284 = vmatprep.mubr.bf16.mxu1 %v3880_v55  ;;  %3577 = vmatprep.mubr.bf16.mxu0 %v3882_v56  ;;  %v1732_v59 = vadd.f32 %v4333_v26, %v4311_v54 }
 0x131   : > { %v3211_v1 = vpop.f32.mrb[28].mxu1  ;;  %v3123_v3 = vpop.f32.mrb[28].mxu0 }
 0x132   : > { %v3212_v6 = vpop.f32.mrb[29].mxu1  ;;  %v3124_v7 = vpop.f32.mrb[29].mxu0 }
 0x133   : > { %v3213_v10 = vadd.f32 %v3212_v6, %v3211_v1  ;;  %v3214_v13 = vpop.f32.mrb[30].mxu1  ;;  %v4365_v16 = vadd.f32 %v3124_v7, %v3123_v3  ;;  %v3126_v17 = vpop.f32.mrb[30].mxu0 }
 0x134   : > { %v3215_v22 = vpop.f32.mrb[31].mxu1  ;;  %v3127_v23 = vpop.f32.mrb[31].mxu0 }
 0x135   : > { %v4371_v24 = vadd.f32 %v3213_v10, %v1716_v37  ;;  %v3216_v25 = vadd.f32 %v3215_v22, %v3214_v13  ;;  %v4373_v27 = vadd.f32 %v3127_v23, %v3126_v17  ;;  %v1740_v22 = vadd.f32 %v4349_v50, %v4311_v54 }
 0x136   : > { %2285 = vmatmul.mubr.bf16.gmra.mrb[136].mxu1 %v3883_v8  ;;  %3578 = vmatmul.mubr.bf16.gmra.mrb[136].mxu0 %v3884_v9  ;;  %v1735_v8 = vadd.f32 %v4341_v39, %v4311_v54 }
 0x137   : > { %v4375_v46 = vadd.f32 %v3216_v25, %v1719_v5  ;;  %2292 = vmatprep.mubr.bf16.mxu1 %v3885_v18  ;;  %3581 = vmatprep.mubr.bf16.mxu0 %v3887_v19 }
 0x139   : > { %v3217_v29 = vpop.f32.mrb[32].mxu1  ;;  %v3129_v31 = vpop.f32.mrb[32].mxu0 }
 0x13a   : > { %v3218_v32 = vpop.f32.mrb[33].mxu1  ;;  %v3130_v33 = vpop.f32.mrb[33].mxu0 }
 0x13b   : > { %v3219_v40 = vadd.f32 %v3218_v32, %v3217_v29  ;;  %v3220_v41 = vpop.f32.mrb[34].mxu1  ;;  %v4381_v42 = vadd.f32 %v3130_v33, %v3129_v31  ;;  %v3132_v43 = vpop.f32.mrb[34].mxu0  ;;  %v1743_v32 = vadd.f32 %v4357_v0, %v4311_v54 }
 0x13c   : > { %v3221_v45 = vpop.f32.mrb[35].mxu1  ;;  %v3133_v47 = vpop.f32.mrb[35].mxu0 }
 0x13d   : > { %v4385_v48 = vadd.f32 %v3219_v40, %v1724_v53  ;;  %v3222_v49 = vadd.f32 %v3221_v45, %v3220_v41  ;;  %v3134_v51 = vadd.f32 %v3133_v47, %v3132_v43  ;;  %v1748_v45 = vadd.f32 %v4365_v16, %v4311_v54 }
 0x13e   : > { %2293 = vmatmul.mubr.bf16.gmra.mrb[140].mxu1 %v3888_v34  ;;  %3582 = vmatmul.mubr.bf16.gmra.mrb[140].mxu0 %v3889_v38 }
 0x13f   : > { %v4387_v55 = vadd.f32 %v3222_v49, %v1727_v21 }
 0x141   : > { %v3223_v56 = vpop.f32.mrb[36].mxu1  ;;  %v3135_v2 = vpop.f32.mrb[36].mxu0 }
 0x142   : > { %v3224_v57 = vpop.f32.mrb[37].mxu1  ;;  %v3136_v58 = vpop.f32.mrb[37].mxu0 }
 0x143   : > { %v3225_v63 = vadd.f32 %v3224_v57, %v3223_v56  ;;  %v3226_v1 = vpop.f32.mrb[38].mxu1  ;;  %v4391_v3 = vadd.f32 %v3136_v58, %v3135_v2  ;;  %v3138_v15 = vpop.f32.mrb[38].mxu0  ;;  %v1751_v57 = vadd.f32 %v4373_v27, %v4311_v54  ;;  %v1759_v27 = vadd.f32 %v3134_v51, %v4311_v54 }
 0x144   : > { %v3227_v6 = vpop.f32.mrb[39].mxu1  ;;  %v3139_v7 = vpop.f32.mrb[39].mxu0 }
 0x145   : > { %v4395_v9 = vadd.f32 %v3225_v63, %v1732_v59  ;;  %v3228_v37 = vadd.f32 %v3227_v6, %v3226_v1  ;;  %v3140_v10 = vadd.f32 %v3139_v7, %v3138_v15  ;;  %v1764_v51 = vadd.f32 %v4391_v3, %v4311_v54 }
 0x147   : > { %v4397_v13 = vadd.f32 %v3228_v37, %v1735_v8  ;;  %v1756_v8 = vadd.f32 %v4381_v42, %v4311_v54 }
 0x149   : > { %v3229_v17 = vpop.f32.mrb[40].mxu1  ;;  %v3141_v18 = vpop.f32.mrb[40].mxu0 }
 0x14a   : > { %v3230_v19 = vpop.f32.mrb[41].mxu1  ;;  %v3142_v26 = vpop.f32.mrb[41].mxu0 }
 0x14b   : > { %v3231_v23 = vadd.f32 %v3230_v19, %v3229_v17  ;;  %v3232_v5 = vpop.f32.mrb[42].mxu1  ;;  %v4401_v25 = vadd.f32 %v3142_v26, %v3141_v18  ;;  %v3144_v29 = vpop.f32.mrb[42].mxu0 }
 0x14c   : > { %v3233_v31 = vpop.f32.mrb[43].mxu1  ;;  %v3145_v39 = vpop.f32.mrb[43].mxu0 }
 0x14d   : > { %v4405_v33 = vadd.f32 %v3231_v23, %v1740_v22  ;;  %v3234_v34 = vadd.f32 %v3233_v31, %v3232_v5  ;;  %v4407_v38 = vadd.f32 %v3145_v39, %v3144_v29 }
 0x14f   : > { %v4409_v53 = vadd.f32 %v3234_v34, %v1743_v32 }
 0x151   : > { %v3235_v40 = vpop.f32.mrb[44].mxu1  ;;  %v3147_v41 = vpop.f32.mrb[44].mxu0 }
 0x152   : > { %v3236_v50 = vpop.f32.mrb[45].mxu1  ;;  %v3148_v43 = vpop.f32.mrb[45].mxu0 }
 0x153   : > { %v3237_v47 = vadd.f32 %v3236_v50, %v3235_v40  ;;  %v3238_v21 = vpop.f32.mrb[46].mxu1  ;;  %v4413_v49 = vadd.f32 %v3148_v43, %v3147_v41  ;;  %v3150_v56 = vpop.f32.mrb[46].mxu0 }
 0x154   : > { %v3239_v0 = vpop.f32.mrb[47].mxu1  ;;  %v3151_v2 = vpop.f32.mrb[47].mxu0 }
 0x155   : > { %v4417_v58 = vadd.f32 %v3237_v47, %v1748_v45  ;;  %v3240_v59 = vadd.f32 %v3239_v0, %v3238_v21  ;;  %v4419_v63 = vadd.f32 %v3151_v2, %v3150_v56 }
 0x157   : > { %v4421_v1 = vadd.f32 %v3240_v59, %v1751_v57 }
 0x159   : > { %v3241_v15 = vpop.f32.mrb[48].mxu1  ;;  %v3305_v6 = vpop.f32.mrb[48].mxu0 }
 0x15a   : > { %v3242_v16 = vpop.f32.mrb[49].mxu1  ;;  %v3306_v7 = vpop.f32.mrb[49].mxu0 }
 0x15b   : > { %v3243_v37 = vadd.f32 %v3242_v16, %v3241_v15  ;;  %v3307_v17 = vadd.f32 %v3306_v7, %v3305_v6  ;;  %v3244_v18 = vpop.f32.mrb[50].mxu1  ;;  %v3308_v19 = vpop.f32.mrb[50].mxu0 }
 0x15c   : > { %v3245_v26 = vpop.f32.mrb[51].mxu1  ;;  %v3309_v22 = vpop.f32.mrb[51].mxu0 }
 0x15d   : > { %v4426_v23 = vadd.f32 %v3243_v37, %v1756_v8  ;;  %v4429_v5 = vadd.f32 %v3307_v17, %v4323_v11  ;;  %v3246_v29 = vadd.f32 %v3245_v26, %v3244_v18  ;;  %v3310_v31 = vadd.f32 %v3309_v22, %v3308_v19 }
 0x15e   : > { %v1767_v11 = vadd.f32 %v3140_v10, %v4311_v54  ;;  %v1772_v10 = vadd.f32 %v4401_v25, %v4311_v54 }
 0x15f   : > { %v4431_v39 = vadd.f32 %v3246_v29, %v1759_v27  ;;  %v4434_v32 = vadd.f32 %v3310_v31, %v4327_v62 }
 0x161   : > { %v3247_v42 = vpop.f32.mrb[52].mxu1  ;;  %v3311_v34 = vpop.f32.mrb[52].mxu0 }
 0x162   : > { %v3248_v40 = vpop.f32.mrb[53].mxu1  ;;  %v3312_v41 = vpop.f32.mrb[53].mxu0 }
 0x163   : > { %v3249_v50 = vadd.f32 %v3248_v40, %v3247_v42  ;;  %v3313_v43 = vadd.f32 %v3312_v41, %v3311_v34  ;;  %v3250_v45 = vpop.f32.mrb[54].mxu1  ;;  %v3314_v47 = vpop.f32.mrb[54].mxu0 }
 0x164   : > { %v3251_v21 = vpop.f32.mrb[55].mxu1  ;;  %v3315_v56 = vpop.f32.mrb[55].mxu0 }
 0x165   : > { %v4439_v0 = vadd.f32 %v3249_v50, %v1764_v51  ;;  %v4442_v62 = vadd.f32 %v3313_v43, %v4339_v35  ;;  %v3252_v2 = vadd.f32 %v3251_v21, %v3250_v45  ;;  %v3316_v57 = vadd.f32 %v3315_v56, %v3314_v47 }
 0x166   : > { %v1775_v35 = vadd.f32 %v4407_v38, %v4311_v54  ;;  %v1780_v38 = vadd.f32 %v4413_v49, %v4311_v54 }
 0x167   : > { %v4444_v59 = vadd.f32 %v3252_v2, %v1767_v11  ;;  %v4447_v15 = vadd.f32 %v3316_v57, %v4343_v14 }
 0x169   : > { %v3253_v3 = vpop.f32.mrb[56].mxu1  ;;  %v3317_v6 = vpop.f32.mrb[56].mxu0 }
 0x16a   : > { %v3254_v16 = vpop.f32.mrb[57].mxu1  ;;  %v3318_v7 = vpop.f32.mrb[57].mxu0 }
 0x16b   : > { %v3255_v8 = vadd.f32 %v3254_v16, %v3253_v3  ;;  %v3319_v37 = vadd.f32 %v3318_v7, %v3317_v6  ;;  %v3256_v17 = vpop.f32.mrb[58].mxu1  ;;  %v3320_v18 = vpop.f32.mrb[58].mxu0 }
 0x16c   : > { %v3257_v19 = vpop.f32.mrb[59].mxu1  ;;  %v3321_v27 = vpop.f32.mrb[59].mxu0 }
 0x16d   : > { %v4453_v26 = vadd.f32 %v3255_v8, %v1772_v10  ;;  %v4456_v14 = vadd.f32 %v3319_v37, %v4355_v61  ;;  %v3258_v22 = vadd.f32 %v3257_v19, %v3256_v17  ;;  %v3322_v29 = vadd.f32 %v3321_v27, %v3320_v18 }
 0x16e   : > { %v1783_v61 = vadd.f32 %v4419_v63, %v4311_v54  ;;  %v1788_v63 = vadd.f32 %v4262_v60, %v4311_v54 }
 0x16f   : > { %v4458_v31 = vadd.f32 %v3258_v22, %v1775_v35  ;;  %v4461_v25 = vadd.f32 %v3322_v29, %v4359_v30 }
 0x171   : > { %v3259_v42 = vpop.f32.mrb[60].mxu1  ;;  %v3323_v34 = vpop.f32.mrb[60].mxu0 }
 0x172   : > { %v3260_v40 = vpop.f32.mrb[61].mxu1  ;;  %v3324_v41 = vpop.f32.mrb[61].mxu0 }
 0x173   : > { %v3261_v51 = vadd.f32 %v3260_v40, %v3259_v42  ;;  %v3325_v50 = vadd.f32 %v3324_v41, %v3323_v34  ;;  %v3262_v43 = vpop.f32.mrb[62].mxu1  ;;  %v3326_v45 = vpop.f32.mrb[62].mxu0 }
 0x174   : > { %v3263_v47 = vpop.f32.mrb[63].mxu1  ;;  %v3327_v11 = vpop.f32.mrb[63].mxu0 }
 0x175   : > { %v4467_v21 = vadd.f32 %v3261_v51, %v1780_v38  ;;  %v4470_v30 = vadd.f32 %v3325_v50, %v4371_v24  ;;  %v3264_v56 = vadd.f32 %v3263_v47, %v3262_v43  ;;  %v3328_v2 = vadd.f32 %v3327_v11, %v3326_v45 }
 0x176   : > { %v1791_v24 = vadd.f32 %v4268_v4, %v4311_v54  ;;  %v1796_v4 = vadd.f32 %v4274_v12, %v4311_v54 }
 0x177   : > { %v4472_v57 = vadd.f32 %v3264_v56, %v1783_v61  ;;  %v4475_v49 = vadd.f32 %v3328_v2, %v4375_v46 }
 0x179   : > { %v3265_v3 = vpop.f32.mrb[64].mxu1  ;;  %v3329_v6 = vpop.f32.mrb[64].mxu0 }
 0x17a   : > { %v3266_v16 = vpop.f32.mrb[65].mxu1  ;;  %v3330_v7 = vpop.f32.mrb[65].mxu0 }
 0x17b   : > { %v3267_v10 = vadd.f32 %v3266_v16, %v3265_v3  ;;  %v3331_v8 = vadd.f32 %v3330_v7, %v3329_v6  ;;  %v3268_v37 = vpop.f32.mrb[66].mxu1  ;;  %v3332_v17 = vpop.f32.mrb[66].mxu0 }
 0x17c   : > { %v3269_v18 = vpop.f32.mrb[67].mxu1  ;;  %v3333_v35 = vpop.f32.mrb[67].mxu0 }
 0x17d   : > { %v4481_v19 = vadd.f32 %v3267_v10, %v1788_v63  ;;  %v4484_v46 = vadd.f32 %v3331_v8, %v4385_v48  ;;  %v3270_v27 = vadd.f32 %v3269_v18, %v3268_v37  ;;  %v3334_v22 = vadd.f32 %v3333_v35, %v3332_v17 }
 0x17e   : > { %v1799_v48 = vadd.f32 %v4280_v20, %v4311_v54  ;;  %v1804_v20 = vadd.f32 %v4286_v28, %v4311_v54 }
 0x17f   : > { %v4486_v29 = vadd.f32 %v3270_v27, %v1791_v24  ;;  %v4489_v60 = vadd.f32 %v3334_v22, %v4387_v55 }
 0x181   : > { %v3271_v42 = vpop.f32.mrb[68].mxu1  ;;  %v3335_v34 = vpop.f32.mrb[68].mxu0 }
 0x182   : > { %v3272_v40 = vpop.f32.mrb[69].mxu1  ;;  %v3336_v41 = vpop.f32.mrb[69].mxu0 }
 0x183   : > { %v3273_v38 = vadd.f32 %v3272_v40, %v3271_v42  ;;  %v3337_v51 = vadd.f32 %v3336_v41, %v3335_v34  ;;  %v3274_v50 = vpop.f32.mrb[70].mxu1  ;;  %v3338_v43 = vpop.f32.mrb[70].mxu0 }
 0x184   : > { %v3275_v45 = vpop.f32.mrb[71].mxu1  ;;  %v3339_v61 = vpop.f32.mrb[71].mxu0 }
 0x185   : > { %v4495_v47 = vadd.f32 %v3273_v38, %v1796_v4  ;;  %v4498_v55 = vadd.f32 %v3337_v51, %v4395_v9  ;;  %v3276_v11 = vadd.f32 %v3275_v45, %v3274_v50  ;;  %v3340_v56 = vadd.f32 %v3339_v61, %v3338_v43 }
 0x186   : > { %v1807_v9 = vadd.f32 %v4292_v36, %v4311_v54  ;;  %v1812_v36 = vadd.f32 %v4298_v44, %v4311_v54 }
 0x187   : > { %v4500_v2 = vadd.f32 %v3276_v11, %v1799_v48  ;;  %v4503_v12 = vadd.f32 %v3340_v56, %v4397_v13 }
 0x189   : > { %v3277_v3 = vpop.f32.mrb[72].mxu1  ;;  %v3341_v6 = vpop.f32.mrb[72].mxu0 }
 0x18a   : > { %v3278_v16 = vpop.f32.mrb[73].mxu1  ;;  %v3342_v7 = vpop.f32.mrb[73].mxu0 }
 0x18b   : > { %v3279_v63 = vadd.f32 %v3278_v16, %v3277_v3  ;;  %v3343_v10 = vadd.f32 %v3342_v7, %v3341_v6  ;;  %v3280_v8 = vpop.f32.mrb[74].mxu1  ;;  %v3344_v37 = vpop.f32.mrb[74].mxu0 }
 0x18c   : > { %v3281_v17 = vpop.f32.mrb[75].mxu1  ;;  %v3345_v24 = vpop.f32.mrb[75].mxu0 }
 0x18d   : > { %v4509_v18 = vadd.f32 %v3279_v63, %v1804_v20  ;;  %v4512_v13 = vadd.f32 %v3343_v10, %v4405_v33  ;;  %v3282_v35 = vadd.f32 %v3281_v17, %v3280_v8  ;;  %v3346_v27 = vadd.f32 %v3345_v24, %v3344_v37 }
 0x18e   : > { %v1815_v33 = vadd.f32 %v4304_v52, %v4311_v54 }
 0x18f   : > { %v4514_v22 = vadd.f32 %v3282_v35, %v1807_v9  ;;  %v4517_v28 = vadd.f32 %v3346_v27, %v4409_v53 }
 0x191   : > { %v3283_v42 = vpop.f32.mrb[76].mxu1  ;;  %v3347_v34 = vpop.f32.mrb[76].mxu0 }
 0x192   : > { %v3284_v40 = vpop.f32.mrb[77].mxu1  ;;  %v3348_v41 = vpop.f32.mrb[77].mxu0 }
 0x193   : > { %v3285_v4 = vadd.f32 %v3284_v40, %v3283_v42  ;;  %v3349_v38 = vadd.f32 %v3348_v41, %v3347_v34  ;;  %v3286_v51 = vpop.f32.mrb[78].mxu1  ;;  %v3350_v50 = vpop.f32.mrb[78].mxu0 }
 0x194   : > { %v3287_v43 = vpop.f32.mrb[79].mxu1  ;;  %v3351_v48 = vpop.f32.mrb[79].mxu0 }
 0x195   : > { %v4523_v45 = vadd.f32 %v3285_v4, %v1812_v36  ;;  %v4526_v53 = vadd.f32 %v3349_v38, %v4417_v58  ;;  %v3288_v61 = vadd.f32 %v3287_v43, %v3286_v51  ;;  %v3352_v11 = vadd.f32 %v3351_v48, %v3350_v50 }
 0x197   : > { %v4528_v56 = vadd.f32 %v3288_v61, %v1815_v33  ;;  %v4531_v44 = vadd.f32 %v3352_v11, %v4421_v1 }
 0x199   : > { %v3353_v3 = vpop.f32.mrb[80].mxu0  ;;  %v3417_v6 = vpop.f32.mrb[80].mxu1 }
 0x19a   : > { %v3354_v16 = vpop.f32.mrb[81].mxu0  ;;  %v3418_v7 = vpop.f32.mrb[81].mxu1 }
 0x19b   : > { %v3355_v20 = vadd.f32 %v3354_v16, %v3353_v3  ;;  %v3419_v52 = vadd.f32 %v3418_v7, %v3417_v6  ;;  %v3356_v54 = vpop.f32.mrb[82].mxu0  ;;  %v3420_v63 = vpop.f32.mrb[82].mxu1 }
 0x19c   : > { %v3357_v10 = vpop.f32.mrb[83].mxu0  ;;  %v3421_v8 = vpop.f32.mrb[83].mxu1 }
 0x19d   : > { %v4534_v58 = vadd.f32 %v3355_v20, %v4426_v23  ;;  %v3358_v37 = vadd.f32 %v3357_v10, %v3356_v54  ;;  %v3422_v9 = vadd.f32 %v3421_v8, %v3420_v63  ;;  %v4537_v17 = vadd.f32 %v3419_v52, %v4429_v5 }
 0x19f   : > { %v4540_v1 = vadd.f32 %v3358_v37, %v4431_v39  ;;  %v4543_v24 = vadd.f32 %v3422_v9, %v4434_v32 }
 0x1a1   : > { %v3359_v35 = vpop.f32.mrb[84].mxu0  ;;  %v3423_v27 = vpop.f32.mrb[84].mxu1 }
 0x1a2   : > { %v3360_v42 = vpop.f32.mrb[85].mxu0  ;;  %v3424_v34 = vpop.f32.mrb[85].mxu1 }
 0x1a3   : > { %v3361_v40 = vadd.f32 %v3360_v42, %v3359_v35  ;;  %v3425_v41 = vadd.f32 %v3424_v34, %v3423_v27  ;;  %v3362_v36 = vpop.f32.mrb[86].mxu0  ;;  %v3426_v23 = vpop.f32.mrb[86].mxu1 }
 0x1a4   : > { %v3363_v4 = vpop.f32.mrb[87].mxu0  ;;  %v3427_v38 = vpop.f32.mrb[87].mxu1 }
 0x1a5   : > { %v4546_v51 = vadd.f32 %v3361_v40, %v4439_v0  ;;  %v3364_v5 = vadd.f32 %v3363_v4, %v3362_v36  ;;  %v3428_v50 = vadd.f32 %v3427_v38, %v3426_v23  ;;  %v4549_v39 = vadd.f32 %v3425_v41, %v4442_v62 }
 0x1a7   : > { %v4552_v32 = vadd.f32 %v3364_v5, %v4444_v59  ;;  %v4555_v33 = vadd.f32 %v3428_v50, %v4447_v15 }
 0x1a9   : > { %v3365_v43 = vpop.f32.mrb[88].mxu0  ;;  %v3429_v48 = vpop.f32.mrb[88].mxu1 }
 0x1aa   : > { %v3366_v61 = vpop.f32.mrb[89].mxu0  ;;  %v3430_v11 = vpop.f32.mrb[89].mxu1 }
 0x1ab   : > { %v3367_v3 = vadd.f32 %v3366_v61, %v3365_v43  ;;  %v3431_v6 = vadd.f32 %v3430_v11, %v3429_v48  ;;  %v3368_v16 = vpop.f32.mrb[90].mxu0  ;;  %v3432_v0 = vpop.f32.mrb[90].mxu1 }
 0x1ac   : > { %v3369_v7 = vpop.f32.mrb[91].mxu0  ;;  %v3433_v20 = vpop.f32.mrb[91].mxu1 }
 0x1ad   : > { %v4558_v52 = vadd.f32 %v3367_v3, %v4453_v26  ;;  %v3370_v62 = vadd.f32 %v3369_v7, %v3368_v16  ;;  %v3434_v54 = vadd.f32 %v3433_v20, %v3432_v0  ;;  %v4561_v59 = vadd.f32 %v3431_v6, %v4456_v14 }
 0x1af   : > { %v4564_v15 = vadd.f32 %v3370_v62, %v4458_v31  ;;  %v4567_v63 = vadd.f32 %v3434_v54, %v4461_v25 }
 0x1b1   : > { %v3371_v10 = vpop.f32.mrb[92].mxu0  ;;  %v3435_v8 = vpop.f32.mrb[92].mxu1 }
 0x1b2   : > { %v3372_v37 = vpop.f32.mrb[93].mxu0  ;;  %v3436_v9 = vpop.f32.mrb[93].mxu1 }
 0x1b3   : > { %v3373_v35 = vadd.f32 %v3372_v37, %v3371_v10  ;;  %v3437_v27 = vadd.f32 %v3436_v9, %v3435_v8  ;;  %v3374_v42 = vpop.f32.mrb[94].mxu0  ;;  %v3438_v26 = vpop.f32.mrb[94].mxu1 }
 0x1b4   : > { %v3375_v34 = vpop.f32.mrb[95].mxu0  ;;  %v3439_v40 = vpop.f32.mrb[95].mxu1 }
 0x1b5   : > { %v4570_v41 = vadd.f32 %v3373_v35, %v4467_v21  ;;  %v3376_v14 = vadd.f32 %v3375_v34, %v3374_v42  ;;  %v3440_v36 = vadd.f32 %v3439_v40, %v3438_v26  ;;  %v4573_v31 = vadd.f32 %v3437_v27, %v4470_v30 }
 0x1b7   : > { %v4576_v25 = vadd.f32 %v3376_v14, %v4472_v57  ;;  %v4579_v23 = vadd.f32 %v3440_v36, %v4475_v49 }
 0x1b9   : > { %v3377_v4 = vpop.f32.mrb[96].mxu0  ;;  %v3441_v38 = vpop.f32.mrb[96].mxu1 }
 0x1ba   : > { %v3378_v5 = vpop.f32.mrb[97].mxu0  ;;  %v3442_v50 = vpop.f32.mrb[97].mxu1 }
 0x1bb   : > { %v3379_v43 = vadd.f32 %v3378_v5, %v3377_v4  ;;  %v3443_v48 = vadd.f32 %v3442_v50, %v3441_v38  ;;  %v3380_v61 = vpop.f32.mrb[98].mxu0  ;;  %v3444_v21 = vpop.f32.mrb[98].mxu1 }
 0x1bc   : > { %v3381_v11 = vpop.f32.mrb[99].mxu0  ;;  %v3445_v3 = vpop.f32.mrb[99].mxu1 }
 0x1bd   : > { %v4582_v6 = vadd.f32 %v3379_v43, %v4481_v19  ;;  %v3382_v30 = vadd.f32 %v3381_v11, %v3380_v61  ;;  %v3446_v16 = vadd.f32 %v3445_v3, %v3444_v21  ;;  %v4585_v57 = vadd.f32 %v3443_v48, %v4484_v46 }
 0x1bf   : > { %v4588_v49 = vadd.f32 %v3382_v30, %v4486_v29  ;;  %v4591_v0 = vadd.f32 %v3446_v16, %v4489_v60 }
 0x1c1   : > { %v3383_v7 = vpop.f32.mrb[100].mxu0  ;;  %v3447_v20 = vpop.f32.mrb[100].mxu1 }
 0x1c2   : > { %v3384_v62 = vpop.f32.mrb[101].mxu0  ;;  %v3448_v54 = vpop.f32.mrb[101].mxu1 }
 0x1c3   : > { %v3385_v10 = vadd.f32 %v3384_v62, %v3383_v7  ;;  %v3449_v8 = vadd.f32 %v3448_v54, %v3447_v20  ;;  %v3386_v37 = vpop.f32.mrb[102].mxu0  ;;  %v3450_v19 = vpop.f32.mrb[102].mxu1 }
 0x1c4   : > { %v3387_v9 = vpop.f32.mrb[103].mxu0  ;;  %v3451_v35 = vpop.f32.mrb[103].mxu1 }
 0x1c5   : > { %v4594_v27 = vadd.f32 %v3385_v10, %v4495_v47  ;;  %v3388_v46 = vadd.f32 %v3387_v9, %v3386_v37  ;;  %v3452_v42 = vadd.f32 %v3451_v35, %v3450_v19  ;;  %v4597_v29 = vadd.f32 %v3449_v8, %v4498_v55 }
 0x1c7   : > { %v4600_v60 = vadd.f32 %v3388_v46, %v4500_v2  ;;  %v4603_v26 = vadd.f32 %v3452_v42, %v4503_v12 }
 0x1c9   : > { %v3389_v34 = vpop.f32.mrb[104].mxu0  ;;  %v3453_v40 = vpop.f32.mrb[104].mxu1 }
 0x1ca   : > { %v3390_v14 = vpop.f32.mrb[105].mxu0  ;;  %v3454_v36 = vpop.f32.mrb[105].mxu1 }
 0x1cb   : > { %v3391_v4 = vadd.f32 %v3390_v14, %v3389_v34  ;;  %v3455_v38 = vadd.f32 %v3454_v36, %v3453_v40  ;;  %v3392_v5 = vpop.f32.mrb[106].mxu0  ;;  %v3456_v47 = vpop.f32.mrb[106].mxu1 }
 0x1cc   : > { %v3393_v50 = vpop.f32.mrb[107].mxu0  ;;  %v3457_v43 = vpop.f32.mrb[107].mxu1 }
 0x1cd   : > { %v4606_v48 = vadd.f32 %v3391_v4, %v4509_v18  ;;  %v3394_v55 = vadd.f32 %v3393_v50, %v3392_v5  ;;  %v3458_v61 = vadd.f32 %v3457_v43, %v3456_v47  ;;  %v4609_v2 = vadd.f32 %v3455_v38, %v4512_v13 }
 0x1cf   : > { %v4612_v12 = vadd.f32 %v3394_v55, %v4514_v22  ;;  %v4615_v21 = vadd.f32 %v3458_v61, %v4517_v28 }
 0x1d1   : > { %v3395_v11 = vpop.f32.mrb[108].mxu0  ;;  %v3459_v3 = vpop.f32.mrb[108].mxu1 }
 0x1d2   : > { %v3396_v30 = vpop.f32.mrb[109].mxu0  ;;  %v3460_v16 = vpop.f32.mrb[109].mxu1 }
 0x1d3   : > { %v3397_v7 = vadd.f32 %v3396_v30, %v3395_v11  ;;  %v3461_v20 = vadd.f32 %v3460_v16, %v3459_v3  ;;  %v3398_v18 = vpop.f32.mrb[110].mxu0  ;;  %v3462_v62 = vpop.f32.mrb[110].mxu1 }
 0x1d4   : > { %v3399_v54 = vpop.f32.mrb[111].mxu0  ;;  %v3463_v10 = vpop.f32.mrb[111].mxu1 }
 0x1d5   : > { %v4618_v13 = vadd.f32 %v3397_v7, %v4523_v45  ;;  %v3400_v8 = vadd.f32 %v3399_v54, %v3398_v18  ;;  %v3464_v22 = vadd.f32 %v3463_v10, %v3462_v62  ;;  %v4621_v37 = vadd.f32 %v3461_v20, %v4526_v53 }
 0x1d7   : > { %v4624_v28 = vadd.f32 %v3400_v8, %v4528_v56  ;;  %v4627_v19 = vadd.f32 %v3464_v22, %v4531_v44 }
 0x1d9   : > { %v3465_v9 = vpop.f32.mrb[112].mxu1  ;;  %v3555_v35 = vpop.f32.mrb[112].mxu0 }
 0x1da   : > { %v2344_v46 = vadd.f32 %v3555_v35, %v4549_v39  ;;  %v3466_v42 = vpop.f32.mrb[113].mxu1  ;;  %v2335_v34 = vpop.f32.mrb[113].mxu0 }
 0x1db   : > { %v3467_v45 = vadd.f32 %v3466_v42, %v3465_v9  ;;  %v2336_v40 = vadd.f32 %v2335_v34, %v4537_v17  ;;  %v3468_v14 = vpop.f32.mrb[114].mxu1  ;;  %v3556_v36 = vpop.f32.mrb[114].mxu0 }
 0x1dc   : > { %v2347_v53 = vadd.f32 %v3556_v36, %v4555_v33  ;;  %v3469_v4 = vpop.f32.mrb[115].mxu1  ;;  %v2338_v56 = vpop.f32.mrb[115].mxu0 }
 0x1dd   : > { %v3470_v44 = vadd.f32 %v3469_v4, %v3468_v14  ;;  %v2339_v39 = vadd.f32 %v2338_v56, %v4543_v24  ;;  %v4640_v38 = vadd.f32 %v3467_v45, %v4534_v58 }
 0x1de   : > { %v2978_v17 = vpack.c.bf16 %v2347_v53, %v2344_v46 }
 0x1df   : > { %v2973_v5 = vpack.c.bf16 %v2339_v39, %v2336_v40  ;;  %v4643_v47 = vadd.f32 %v3470_v44, %v4540_v1 }
 0x1e0   : > { %3050 = vst [vmem:[%s4636_s22 + $0x8] sm:$0xff] %v2978_v17  }
 0x1e1   : > { %2974 = vst [vmem:[%s4636_s22] sm:$0xff] %v2973_v5   ;;  %v3471_v33 = vpop.f32.mrb[116].mxu1  ;;  %v3559_v50 = vpop.f32.mrb[116].mxu0 }
 0x1e2   : > { %v2360_v43 = vadd.f32 %v3559_v50, %v4573_v31  ;;  %v3472_v55 = vpop.f32.mrb[117].mxu1  ;;  %v2351_v61 = vpop.f32.mrb[117].mxu0 }
 0x1e3   : > { %v3473_v11 = vadd.f32 %v3472_v55, %v3471_v33  ;;  %v2352_v24 = vadd.f32 %v2351_v61, %v4561_v59  ;;  %v3474_v58 = vpop.f32.mrb[118].mxu1  ;;  %v3560_v3 = vpop.f32.mrb[118].mxu0 }
 0x1e4   : > { %v2363_v30 = vadd.f32 %v3560_v3, %v4579_v23  ;;  %v3475_v16 = vpop.f32.mrb[119].mxu1  ;;  %v2354_v1 = vpop.f32.mrb[119].mxu0 }
 0x1e5   : > { %v3476_v7 = vadd.f32 %v3475_v16, %v3474_v58  ;;  %v2355_v20 = vadd.f32 %v2354_v1, %v4567_v63  ;;  %v2247_v18 = vadd.f32 %v3473_v11, %v4546_v51 }
 0x1e6   : > { %v2988_v62 = vpack.c.bf16 %v2363_v30, %v2360_v43 }
 0x1e7   : > { %v2983_v31 = vpack.c.bf16 %v2355_v20, %v2352_v24  ;;  %v2250_v54 = vadd.f32 %v3476_v7, %v4552_v32 }
 0x1e8   : > { %3052 = vst [vmem:[%s4636_s22 + $0x18] sm:$0xff] %v2988_v62  }
 0x1e9   : > { %3051 = vst [vmem:[%s4636_s22 + $0x10] sm:$0xff] %v2983_v31   ;;  %v3477_v10 = vpop.f32.mrb[120].mxu1  ;;  %v3563_v8 = vpop.f32.mrb[120].mxu0 }
 0x1ea   : > { %v2376_v59 = vadd.f32 %v3563_v8, %v4597_v29  ;;  %v3478_v22 = vpop.f32.mrb[121].mxu1  ;;  %v2367_v23 = vpop.f32.mrb[121].mxu0 }
 0x1eb   : > { %v3479_v9 = vadd.f32 %v3478_v22, %v3477_v10  ;;  %v2368_v35 = vadd.f32 %v2367_v23, %v4585_v57  ;;  %v3480_v63 = vpop.f32.mrb[122].mxu1  ;;  %v3564_v46 = vpop.f32.mrb[122].mxu0 }
 0x1ec   : > { %v2379_v51 = vadd.f32 %v3564_v46, %v4603_v26  ;;  %v3481_v42 = vpop.f32.mrb[123].mxu1  ;;  %v2370_v34 = vpop.f32.mrb[123].mxu0 }
 0x1ed   : > { %v3482_v32 = vadd.f32 %v3481_v42, %v3480_v63  ;;  %v2371_v45 = vadd.f32 %v2370_v34, %v4591_v0  ;;  %v2255_v40 = vadd.f32 %v3479_v9, %v4558_v52 }
 0x1ee   : > { %v2998_v14 = vpack.c.bf16 %v2379_v51, %v2376_v59 }
 0x1ef   : > { %v2993_v29 = vpack.c.bf16 %v2371_v45, %v2368_v35  ;;  %v2258_v36 = vadd.f32 %v3482_v32, %v4564_v15 }
 0x1f0   : > { %3054 = vst [vmem:[%s4636_s22 + $0x28] sm:$0xff] %v2998_v14  }
 0x1f1   : > { %3053 = vst [vmem:[%s4636_s22 + $0x20] sm:$0xff] %v2993_v29   ;;  %v3483_v53 = vpop.f32.mrb[124].mxu1  ;;  %v3567_v4 = vpop.f32.mrb[124].mxu0 }
 0x1f2   : > { %v2392_v57 = vadd.f32 %v3567_v4, %v4621_v37  ;;  %v3484_v56 = vpop.f32.mrb[125].mxu1  ;;  %v2383_v26 = vpop.f32.mrb[125].mxu0 }
 0x1f3   : > { %v3485_v44 = vadd.f32 %v3484_v56, %v3483_v53  ;;  %v2384_v39 = vadd.f32 %v2383_v26, %v4609_v2  ;;  %v3486_v0 = vpop.f32.mrb[126].mxu1  ;;  %v3568_v17 = vpop.f32.mrb[126].mxu0 }
 0x1f4   : > { %v2395_v52 = vadd.f32 %v3568_v17, %v4627_v19  ;;  %v3487_v5 = vpop.f32.mrb[127].mxu1  ;;  %v2386_v33 = vpop.f32.mrb[127].mxu0 }
 0x1f5   : > { %v3488_v15 = vadd.f32 %v3487_v5, %v3486_v0  ;;  %v2387_v50 = vadd.f32 %v2386_v33, %v4615_v21  ;;  %v2263_v43 = vadd.f32 %v3485_v44, %v4570_v41 }
 0x1f6   : > { %v3008_v55 = vpack.c.bf16 %v2395_v52, %v2392_v57 }
 0x1f7   : > { %v3003_v37 = vpack.c.bf16 %v2387_v50, %v2384_v39  ;;  %v2266_v61 = vadd.f32 %v3488_v15, %v4576_v25 }
 0x1f8   : > { %3056 = vst [vmem:[%s4636_s22 + $0x38] sm:$0xff] %v3008_v55  }
 0x1f9   : > { %3055 = vst [vmem:[%s4636_s22 + $0x30] sm:$0xff] %v3003_v37   ;;  %v3489_v11 = vpop.f32.mrb[128].mxu1  ;;  %v3571_v24 = vpop.f32.mrb[128].mxu0 }
 0x1fa   : > { %v2408_v2 = vadd.f32 %v3571_v24, %v2247_v18  ;;  %v3490_v58 = vpop.f32.mrb[129].mxu1  ;;  %v2399_v19 = vpop.f32.mrb[129].mxu0 }
 0x1fb   : > { %v3491_v3 = vadd.f32 %v3490_v58, %v3489_v11  ;;  %v2400_v30 = vadd.f32 %v2399_v19, %v4640_v38  ;;  %v3492_v16 = vpop.f32.mrb[130].mxu1  ;;  %v3572_v21 = vpop.f32.mrb[130].mxu0 }
 0x1fc   : > { %v2411_v1 = vadd.f32 %v3572_v21, %v2250_v54  ;;  %v3493_v41 = vpop.f32.mrb[131].mxu1  ;;  %v2402_v7 = vpop.f32.mrb[131].mxu0 }
 0x1fd   : > { %v3494_v20 = vadd.f32 %v3493_v41, %v3492_v16  ;;  %v2403_v25 = vadd.f32 %v2402_v7, %v4643_v47  ;;  %v2271_v62 = vadd.f32 %v3491_v3, %v4582_v6 }
 0x1fe   : > { %v3018_v31 = vpack.c.bf16 %v2411_v1, %v2408_v2 }
 0x1ff   : > { %v3013_v10 = vpack.c.bf16 %v2403_v25, %v2400_v30  ;;  %v2274_v18 = vadd.f32 %v3494_v20, %v4588_v49 }
 0x200   : > { %3058 = vst [vmem:[%s4636_s22 + $0x48] sm:$0xff] %v3018_v31  }
 0x201   : > { %3057 = vst [vmem:[%s4636_s22 + $0x40] sm:$0xff] %v3013_v10   ;;  %v3495_v8 = vpop.f32.mrb[132].mxu1  ;;  %v3575_v59 = vpop.f32.mrb[132].mxu0 }
 0x202   : > { %v2424_v22 = vadd.f32 %v3575_v59, %v2263_v43  ;;  %v3496_v38 = vpop.f32.mrb[133].mxu1  ;;  %v2415_v54 = vpop.f32.mrb[133].mxu0 }
 0x203   : > { %v3497_v23 = vadd.f32 %v3496_v38, %v3495_v8  ;;  %v2416_v9 = vadd.f32 %v2415_v54, %v2255_v40  ;;  %v3498_v35 = vpop.f32.mrb[134].mxu1  ;;  %v3576_v63 = vpop.f32.mrb[134].mxu0 }
 0x204   : > { %v2427_v47 = vadd.f32 %v3576_v63, %v2266_v61  ;;  %v3499_v46 = vpop.f32.mrb[135].mxu1  ;;  %v2418_v6 = vpop.f32.mrb[135].mxu0 }
 0x205   : > { %v3500_v51 = vadd.f32 %v3499_v46, %v3498_v35  ;;  %v2419_v42 = vadd.f32 %v2418_v6, %v2258_v36  ;;  %v2279_v49 = vadd.f32 %v3497_v23, %v4594_v27 }
 0x206   : > { %v3028_v34 = vpack.c.bf16 %v2427_v47, %v2424_v22 }
 0x207   : > { %v3023_v32 = vpack.c.bf16 %v2419_v42, %v2416_v9  ;;  %v2282_v45 = vadd.f32 %v3500_v51, %v4600_v60 }
 0x208   : > { %3060 = vst [vmem:[%s4636_s22 + $0x58] sm:$0xff] %v3028_v34  }
 0x209   : > { %3059 = vst [vmem:[%s4636_s22 + $0x50] sm:$0xff] %v3023_v32   ;;  %v3501_v14 = vpop.f32.mrb[136].mxu1  ;;  %v3579_v29 = vpop.f32.mrb[136].mxu0 }
 0x20a   : > { %v2440_v53 = vadd.f32 %v3579_v29, %v2279_v49  ;;  %v3502_v40 = vpop.f32.mrb[137].mxu1  ;;  %v2431_v4 = vpop.f32.mrb[137].mxu0 }
 0x20b   : > { %v3503_v57 = vadd.f32 %v3502_v40, %v3501_v14  ;;  %v2432_v56 = vadd.f32 %v2431_v4, %v2271_v62  ;;  %v3504_v26 = vpop.f32.mrb[138].mxu1  ;;  %v3580_v44 = vpop.f32.mrb[138].mxu0 }
 0x20c   : > { %v2443_v36 = vadd.f32 %v3580_v44, %v2282_v45  ;;  %v3505_v39 = vpop.f32.mrb[139].mxu1  ;;  %v2434_v27 = vpop.f32.mrb[139].mxu0 }
 0x20d   : > { %v3506_v0 = vadd.f32 %v3505_v39, %v3504_v26  ;;  %v2435_v17 = vadd.f32 %v2434_v27, %v2274_v18  ;;  %v2287_v60 = vadd.f32 %v3503_v57, %v4606_v48 }
 0x20e   : > { %v3038_v52 = vpack.c.bf16 %v2443_v36, %v2440_v53 }
 0x20f   : > { %v3033_v5 = vpack.c.bf16 %v2435_v17, %v2432_v56  ;;  %v2290_v33 = vadd.f32 %v3506_v0, %v4612_v12 }
 0x210   : > { %3062 = vst [vmem:[%s4636_s22 + $0x68] sm:$0xff] %v3038_v52  }
 0x211   : > { %3061 = vst [vmem:[%s4636_s22 + $0x60] sm:$0xff] %v3033_v5   ;;  %v3507_v15 = vpop.f32.mrb[140].mxu1  ;;  %v3583_v50 = vpop.f32.mrb[140].mxu0 }
 0x212   : > { %v3508_v43 = vpop.f32.mrb[141].mxu1  ;;  %v2447_v55 = vpop.f32.mrb[141].mxu0 }
 0x213   : > { %v3509_v37 = vadd.f32 %v3508_v43, %v3507_v15  ;;  %v2448_v61 = vadd.f32 %v2447_v55, %v2287_v60  ;;  %v3510_v11 = vpop.f32.mrb[142].mxu1  ;;  %v3584_v24 = vpop.f32.mrb[142].mxu0 }
 0x214   : > { %v3511_v2 = vpop.f32.mrb[143].mxu1  ;;  %v2450_v58 = vpop.f32.mrb[143].mxu0 }
 0x215   : > { %v2295_v48 = vadd.f32 %v3509_v37, %v4618_v13  ;;  %v3512_v19 = vadd.f32 %v3511_v2, %v3510_v11  ;;  %v2451_v3 = vadd.f32 %v2450_v58, %v2290_v33 }
 0x217   : > { %v2456_v30 = vadd.f32 %v3583_v50, %v2295_v48  ;;  %v2298_v12 = vadd.f32 %v3512_v19, %v4624_v28  ;;  %v3043_v16 = vpack.c.bf16 %v2451_v3, %v2448_v61 }
 0x219   : > { %v2459_v21 = vadd.f32 %v3584_v24, %v2298_v12  ;;  %3063 = vst [vmem:[%s4636_s22 + $0x70] sm:$0xff] %v3043_v16  }
 0x21b   : > { %v3048_v1 = vpack.c.bf16 %v2459_v21, %v2456_v30 }
 0x21d   : > { %3064 = vst [vmem:[%s4636_s22 + $0x78] sm:$0xff] %v3048_v1  }
 0x21e PF: > { %s13_s12 = sadd.s32 1, %s3896_s12  }
 0x21f   : > { %p10_p4 = scmp.ge.s32.totalorder %s13_s12, 4  }
 0x221   :  { %12 = sbr.rel (!%p10_p4) target bundleno = 1 (0x1), region = 62 }

// kernel: retinanet_forward.46
= control target key start
LH: loop header
LB: loop body
LE: loop exit
PB: predicated region body
PF: predicated region fallthrough
CT: control target
= control target key end

     0   :  { %s2614_s12 = smov 0   ;;  %s3036_s0 = inlined_call_operand.vmem [shape: bf16[640,1152], index: 0, kind: input, shape index: {}]   ;;  %s3037_s1 = inlined_call_operand.vmem [shape: bf16[1152,128], index: 1, kind: input, shape index: {}]   ;;  %s3038_s2 = inlined_call_operand.vmem [shape: f32[1,128], index: 2, kind: input, shape index: {}]   ;;  %s3039_s3 = inlined_call_operand.vmem [shape: bf16[640,128], index: 3, kind: output, shape index: {}]  }
   0x1 LB: > { %s1846_s13 = sadd.s32 4294967295, %s2592_s12   ;;  %p1850_p0 = scmp.ge.s32.totalorder %s2592_s12, 1  ;;  %s2592_s12 = sphi %s2614_s12, %s13_s12  }
   0x2   : > { %p139_p1 = scmp.lt.s32.totalorder %s2592_s12, 6 }
   0x4   : > { %p140_p2 = pnand %p1850_p0, %p139_p1 }
   0x5   : > { %v2410_v0 = vld [vmem:[%s3037_s1 + $0x40] sm:$0xff] (!%p140_p2)   ;;  %v2414_v4 = vld [vmem:[%s3037_s1 + $0x48] sm:$0xff] (!%p140_p2)   ;;  %v2418_v8 = vld [vmem:[%s3037_s1 + $0x50] sm:$0xff] (!%p140_p2)   ;;  %s1851_s19 = sshll.u32 (!%p140_p2), %s1846_s13, 4 }
   0x6   : > { %143 = sbr.rel (%p140_p2) target bundleno = 398 (0x18e), region = 32  ;;  %v2411_v1 = vld [vmem:[%s3037_s1 + $0xc0] sm:$0xff] (!%p140_p2)   ;;  %2081 = vmatprep.subr.bf16.mxu0 (!%p140_p2), %v2410_v0  ;;  %v2415_v5 = vld [vmem:[%s3037_s1 + $0xc8] sm:$0xff] (!%p140_p2)   ;;  %v2419_v9 = vld [vmem:[%s3037_s1 + $0xd0] sm:$0xff] (!%p140_p2)   ;;  %p165_p3 = scmp.lt.s32.totalorder (!%p140_p2), %s1851_s19, 79 }
   0x7   : > { %v2412_v2 = vld [vmem:[%s3037_s1] sm:$0xff] (!%p140_p2)   ;;  %2145 = vmatprep.subr.bf16.mxu1 (!%p140_p2), %v2411_v1  ;;  %v2416_v6 = vld [vmem:[%s3037_s1 + $0x8] sm:$0xff] (!%p140_p2)   ;;  %v2420_v10 = vld [vmem:[%s3037_s1 + $0x10] sm:$0xff] (!%p140_p2)  }
   0x8   : > { %v2413_v3 = vld [vmem:[%s3037_s1 + $0x80] sm:$0xff] (!%p140_p2)   ;;  %2082 = vmatpush3.bf16.msra.mxu0 (!%p140_p2), %v2412_v2  ;;  %v2417_v7 = vld [vmem:[%s3037_s1 + $0x88] sm:$0xff] (!%p140_p2)   ;;  %v2421_v11 = vld [vmem:[%s3037_s1 + $0x90] sm:$0xff] (!%p140_p2)  }
   0x9   : > { %2146 = vmatpush3.bf16.msra.mxu1 (!%p140_p2), %v2413_v3  ;;  %2083 = vmatprep.subr.bf16.mxu0 (!%p140_p2), %v2414_v4  ;;  %v2422_v12 = vld [vmem:[%s3037_s1 + $0x58] sm:$0xff] (!%p140_p2)   ;;  %v2426_v16 = vld [vmem:[%s3037_s1 + $0x60] sm:$0xff] (!%p140_p2)   ;;  %v2430_v20 = vld [vmem:[%s3037_s1 + $0x68] sm:$0xff] (!%p140_p2)  }
   0xa   : > { %2147 = vmatprep.subr.bf16.mxu1 (!%p140_p2), %v2415_v5  ;;  %v2423_v13 = vld [vmem:[%s3037_s1 + $0xd8] sm:$0xff] (!%p140_p2)   ;;  %v2427_v17 = vld [vmem:[%s3037_s1 + $0xe0] sm:$0xff] (!%p140_p2)   ;;  %v2431_v21 = vld [vmem:[%s3037_s1 + $0xe8] sm:$0xff] (!%p140_p2)  }
   0xb   : > { %v2424_v14 = vld [vmem:[%s3037_s1 + $0x18] sm:$0xff] (!%p140_p2)   ;;  %v2428_v18 = vld [vmem:[%s3037_s1 + $0x20] sm:$0xff] (!%p140_p2)   ;;  %v2432_v22 = vld [vmem:[%s3037_s1 + $0x28] sm:$0xff] (!%p140_p2)  }
   0xc   : > { %2084 = vmatpush3.bf16.msra.mxu0 (!%p140_p2), %v2416_v6  ;;  %v2425_v15 = vld [vmem:[%s3037_s1 + $0x98] sm:$0xff] (!%p140_p2)   ;;  %v2429_v19 = vld [vmem:[%s3037_s1 + $0xa0] sm:$0xff] (!%p140_p2)   ;;  %v2433_v23 = vld [vmem:[%s3037_s1 + $0xa8] sm:$0xff] (!%p140_p2)  }
   0xd   : > { %2148 = vmatpush3.bf16.msra.mxu1 %v2417_v7  ;;  %2085 = vmatprep.subr.bf16.mxu0 %v2418_v8  ;;  %s3041_s19 = smov (!%p165_p3, %s1851_s19), 79  ;;  %v2434_v24 = vld [vmem:[%s3037_s1 + $0x70] sm:$0xff]   ;;  %v2438_v28 = vld [vmem:[%s3037_s1 + $0x78] sm:$0xff]   ;;  %v2448_v36 = vld [vmem:[%s3037_s1 + $0x140] sm:$0xff]  }
   0xe   : > { %2149 = vmatprep.subr.bf16.mxu1 %v2419_v9  ;;  %v2435_v25 = vld [vmem:[%s3037_s1 + $0xf0] sm:$0xff]   ;;  %s2401_s16 = smul.u32 36, %s3041_s19  ;;  %v2439_v29 = vld [vmem:[%s3037_s1 + $0xf8] sm:$0xff]   ;;  %v2449_v37 = vld [vmem:[%s3037_s1 + $0x1c0] sm:$0xff]  }
   0xf   : > { %v2436_v26 = vld [vmem:[%s3037_s1 + $0x30] sm:$0xff]   ;;  %v2440_v30 = vld [vmem:[%s3037_s1 + $0x38] sm:$0xff]   ;;  %v2450_v38 = vld [vmem:[%s3037_s1 + $0x100] sm:$0xff]  }
  0x10   : > { %2086 = vmatpush3.bf16.msra.mxu0 %v2420_v10  ;;  %v2437_v27 = vld [vmem:[%s3037_s1 + $0xb0] sm:$0xff]   ;;  %s2720_s13 = scalar_lea.vmem %s3036_s0, %s2401_s16  ;;  %v2441_v31 = vld [vmem:[%s3037_s1 + $0xb8] sm:$0xff]   ;;  %v2451_v39 = vld [vmem:[%s3037_s1 + $0x180] sm:$0xff]  }
  0x11   : > { %2150 = vmatpush3.bf16.msra.mxu1 %v2421_v11  ;;  %2087 = vmatprep.subr.bf16.mxu0 %v2422_v12  ;;  %v2442_v32 = vld [vmem:[%s2720_s13] ss:$36 sps:$4 sm:$0xff]   ;;  %v2445_v34 = vld [vmem:[%s2720_s13 + $0x8] ss:$36 sps:$4 sm:$0xff]   ;;  %v2454_v41 = vld [vmem:[%s2720_s13 + $0x54] ss:$36 sps:$4 sm:$0xff]  }
  0x12   : > { %2151 = vmatprep.subr.bf16.mxu1 %v2423_v13  ;;  %v2444_v33 = vld [vmem:[%s2720_s13 + $0x4] ss:$36 sps:$4 sm:$0xff]   ;;  %v2447_v35 = vld [vmem:[%s2720_s13 + $0xc] ss:$36 sps:$4 sm:$0xff]   ;;  %v2462_v48 = vld [vmem:[%s2720_s13 + $0x94] ss:$36 sps:$4 sm:$0xff]  }
  0x13   : > { %1241 = vmatprep.mubr.bf16.mxu0 %v2444_v33  ;;  %1338 = vmatprep.mubr.bf16.mxu1 %v2447_v35  ;;  %v2452_v40 = vld [vmem:[%s2720_s13 + $0x4c] ss:$36 sps:$4 sm:$0xff]   ;;  %v2464_v49 = vld [vmem:[%s2720_s13 + $0x9c] ss:$36 sps:$4 sm:$0xff]   ;;  %v2474_v57 = vld [vmem:[%s2720_s13 + $0xe4] ss:$36 sps:$4 sm:$0xff]  }
  0x14   : > { %2088 = vmatpush3.bf16.msra.mxu0 %v2424_v14  ;;  %v2456_v42 = vld [vmem:[%s2720_s13 + $0x48] ss:$36 sps:$4 sm:$0xff]   ;;  %v2457_v43 = vld [vmem:[%s2720_s13 + $0x50] ss:$36 sps:$4 sm:$0xff]   ;;  %v2467_v51 = vld [vmem:[%s2720_s13 + $0x98] ss:$36 sps:$4 sm:$0xff]  }
  0x15   : > { %2152 = vmatpush3.bf16.msra.mxu1 %v2425_v15  ;;  %2089 = vmatprep.subr.bf16.mxu0 %v2426_v16  ;;  %v2458_v44 = vld [vmem:[%s3037_s1 + $0x148] sm:$0xff]   ;;  %v2466_v50 = vld [vmem:[%s2720_s13 + $0x90] ss:$36 sps:$4 sm:$0xff]   ;;  %v2472_v56 = vld [vmem:[%s2720_s13 + $0xdc] ss:$36 sps:$4 sm:$0xff]  }
  0x16   : > { %2153 = vmatprep.subr.bf16.mxu1 %v2427_v17  ;;  %v2459_v45 = vld [vmem:[%s3037_s1 + $0x1c8] sm:$0xff]   ;;  %v2468_v52 = vld [vmem:[%s3037_s1 + $0x150] sm:$0xff]   ;;  %v2476_v58 = vld [vmem:[%s2720_s13 + $0xd8] ss:$36 sps:$4 sm:$0xff]  }
  0x17   : > { %v2460_v46 = vld [vmem:[%s3037_s1 + $0x108] sm:$0xff]   ;;  %v2469_v53 = vld [vmem:[%s3037_s1 + $0x1d0] sm:$0xff]   ;;  %v2477_v59 = vld [vmem:[%s2720_s13 + $0xe0] ss:$36 sps:$4 sm:$0xff]  }
  0x18   : > { %2090 = vmatpush3.bf16.msra.mxu0 %v2428_v18  ;;  %v2461_v47 = vld [vmem:[%s3037_s1 + $0x188] sm:$0xff]   ;;  %v2470_v54 = vld [vmem:[%s3037_s1 + $0x110] sm:$0xff]   ;;  %v2478_v60 = vld [vmem:[%s3037_s1 + $0x158] sm:$0xff]  }
  0x19   : > { %2154 = vmatpush3.bf16.msra.mxu1 %v2429_v19  ;;  %2091 = vmatprep.subr.bf16.mxu0 %v2430_v20  ;;  %v2471_v55 = vld [vmem:[%s3037_s1 + $0x190] sm:$0xff]   ;;  %v2479_v61 = vld [vmem:[%s3037_s1 + $0x1d8] sm:$0xff]   ;;  %v2482_v0 = vld [vmem:[%s2720_s13 + $0x124] ss:$36 sps:$4 sm:$0xff]  }
  0x1a   : > { %2155 = vmatprep.subr.bf16.mxu1 %v2431_v21  ;;  %v2480_v62 = vld [vmem:[%s3037_s1 + $0x118] sm:$0xff]   ;;  %v2484_v1 = vld [vmem:[%s2720_s13 + $0x12c] ss:$36 sps:$4 sm:$0xff]   ;;  %v2486_v2 = vld [vmem:[%s2720_s13 + $0x120] ss:$36 sps:$4 sm:$0xff]  }
  0x1b   : > { %v2481_v63 = vld [vmem:[%s3037_s1 + $0x198] sm:$0xff]   ;;  %v2488_v3 = vld [vmem:[%s3037_s1 + $0x160] sm:$0xff]   ;;  %v2487_v4 = vld [vmem:[%s2720_s13 + $0x128] ss:$36 sps:$4 sm:$0xff]  }
  0x1c   : > { %2092 = vmatpush3.bf16.msra.mxu0 %v2432_v22  ;;  %v2489_v5 = vld [vmem:[%s3037_s1 + $0x1e0] sm:$0xff]   ;;  %v2492_v8 = vld [vmem:[%s2720_s13 + $0x16c] ss:$36 sps:$4 sm:$0xff]   ;;  %v2494_v9 = vld [vmem:[%s2720_s13 + $0x174] ss:$36 sps:$4 sm:$0xff]  }
  0x1d   : > { %2156 = vmatpush3.bf16.msra.mxu1 %v2433_v23  ;;  %2093 = vmatprep.subr.bf16.mxu0 %v2434_v24  ;;  %v2490_v6 = vld [vmem:[%s3037_s1 + $0x120] sm:$0xff]   ;;  %v2498_v10 = vld [vmem:[%s3037_s1 + $0x168] sm:$0xff]   ;;  %v2497_v15 = vld [vmem:[%s2720_s13 + $0x170] ss:$36 sps:$4 sm:$0xff]  }
  0x1e   : > { %2157 = vmatprep.subr.bf16.mxu1 %v2435_v25  ;;  %v2491_v7 = vld [vmem:[%s3037_s1 + $0x1a0] sm:$0xff]   ;;  %v2499_v11 = vld [vmem:[%s3037_s1 + $0x1e8] sm:$0xff]   ;;  %v2502_v16 = vld [vmem:[%s2720_s13 + $0x1b4] ss:$36 sps:$4 sm:$0xff]  }
  0x1f   : > { %v2496_v12 = vld [vmem:[%s2720_s13 + $0x168] ss:$36 sps:$4 sm:$0xff]   ;;  %v2504_v17 = vld [vmem:[%s2720_s13 + $0x1bc] ss:$36 sps:$4 sm:$0xff]   ;;  %v2508_v18 = vld [vmem:[%s3037_s1 + $0x170] sm:$0xff]  }
  0x20   : > { %2094 = vmatpush3.bf16.msra.mxu0 %v2436_v26  ;;  %v2500_v13 = vld [vmem:[%s3037_s1 + $0x128] sm:$0xff]   ;;  %v2509_v19 = vld [vmem:[%s3037_s1 + $0x1f0] sm:$0xff]   ;;  %v2507_v23 = vld [vmem:[%s2720_s13 + $0x1b8] ss:$36 sps:$4 sm:$0xff]  }
  0x21   : > { %2158 = vmatpush3.bf16.msra.mxu1 %v2437_v27  ;;  %2095 = vmatprep.subr.bf16.mxu0 %v2438_v28  ;;  %v2501_v14 = vld [vmem:[%s3037_s1 + $0x1a8] sm:$0xff]   ;;  %v2510_v20 = vld [vmem:[%s3037_s1 + $0x130] sm:$0xff]   ;;  %v2512_v24 = vld [vmem:[%s2720_s13 + $0x1fc] ss:$36 sps:$4 sm:$0xff]  }
  0x22   : > { %2159 = vmatprep.subr.bf16.mxu1 %v2439_v29  ;;  %v2511_v21 = vld [vmem:[%s3037_s1 + $0x1b0] sm:$0xff]   ;;  %v2514_v25 = vld [vmem:[%s2720_s13 + $0x204] ss:$36 sps:$4 sm:$0xff]   ;;  %v2518_v26 = vld [vmem:[%s3037_s1 + $0x178] sm:$0xff]  }
  0x23   : > { %v2506_v22 = vld [vmem:[%s2720_s13 + $0x1b0] ss:$36 sps:$4 sm:$0xff]   ;;  %v2519_v27 = vld [vmem:[%s3037_s1 + $0x1f8] sm:$0xff]  }
  0x24   : > { %2096 = vmatpush3.bf16.msra.mxu0 %v2440_v30  ;;  %v2520_v28 = vld [vmem:[%s3037_s1 + $0x138] sm:$0xff]   ;;  %v2522_v35 = vld [vmem:[%s2720_s13 + $0x10] ss:$36 sps:$4 sm:$0xff]  }
  0x25   : > { %2160 = vmatpush3.bf16.msra.mxu1 %v2441_v31  ;;  %2209 = vmatprep.subr.bf16.mxu0 %v2448_v36  ;;  %v2521_v29 = vld [vmem:[%s3037_s1 + $0x1b8] sm:$0xff]   ;;  %v2517_v31 = vld [vmem:[%s2720_s13 + $0x200] ss:$36 sps:$4 sm:$0xff]  }
  0x26   : > { %2273 = vmatprep.subr.bf16.mxu1 %v2449_v37  ;;  %v2516_v30 = vld [vmem:[%s2720_s13 + $0x1f8] ss:$36 sps:$4 sm:$0xff]  }
  0x27   : > { %1242 = vmatmul.mubr.bf16.vlgmr.msra.gmra.mrb[0].mxu0 %v2442_v32  ;;  %v2528_v32 = vld [vmem:[%s3037_s1 + $0x200] sm:$0xff]   ;;  %v2524_v33 = vld [vmem:[%s2720_s13 + $0x14] ss:$36 sps:$4 sm:$0xff]  }
  0x28   : > { %1339 = vmatmul.mubr.bf16.vlgmr.msra.gmra.mrb[0].mxu1 %v2445_v34  ;;  %2210 = vmatpush3.bf16.msra.mxu0 %v2450_v38  ;;  %v2527_v34 = vld [vmem:[%s2720_s13 + $0x1c] ss:$36 sps:$4 sm:$0xff]   ;;  %v2531_v38 = vld [vmem:[%s2720_s13 + $0x64] ss:$36 sps:$4 sm:$0xff]  }
  0x29   : > { %2274 = vmatpush3.bf16.msra.mxu1 %v2451_v39  ;;  %1249 = vmatprep.mubr.bf16.mxu0 %v2452_v40  ;;  %v2525_v36 = vld [vmem:[%s2720_s13 + $0x18] ss:$36 sps:$4 sm:$0xff]   ;;  %v2535_v39 = vld [vmem:[%s3037_s1 + $0x208] sm:$0xff]   ;;  %v2542_v40 = vld [vmem:[%s3037_s1 + $0x210] sm:$0xff]  }
  0x2a   : > { %1346 = vmatprep.mubr.bf16.mxu1 %v2454_v41  ;;  %2211 = vmatprep.subr.bf16.mxu0 %v2458_v44  ;;  %v2529_v37 = vld [vmem:[%s2720_s13 + $0x5c] ss:$36 sps:$4 sm:$0xff]   ;;  %v2538_v44 = vld [vmem:[%s2720_s13 + $0xac] ss:$36 sps:$4 sm:$0xff]  }
  0x2b   : > { %2275 = vmatprep.subr.bf16.mxu1 %v2459_v45  ;;  %v2533_v41 = vld [vmem:[%s2720_s13 + $0x58] ss:$36 sps:$4 sm:$0xff]  }
  0x2c   : > { %2212 = vmatpush3.bf16.msra.mxu0 %v2460_v46  ;;  %v2549_v45 = vld [vmem:[%s3037_s1 + $0x218] sm:$0xff]   ;;  %v2556_v46 = vld [vmem:[%s3037_s1 + $0x220] sm:$0xff]  }
  0x2d   : > { %2276 = vmatpush3.bf16.msra.mxu1 %v2461_v47  ;;  %2213 = vmatprep.subr.bf16.mxu0 %v2468_v52  ;;  %v2540_v47 = vld [vmem:[%s2720_s13 + $0xa0] ss:$36 sps:$4 sm:$0xff]   ;;  %v2547_v52 = vld [vmem:[%s2720_s13 + $0xe8] ss:$36 sps:$4 sm:$0xff]  }
  0x2e   : > { %2277 = vmatprep.subr.bf16.mxu1 %v2469_v53  ;;  %v2570_v53 = vld [vmem:[%s3037_s1 + $0x230] sm:$0xff]  }
  0x2f   : > { %1250 = vmatmul.mubr.bf16.gmra.mrb[4].mxu0 %v2456_v42  ;;  %v2534_v42 = vld [vmem:[%s2720_s13 + $0x60] ss:$36 sps:$4 sm:$0xff]  }
  0x30   : > { %1347 = vmatmul.mubr.bf16.gmra.mrb[4].mxu1 %v2457_v43  ;;  %1257 = vmatprep.mubr.bf16.mxu0 %v2462_v48  ;;  %v2536_v43 = vld [vmem:[%s2720_s13 + $0xa4] ss:$36 sps:$4 sm:$0xff]  }
  0x31   : > { %1354 = vmatprep.mubr.bf16.mxu1 %v2464_v49  ;;  %2214 = vmatpush3.bf16.msra.mxu0 %v2470_v54  ;;  %v2541_v48 = vld [vmem:[%s2720_s13 + $0xa8] ss:$36 sps:$4 sm:$0xff]   ;;  %v2548_v54 = vld [vmem:[%s2720_s13 + $0xf0] ss:$36 sps:$4 sm:$0xff]  }
  0x32   : > { %2278 = vmatpush3.bf16.msra.mxu1 %v2471_v55  ;;  %2215 = vmatprep.subr.bf16.mxu0 %v2478_v60  ;;  %v2543_v49 = vld [vmem:[%s2720_s13 + $0xec] ss:$36 sps:$4 sm:$0xff]   ;;  %v2550_v55 = vld [vmem:[%s2720_s13 + $0x134] ss:$36 sps:$4 sm:$0xff]   ;;  %v2557_v60 = vld [vmem:[%s2720_s13 + $0x17c] ss:$36 sps:$4 sm:$0xff]  }
  0x33   : > { %2279 = vmatprep.subr.bf16.mxu1 %v2479_v61  ;;  %v2559_v61 = vld [vmem:[%s2720_s13 + $0x184] ss:$36 sps:$4 sm:$0xff]  }
  0x35   : > { %2216 = vmatpush3.bf16.msra.mxu0 %v2480_v62  ;;  %v2561_v62 = vld [vmem:[%s2720_s13 + $0x178] ss:$36 sps:$4 sm:$0xff]  }
  0x36   : > { %2280 = vmatpush3.bf16.msra.mxu1 %v2481_v63  ;;  %2217 = vmatprep.subr.bf16.mxu0 %v2488_v3  ;;  %v2562_v63 = vld [vmem:[%s2720_s13 + $0x180] ss:$36 sps:$4 sm:$0xff]   ;;  %v2569_v3 = vld [vmem:[%s2720_s13 + $0x1c8] ss:$36 sps:$4 sm:$0xff]  }
  0x37   : > { %1258 = vmatmul.mubr.bf16.gmra.mrb[8].mxu0 %v2466_v50  ;;  %2281 = vmatprep.subr.bf16.mxu1 %v2489_v5  ;;  %v2545_v50 = vld [vmem:[%s2720_s13 + $0xf4] ss:$36 sps:$4 sm:$0xff]  }
  0x38   : > { %1355 = vmatmul.mubr.bf16.gmra.mrb[8].mxu1 %v2467_v51  ;;  %1265 = vmatprep.mubr.bf16.mxu0 %v2472_v56  ;;  %v2563_v51 = vld [vmem:[%s3037_s1 + $0x228] sm:$0xff]   ;;  %v2552_v56 = vld [vmem:[%s2720_s13 + $0x13c] ss:$36 sps:$4 sm:$0xff]   ;;  %v2573_v5 = vld [vmem:[%s2720_s13 + $0x214] ss:$36 sps:$4 sm:$0xff]  }
  0x39   : > { %1362 = vmatprep.mubr.bf16.mxu1 %v2474_v57  ;;  %2218 = vmatpush3.bf16.msra.mxu0 %v2490_v6  ;;  %v2577_v57 = vld [vmem:[%s3037_s1 + $0x238] sm:$0xff]   ;;  %v2575_v6 = vld [vmem:[%s2720_s13 + $0x208] ss:$36 sps:$4 sm:$0xff]  }
  0x3a   : > { %2282 = vmatpush3.bf16.msra.mxu1 %v2491_v7  ;;  %2219 = vmatprep.subr.bf16.mxu0 %v2498_v10  ;;  %v2576_v7 = vld [vmem:[%s2720_s13 + $0x210] ss:$36 sps:$4 sm:$0xff]   ;;  %v2580_v10 = vld [vmem:[%s2720_s13 + $0x68] ss:$36 sps:$4 sm:$0xff]  }
  0x3b   : > { %2283 = vmatprep.subr.bf16.mxu1 %v2499_v11  ;;  %v2581_v11 = vld [vmem:[%s2720_s13 + $0x188] ss:$36 sps:$4 sm:$0xff]  }
  0x3d   : > { %2220 = vmatpush3.bf16.msra.mxu0 %v2500_v13  ;;  %v2583_v13 = vld [vmem:[%s2720_s13 + $0x1d0] ss:$36 sps:$4 sm:$0xff]  }
  0x3e   : > { %2284 = vmatpush3.bf16.msra.mxu1 %v2501_v14  ;;  %2221 = vmatprep.subr.bf16.mxu0 %v2508_v18  ;;  %v2584_v14 = vld [vmem:[%s2720_s13 + $0xf8] ss:$36 sps:$4 sm:$0xff]   ;;  %v2923_v18 = vld [vmem:[%s3038_s2] ss:$0 sm:$0xff] }
  0x3f   : > { %1266 = vmatmul.mubr.bf16.gmra.mrb[12].mxu0 %v2476_v58  ;;  %2285 = vmatprep.subr.bf16.mxu1 %v2509_v19  ;;  %v2554_v58 = vld [vmem:[%s2720_s13 + $0x130] ss:$36 sps:$4 sm:$0xff]  }
  0x40   : > { %1363 = vmatmul.mubr.bf16.gmra.mrb[12].mxu1 %v2477_v59  ;;  %1273 = vmatprep.mubr.bf16.mxu0 %v2482_v0  ;;  %v2555_v59 = vld [vmem:[%s2720_s13 + $0x138] ss:$36 sps:$4 sm:$0xff]   ;;  %v2564_v0 = vld [vmem:[%s2720_s13 + $0x1c4] ss:$36 sps:$4 sm:$0xff]  }
  0x41   : > { %1370 = vmatprep.mubr.bf16.mxu1 %v2484_v1  ;;  %2222 = vmatpush3.bf16.msra.mxu0 %v2510_v20  ;;  %v2566_v1 = vld [vmem:[%s2720_s13 + $0x1cc] ss:$36 sps:$4 sm:$0xff]  }
  0x42   : > { %2286 = vmatpush3.bf16.msra.mxu1 %v2511_v21  ;;  %2223 = vmatprep.subr.bf16.mxu0 %v2518_v26 }
  0x43   : > { %2287 = vmatprep.subr.bf16.mxu1 %v2519_v27 }
  0x45   : > { %2224 = vmatpush3.bf16.msra.mxu0 %v2520_v28 }
  0x46   : > { %2288 = vmatpush3.bf16.msra.mxu1 %v2521_v29  ;;  %2353 = vmatprep.subr.bf16.mxu0 %v2528_v32 }
  0x47   : > { %1274 = vmatmul.mubr.bf16.gmra.mrb[16].mxu0 %v2486_v2  ;;  %2385 = vmatprep.subr.bf16.mxu1 %v2528_v32  ;;  %v2568_v2 = vld [vmem:[%s2720_s13 + $0x1c0] ss:$36 sps:$4 sm:$0xff]  }
  0x48   : > { %1371 = vmatmul.mubr.bf16.gmra.mrb[16].mxu1 %v2487_v4  ;;  %1281 = vmatprep.mubr.bf16.mxu0 %v2492_v8  ;;  %v2571_v4 = vld [vmem:[%s2720_s13 + $0x20c] ss:$36 sps:$4 sm:$0xff]   ;;  %v2578_v8 = vld [vmem:[%s2720_s13 + $0x20] ss:$36 sps:$4 sm:$0xff]  }
  0x49   : > { %1378 = vmatprep.mubr.bf16.mxu1 %v2494_v9  ;;  %v2579_v9 = vld [vmem:[%s2720_s13 + $0x140] ss:$36 sps:$4 sm:$0xff]  }
  0x4f   : > { %1282 = vmatmul.mubr.bf16.gmra.mrb[20].mxu0 %v2496_v12  ;;  %v2582_v12 = vld [vmem:[%s2720_s13 + $0xb0] ss:$36 sps:$4 sm:$0xff]  }
  0x50   : > { %1379 = vmatmul.mubr.bf16.gmra.mrb[20].mxu1 %v2497_v15  ;;  %1289 = vmatprep.mubr.bf16.mxu0 %v2502_v16  ;;  %v2585_v15 = vld [vmem:[%s2720_s13 + $0x218] ss:$36 sps:$4 sm:$0xff]   ;;  %s1854_s13 = sshll.u32 %s3041_s19, 2 }
  0x51   : > { %1386 = vmatprep.mubr.bf16.mxu1 %v2504_v17  ;;  %s3018_s20 = scalar_lea.vmem %s3039_s3, %s1854_s13 }
  0x57   : > { %1290 = vmatmul.mubr.bf16.gmra.mrb[24].mxu0 %v2506_v22 }
  0x58   : > { %1387 = vmatmul.mubr.bf16.gmra.mrb[24].mxu1 %v2507_v23  ;;  %1297 = vmatprep.mubr.bf16.mxu0 %v2512_v24 }
  0x59   : > { %1394 = vmatprep.mubr.bf16.mxu1 %v2514_v25 }
  0x5f   : > { %1298 = vmatmul.mubr.bf16.gmra.mrb[28].mxu0 %v2516_v30 }
  0x60   : > { %1395 = vmatmul.mubr.bf16.gmra.mrb[28].mxu1 %v2517_v31  ;;  %1435 = vmatprep.mubr.bf16.mxu0 %v2524_v33 }
  0x61   : > { %1532 = vmatprep.mubr.bf16.mxu1 %v2527_v34 }
  0x67   : > { %1436 = vmatmul.mubr.bf16.vlgmr.msra.gmra.mrb[32].mxu0 %v2522_v35 }
  0x68   : > { %1533 = vmatmul.mubr.bf16.vlgmr.msra.gmra.mrb[32].mxu1 %v2525_v36  ;;  %2354 = vmatpush3.bf16.msra.mxu0 %v2528_v32 }
  0x69   : > { %2393 = vmatpush3.bf16.msra.mxu1 %v2528_v32  ;;  %1443 = vmatprep.mubr.bf16.mxu0 %v2529_v37 }
  0x6a   : > { %1540 = vmatprep.mubr.bf16.mxu1 %v2531_v38  ;;  %2355 = vmatprep.subr.bf16.mxu0 %v2535_v39 }
  0x6b   : > { %2386 = vmatprep.subr.bf16.mxu1 %v2535_v39 }
  0x6c   : > { %2356 = vmatpush3.bf16.msra.mxu0 %v2535_v39 }
  0x6d   : > { %2394 = vmatpush3.bf16.msra.mxu1 %v2535_v39  ;;  %2357 = vmatprep.subr.bf16.mxu0 %v2542_v40 }
  0x6e   : > { %2387 = vmatprep.subr.bf16.mxu1 %v2542_v40 }
  0x6f   : > { %1444 = vmatmul.mubr.bf16.gmra.mrb[36].mxu0 %v2533_v41 }
  0x70   : > { %1541 = vmatmul.mubr.bf16.gmra.mrb[36].mxu1 %v2534_v42  ;;  %1451 = vmatprep.mubr.bf16.mxu0 %v2536_v43 }
  0x71   : > { %1548 = vmatprep.mubr.bf16.mxu1 %v2538_v44  ;;  %2358 = vmatpush3.bf16.msra.mxu0 %v2542_v40 }
  0x72   : > { %2395 = vmatpush3.bf16.msra.mxu1 %v2542_v40  ;;  %2359 = vmatprep.subr.bf16.mxu0 %v2549_v45 }
  0x73   : > { %2388 = vmatprep.subr.bf16.mxu1 %v2549_v45 }
  0x75   : > { %2360 = vmatpush3.bf16.msra.mxu0 %v2549_v45 }
  0x76   : > { %2396 = vmatpush3.bf16.msra.mxu1 %v2549_v45  ;;  %2361 = vmatprep.subr.bf16.mxu0 %v2556_v46 }
  0x77   : > { %1452 = vmatmul.mubr.bf16.gmra.mrb[40].mxu0 %v2540_v47  ;;  %2389 = vmatprep.subr.bf16.mxu1 %v2556_v46 }
  0x78   : > { %1549 = vmatmul.mubr.bf16.gmra.mrb[40].mxu1 %v2541_v48  ;;  %1459 = vmatprep.mubr.bf16.mxu0 %v2543_v49 }
  0x79   : > { %1556 = vmatprep.mubr.bf16.mxu1 %v2545_v50  ;;  %2362 = vmatpush3.bf16.msra.mxu0 %v2556_v46 }
  0x7a   : > { %2397 = vmatpush3.bf16.msra.mxu1 %v2556_v46  ;;  %2363 = vmatprep.subr.bf16.mxu0 %v2563_v51 }
  0x7b   : > { %2390 = vmatprep.subr.bf16.mxu1 %v2563_v51 }
  0x7d   : > { %2364 = vmatpush3.bf16.msra.mxu0 %v2563_v51 }
  0x7e   : > { %2398 = vmatpush3.bf16.msra.mxu1 %v2563_v51  ;;  %2365 = vmatprep.subr.bf16.mxu0 %v2570_v53 }
  0x7f   : > { %1460 = vmatmul.mubr.bf16.gmra.mrb[44].mxu0 %v2547_v52  ;;  %2391 = vmatprep.subr.bf16.mxu1 %v2570_v53 }
  0x80   : > { %1557 = vmatmul.mubr.bf16.gmra.mrb[44].mxu1 %v2548_v54  ;;  %1467 = vmatprep.mubr.bf16.mxu0 %v2550_v55 }
  0x81   : > { %1564 = vmatprep.mubr.bf16.mxu1 %v2552_v56  ;;  %2366 = vmatpush3.bf16.msra.mxu0 %v2570_v53 }
  0x82   : > { %2399 = vmatpush3.bf16.msra.mxu1 %v2570_v53  ;;  %2367 = vmatprep.subr.bf16.mxu0 %v2577_v57 }
  0x83   : > { %2392 = vmatprep.subr.bf16.mxu1 %v2577_v57 }
  0x85   : > { %2368 = vmatpush3.bf16.msra.mxu0 %v2577_v57 }
  0x86   : > { %2400 = vmatpush3.bf16.msra.mxu1 %v2577_v57 }
  0x87   : > { %1468 = vmatmul.mubr.bf16.gmra.mrb[48].mxu0 %v2554_v58 }
  0x88   : > { %1565 = vmatmul.mubr.bf16.gmra.mrb[48].mxu1 %v2555_v59  ;;  %1475 = vmatprep.mubr.bf16.mxu0 %v2557_v60 }
  0x89   : > { %1572 = vmatprep.mubr.bf16.mxu1 %v2559_v61 }
  0x8f   : > { %1476 = vmatmul.mubr.bf16.gmra.mrb[52].mxu0 %v2561_v62 }
  0x90   : > { %1573 = vmatmul.mubr.bf16.gmra.mrb[52].mxu1 %v2562_v63  ;;  %1483 = vmatprep.mubr.bf16.mxu0 %v2564_v0 }
  0x91   : > { %1580 = vmatprep.mubr.bf16.mxu1 %v2566_v1 }
  0x97   : > { %1484 = vmatmul.mubr.bf16.gmra.mrb[56].mxu0 %v2568_v2 }
  0x98   : > { %1581 = vmatmul.mubr.bf16.gmra.mrb[56].mxu1 %v2569_v3  ;;  %1491 = vmatprep.mubr.bf16.mxu0 %v2571_v4 }
  0x99   : > { %1588 = vmatprep.mubr.bf16.mxu1 %v2573_v5 }
  0x9f   : > { %1492 = vmatmul.mubr.bf16.gmra.mrb[60].mxu0 %v2575_v6 }
  0xa0   : > { %1589 = vmatmul.mubr.bf16.gmra.mrb[60].mxu1 %v2576_v7  ;;  %2369 = vmatprep.mubr.bf16.mxu0 %v2578_v8 }
  0xa1   : > { %2377 = vmatprep.mubr.bf16.mxu1 %v2579_v9 }
  0xa7   : > { %2370 = vmatmul.mubr.bf16.vlgmr.msra.gmra.mrb[64].mxu0 %v2580_v10 }
  0xa8   : > { %2378 = vmatmul.mubr.bf16.vlgmr.msra.gmra.mrb[64].mxu1 %v2581_v11  ;;  %2373 = vmatprep.mubr.bf16.mxu0 %v2582_v12 }
  0xa9   : > { %2381 = vmatprep.mubr.bf16.mxu1 %v2583_v13 }
  0xaf   : > { %2374 = vmatmul.mubr.bf16.gmra.mrb[68].mxu0 %v2584_v14 }
  0xb0   : > { %2382 = vmatmul.mubr.bf16.gmra.mrb[68].mxu1 %v2585_v15 }
  0xfa   : > { %v2097_v16 = vpop.f32.mrb[0].mxu0 }
  0xfb   : > { %v2161_v17 = vpop.f32.mrb[0].mxu1  ;;  %v2098_v19 = vpop.f32.mrb[1].mxu0 }
  0xfc   : > { %v2099_v20 = vadd.f32 %v2098_v19, %v2097_v16  ;;  %v2162_v21 = vpop.f32.mrb[1].mxu1  ;;  %v2100_v22 = vpop.f32.mrb[2].mxu0 }
  0xfd   : > { %v2163_v23 = vadd.f32 %v2162_v21, %v2161_v17  ;;  %v2164_v24 = vpop.f32.mrb[2].mxu1  ;;  %v2101_v25 = vpop.f32.mrb[3].mxu0 }
  0xfe   : > { %v1244_v26 = vadd.f32 %v2099_v20, %v2923_v18  ;;  %v2102_v27 = vadd.f32 %v2101_v25, %v2100_v22  ;;  %v2165_v28 = vpop.f32.mrb[3].mxu1 }
  0xff   : > { %v2166_v29 = vadd.f32 %v2165_v28, %v2164_v24 }
 0x100   : > { %v2926_v30 = vadd.f32 %v2163_v23, %v1244_v26  ;;  %v1247_v31 = vadd.f32 %v2102_v27, %v2923_v18 }
 0x102   : > { %v2929_v32 = vadd.f32 %v2166_v29, %v1247_v31  ;;  %v2103_v33 = vpop.f32.mrb[4].mxu0 }
 0x103   : > { %v2167_v34 = vpop.f32.mrb[4].mxu1  ;;  %v2104_v35 = vpop.f32.mrb[5].mxu0 }
 0x104   : > { %v2105_v36 = vadd.f32 %v2104_v35, %v2103_v33  ;;  %v2168_v37 = vpop.f32.mrb[5].mxu1  ;;  %v2106_v38 = vpop.f32.mrb[6].mxu0 }
 0x105   : > { %v2169_v39 = vadd.f32 %v2168_v37, %v2167_v34  ;;  %v2170_v40 = vpop.f32.mrb[6].mxu1  ;;  %v2107_v41 = vpop.f32.mrb[7].mxu0 }
 0x106   : > { %v1252_v42 = vadd.f32 %v2105_v36, %v2923_v18  ;;  %v2108_v43 = vadd.f32 %v2107_v41, %v2106_v38  ;;  %v2171_v44 = vpop.f32.mrb[7].mxu1 }
 0x107   : > { %v2172_v45 = vadd.f32 %v2171_v44, %v2170_v40 }
 0x108   : > { %v2932_v46 = vadd.f32 %v2169_v39, %v1252_v42  ;;  %v1255_v47 = vadd.f32 %v2108_v43, %v2923_v18 }
 0x10a   : > { %v2935_v48 = vadd.f32 %v2172_v45, %v1255_v47  ;;  %v2109_v49 = vpop.f32.mrb[8].mxu0 }
 0x10b   : > { %v2173_v50 = vpop.f32.mrb[8].mxu1  ;;  %v2110_v51 = vpop.f32.mrb[9].mxu0 }
 0x10c   : > { %v2111_v52 = vadd.f32 %v2110_v51, %v2109_v49  ;;  %v2174_v53 = vpop.f32.mrb[9].mxu1  ;;  %v2112_v54 = vpop.f32.mrb[10].mxu0 }
 0x10d   : > { %v2175_v55 = vadd.f32 %v2174_v53, %v2173_v50  ;;  %v2176_v56 = vpop.f32.mrb[10].mxu1  ;;  %v2113_v57 = vpop.f32.mrb[11].mxu0 }
 0x10e   : > { %v1260_v58 = vadd.f32 %v2111_v52, %v2923_v18  ;;  %v2114_v59 = vadd.f32 %v2113_v57, %v2112_v54  ;;  %v2177_v60 = vpop.f32.mrb[11].mxu1 }
 0x10f   : > { %v2178_v61 = vadd.f32 %v2177_v60, %v2176_v56 }
 0x110   : > { %v2938_v62 = vadd.f32 %v2175_v55, %v1260_v58  ;;  %v1263_v63 = vadd.f32 %v2114_v59, %v2923_v18 }
 0x112   : > { %v2941_v0 = vadd.f32 %v2178_v61, %v1263_v63  ;;  %v2115_v1 = vpop.f32.mrb[12].mxu0 }
 0x113   : > { %v2179_v2 = vpop.f32.mrb[12].mxu1  ;;  %v2116_v3 = vpop.f32.mrb[13].mxu0 }
 0x114   : > { %v2117_v4 = vadd.f32 %v2116_v3, %v2115_v1  ;;  %v2180_v5 = vpop.f32.mrb[13].mxu1  ;;  %v2118_v6 = vpop.f32.mrb[14].mxu0 }
 0x115   : > { %v2181_v7 = vadd.f32 %v2180_v5, %v2179_v2  ;;  %v2182_v8 = vpop.f32.mrb[14].mxu1  ;;  %v2119_v9 = vpop.f32.mrb[15].mxu0 }
 0x116   : > { %v1268_v10 = vadd.f32 %v2117_v4, %v2923_v18  ;;  %v2120_v11 = vadd.f32 %v2119_v9, %v2118_v6  ;;  %v2183_v12 = vpop.f32.mrb[15].mxu1 }
 0x117   : > { %v2184_v13 = vadd.f32 %v2183_v12, %v2182_v8 }
 0x118   : > { %v2944_v14 = vadd.f32 %v2181_v7, %v1268_v10  ;;  %v1271_v15 = vadd.f32 %v2120_v11, %v2923_v18 }
 0x11a   : > { %v2947_v16 = vadd.f32 %v2184_v13, %v1271_v15  ;;  %v2121_v17 = vpop.f32.mrb[16].mxu0 }
 0x11b   : > { %v2185_v19 = vpop.f32.mrb[16].mxu1  ;;  %v2122_v20 = vpop.f32.mrb[17].mxu0 }
 0x11c   : > { %v2123_v21 = vadd.f32 %v2122_v20, %v2121_v17  ;;  %v2186_v22 = vpop.f32.mrb[17].mxu1  ;;  %v2124_v23 = vpop.f32.mrb[18].mxu0 }
 0x11d   : > { %v2187_v24 = vadd.f32 %v2186_v22, %v2185_v19  ;;  %v2188_v25 = vpop.f32.mrb[18].mxu1  ;;  %v2125_v26 = vpop.f32.mrb[19].mxu0 }
 0x11e   : > { %v1276_v27 = vadd.f32 %v2123_v21, %v2923_v18  ;;  %v2126_v28 = vadd.f32 %v2125_v26, %v2124_v23  ;;  %v2189_v29 = vpop.f32.mrb[19].mxu1 }
 0x11f   : > { %v2190_v31 = vadd.f32 %v2189_v29, %v2188_v25 }
 0x120   : > { %v2950_v33 = vadd.f32 %v2187_v24, %v1276_v27  ;;  %v1279_v34 = vadd.f32 %v2126_v28, %v2923_v18 }
 0x122   : > { %v2953_v35 = vadd.f32 %v2190_v31, %v1279_v34  ;;  %v2127_v36 = vpop.f32.mrb[20].mxu0 }
 0x123   : > { %v2191_v37 = vpop.f32.mrb[20].mxu1  ;;  %v2128_v38 = vpop.f32.mrb[21].mxu0 }
 0x124   : > { %v2129_v39 = vadd.f32 %v2128_v38, %v2127_v36  ;;  %v2192_v40 = vpop.f32.mrb[21].mxu1  ;;  %v2130_v41 = vpop.f32.mrb[22].mxu0 }
 0x125   : > { %v2193_v42 = vadd.f32 %v2192_v40, %v2191_v37  ;;  %v2194_v43 = vpop.f32.mrb[22].mxu1  ;;  %v2131_v44 = vpop.f32.mrb[23].mxu0 }
 0x126   : > { %v1284_v45 = vadd.f32 %v2129_v39, %v2923_v18  ;;  %v2132_v47 = vadd.f32 %v2131_v44, %v2130_v41  ;;  %v2195_v49 = vpop.f32.mrb[23].mxu1 }
 0x127   : > { %v2196_v50 = vadd.f32 %v2195_v49, %v2194_v43 }
 0x128   : > { %v2956_v51 = vadd.f32 %v2193_v42, %v1284_v45  ;;  %v1287_v52 = vadd.f32 %v2132_v47, %v2923_v18 }
 0x12a   : > { %v2959_v53 = vadd.f32 %v2196_v50, %v1287_v52  ;;  %v2133_v54 = vpop.f32.mrb[24].mxu0 }
 0x12b   : > { %v2197_v55 = vpop.f32.mrb[24].mxu1  ;;  %v2134_v56 = vpop.f32.mrb[25].mxu0 }
 0x12c   : > { %v2135_v57 = vadd.f32 %v2134_v56, %v2133_v54  ;;  %v2198_v58 = vpop.f32.mrb[25].mxu1  ;;  %v2136_v59 = vpop.f32.mrb[26].mxu0 }
 0x12d   : > { %v2199_v60 = vadd.f32 %v2198_v58, %v2197_v55  ;;  %v2200_v61 = vpop.f32.mrb[26].mxu1  ;;  %v2137_v63 = vpop.f32.mrb[27].mxu0 }
 0x12e   : > { %v1292_v1 = vadd.f32 %v2135_v57, %v2923_v18  ;;  %v2138_v2 = vadd.f32 %v2137_v63, %v2136_v59  ;;  %v2201_v3 = vpop.f32.mrb[27].mxu1 }
 0x12f   : > { %v2202_v4 = vadd.f32 %v2201_v3, %v2200_v61 }
 0x130   : > { %v2962_v5 = vadd.f32 %v2199_v60, %v1292_v1  ;;  %v1295_v6 = vadd.f32 %v2138_v2, %v2923_v18 }
 0x132   : > { %v2965_v7 = vadd.f32 %v2202_v4, %v1295_v6  ;;  %v2139_v8 = vpop.f32.mrb[28].mxu0 }
 0x133   : > { %v2203_v9 = vpop.f32.mrb[28].mxu1  ;;  %v2140_v10 = vpop.f32.mrb[29].mxu0 }
 0x134   : > { %v2141_v11 = vadd.f32 %v2140_v10, %v2139_v8  ;;  %v2204_v12 = vpop.f32.mrb[29].mxu1  ;;  %v2142_v13 = vpop.f32.mrb[30].mxu0 }
 0x135   : > { %v2205_v15 = vadd.f32 %v2204_v12, %v2203_v9  ;;  %v2206_v17 = vpop.f32.mrb[30].mxu1  ;;  %v2143_v19 = vpop.f32.mrb[31].mxu0 }
 0x136   : > { %v1300_v20 = vadd.f32 %v2141_v11, %v2923_v18  ;;  %v2144_v21 = vadd.f32 %v2143_v19, %v2142_v13  ;;  %v2207_v22 = vpop.f32.mrb[31].mxu1 }
 0x137   : > { %v2208_v23 = vadd.f32 %v2207_v22, %v2206_v17 }
 0x138   : > { %v2968_v24 = vadd.f32 %v2205_v15, %v1300_v20  ;;  %v1303_v25 = vadd.f32 %v2144_v21, %v2923_v18 }
 0x13a   : > { %v2971_v26 = vadd.f32 %v2208_v23, %v1303_v25  ;;  %v2225_v27 = vpop.f32.mrb[32].mxu0 }
 0x13b   : > { %v2289_v28 = vpop.f32.mrb[32].mxu1  ;;  %v2226_v29 = vpop.f32.mrb[33].mxu0 }
 0x13c   : > { %v2227_v31 = vadd.f32 %v2226_v29, %v2225_v27  ;;  %v2290_v34 = vpop.f32.mrb[33].mxu1  ;;  %v2228_v36 = vpop.f32.mrb[34].mxu0 }
 0x13d   : > { %v2291_v37 = vadd.f32 %v2290_v34, %v2289_v28  ;;  %v2292_v38 = vpop.f32.mrb[34].mxu1  ;;  %v2229_v39 = vpop.f32.mrb[35].mxu0 }
 0x13e   : > { %v1438_v40 = vadd.f32 %v2227_v31, %v2926_v30  ;;  %v2230_v41 = vadd.f32 %v2229_v39, %v2228_v36  ;;  %v2293_v42 = vpop.f32.mrb[35].mxu1 }
 0x13f   : > { %v2294_v43 = vadd.f32 %v2293_v42, %v2292_v38 }
 0x140   : > { %v1441_v44 = vadd.f32 %v2230_v41, %v2929_v32  ;;  %v2975_v45 = vadd.f32 %v2291_v37, %v1438_v40 }
 0x142   : > { %v2231_v18 = vpop.f32.mrb[36].mxu0  ;;  %v2977_v47 = vadd.f32 %v2294_v43, %v1441_v44 }
 0x143   : > { %v2295_v49 = vpop.f32.mrb[36].mxu1  ;;  %v2232_v50 = vpop.f32.mrb[37].mxu0 }
 0x144   : > { %v2233_v52 = vadd.f32 %v2232_v50, %v2231_v18  ;;  %v2296_v54 = vpop.f32.mrb[37].mxu1  ;;  %v2234_v55 = vpop.f32.mrb[38].mxu0 }
 0x145   : > { %v2297_v56 = vadd.f32 %v2296_v54, %v2295_v49  ;;  %v2298_v57 = vpop.f32.mrb[38].mxu1  ;;  %v2235_v58 = vpop.f32.mrb[39].mxu0 }
 0x146   : > { %v1446_v30 = vadd.f32 %v2233_v52, %v2932_v46  ;;  %v2236_v59 = vadd.f32 %v2235_v58, %v2234_v55  ;;  %v2299_v60 = vpop.f32.mrb[39].mxu1 }
 0x147   : > { %v2300_v61 = vadd.f32 %v2299_v60, %v2298_v57 }
 0x148   : > { %v1449_v32 = vadd.f32 %v2236_v59, %v2935_v48  ;;  %v2981_v63 = vadd.f32 %v2297_v56, %v1446_v30 }
 0x14a   : > { %v2237_v1 = vpop.f32.mrb[40].mxu0  ;;  %v2983_v2 = vadd.f32 %v2300_v61, %v1449_v32 }
 0x14b   : > { %v2301_v3 = vpop.f32.mrb[40].mxu1  ;;  %v2238_v4 = vpop.f32.mrb[41].mxu0 }
 0x14c   : > { %v2239_v6 = vadd.f32 %v2238_v4, %v2237_v1  ;;  %v2302_v8 = vpop.f32.mrb[41].mxu1  ;;  %v2240_v9 = vpop.f32.mrb[42].mxu0 }
 0x14d   : > { %v2303_v10 = vadd.f32 %v2302_v8, %v2301_v3  ;;  %v2304_v11 = vpop.f32.mrb[42].mxu1  ;;  %v2241_v12 = vpop.f32.mrb[43].mxu0 }
 0x14e   : > { %v1454_v46 = vadd.f32 %v2239_v6, %v2938_v62  ;;  %v2242_v13 = vadd.f32 %v2241_v12, %v2240_v9  ;;  %v2305_v15 = vpop.f32.mrb[43].mxu1 }
 0x14f   : > { %v2306_v17 = vadd.f32 %v2305_v15, %v2304_v11 }
 0x150   : > { %v1457_v48 = vadd.f32 %v2242_v13, %v2941_v0  ;;  %v2987_v19 = vadd.f32 %v2303_v10, %v1454_v46 }
 0x152   : > { %v2243_v20 = vpop.f32.mrb[44].mxu0  ;;  %v2989_v21 = vadd.f32 %v2306_v17, %v1457_v48 }
 0x153   : > { %v2307_v22 = vpop.f32.mrb[44].mxu1  ;;  %v2244_v23 = vpop.f32.mrb[45].mxu0 }
 0x154   : > { %v2245_v25 = vadd.f32 %v2244_v23, %v2243_v20  ;;  %v2308_v27 = vpop.f32.mrb[45].mxu1  ;;  %v2246_v28 = vpop.f32.mrb[46].mxu0 }
 0x155   : > { %v2309_v29 = vadd.f32 %v2308_v27, %v2307_v22  ;;  %v2310_v31 = vpop.f32.mrb[46].mxu1  ;;  %v2247_v34 = vpop.f32.mrb[47].mxu0 }
 0x156   : > { %v1462_v62 = vadd.f32 %v2245_v25, %v2944_v14  ;;  %v2248_v36 = vadd.f32 %v2247_v34, %v2246_v28  ;;  %v2311_v37 = vpop.f32.mrb[47].mxu1 }
 0x157   : > { %v2312_v38 = vadd.f32 %v2311_v37, %v2310_v31 }
 0x158   : > { %v1465_v0 = vadd.f32 %v2248_v36, %v2947_v16  ;;  %v2993_v39 = vadd.f32 %v2309_v29, %v1462_v62 }
 0x15a   : > { %v2249_v40 = vpop.f32.mrb[48].mxu0  ;;  %v2995_v41 = vadd.f32 %v2312_v38, %v1465_v0 }
 0x15b   : > { %v2313_v42 = vpop.f32.mrb[48].mxu1  ;;  %v2250_v43 = vpop.f32.mrb[49].mxu0 }
 0x15c   : > { %v2251_v44 = vadd.f32 %v2250_v43, %v2249_v40  ;;  %v2314_v18 = vpop.f32.mrb[49].mxu1  ;;  %v2252_v49 = vpop.f32.mrb[50].mxu0 }
 0x15d   : > { %v2315_v50 = vadd.f32 %v2314_v18, %v2313_v42  ;;  %v2316_v52 = vpop.f32.mrb[50].mxu1  ;;  %v2253_v54 = vpop.f32.mrb[51].mxu0 }
 0x15e   : > { %v1470_v14 = vadd.f32 %v2251_v44, %v2950_v33  ;;  %v2254_v55 = vadd.f32 %v2253_v54, %v2252_v49  ;;  %v2317_v56 = vpop.f32.mrb[51].mxu1 }
 0x15f   : > { %v2318_v57 = vadd.f32 %v2317_v56, %v2316_v52 }
 0x160   : > { %v1473_v16 = vadd.f32 %v2254_v55, %v2953_v35  ;;  %v1567_v58 = vadd.f32 %v2315_v50, %v1470_v14 }
 0x162   : > { %v2255_v30 = vpop.f32.mrb[52].mxu0  ;;  %v2999_v59 = vadd.f32 %v2318_v57, %v1473_v16 }
 0x163   : > { %v2319_v60 = vpop.f32.mrb[52].mxu1  ;;  %v2256_v61 = vpop.f32.mrb[53].mxu0 }
 0x164   : > { %v2257_v32 = vadd.f32 %v2256_v61, %v2255_v30  ;;  %v2320_v1 = vpop.f32.mrb[53].mxu1  ;;  %v2258_v3 = vpop.f32.mrb[54].mxu0 }
 0x165   : > { %v2321_v4 = vadd.f32 %v2320_v1, %v2319_v60  ;;  %v2322_v6 = vpop.f32.mrb[54].mxu1  ;;  %v2259_v8 = vpop.f32.mrb[55].mxu0 }
 0x166   : > { %v1478_v9 = vadd.f32 %v2257_v32, %v2956_v51  ;;  %v2260_v33 = vadd.f32 %v2259_v8, %v2258_v3  ;;  %v2323_v10 = vpop.f32.mrb[55].mxu1 }
 0x167   : > { %v2324_v11 = vadd.f32 %v2323_v10, %v2322_v6 }
 0x168   : > { %v1481_v12 = vadd.f32 %v2260_v33, %v2959_v53  ;;  %v1575_v35 = vadd.f32 %v2321_v4, %v1478_v9 }
 0x16a   : > { %v2261_v46 = vpop.f32.mrb[56].mxu0  ;;  %v1578_v13 = vadd.f32 %v2324_v11, %v1481_v12 }
 0x16b   : > { %v2325_v15 = vpop.f32.mrb[56].mxu1  ;;  %v2262_v17 = vpop.f32.mrb[57].mxu0 }
 0x16c   : > { %v2263_v48 = vadd.f32 %v2262_v17, %v2261_v46  ;;  %v2326_v20 = vpop.f32.mrb[57].mxu1  ;;  %v2264_v22 = vpop.f32.mrb[58].mxu0 }
 0x16d   : > { %v2327_v23 = vadd.f32 %v2326_v20, %v2325_v15  ;;  %v2328_v25 = vpop.f32.mrb[58].mxu1  ;;  %v2265_v27 = vpop.f32.mrb[59].mxu0 }
 0x16e   : > { %v1486_v28 = vadd.f32 %v2263_v48, %v2962_v5  ;;  %v2266_v29 = vadd.f32 %v2265_v27, %v2264_v22  ;;  %v2329_v51 = vpop.f32.mrb[59].mxu1 }
 0x16f   : > { %v2330_v31 = vadd.f32 %v2329_v51, %v2328_v25 }
 0x170   : > { %v1489_v34 = vadd.f32 %v2266_v29, %v2965_v7  ;;  %v1583_v62 = vadd.f32 %v2327_v23, %v1486_v28 }
 0x172   : > { %v2267_v53 = vpop.f32.mrb[60].mxu0  ;;  %v3005_v36 = vadd.f32 %v2330_v31, %v1489_v34 }
 0x173   : > { %v2331_v37 = vpop.f32.mrb[60].mxu1  ;;  %v2268_v38 = vpop.f32.mrb[61].mxu0 }
 0x174   : > { %v2269_v0 = vadd.f32 %v2268_v38, %v2267_v53  ;;  %v2332_v40 = vpop.f32.mrb[61].mxu1  ;;  %v2270_v42 = vpop.f32.mrb[62].mxu0 }
 0x175   : > { %v2333_v43 = vadd.f32 %v2332_v40, %v2331_v37  ;;  %v2334_v44 = vpop.f32.mrb[62].mxu1  ;;  %v2271_v18 = vpop.f32.mrb[63].mxu0 }
 0x176   : > { %v1494_v49 = vadd.f32 %v2269_v0, %v2968_v24  ;;  %v2272_v5 = vadd.f32 %v2271_v18, %v2270_v42  ;;  %v2335_v50 = vpop.f32.mrb[63].mxu1 }
 0x177   : > { %v2336_v52 = vadd.f32 %v2335_v50, %v2334_v44 }
 0x178   : > { %v1497_v7 = vadd.f32 %v2272_v5, %v2971_v26  ;;  %v1591_v54 = vadd.f32 %v2333_v43, %v1494_v49 }
 0x17a   : > { %v2371_v14 = vpop.f32.mrb[64].mxu0  ;;  %v1594_v55 = vadd.f32 %v2336_v52, %v1497_v7 }
 0x17b   : > { %v1640_v56 = vadd.f32 %v2371_v14, %v2981_v63  ;;  %v2379_v57 = vpop.f32.mrb[64].mxu1  ;;  %v1631_v16 = vpop.f32.mrb[65].mxu0 }
 0x17c   : > { %v1672_v30 = vadd.f32 %v2379_v57, %v1575_v35  ;;  %v1632_v60 = vadd.f32 %v1631_v16, %v2975_v45  ;;  %v1663_v61 = vpop.f32.mrb[65].mxu1  ;;  %v2372_v32 = vpop.f32.mrb[66].mxu0 }
 0x17d   : > { %v1664_v1 = vadd.f32 %v1663_v61, %v1567_v58  ;;  %v1643_v24 = vadd.f32 %v2372_v32, %v2983_v2  ;;  %v2380_v3 = vpop.f32.mrb[66].mxu1  ;;  %v1634_v4 = vpop.f32.mrb[67].mxu0  ;;  %v1696_v9 = vmax.f32 %v1640_v56, 0.0 }
 0x17e   : > { %v1675_v6 = vadd.f32 %v2380_v3, %v1578_v13  ;;  %v1635_v26 = vadd.f32 %v1634_v4, %v2977_v47  ;;  %v1666_v8 = vpop.f32.mrb[67].mxu1  ;;  %v1704_v10 = vmax.f32 %v1672_v30, 0.0  ;;  %v1694_v11 = vmax.f32 %v1632_v60, 0.0 }
 0x17f   : > { %v1697_v33 = vmax.f32 %v1643_v24, 0.0  ;;  %v1667_v63 = vadd.f32 %v1666_v8, %v2999_v59  ;;  %v1702_v58 = vmax.f32 %v1664_v1, 0.0 }
 0x180   : > { %v1705_v45 = vmax.f32 %v1675_v6, 0.0  ;;  %v1695_v2 = vmax.f32 %v1635_v26, 0.0 }
 0x181   : > { %v2042_v12 = vpack.c.bf16 %v1697_v33, %v1696_v9  ;;  %v1703_v47 = vmax.f32 %v1667_v63, 0.0 }
 0x182   : > { %v2062_v35 = vpack.c.bf16 %v1705_v45, %v1704_v10  ;;  %v2037_v46 = vpack.c.bf16 %v1695_v2, %v1694_v11  ;;  %v2375_v13 = vpop.f32.mrb[68].mxu0 }
 0x183   : > { %2074 = vst [vmem:[%s3018_s20 + $0x8] sm:$0xff] %v2042_v12   ;;  %v2057_v59 = vpack.c.bf16 %v1703_v47, %v1702_v58  ;;  %v1656_v15 = vadd.f32 %v2375_v13, %v2993_v39  ;;  %v2383_v17 = vpop.f32.mrb[68].mxu1  ;;  %v1647_v48 = vpop.f32.mrb[69].mxu0 }
 0x184   : > { %2078 = vst [vmem:[%s3018_s20 + $0x28] sm:$0xff] %v2062_v35   ;;  %2038 = vst [vmem:[%s3018_s20] sm:$0xff] %v2037_v46   ;;  %v1688_v20 = vadd.f32 %v2383_v17, %v1591_v54  ;;  %v1648_v22 = vadd.f32 %v1647_v48, %v2987_v19  ;;  %v1679_v23 = vpop.f32.mrb[69].mxu1  ;;  %v2376_v25 = vpop.f32.mrb[70].mxu0 }
 0x185   : > { %2077 = vst [vmem:[%s3018_s20 + $0x20] sm:$0xff] %v2057_v59   ;;  %v1680_v27 = vadd.f32 %v1679_v23, %v1583_v62  ;;  %v1659_v28 = vadd.f32 %v2376_v25, %v2995_v41  ;;  %v2384_v29 = vpop.f32.mrb[70].mxu1  ;;  %v1650_v51 = vpop.f32.mrb[71].mxu0  ;;  %v1700_v53 = vmax.f32 %v1656_v15, 0.0 }
 0x186   : > { %v1691_v31 = vadd.f32 %v2384_v29, %v1594_v55  ;;  %v1651_v34 = vadd.f32 %v1650_v51, %v2989_v21  ;;  %v1682_v39 = vpop.f32.mrb[71].mxu1  ;;  %v1708_v38 = vmax.f32 %v1688_v20, 0.0  ;;  %v1698_v0 = vmax.f32 %v1648_v22, 0.0 }
 0x187   : > { %v1701_v37 = vmax.f32 %v1659_v28, 0.0  ;;  %v1683_v19 = vadd.f32 %v1682_v39, %v3005_v36  ;;  %v1706_v42 = vmax.f32 %v1680_v27, 0.0 }
 0x188   : > { %v1709_v40 = vmax.f32 %v1691_v31, 0.0  ;;  %v1699_v62 = vmax.f32 %v1651_v34, 0.0 }
 0x189   : > { %v2052_v41 = vpack.c.bf16 %v1701_v37, %v1700_v53  ;;  %v1707_v43 = vmax.f32 %v1683_v19, 0.0 }
 0x18a   : > { %v2072_v44 = vpack.c.bf16 %v1709_v40, %v1708_v38  ;;  %v2047_v18 = vpack.c.bf16 %v1699_v62, %v1698_v0 }
 0x18b   : > { %2076 = vst [vmem:[%s3018_s20 + $0x18] sm:$0xff] %v2052_v41   ;;  %v2067_v49 = vpack.c.bf16 %v1707_v43, %v1706_v42 }
 0x18c   : > { %2080 = vst [vmem:[%s3018_s20 + $0x38] sm:$0xff] %v2072_v44   ;;  %2075 = vst [vmem:[%s3018_s20 + $0x10] sm:$0xff] %v2047_v18  }
 0x18d   : > { %2079 = vst [vmem:[%s3018_s20 + $0x30] sm:$0xff] %v2067_v49  }
 0x18e PF: > { %s13_s12 = sadd.s32 1, %s2592_s12  }
 0x18f   : > { %p10_p4 = scmp.ge.s32.totalorder %s13_s12, 7  }
 0x191   :  { %12 = sbr.rel (!%p10_p4) target bundleno = 1 (0x1), region = 62 }

// kernel: retinanet_forward.50
= control target key start
LH: loop header
LB: loop body
LE: loop exit
PB: predicated region body
PF: predicated region fallthrough
CT: control target
= control target key end

     0   :  { %s2456_s12 = smov 0   ;;  %s2902_s0 = inlined_call_operand.vmem [shape: bf16[640,1152], index: 0, kind: input, shape index: {}]   ;;  %s2903_s1 = inlined_call_operand.vmem [shape: bf16[1152,2], index: 1, kind: input, shape index: {}]   ;;  %s2904_s2 = inlined_call_operand.vmem [shape: f32[1,2], index: 2, kind: input, shape index: {}]   ;;  %s2905_s3 = inlined_call_operand.vmem [shape: f32[640,2], index: 3, kind: output, shape index: {}]  }
   0x1 LB: > { %s1767_s13 = sadd.s32 4294967295, %s2434_s12   ;;  %p1771_p0 = scmp.ge.s32.totalorder %s2434_s12, 1  ;;  %s2434_s12 = sphi %s2456_s12, %s13_s12  }
   0x2   : > { %p139_p1 = scmp.lt.s32.totalorder %s2434_s12, 6 }
   0x4   : > { %p140_p2 = pnand %p1771_p0, %p139_p1 }
   0x5   : > { %v2252_v0 = vld [vmem:[%s2903_s1 + $0x40] sm:$0xff] (!%p140_p2)   ;;  %v2256_v4 = vld [vmem:[%s2903_s1 + $0x48] sm:$0xff] (!%p140_p2)   ;;  %v2260_v8 = vld [vmem:[%s2903_s1 + $0x50] sm:$0xff] (!%p140_p2)   ;;  %s1772_s19 = sshll.u32 (!%p140_p2), %s1767_s13, 4  ;;  %vm1694_vm0 = vcmask (!%p140_p2), 15360  }
   0x6   : > { %143 = sbr.rel (%p140_p2) target bundleno = 394 (0x18a), region = 32  ;;  %v2253_v1 = vld [vmem:[%s2903_s1 + $0xc0] sm:$0xff] (!%p140_p2)   ;;  %1923 = vmatprep.subr.bf16.mxu0 (!%p140_p2), %v2252_v0  ;;  %v2257_v5 = vld [vmem:[%s2903_s1 + $0xc8] sm:$0xff] (!%p140_p2)   ;;  %v2261_v9 = vld [vmem:[%s2903_s1 + $0xd0] sm:$0xff] (!%p140_p2)   ;;  %p165_p3 = scmp.lt.s32.totalorder (!%p140_p2), %s1772_s19, 79 }
   0x7   : > { %v2254_v2 = vld [vmem:[%s2903_s1] sm:$0xff] (!%p140_p2)   ;;  %1987 = vmatprep.subr.bf16.mxu1 (!%p140_p2), %v2253_v1  ;;  %v2258_v6 = vld [vmem:[%s2903_s1 + $0x8] sm:$0xff] (!%p140_p2)   ;;  %v2262_v10 = vld [vmem:[%s2903_s1 + $0x10] sm:$0xff] (!%p140_p2)  }
   0x8   : > { %v2255_v3 = vld [vmem:[%s2903_s1 + $0x80] sm:$0xff] (!%p140_p2)   ;;  %1924 = vmatpush3.bf16.msra.mxu0 (!%p140_p2), %v2254_v2  ;;  %v2259_v7 = vld [vmem:[%s2903_s1 + $0x88] sm:$0xff] (!%p140_p2)   ;;  %v2263_v11 = vld [vmem:[%s2903_s1 + $0x90] sm:$0xff] (!%p140_p2)  }
   0x9   : > { %1988 = vmatpush3.bf16.msra.mxu1 (!%p140_p2), %v2255_v3  ;;  %1925 = vmatprep.subr.bf16.mxu0 (!%p140_p2), %v2256_v4  ;;  %v2264_v12 = vld [vmem:[%s2903_s1 + $0x58] sm:$0xff] (!%p140_p2)   ;;  %v2268_v16 = vld [vmem:[%s2903_s1 + $0x60] sm:$0xff] (!%p140_p2)   ;;  %v2272_v20 = vld [vmem:[%s2903_s1 + $0x68] sm:$0xff] (!%p140_p2)  }
   0xa   : > { %1989 = vmatprep.subr.bf16.mxu1 (!%p140_p2), %v2257_v5  ;;  %v2265_v13 = vld [vmem:[%s2903_s1 + $0xd8] sm:$0xff] (!%p140_p2)   ;;  %v2269_v17 = vld [vmem:[%s2903_s1 + $0xe0] sm:$0xff] (!%p140_p2)   ;;  %v2273_v21 = vld [vmem:[%s2903_s1 + $0xe8] sm:$0xff] (!%p140_p2)  }
   0xb   : > { %v2266_v14 = vld [vmem:[%s2903_s1 + $0x18] sm:$0xff] (!%p140_p2)   ;;  %v2270_v18 = vld [vmem:[%s2903_s1 + $0x20] sm:$0xff] (!%p140_p2)   ;;  %v2274_v22 = vld [vmem:[%s2903_s1 + $0x28] sm:$0xff] (!%p140_p2)  }
   0xc   : > { %1926 = vmatpush3.bf16.msra.mxu0 (!%p140_p2), %v2258_v6  ;;  %v2267_v15 = vld [vmem:[%s2903_s1 + $0x98] sm:$0xff] (!%p140_p2)   ;;  %v2271_v19 = vld [vmem:[%s2903_s1 + $0xa0] sm:$0xff] (!%p140_p2)   ;;  %v2275_v23 = vld [vmem:[%s2903_s1 + $0xa8] sm:$0xff] (!%p140_p2)  }
   0xd   : > { %1990 = vmatpush3.bf16.msra.mxu1 %v2259_v7  ;;  %1927 = vmatprep.subr.bf16.mxu0 %v2260_v8  ;;  %s2907_s19 = smov (!%p165_p3, %s1772_s19), 79  ;;  %v2276_v24 = vld [vmem:[%s2903_s1 + $0x70] sm:$0xff]   ;;  %v2280_v28 = vld [vmem:[%s2903_s1 + $0x78] sm:$0xff]   ;;  %v2290_v36 = vld [vmem:[%s2903_s1 + $0x140] sm:$0xff]  }
   0xe   : > { %1991 = vmatprep.subr.bf16.mxu1 %v2261_v9  ;;  %v2277_v25 = vld [vmem:[%s2903_s1 + $0xf0] sm:$0xff]   ;;  %s2243_s16 = smul.u32 36, %s2907_s19  ;;  %v2281_v29 = vld [vmem:[%s2903_s1 + $0xf8] sm:$0xff]   ;;  %v2291_v37 = vld [vmem:[%s2903_s1 + $0x1c0] sm:$0xff]  }
   0xf   : > { %v2278_v26 = vld [vmem:[%s2903_s1 + $0x30] sm:$0xff]   ;;  %v2282_v30 = vld [vmem:[%s2903_s1 + $0x38] sm:$0xff]   ;;  %v2292_v38 = vld [vmem:[%s2903_s1 + $0x100] sm:$0xff]  }
  0x10   : > { %1928 = vmatpush3.bf16.msra.mxu0 %v2262_v10  ;;  %v2279_v27 = vld [vmem:[%s2903_s1 + $0xb0] sm:$0xff]   ;;  %s2562_s13 = scalar_lea.vmem %s2902_s0, %s2243_s16  ;;  %v2283_v31 = vld [vmem:[%s2903_s1 + $0xb8] sm:$0xff]   ;;  %v2293_v39 = vld [vmem:[%s2903_s1 + $0x180] sm:$0xff]  }
  0x11   : > { %1992 = vmatpush3.bf16.msra.mxu1 %v2263_v11  ;;  %1929 = vmatprep.subr.bf16.mxu0 %v2264_v12  ;;  %v2284_v32 = vld [vmem:[%s2562_s13] ss:$36 sps:$4 sm:$0xff]   ;;  %v2287_v34 = vld [vmem:[%s2562_s13 + $0x8] ss:$36 sps:$4 sm:$0xff]   ;;  %v2296_v41 = vld [vmem:[%s2562_s13 + $0x54] ss:$36 sps:$4 sm:$0xff]  }
  0x12   : > { %1993 = vmatprep.subr.bf16.mxu1 %v2265_v13  ;;  %v2286_v33 = vld [vmem:[%s2562_s13 + $0x4] ss:$36 sps:$4 sm:$0xff]   ;;  %v2289_v35 = vld [vmem:[%s2562_s13 + $0xc] ss:$36 sps:$4 sm:$0xff]   ;;  %v2304_v48 = vld [vmem:[%s2562_s13 + $0x94] ss:$36 sps:$4 sm:$0xff]  }
  0x13   : > { %1241 = vmatprep.mubr.bf16.mxu0 %v2286_v33  ;;  %1338 = vmatprep.mubr.bf16.mxu1 %v2289_v35  ;;  %v2294_v40 = vld [vmem:[%s2562_s13 + $0x4c] ss:$36 sps:$4 sm:$0xff]   ;;  %v2306_v49 = vld [vmem:[%s2562_s13 + $0x9c] ss:$36 sps:$4 sm:$0xff]   ;;  %v2316_v57 = vld [vmem:[%s2562_s13 + $0xe4] ss:$36 sps:$4 sm:$0xff]  }
  0x14   : > { %1930 = vmatpush3.bf16.msra.mxu0 %v2266_v14  ;;  %v2298_v42 = vld [vmem:[%s2562_s13 + $0x48] ss:$36 sps:$4 sm:$0xff]   ;;  %v2299_v43 = vld [vmem:[%s2562_s13 + $0x50] ss:$36 sps:$4 sm:$0xff]   ;;  %v2309_v51 = vld [vmem:[%s2562_s13 + $0x98] ss:$36 sps:$4 sm:$0xff]  }
  0x15   : > { %1994 = vmatpush3.bf16.msra.mxu1 %v2267_v15  ;;  %1931 = vmatprep.subr.bf16.mxu0 %v2268_v16  ;;  %v2300_v44 = vld [vmem:[%s2903_s1 + $0x148] sm:$0xff]   ;;  %v2308_v50 = vld [vmem:[%s2562_s13 + $0x90] ss:$36 sps:$4 sm:$0xff]   ;;  %v2314_v56 = vld [vmem:[%s2562_s13 + $0xdc] ss:$36 sps:$4 sm:$0xff]  }
  0x16   : > { %1995 = vmatprep.subr.bf16.mxu1 %v2269_v17  ;;  %v2301_v45 = vld [vmem:[%s2903_s1 + $0x1c8] sm:$0xff]   ;;  %v2310_v52 = vld [vmem:[%s2903_s1 + $0x150] sm:$0xff]   ;;  %v2318_v58 = vld [vmem:[%s2562_s13 + $0xd8] ss:$36 sps:$4 sm:$0xff]  }
  0x17   : > { %v2302_v46 = vld [vmem:[%s2903_s1 + $0x108] sm:$0xff]   ;;  %v2311_v53 = vld [vmem:[%s2903_s1 + $0x1d0] sm:$0xff]   ;;  %v2319_v59 = vld [vmem:[%s2562_s13 + $0xe0] ss:$36 sps:$4 sm:$0xff]  }
  0x18   : > { %1932 = vmatpush3.bf16.msra.mxu0 %v2270_v18  ;;  %v2303_v47 = vld [vmem:[%s2903_s1 + $0x188] sm:$0xff]   ;;  %v2312_v54 = vld [vmem:[%s2903_s1 + $0x110] sm:$0xff]   ;;  %v2320_v60 = vld [vmem:[%s2903_s1 + $0x158] sm:$0xff]  }
  0x19   : > { %1996 = vmatpush3.bf16.msra.mxu1 %v2271_v19  ;;  %1933 = vmatprep.subr.bf16.mxu0 %v2272_v20  ;;  %v2313_v55 = vld [vmem:[%s2903_s1 + $0x190] sm:$0xff]   ;;  %v2321_v61 = vld [vmem:[%s2903_s1 + $0x1d8] sm:$0xff]   ;;  %v2324_v0 = vld [vmem:[%s2562_s13 + $0x124] ss:$36 sps:$4 sm:$0xff]  }
  0x1a   : > { %1997 = vmatprep.subr.bf16.mxu1 %v2273_v21  ;;  %v2322_v62 = vld [vmem:[%s2903_s1 + $0x118] sm:$0xff]   ;;  %v2326_v1 = vld [vmem:[%s2562_s13 + $0x12c] ss:$36 sps:$4 sm:$0xff]   ;;  %v2328_v2 = vld [vmem:[%s2562_s13 + $0x120] ss:$36 sps:$4 sm:$0xff]  }
  0x1b   : > { %v2323_v63 = vld [vmem:[%s2903_s1 + $0x198] sm:$0xff]   ;;  %v2330_v3 = vld [vmem:[%s2903_s1 + $0x160] sm:$0xff]   ;;  %v2329_v4 = vld [vmem:[%s2562_s13 + $0x128] ss:$36 sps:$4 sm:$0xff]  }
  0x1c   : > { %1934 = vmatpush3.bf16.msra.mxu0 %v2274_v22  ;;  %v2331_v5 = vld [vmem:[%s2903_s1 + $0x1e0] sm:$0xff]   ;;  %v2334_v8 = vld [vmem:[%s2562_s13 + $0x16c] ss:$36 sps:$4 sm:$0xff]   ;;  %v2336_v9 = vld [vmem:[%s2562_s13 + $0x174] ss:$36 sps:$4 sm:$0xff]  }
  0x1d   : > { %1998 = vmatpush3.bf16.msra.mxu1 %v2275_v23  ;;  %1935 = vmatprep.subr.bf16.mxu0 %v2276_v24  ;;  %v2332_v6 = vld [vmem:[%s2903_s1 + $0x120] sm:$0xff]   ;;  %v2340_v10 = vld [vmem:[%s2903_s1 + $0x168] sm:$0xff]   ;;  %v2339_v15 = vld [vmem:[%s2562_s13 + $0x170] ss:$36 sps:$4 sm:$0xff]  }
  0x1e   : > { %1999 = vmatprep.subr.bf16.mxu1 %v2277_v25  ;;  %v2333_v7 = vld [vmem:[%s2903_s1 + $0x1a0] sm:$0xff]   ;;  %v2341_v11 = vld [vmem:[%s2903_s1 + $0x1e8] sm:$0xff]   ;;  %v2344_v16 = vld [vmem:[%s2562_s13 + $0x1b4] ss:$36 sps:$4 sm:$0xff]  }
  0x1f   : > { %v2338_v12 = vld [vmem:[%s2562_s13 + $0x168] ss:$36 sps:$4 sm:$0xff]   ;;  %v2346_v17 = vld [vmem:[%s2562_s13 + $0x1bc] ss:$36 sps:$4 sm:$0xff]   ;;  %v2350_v18 = vld [vmem:[%s2903_s1 + $0x170] sm:$0xff]  }
  0x20   : > { %1936 = vmatpush3.bf16.msra.mxu0 %v2278_v26  ;;  %v2342_v13 = vld [vmem:[%s2903_s1 + $0x128] sm:$0xff]   ;;  %v2351_v19 = vld [vmem:[%s2903_s1 + $0x1f0] sm:$0xff]   ;;  %v2349_v23 = vld [vmem:[%s2562_s13 + $0x1b8] ss:$36 sps:$4 sm:$0xff]  }
  0x21   : > { %2000 = vmatpush3.bf16.msra.mxu1 %v2279_v27  ;;  %1937 = vmatprep.subr.bf16.mxu0 %v2280_v28  ;;  %v2343_v14 = vld [vmem:[%s2903_s1 + $0x1a8] sm:$0xff]   ;;  %v2352_v20 = vld [vmem:[%s2903_s1 + $0x130] sm:$0xff]   ;;  %v2354_v24 = vld [vmem:[%s2562_s13 + $0x1fc] ss:$36 sps:$4 sm:$0xff]  }
  0x22   : > { %2001 = vmatprep.subr.bf16.mxu1 %v2281_v29  ;;  %v2353_v21 = vld [vmem:[%s2903_s1 + $0x1b0] sm:$0xff]   ;;  %v2356_v25 = vld [vmem:[%s2562_s13 + $0x204] ss:$36 sps:$4 sm:$0xff]   ;;  %v2360_v26 = vld [vmem:[%s2903_s1 + $0x178] sm:$0xff]  }
  0x23   : > { %v2348_v22 = vld [vmem:[%s2562_s13 + $0x1b0] ss:$36 sps:$4 sm:$0xff]   ;;  %v2361_v27 = vld [vmem:[%s2903_s1 + $0x1f8] sm:$0xff]  }
  0x24   : > { %1938 = vmatpush3.bf16.msra.mxu0 %v2282_v30  ;;  %v2362_v28 = vld [vmem:[%s2903_s1 + $0x138] sm:$0xff]   ;;  %v2364_v35 = vld [vmem:[%s2562_s13 + $0x10] ss:$36 sps:$4 sm:$0xff]  }
  0x25   : > { %2002 = vmatpush3.bf16.msra.mxu1 %v2283_v31  ;;  %2051 = vmatprep.subr.bf16.mxu0 %v2290_v36  ;;  %v2363_v29 = vld [vmem:[%s2903_s1 + $0x1b8] sm:$0xff]   ;;  %v2359_v31 = vld [vmem:[%s2562_s13 + $0x200] ss:$36 sps:$4 sm:$0xff]  }
  0x26   : > { %2115 = vmatprep.subr.bf16.mxu1 %v2291_v37  ;;  %v2358_v30 = vld [vmem:[%s2562_s13 + $0x1f8] ss:$36 sps:$4 sm:$0xff]  }
  0x27   : > { %1242 = vmatmul.mubr.bf16.vlgmr.msra.gmra.mrb[0].mxu0 %v2284_v32  ;;  %v2370_v32 = vld [vmem:[%s2903_s1 + $0x200] sm:$0xff]   ;;  %v2366_v33 = vld [vmem:[%s2562_s13 + $0x14] ss:$36 sps:$4 sm:$0xff]  }
  0x28   : > { %1339 = vmatmul.mubr.bf16.vlgmr.msra.gmra.mrb[0].mxu1 %v2287_v34  ;;  %2052 = vmatpush3.bf16.msra.mxu0 %v2292_v38  ;;  %v2369_v34 = vld [vmem:[%s2562_s13 + $0x1c] ss:$36 sps:$4 sm:$0xff]   ;;  %v2373_v38 = vld [vmem:[%s2562_s13 + $0x64] ss:$36 sps:$4 sm:$0xff]  }
  0x29   : > { %2116 = vmatpush3.bf16.msra.mxu1 %v2293_v39  ;;  %1249 = vmatprep.mubr.bf16.mxu0 %v2294_v40  ;;  %v2367_v36 = vld [vmem:[%s2562_s13 + $0x18] ss:$36 sps:$4 sm:$0xff]   ;;  %v2377_v39 = vld [vmem:[%s2903_s1 + $0x208] sm:$0xff]   ;;  %v2384_v40 = vld [vmem:[%s2903_s1 + $0x210] sm:$0xff]  }
  0x2a   : > { %1346 = vmatprep.mubr.bf16.mxu1 %v2296_v41  ;;  %2053 = vmatprep.subr.bf16.mxu0 %v2300_v44  ;;  %v2371_v37 = vld [vmem:[%s2562_s13 + $0x5c] ss:$36 sps:$4 sm:$0xff]   ;;  %v2380_v44 = vld [vmem:[%s2562_s13 + $0xac] ss:$36 sps:$4 sm:$0xff]  }
  0x2b   : > { %2117 = vmatprep.subr.bf16.mxu1 %v2301_v45  ;;  %v2375_v41 = vld [vmem:[%s2562_s13 + $0x58] ss:$36 sps:$4 sm:$0xff]  }
  0x2c   : > { %2054 = vmatpush3.bf16.msra.mxu0 %v2302_v46  ;;  %v2391_v45 = vld [vmem:[%s2903_s1 + $0x218] sm:$0xff]   ;;  %v2398_v46 = vld [vmem:[%s2903_s1 + $0x220] sm:$0xff]  }
  0x2d   : > { %2118 = vmatpush3.bf16.msra.mxu1 %v2303_v47  ;;  %2055 = vmatprep.subr.bf16.mxu0 %v2310_v52  ;;  %v2382_v47 = vld [vmem:[%s2562_s13 + $0xa0] ss:$36 sps:$4 sm:$0xff]   ;;  %v2389_v52 = vld [vmem:[%s2562_s13 + $0xe8] ss:$36 sps:$4 sm:$0xff]  }
  0x2e   : > { %2119 = vmatprep.subr.bf16.mxu1 %v2311_v53  ;;  %v2412_v53 = vld [vmem:[%s2903_s1 + $0x230] sm:$0xff]  }
  0x2f   : > { %1250 = vmatmul.mubr.bf16.gmra.mrb[4].mxu0 %v2298_v42  ;;  %v2376_v42 = vld [vmem:[%s2562_s13 + $0x60] ss:$36 sps:$4 sm:$0xff]  }
  0x30   : > { %1347 = vmatmul.mubr.bf16.gmra.mrb[4].mxu1 %v2299_v43  ;;  %1257 = vmatprep.mubr.bf16.mxu0 %v2304_v48  ;;  %v2378_v43 = vld [vmem:[%s2562_s13 + $0xa4] ss:$36 sps:$4 sm:$0xff]  }
  0x31   : > { %1354 = vmatprep.mubr.bf16.mxu1 %v2306_v49  ;;  %2056 = vmatpush3.bf16.msra.mxu0 %v2312_v54  ;;  %v2383_v48 = vld [vmem:[%s2562_s13 + $0xa8] ss:$36 sps:$4 sm:$0xff]   ;;  %v2390_v54 = vld [vmem:[%s2562_s13 + $0xf0] ss:$36 sps:$4 sm:$0xff]  }
  0x32   : > { %2120 = vmatpush3.bf16.msra.mxu1 %v2313_v55  ;;  %2057 = vmatprep.subr.bf16.mxu0 %v2320_v60  ;;  %v2385_v49 = vld [vmem:[%s2562_s13 + $0xec] ss:$36 sps:$4 sm:$0xff]   ;;  %v2392_v55 = vld [vmem:[%s2562_s13 + $0x134] ss:$36 sps:$4 sm:$0xff]   ;;  %v2399_v60 = vld [vmem:[%s2562_s13 + $0x17c] ss:$36 sps:$4 sm:$0xff]  }
  0x33   : > { %2121 = vmatprep.subr.bf16.mxu1 %v2321_v61  ;;  %v2401_v61 = vld [vmem:[%s2562_s13 + $0x184] ss:$36 sps:$4 sm:$0xff]  }
  0x35   : > { %2058 = vmatpush3.bf16.msra.mxu0 %v2322_v62  ;;  %v2403_v62 = vld [vmem:[%s2562_s13 + $0x178] ss:$36 sps:$4 sm:$0xff]  }
  0x36   : > { %2122 = vmatpush3.bf16.msra.mxu1 %v2323_v63  ;;  %2059 = vmatprep.subr.bf16.mxu0 %v2330_v3  ;;  %v2404_v63 = vld [vmem:[%s2562_s13 + $0x180] ss:$36 sps:$4 sm:$0xff]   ;;  %v2411_v3 = vld [vmem:[%s2562_s13 + $0x1c8] ss:$36 sps:$4 sm:$0xff]  }
  0x37   : > { %1258 = vmatmul.mubr.bf16.gmra.mrb[8].mxu0 %v2308_v50  ;;  %2123 = vmatprep.subr.bf16.mxu1 %v2331_v5  ;;  %v2387_v50 = vld [vmem:[%s2562_s13 + $0xf4] ss:$36 sps:$4 sm:$0xff]  }
  0x38   : > { %1355 = vmatmul.mubr.bf16.gmra.mrb[8].mxu1 %v2309_v51  ;;  %1265 = vmatprep.mubr.bf16.mxu0 %v2314_v56  ;;  %v2405_v51 = vld [vmem:[%s2903_s1 + $0x228] sm:$0xff]   ;;  %v2394_v56 = vld [vmem:[%s2562_s13 + $0x13c] ss:$36 sps:$4 sm:$0xff]   ;;  %v2415_v5 = vld [vmem:[%s2562_s13 + $0x214] ss:$36 sps:$4 sm:$0xff]  }
  0x39   : > { %1362 = vmatprep.mubr.bf16.mxu1 %v2316_v57  ;;  %2060 = vmatpush3.bf16.msra.mxu0 %v2332_v6  ;;  %v2419_v57 = vld [vmem:[%s2903_s1 + $0x238] sm:$0xff]   ;;  %v2417_v6 = vld [vmem:[%s2562_s13 + $0x208] ss:$36 sps:$4 sm:$0xff]  }
  0x3a   : > { %2124 = vmatpush3.bf16.msra.mxu1 %v2333_v7  ;;  %2061 = vmatprep.subr.bf16.mxu0 %v2340_v10  ;;  %v2418_v7 = vld [vmem:[%s2562_s13 + $0x210] ss:$36 sps:$4 sm:$0xff]   ;;  %v2422_v10 = vld [vmem:[%s2562_s13 + $0x68] ss:$36 sps:$4 sm:$0xff]  }
  0x3b   : > { %2125 = vmatprep.subr.bf16.mxu1 %v2341_v11  ;;  %v2423_v11 = vld [vmem:[%s2562_s13 + $0x188] ss:$36 sps:$4 sm:$0xff]  }
  0x3d   : > { %2062 = vmatpush3.bf16.msra.mxu0 %v2342_v13  ;;  %v2425_v13 = vld [vmem:[%s2562_s13 + $0x1d0] ss:$36 sps:$4 sm:$0xff]  }
  0x3e   : > { %2126 = vmatpush3.bf16.msra.mxu1 %v2343_v14  ;;  %2063 = vmatprep.subr.bf16.mxu0 %v2350_v18  ;;  %v2426_v14 = vld [vmem:[%s2562_s13 + $0xf8] ss:$36 sps:$4 sm:$0xff]   ;;  %v2765_v18 = vld [vmem:[%s2904_s2] ss:$0 sm:$0xff] }
  0x3f   : > { %1266 = vmatmul.mubr.bf16.gmra.mrb[12].mxu0 %v2318_v58  ;;  %2127 = vmatprep.subr.bf16.mxu1 %v2351_v19  ;;  %v2396_v58 = vld [vmem:[%s2562_s13 + $0x130] ss:$36 sps:$4 sm:$0xff]  }
  0x40   : > { %1363 = vmatmul.mubr.bf16.gmra.mrb[12].mxu1 %v2319_v59  ;;  %1273 = vmatprep.mubr.bf16.mxu0 %v2324_v0  ;;  %v2397_v59 = vld [vmem:[%s2562_s13 + $0x138] ss:$36 sps:$4 sm:$0xff]   ;;  %v2406_v0 = vld [vmem:[%s2562_s13 + $0x1c4] ss:$36 sps:$4 sm:$0xff]  }
  0x41   : > { %1370 = vmatprep.mubr.bf16.mxu1 %v2326_v1  ;;  %2064 = vmatpush3.bf16.msra.mxu0 %v2352_v20  ;;  %v2408_v1 = vld [vmem:[%s2562_s13 + $0x1cc] ss:$36 sps:$4 sm:$0xff]  }
  0x42   : > { %2128 = vmatpush3.bf16.msra.mxu1 %v2353_v21  ;;  %2065 = vmatprep.subr.bf16.mxu0 %v2360_v26 }
  0x43   : > { %2129 = vmatprep.subr.bf16.mxu1 %v2361_v27 }
  0x45   : > { %2066 = vmatpush3.bf16.msra.mxu0 %v2362_v28 }
  0x46   : > { %2130 = vmatpush3.bf16.msra.mxu1 %v2363_v29  ;;  %2195 = vmatprep.subr.bf16.mxu0 %v2370_v32 }
  0x47   : > { %1274 = vmatmul.mubr.bf16.gmra.mrb[16].mxu0 %v2328_v2  ;;  %2227 = vmatprep.subr.bf16.mxu1 %v2370_v32  ;;  %v2410_v2 = vld [vmem:[%s2562_s13 + $0x1c0] ss:$36 sps:$4 sm:$0xff]  }
  0x48   : > { %1371 = vmatmul.mubr.bf16.gmra.mrb[16].mxu1 %v2329_v4  ;;  %1281 = vmatprep.mubr.bf16.mxu0 %v2334_v8  ;;  %v2413_v4 = vld [vmem:[%s2562_s13 + $0x20c] ss:$36 sps:$4 sm:$0xff]   ;;  %v2420_v8 = vld [vmem:[%s2562_s13 + $0x20] ss:$36 sps:$4 sm:$0xff]  }
  0x49   : > { %1378 = vmatprep.mubr.bf16.mxu1 %v2336_v9  ;;  %v2421_v9 = vld [vmem:[%s2562_s13 + $0x140] ss:$36 sps:$4 sm:$0xff]  }
  0x4f   : > { %1282 = vmatmul.mubr.bf16.gmra.mrb[20].mxu0 %v2338_v12  ;;  %v2424_v12 = vld [vmem:[%s2562_s13 + $0xb0] ss:$36 sps:$4 sm:$0xff]  }
  0x50   : > { %1379 = vmatmul.mubr.bf16.gmra.mrb[20].mxu1 %v2339_v15  ;;  %1289 = vmatprep.mubr.bf16.mxu0 %v2344_v16  ;;  %v2427_v15 = vld [vmem:[%s2562_s13 + $0x218] ss:$36 sps:$4 sm:$0xff]   ;;  %s1775_s13 = sshll.u32 %s2907_s19, 3 }
  0x51   : > { %1386 = vmatprep.mubr.bf16.mxu1 %v2346_v17  ;;  %s2855_s20 = scalar_lea.vmem %s2905_s3, %s1775_s13 }
  0x57   : > { %1290 = vmatmul.mubr.bf16.gmra.mrb[24].mxu0 %v2348_v22 }
  0x58   : > { %1387 = vmatmul.mubr.bf16.gmra.mrb[24].mxu1 %v2349_v23  ;;  %1297 = vmatprep.mubr.bf16.mxu0 %v2354_v24 }
  0x59   : > { %1394 = vmatprep.mubr.bf16.mxu1 %v2356_v25 }
  0x5f   : > { %1298 = vmatmul.mubr.bf16.gmra.mrb[28].mxu0 %v2358_v30 }
  0x60   : > { %1395 = vmatmul.mubr.bf16.gmra.mrb[28].mxu1 %v2359_v31  ;;  %1435 = vmatprep.mubr.bf16.mxu0 %v2366_v33 }
  0x61   : > { %1532 = vmatprep.mubr.bf16.mxu1 %v2369_v34 }
  0x67   : > { %1436 = vmatmul.mubr.bf16.vlgmr.msra.gmra.mrb[32].mxu0 %v2364_v35 }
  0x68   : > { %1533 = vmatmul.mubr.bf16.vlgmr.msra.gmra.mrb[32].mxu1 %v2367_v36  ;;  %2196 = vmatpush3.bf16.msra.mxu0 %v2370_v32 }
  0x69   : > { %2235 = vmatpush3.bf16.msra.mxu1 %v2370_v32  ;;  %1443 = vmatprep.mubr.bf16.mxu0 %v2371_v37 }
  0x6a   : > { %1540 = vmatprep.mubr.bf16.mxu1 %v2373_v38  ;;  %2197 = vmatprep.subr.bf16.mxu0 %v2377_v39 }
  0x6b   : > { %2228 = vmatprep.subr.bf16.mxu1 %v2377_v39 }
  0x6c   : > { %2198 = vmatpush3.bf16.msra.mxu0 %v2377_v39 }
  0x6d   : > { %2236 = vmatpush3.bf16.msra.mxu1 %v2377_v39  ;;  %2199 = vmatprep.subr.bf16.mxu0 %v2384_v40 }
  0x6e   : > { %2229 = vmatprep.subr.bf16.mxu1 %v2384_v40 }
  0x6f   : > { %1444 = vmatmul.mubr.bf16.gmra.mrb[36].mxu0 %v2375_v41 }
  0x70   : > { %1541 = vmatmul.mubr.bf16.gmra.mrb[36].mxu1 %v2376_v42  ;;  %1451 = vmatprep.mubr.bf16.mxu0 %v2378_v43 }
  0x71   : > { %1548 = vmatprep.mubr.bf16.mxu1 %v2380_v44  ;;  %2200 = vmatpush3.bf16.msra.mxu0 %v2384_v40 }
  0x72   : > { %2237 = vmatpush3.bf16.msra.mxu1 %v2384_v40  ;;  %2201 = vmatprep.subr.bf16.mxu0 %v2391_v45 }
  0x73   : > { %2230 = vmatprep.subr.bf16.mxu1 %v2391_v45 }
  0x75   : > { %2202 = vmatpush3.bf16.msra.mxu0 %v2391_v45 }
  0x76   : > { %2238 = vmatpush3.bf16.msra.mxu1 %v2391_v45  ;;  %2203 = vmatprep.subr.bf16.mxu0 %v2398_v46 }
  0x77   : > { %1452 = vmatmul.mubr.bf16.gmra.mrb[40].mxu0 %v2382_v47  ;;  %2231 = vmatprep.subr.bf16.mxu1 %v2398_v46 }
  0x78   : > { %1549 = vmatmul.mubr.bf16.gmra.mrb[40].mxu1 %v2383_v48  ;;  %1459 = vmatprep.mubr.bf16.mxu0 %v2385_v49 }
  0x79   : > { %1556 = vmatprep.mubr.bf16.mxu1 %v2387_v50  ;;  %2204 = vmatpush3.bf16.msra.mxu0 %v2398_v46 }
  0x7a   : > { %2239 = vmatpush3.bf16.msra.mxu1 %v2398_v46  ;;  %2205 = vmatprep.subr.bf16.mxu0 %v2405_v51 }
  0x7b   : > { %2232 = vmatprep.subr.bf16.mxu1 %v2405_v51 }
  0x7d   : > { %2206 = vmatpush3.bf16.msra.mxu0 %v2405_v51 }
  0x7e   : > { %2240 = vmatpush3.bf16.msra.mxu1 %v2405_v51  ;;  %2207 = vmatprep.subr.bf16.mxu0 %v2412_v53 }
  0x7f   : > { %1460 = vmatmul.mubr.bf16.gmra.mrb[44].mxu0 %v2389_v52  ;;  %2233 = vmatprep.subr.bf16.mxu1 %v2412_v53 }
  0x80   : > { %1557 = vmatmul.mubr.bf16.gmra.mrb[44].mxu1 %v2390_v54  ;;  %1467 = vmatprep.mubr.bf16.mxu0 %v2392_v55 }
  0x81   : > { %1564 = vmatprep.mubr.bf16.mxu1 %v2394_v56  ;;  %2208 = vmatpush3.bf16.msra.mxu0 %v2412_v53 }
  0x82   : > { %2241 = vmatpush3.bf16.msra.mxu1 %v2412_v53  ;;  %2209 = vmatprep.subr.bf16.mxu0 %v2419_v57 }
  0x83   : > { %2234 = vmatprep.subr.bf16.mxu1 %v2419_v57 }
  0x85   : > { %2210 = vmatpush3.bf16.msra.mxu0 %v2419_v57 }
  0x86   : > { %2242 = vmatpush3.bf16.msra.mxu1 %v2419_v57 }
  0x87   : > { %1468 = vmatmul.mubr.bf16.gmra.mrb[48].mxu0 %v2396_v58 }
  0x88   : > { %1565 = vmatmul.mubr.bf16.gmra.mrb[48].mxu1 %v2397_v59  ;;  %1475 = vmatprep.mubr.bf16.mxu0 %v2399_v60 }
  0x89   : > { %1572 = vmatprep.mubr.bf16.mxu1 %v2401_v61 }
  0x8f   : > { %1476 = vmatmul.mubr.bf16.gmra.mrb[52].mxu0 %v2403_v62 }
  0x90   : > { %1573 = vmatmul.mubr.bf16.gmra.mrb[52].mxu1 %v2404_v63  ;;  %1483 = vmatprep.mubr.bf16.mxu0 %v2406_v0 }
  0x91   : > { %1580 = vmatprep.mubr.bf16.mxu1 %v2408_v1 }
  0x97   : > { %1484 = vmatmul.mubr.bf16.gmra.mrb[56].mxu0 %v2410_v2 }
  0x98   : > { %1581 = vmatmul.mubr.bf16.gmra.mrb[56].mxu1 %v2411_v3  ;;  %1491 = vmatprep.mubr.bf16.mxu0 %v2413_v4 }
  0x99   : > { %1588 = vmatprep.mubr.bf16.mxu1 %v2415_v5 }
  0x9f   : > { %1492 = vmatmul.mubr.bf16.gmra.mrb[60].mxu0 %v2417_v6 }
  0xa0   : > { %1589 = vmatmul.mubr.bf16.gmra.mrb[60].mxu1 %v2418_v7  ;;  %2211 = vmatprep.mubr.bf16.mxu0 %v2420_v8 }
  0xa1   : > { %2219 = vmatprep.mubr.bf16.mxu1 %v2421_v9 }
  0xa7   : > { %2212 = vmatmul.mubr.bf16.vlgmr.msra.gmra.mrb[64].mxu0 %v2422_v10 }
  0xa8   : > { %2220 = vmatmul.mubr.bf16.vlgmr.msra.gmra.mrb[64].mxu1 %v2423_v11  ;;  %2215 = vmatprep.mubr.bf16.mxu0 %v2424_v12 }
  0xa9   : > { %2223 = vmatprep.mubr.bf16.mxu1 %v2425_v13 }
  0xaf   : > { %2216 = vmatmul.mubr.bf16.gmra.mrb[68].mxu0 %v2426_v14 }
  0xb0   : > { %2224 = vmatmul.mubr.bf16.gmra.mrb[68].mxu1 %v2427_v15 }
  0xfa   : > { %v1939_v16 = vpop.f32.mrb[0].mxu0 }
  0xfb   : > { %v2003_v17 = vpop.f32.mrb[0].mxu1  ;;  %v1940_v19 = vpop.f32.mrb[1].mxu0 }
  0xfc   : > { %v1941_v20 = vadd.f32 %v1940_v19, %v1939_v16  ;;  %v2004_v21 = vpop.f32.mrb[1].mxu1  ;;  %v1942_v22 = vpop.f32.mrb[2].mxu0 }
  0xfd   : > { %v2005_v23 = vadd.f32 %v2004_v21, %v2003_v17  ;;  %v2006_v24 = vpop.f32.mrb[2].mxu1  ;;  %v1943_v25 = vpop.f32.mrb[3].mxu0 }
  0xfe   : > { %v1244_v26 = vadd.f32 %v1941_v20, %v2765_v18  ;;  %v1944_v27 = vadd.f32 %v1943_v25, %v1942_v22  ;;  %v2007_v28 = vpop.f32.mrb[3].mxu1 }
  0xff   : > { %v2008_v29 = vadd.f32 %v2007_v28, %v2006_v24 }
 0x100   : > { %v2768_v30 = vadd.f32 %v2005_v23, %v1244_v26  ;;  %v1247_v31 = vadd.f32 %v1944_v27, %v2765_v18 }
 0x102   : > { %v2771_v32 = vadd.f32 %v2008_v29, %v1247_v31  ;;  %v1945_v33 = vpop.f32.mrb[4].mxu0 }
 0x103   : > { %v2009_v34 = vpop.f32.mrb[4].mxu1  ;;  %v1946_v35 = vpop.f32.mrb[5].mxu0 }
 0x104   : > { %v1947_v36 = vadd.f32 %v1946_v35, %v1945_v33  ;;  %v2010_v37 = vpop.f32.mrb[5].mxu1  ;;  %v1948_v38 = vpop.f32.mrb[6].mxu0 }
 0x105   : > { %v2011_v39 = vadd.f32 %v2010_v37, %v2009_v34  ;;  %v2012_v40 = vpop.f32.mrb[6].mxu1  ;;  %v1949_v41 = vpop.f32.mrb[7].mxu0 }
 0x106   : > { %v1252_v42 = vadd.f32 %v1947_v36, %v2765_v18  ;;  %v1950_v43 = vadd.f32 %v1949_v41, %v1948_v38  ;;  %v2013_v44 = vpop.f32.mrb[7].mxu1 }
 0x107   : > { %v2014_v45 = vadd.f32 %v2013_v44, %v2012_v40 }
 0x108   : > { %v2774_v46 = vadd.f32 %v2011_v39, %v1252_v42  ;;  %v1255_v47 = vadd.f32 %v1950_v43, %v2765_v18 }
 0x10a   : > { %v2777_v48 = vadd.f32 %v2014_v45, %v1255_v47  ;;  %v1951_v49 = vpop.f32.mrb[8].mxu0 }
 0x10b   : > { %v2015_v50 = vpop.f32.mrb[8].mxu1  ;;  %v1952_v51 = vpop.f32.mrb[9].mxu0 }
 0x10c   : > { %v1953_v52 = vadd.f32 %v1952_v51, %v1951_v49  ;;  %v2016_v53 = vpop.f32.mrb[9].mxu1  ;;  %v1954_v54 = vpop.f32.mrb[10].mxu0 }
 0x10d   : > { %v2017_v55 = vadd.f32 %v2016_v53, %v2015_v50  ;;  %v2018_v56 = vpop.f32.mrb[10].mxu1  ;;  %v1955_v57 = vpop.f32.mrb[11].mxu0 }
 0x10e   : > { %v1260_v58 = vadd.f32 %v1953_v52, %v2765_v18  ;;  %v1956_v59 = vadd.f32 %v1955_v57, %v1954_v54  ;;  %v2019_v60 = vpop.f32.mrb[11].mxu1 }
 0x10f   : > { %v2020_v61 = vadd.f32 %v2019_v60, %v2018_v56 }
 0x110   : > { %v2780_v62 = vadd.f32 %v2017_v55, %v1260_v58  ;;  %v1263_v63 = vadd.f32 %v1956_v59, %v2765_v18 }
 0x112   : > { %v2783_v0 = vadd.f32 %v2020_v61, %v1263_v63  ;;  %v1957_v1 = vpop.f32.mrb[12].mxu0 }
 0x113   : > { %v2021_v2 = vpop.f32.mrb[12].mxu1  ;;  %v1958_v3 = vpop.f32.mrb[13].mxu0 }
 0x114   : > { %v1959_v4 = vadd.f32 %v1958_v3, %v1957_v1  ;;  %v2022_v5 = vpop.f32.mrb[13].mxu1  ;;  %v1960_v6 = vpop.f32.mrb[14].mxu0 }
 0x115   : > { %v2023_v7 = vadd.f32 %v2022_v5, %v2021_v2  ;;  %v2024_v8 = vpop.f32.mrb[14].mxu1  ;;  %v1961_v9 = vpop.f32.mrb[15].mxu0 }
 0x116   : > { %v1268_v10 = vadd.f32 %v1959_v4, %v2765_v18  ;;  %v1962_v11 = vadd.f32 %v1961_v9, %v1960_v6  ;;  %v2025_v12 = vpop.f32.mrb[15].mxu1 }
 0x117   : > { %v2026_v13 = vadd.f32 %v2025_v12, %v2024_v8 }
 0x118   : > { %v2786_v14 = vadd.f32 %v2023_v7, %v1268_v10  ;;  %v1271_v15 = vadd.f32 %v1962_v11, %v2765_v18 }
 0x11a   : > { %v2789_v16 = vadd.f32 %v2026_v13, %v1271_v15  ;;  %v1963_v17 = vpop.f32.mrb[16].mxu0 }
 0x11b   : > { %v2027_v19 = vpop.f32.mrb[16].mxu1  ;;  %v1964_v20 = vpop.f32.mrb[17].mxu0 }
 0x11c   : > { %v1965_v21 = vadd.f32 %v1964_v20, %v1963_v17  ;;  %v2028_v22 = vpop.f32.mrb[17].mxu1  ;;  %v1966_v23 = vpop.f32.mrb[18].mxu0 }
 0x11d   : > { %v2029_v24 = vadd.f32 %v2028_v22, %v2027_v19  ;;  %v2030_v25 = vpop.f32.mrb[18].mxu1  ;;  %v1967_v26 = vpop.f32.mrb[19].mxu0 }
 0x11e   : > { %v1276_v27 = vadd.f32 %v1965_v21, %v2765_v18  ;;  %v1968_v28 = vadd.f32 %v1967_v26, %v1966_v23  ;;  %v2031_v29 = vpop.f32.mrb[19].mxu1 }
 0x11f   : > { %v2032_v31 = vadd.f32 %v2031_v29, %v2030_v25 }
 0x120   : > { %v2792_v33 = vadd.f32 %v2029_v24, %v1276_v27  ;;  %v1279_v34 = vadd.f32 %v1968_v28, %v2765_v18 }
 0x122   : > { %v2795_v35 = vadd.f32 %v2032_v31, %v1279_v34  ;;  %v1969_v36 = vpop.f32.mrb[20].mxu0 }
 0x123   : > { %v2033_v37 = vpop.f32.mrb[20].mxu1  ;;  %v1970_v38 = vpop.f32.mrb[21].mxu0 }
 0x124   : > { %v1971_v39 = vadd.f32 %v1970_v38, %v1969_v36  ;;  %v2034_v40 = vpop.f32.mrb[21].mxu1  ;;  %v1972_v41 = vpop.f32.mrb[22].mxu0 }
 0x125   : > { %v2035_v42 = vadd.f32 %v2034_v40, %v2033_v37  ;;  %v2036_v43 = vpop.f32.mrb[22].mxu1  ;;  %v1973_v44 = vpop.f32.mrb[23].mxu0 }
 0x126   : > { %v1284_v45 = vadd.f32 %v1971_v39, %v2765_v18  ;;  %v1974_v47 = vadd.f32 %v1973_v44, %v1972_v41  ;;  %v2037_v49 = vpop.f32.mrb[23].mxu1 }
 0x127   : > { %v2038_v50 = vadd.f32 %v2037_v49, %v2036_v43 }
 0x128   : > { %v2798_v51 = vadd.f32 %v2035_v42, %v1284_v45  ;;  %v1287_v52 = vadd.f32 %v1974_v47, %v2765_v18 }
 0x12a   : > { %v2801_v53 = vadd.f32 %v2038_v50, %v1287_v52  ;;  %v1975_v54 = vpop.f32.mrb[24].mxu0 }
 0x12b   : > { %v2039_v55 = vpop.f32.mrb[24].mxu1  ;;  %v1976_v56 = vpop.f32.mrb[25].mxu0 }
 0x12c   : > { %v1977_v57 = vadd.f32 %v1976_v56, %v1975_v54  ;;  %v2040_v58 = vpop.f32.mrb[25].mxu1  ;;  %v1978_v59 = vpop.f32.mrb[26].mxu0 }
 0x12d   : > { %v2041_v60 = vadd.f32 %v2040_v58, %v2039_v55  ;;  %v2042_v61 = vpop.f32.mrb[26].mxu1  ;;  %v1979_v63 = vpop.f32.mrb[27].mxu0 }
 0x12e   : > { %v1292_v1 = vadd.f32 %v1977_v57, %v2765_v18  ;;  %v1980_v2 = vadd.f32 %v1979_v63, %v1978_v59  ;;  %v2043_v3 = vpop.f32.mrb[27].mxu1 }
 0x12f   : > { %v2044_v4 = vadd.f32 %v2043_v3, %v2042_v61 }
 0x130   : > { %v2804_v5 = vadd.f32 %v2041_v60, %v1292_v1  ;;  %v1295_v6 = vadd.f32 %v1980_v2, %v2765_v18 }
 0x132   : > { %v2807_v7 = vadd.f32 %v2044_v4, %v1295_v6  ;;  %v1981_v8 = vpop.f32.mrb[28].mxu0 }
 0x133   : > { %v2045_v9 = vpop.f32.mrb[28].mxu1  ;;  %v1982_v10 = vpop.f32.mrb[29].mxu0 }
 0x134   : > { %v1983_v11 = vadd.f32 %v1982_v10, %v1981_v8  ;;  %v2046_v12 = vpop.f32.mrb[29].mxu1  ;;  %v1984_v13 = vpop.f32.mrb[30].mxu0 }
 0x135   : > { %v2047_v15 = vadd.f32 %v2046_v12, %v2045_v9  ;;  %v2048_v17 = vpop.f32.mrb[30].mxu1  ;;  %v1985_v19 = vpop.f32.mrb[31].mxu0 }
 0x136   : > { %v1300_v20 = vadd.f32 %v1983_v11, %v2765_v18  ;;  %v1986_v21 = vadd.f32 %v1985_v19, %v1984_v13  ;;  %v2049_v22 = vpop.f32.mrb[31].mxu1 }
 0x137   : > { %v2050_v23 = vadd.f32 %v2049_v22, %v2048_v17 }
 0x138   : > { %v2810_v24 = vadd.f32 %v2047_v15, %v1300_v20  ;;  %v1303_v25 = vadd.f32 %v1986_v21, %v2765_v18 }
 0x13a   : > { %v2813_v26 = vadd.f32 %v2050_v23, %v1303_v25  ;;  %v2067_v27 = vpop.f32.mrb[32].mxu0 }
 0x13b   : > { %v2131_v28 = vpop.f32.mrb[32].mxu1  ;;  %v2068_v29 = vpop.f32.mrb[33].mxu0 }
 0x13c   : > { %v2069_v31 = vadd.f32 %v2068_v29, %v2067_v27  ;;  %v2132_v34 = vpop.f32.mrb[33].mxu1  ;;  %v2070_v36 = vpop.f32.mrb[34].mxu0 }
 0x13d   : > { %v2133_v37 = vadd.f32 %v2132_v34, %v2131_v28  ;;  %v2134_v38 = vpop.f32.mrb[34].mxu1  ;;  %v2071_v39 = vpop.f32.mrb[35].mxu0 }
 0x13e   : > { %v1438_v40 = vadd.f32 %v2069_v31, %v2768_v30  ;;  %v2072_v41 = vadd.f32 %v2071_v39, %v2070_v36  ;;  %v2135_v42 = vpop.f32.mrb[35].mxu1 }
 0x13f   : > { %v2136_v43 = vadd.f32 %v2135_v42, %v2134_v38 }
 0x140   : > { %v1441_v44 = vadd.f32 %v2072_v41, %v2771_v32  ;;  %v2817_v45 = vadd.f32 %v2133_v37, %v1438_v40 }
 0x142   : > { %v2073_v18 = vpop.f32.mrb[36].mxu0  ;;  %v2819_v47 = vadd.f32 %v2136_v43, %v1441_v44 }
 0x143   : > { %v2137_v49 = vpop.f32.mrb[36].mxu1  ;;  %v2074_v50 = vpop.f32.mrb[37].mxu0 }
 0x144   : > { %v2075_v52 = vadd.f32 %v2074_v50, %v2073_v18  ;;  %v2138_v54 = vpop.f32.mrb[37].mxu1  ;;  %v2076_v55 = vpop.f32.mrb[38].mxu0 }
 0x145   : > { %v2139_v56 = vadd.f32 %v2138_v54, %v2137_v49  ;;  %v2140_v57 = vpop.f32.mrb[38].mxu1  ;;  %v2077_v58 = vpop.f32.mrb[39].mxu0 }
 0x146   : > { %v1446_v30 = vadd.f32 %v2075_v52, %v2774_v46  ;;  %v2078_v59 = vadd.f32 %v2077_v58, %v2076_v55  ;;  %v2141_v60 = vpop.f32.mrb[39].mxu1 }
 0x147   : > { %v2142_v61 = vadd.f32 %v2141_v60, %v2140_v57 }
 0x148   : > { %v1449_v32 = vadd.f32 %v2078_v59, %v2777_v48  ;;  %v2823_v63 = vadd.f32 %v2139_v56, %v1446_v30 }
 0x14a   : > { %v2079_v1 = vpop.f32.mrb[40].mxu0  ;;  %v2825_v2 = vadd.f32 %v2142_v61, %v1449_v32 }
 0x14b   : > { %v2143_v3 = vpop.f32.mrb[40].mxu1  ;;  %v2080_v4 = vpop.f32.mrb[41].mxu0 }
 0x14c   : > { %v2081_v6 = vadd.f32 %v2080_v4, %v2079_v1  ;;  %v2144_v8 = vpop.f32.mrb[41].mxu1  ;;  %v2082_v9 = vpop.f32.mrb[42].mxu0 }
 0x14d   : > { %v2145_v10 = vadd.f32 %v2144_v8, %v2143_v3  ;;  %v2146_v11 = vpop.f32.mrb[42].mxu1  ;;  %v2083_v12 = vpop.f32.mrb[43].mxu0 }
 0x14e   : > { %v1454_v46 = vadd.f32 %v2081_v6, %v2780_v62  ;;  %v2084_v13 = vadd.f32 %v2083_v12, %v2082_v9  ;;  %v2147_v15 = vpop.f32.mrb[43].mxu1 }
 0x14f   : > { %v2148_v17 = vadd.f32 %v2147_v15, %v2146_v11 }
 0x150   : > { %v1457_v48 = vadd.f32 %v2084_v13, %v2783_v0  ;;  %v2829_v19 = vadd.f32 %v2145_v10, %v1454_v46 }
 0x152   : > { %v2085_v20 = vpop.f32.mrb[44].mxu0  ;;  %v2831_v21 = vadd.f32 %v2148_v17, %v1457_v48 }
 0x153   : > { %v2149_v22 = vpop.f32.mrb[44].mxu1  ;;  %v2086_v23 = vpop.f32.mrb[45].mxu0 }
 0x154   : > { %v2087_v25 = vadd.f32 %v2086_v23, %v2085_v20  ;;  %v2150_v27 = vpop.f32.mrb[45].mxu1  ;;  %v2088_v28 = vpop.f32.mrb[46].mxu0 }
 0x155   : > { %v2151_v29 = vadd.f32 %v2150_v27, %v2149_v22  ;;  %v2152_v31 = vpop.f32.mrb[46].mxu1  ;;  %v2089_v34 = vpop.f32.mrb[47].mxu0 }
 0x156   : > { %v1462_v62 = vadd.f32 %v2087_v25, %v2786_v14  ;;  %v2090_v36 = vadd.f32 %v2089_v34, %v2088_v28  ;;  %v2153_v37 = vpop.f32.mrb[47].mxu1 }
 0x157   : > { %v2154_v38 = vadd.f32 %v2153_v37, %v2152_v31 }
 0x158   : > { %v1465_v0 = vadd.f32 %v2090_v36, %v2789_v16  ;;  %v2835_v39 = vadd.f32 %v2151_v29, %v1462_v62 }
 0x15a   : > { %v2091_v40 = vpop.f32.mrb[48].mxu0  ;;  %v2837_v41 = vadd.f32 %v2154_v38, %v1465_v0 }
 0x15b   : > { %v2155_v42 = vpop.f32.mrb[48].mxu1  ;;  %v2092_v43 = vpop.f32.mrb[49].mxu0 }
 0x15c   : > { %v2093_v44 = vadd.f32 %v2092_v43, %v2091_v40  ;;  %v2156_v18 = vpop.f32.mrb[49].mxu1  ;;  %v2094_v49 = vpop.f32.mrb[50].mxu0 }
 0x15d   : > { %v2157_v50 = vadd.f32 %v2156_v18, %v2155_v42  ;;  %v2158_v52 = vpop.f32.mrb[50].mxu1  ;;  %v2095_v54 = vpop.f32.mrb[51].mxu0 }
 0x15e   : > { %v1470_v14 = vadd.f32 %v2093_v44, %v2792_v33  ;;  %v2096_v55 = vadd.f32 %v2095_v54, %v2094_v49  ;;  %v2159_v56 = vpop.f32.mrb[51].mxu1 }
 0x15f   : > { %v2160_v57 = vadd.f32 %v2159_v56, %v2158_v52 }
 0x160   : > { %v1473_v16 = vadd.f32 %v2096_v55, %v2795_v35  ;;  %v1567_v58 = vadd.f32 %v2157_v50, %v1470_v14 }
 0x162   : > { %v2097_v30 = vpop.f32.mrb[52].mxu0  ;;  %v2841_v59 = vadd.f32 %v2160_v57, %v1473_v16 }
 0x163   : > { %v2161_v60 = vpop.f32.mrb[52].mxu1  ;;  %v2098_v61 = vpop.f32.mrb[53].mxu0 }
 0x164   : > { %v2099_v32 = vadd.f32 %v2098_v61, %v2097_v30  ;;  %v2162_v1 = vpop.f32.mrb[53].mxu1  ;;  %v2100_v3 = vpop.f32.mrb[54].mxu0 }
 0x165   : > { %v2163_v4 = vadd.f32 %v2162_v1, %v2161_v60  ;;  %v2164_v6 = vpop.f32.mrb[54].mxu1  ;;  %v2101_v8 = vpop.f32.mrb[55].mxu0 }
 0x166   : > { %v1478_v9 = vadd.f32 %v2099_v32, %v2798_v51  ;;  %v2102_v33 = vadd.f32 %v2101_v8, %v2100_v3  ;;  %v2165_v10 = vpop.f32.mrb[55].mxu1 }
 0x167   : > { %v2166_v11 = vadd.f32 %v2165_v10, %v2164_v6 }
 0x168   : > { %v1481_v12 = vadd.f32 %v2102_v33, %v2801_v53  ;;  %v1575_v35 = vadd.f32 %v2163_v4, %v1478_v9 }
 0x16a   : > { %v2103_v46 = vpop.f32.mrb[56].mxu0  ;;  %v1578_v13 = vadd.f32 %v2166_v11, %v1481_v12 }
 0x16b   : > { %v2167_v15 = vpop.f32.mrb[56].mxu1  ;;  %v2104_v17 = vpop.f32.mrb[57].mxu0 }
 0x16c   : > { %v2105_v48 = vadd.f32 %v2104_v17, %v2103_v46  ;;  %v2168_v20 = vpop.f32.mrb[57].mxu1  ;;  %v2106_v22 = vpop.f32.mrb[58].mxu0 }
 0x16d   : > { %v2169_v23 = vadd.f32 %v2168_v20, %v2167_v15  ;;  %v2170_v25 = vpop.f32.mrb[58].mxu1  ;;  %v2107_v27 = vpop.f32.mrb[59].mxu0 }
 0x16e   : > { %v1486_v28 = vadd.f32 %v2105_v48, %v2804_v5  ;;  %v2108_v29 = vadd.f32 %v2107_v27, %v2106_v22  ;;  %v2171_v51 = vpop.f32.mrb[59].mxu1 }
 0x16f   : > { %v2172_v31 = vadd.f32 %v2171_v51, %v2170_v25 }
 0x170   : > { %v1489_v34 = vadd.f32 %v2108_v29, %v2807_v7  ;;  %v1583_v53 = vadd.f32 %v2169_v23, %v1486_v28 }
 0x172   : > { %v2109_v62 = vpop.f32.mrb[60].mxu0  ;;  %v2847_v36 = vadd.f32 %v2172_v31, %v1489_v34 }
 0x173   : > { %v2173_v37 = vpop.f32.mrb[60].mxu1  ;;  %v2110_v38 = vpop.f32.mrb[61].mxu0 }
 0x174   : > { %v2111_v0 = vadd.f32 %v2110_v38, %v2109_v62  ;;  %v2174_v40 = vpop.f32.mrb[61].mxu1  ;;  %v2112_v42 = vpop.f32.mrb[62].mxu0 }
 0x175   : > { %v2175_v43 = vadd.f32 %v2174_v40, %v2173_v37  ;;  %v2176_v44 = vpop.f32.mrb[62].mxu1  ;;  %v2113_v18 = vpop.f32.mrb[63].mxu0 }
 0x176   : > { %v1494_v5 = vadd.f32 %v2111_v0, %v2810_v24  ;;  %v2114_v49 = vadd.f32 %v2113_v18, %v2112_v42  ;;  %v2177_v50 = vpop.f32.mrb[63].mxu1 }
 0x177   : > { %v2178_v52 = vadd.f32 %v2177_v50, %v2176_v44 }
 0x178   : > { %v1497_v7 = vadd.f32 %v2114_v49, %v2813_v26  ;;  %v1591_v54 = vadd.f32 %v2175_v43, %v1494_v5 }
 0x17a   : > { %v2213_v14 = vpop.f32.mrb[64].mxu0  ;;  %v1594_v55 = vadd.f32 %v2178_v52, %v1497_v7 }
 0x17b   : > { %v1640_v24 = vadd.f32 %v2213_v14, %v2823_v63  ;;  %v2221_v56 = vpop.f32.mrb[64].mxu1  ;;  %v1631_v57 = vpop.f32.mrb[65].mxu0 }
 0x17c   : > { %v1672_v16 = vadd.f32 %v2221_v56, %v1575_v35  ;;  %v1632_v26 = vadd.f32 %v1631_v57, %v2817_v45  ;;  %v1663_v30 = vpop.f32.mrb[65].mxu1  ;;  %v2214_v60 = vpop.f32.mrb[66].mxu0 }
 0x17d   : > { %1697 = vst.msk [vmem:[%s2855_s20 + $0x10] sm:$0xff] %vm1694_vm0, %v1640_v24  ;;  %v1664_v61 = vadd.f32 %v1663_v30, %v1567_v58  ;;  %v1643_v32 = vadd.f32 %v2214_v60, %v2825_v2  ;;  %v2222_v1 = vpop.f32.mrb[66].mxu1  ;;  %v1634_v3 = vpop.f32.mrb[67].mxu0 }
 0x17e   : > { %1705 = vst.msk [vmem:[%s2855_s20 + $0x50] sm:$0xff] %vm1694_vm0, %v1672_v16  ;;  %1695 = vst.msk [vmem:[%s2855_s20] sm:$0xff] %vm1694_vm0, %v1632_v26  ;;  %v1675_v63 = vadd.f32 %v2222_v1, %v1578_v13  ;;  %v1635_v4 = vadd.f32 %v1634_v3, %v2819_v47  ;;  %v1666_v45 = vpop.f32.mrb[67].mxu1 }
 0x17f   : > { %1703 = vst.msk [vmem:[%s2855_s20 + $0x40] sm:$0xff] %vm1694_vm0, %v1664_v61  ;;  %1698 = vst.msk [vmem:[%s2855_s20 + $0x18] sm:$0xff] %vm1694_vm0, %v1643_v32  ;;  %v1667_v6 = vadd.f32 %v1666_v45, %v2841_v59 }
 0x180   : > { %1706 = vst.msk [vmem:[%s2855_s20 + $0x58] sm:$0xff] %vm1694_vm0, %v1675_v63  ;;  %1696 = vst.msk [vmem:[%s2855_s20 + $0x8] sm:$0xff] %vm1694_vm0, %v1635_v4 }
 0x181   : > { %1704 = vst.msk [vmem:[%s2855_s20 + $0x48] sm:$0xff] %vm1694_vm0, %v1667_v6 }
 0x182   : > { %v2217_v2 = vpop.f32.mrb[68].mxu0 }
 0x183   : > { %v1656_v58 = vadd.f32 %v2217_v2, %v2835_v39  ;;  %v2225_v47 = vpop.f32.mrb[68].mxu1  ;;  %v1647_v8 = vpop.f32.mrb[69].mxu0 }
 0x184   : > { %v1688_v9 = vadd.f32 %v2225_v47, %v1591_v54  ;;  %v1648_v33 = vadd.f32 %v1647_v8, %v2829_v19  ;;  %v1679_v59 = vpop.f32.mrb[69].mxu1  ;;  %v2218_v10 = vpop.f32.mrb[70].mxu0 }
 0x185   : > { %1701 = vst.msk [vmem:[%s2855_s20 + $0x30] sm:$0xff] %vm1694_vm0, %v1656_v58  ;;  %v1680_v11 = vadd.f32 %v1679_v59, %v1583_v53  ;;  %v1659_v12 = vadd.f32 %v2218_v10, %v2837_v41  ;;  %v2226_v35 = vpop.f32.mrb[70].mxu1  ;;  %v1650_v46 = vpop.f32.mrb[71].mxu0 }
 0x186   : > { %1709 = vst.msk [vmem:[%s2855_s20 + $0x70] sm:$0xff] %vm1694_vm0, %v1688_v9  ;;  %1699 = vst.msk [vmem:[%s2855_s20 + $0x20] sm:$0xff] %vm1694_vm0, %v1648_v33  ;;  %v1691_v39 = vadd.f32 %v2226_v35, %v1594_v55  ;;  %v1651_v13 = vadd.f32 %v1650_v46, %v2831_v21  ;;  %v1682_v19 = vpop.f32.mrb[71].mxu1 }
 0x187   : > { %1707 = vst.msk [vmem:[%s2855_s20 + $0x60] sm:$0xff] %vm1694_vm0, %v1680_v11  ;;  %1702 = vst.msk [vmem:[%s2855_s20 + $0x38] sm:$0xff] %vm1694_vm0, %v1659_v12  ;;  %v1683_v15 = vadd.f32 %v1682_v19, %v2847_v36 }
 0x188   : > { %1710 = vst.msk [vmem:[%s2855_s20 + $0x78] sm:$0xff] %vm1694_vm0, %v1691_v39  ;;  %1700 = vst.msk [vmem:[%s2855_s20 + $0x28] sm:$0xff] %vm1694_vm0, %v1651_v13 }
 0x189   : > { %1708 = vst.msk [vmem:[%s2855_s20 + $0x68] sm:$0xff] %vm1694_vm0, %v1683_v15 }
 0x18a PF: > { %s13_s12 = sadd.s32 1, %s2434_s12  }
 0x18b   : > { %p10_p4 = scmp.ge.s32.totalorder %s13_s12, 7  }
 0x18d   :  { %12 = sbr.rel (!%p10_p4) target bundleno = 1 (0x1), region = 62 }

// kernel: retinanet_forward.55
= control target key start
LH: loop header
LB: loop body
LE: loop exit
PB: predicated region body
PF: predicated region fallthrough
CT: control target
= control target key end

     0   :  { %s2456_s12 = smov 0   ;;  %s2902_s0 = inlined_call_operand.vmem [shape: bf16[640,1152], index: 0, kind: input, shape index: {}]   ;;  %s2903_s1 = inlined_call_operand.vmem [shape: bf16[1152,4], index: 1, kind: input, shape index: {}]   ;;  %s2904_s2 = inlined_call_operand.vmem [shape: f32[1,4], index: 2, kind: input, shape index: {}]   ;;  %s2905_s3 = inlined_call_operand.vmem [shape: f32[640,4], index: 3, kind: output, shape index: {}]  }
   0x1 LB: > { %s1767_s13 = sadd.s32 4294967295, %s2434_s12   ;;  %p1771_p0 = scmp.ge.s32.totalorder %s2434_s12, 1  ;;  %s2434_s12 = sphi %s2456_s12, %s13_s12  }
   0x2   : > { %p139_p1 = scmp.lt.s32.totalorder %s2434_s12, 6 }
   0x4   : > { %p140_p2 = pnand %p1771_p0, %p139_p1 }
   0x5   : > { %v2252_v0 = vld [vmem:[%s2903_s1 + $0x40] sm:$0xff] (!%p140_p2)   ;;  %v2256_v4 = vld [vmem:[%s2903_s1 + $0x48] sm:$0xff] (!%p140_p2)   ;;  %v2260_v8 = vld [vmem:[%s2903_s1 + $0x50] sm:$0xff] (!%p140_p2)   ;;  %s1772_s19 = sshll.u32 (!%p140_p2), %s1767_s13, 4  ;;  %vm1694_vm0 = vcmask (!%p140_p2), 31744  }
   0x6   : > { %143 = sbr.rel (%p140_p2) target bundleno = 394 (0x18a), region = 32  ;;  %v2253_v1 = vld [vmem:[%s2903_s1 + $0xc0] sm:$0xff] (!%p140_p2)   ;;  %1923 = vmatprep.subr.bf16.mxu0 (!%p140_p2), %v2252_v0  ;;  %v2257_v5 = vld [vmem:[%s2903_s1 + $0xc8] sm:$0xff] (!%p140_p2)   ;;  %v2261_v9 = vld [vmem:[%s2903_s1 + $0xd0] sm:$0xff] (!%p140_p2)   ;;  %p165_p3 = scmp.lt.s32.totalorder (!%p140_p2), %s1772_s19, 79 }
   0x7   : > { %v2254_v2 = vld [vmem:[%s2903_s1] sm:$0xff] (!%p140_p2)   ;;  %1987 = vmatprep.subr.bf16.mxu1 (!%p140_p2), %v2253_v1  ;;  %v2258_v6 = vld [vmem:[%s2903_s1 + $0x8] sm:$0xff] (!%p140_p2)   ;;  %v2262_v10 = vld [vmem:[%s2903_s1 + $0x10] sm:$0xff] (!%p140_p2)  }
   0x8   : > { %v2255_v3 = vld [vmem:[%s2903_s1 + $0x80] sm:$0xff] (!%p140_p2)   ;;  %1924 = vmatpush3.bf16.msra.mxu0 (!%p140_p2), %v2254_v2  ;;  %v2259_v7 = vld [vmem:[%s2903_s1 + $0x88] sm:$0xff] (!%p140_p2)   ;;  %v2263_v11 = vld [vmem:[%s2903_s1 + $0x90] sm:$0xff] (!%p140_p2)  }
   0x9   : > { %1988 = vmatpush3.bf16.msra.mxu1 (!%p140_p2), %v2255_v3  ;;  %1925 = vmatprep.subr.bf16.mxu0 (!%p140_p2), %v2256_v4  ;;  %v2264_v12 = vld [vmem:[%s2903_s1 + $0x58] sm:$0xff] (!%p140_p2)   ;;  %v2268_v16 = vld [vmem:[%s2903_s1 + $0x60] sm:$0xff] (!%p140_p2)   ;;  %v2272_v20 = vld [vmem:[%s2903_s1 + $0x68] sm:$0xff] (!%p140_p2)  }
   0xa   : > { %1989 = vmatprep.subr.bf16.mxu1 (!%p140_p2), %v2257_v5  ;;  %v2265_v13 = vld [vmem:[%s2903_s1 + $0xd8] sm:$0xff] (!%p140_p2)   ;;  %v2269_v17 = vld [vmem:[%s2903_s1 + $0xe0] sm:$0xff] (!%p140_p2)   ;;  %v2273_v21 = vld [vmem:[%s2903_s1 + $0xe8] sm:$0xff] (!%p140_p2)  }
   0xb   : > { %v2266_v14 = vld [vmem:[%s2903_s1 + $0x18] sm:$0xff] (!%p140_p2)   ;;  %v2270_v18 = vld [vmem:[%s2903_s1 + $0x20] sm:$0xff] (!%p140_p2)   ;;  %v2274_v22 = vld [vmem:[%s2903_s1 + $0x28] sm:$0xff] (!%p140_p2)  }
   0xc   : > { %1926 = vmatpush3.bf16.msra.mxu0 (!%p140_p2), %v2258_v6  ;;  %v2267_v15 = vld [vmem:[%s2903_s1 + $0x98] sm:$0xff] (!%p140_p2)   ;;  %v2271_v19 = vld [vmem:[%s2903_s1 + $0xa0] sm:$0xff] (!%p140_p2)   ;;  %v2275_v23 = vld [vmem:[%s2903_s1 + $0xa8] sm:$0xff] (!%p140_p2)  }
   0xd   : > { %1990 = vmatpush3.bf16.msra.mxu1 %v2259_v7  ;;  %1927 = vmatprep.subr.bf16.mxu0 %v2260_v8  ;;  %s2907_s19 = smov (!%p165_p3, %s1772_s19), 79  ;;  %v2276_v24 = vld [vmem:[%s2903_s1 + $0x70] sm:$0xff]   ;;  %v2280_v28 = vld [vmem:[%s2903_s1 + $0x78] sm:$0xff]   ;;  %v2290_v36 = vld [vmem:[%s2903_s1 + $0x140] sm:$0xff]  }
   0xe   : > { %1991 = vmatprep.subr.bf16.mxu1 %v2261_v9  ;;  %v2277_v25 = vld [vmem:[%s2903_s1 + $0xf0] sm:$0xff]   ;;  %s2243_s16 = smul.u32 36, %s2907_s19  ;;  %v2281_v29 = vld [vmem:[%s2903_s1 + $0xf8] sm:$0xff]   ;;  %v2291_v37 = vld [vmem:[%s2903_s1 + $0x1c0] sm:$0xff]  }
   0xf   : > { %v2278_v26 = vld [vmem:[%s2903_s1 + $0x30] sm:$0xff]   ;;  %v2282_v30 = vld [vmem:[%s2903_s1 + $0x38] sm:$0xff]   ;;  %v2292_v38 = vld [vmem:[%s2903_s1 + $0x100] sm:$0xff]  }
  0x10   : > { %1928 = vmatpush3.bf16.msra.mxu0 %v2262_v10  ;;  %v2279_v27 = vld [vmem:[%s2903_s1 + $0xb0] sm:$0xff]   ;;  %s2562_s13 = scalar_lea.vmem %s2902_s0, %s2243_s16  ;;  %v2283_v31 = vld [vmem:[%s2903_s1 + $0xb8] sm:$0xff]   ;;  %v2293_v39 = vld [vmem:[%s2903_s1 + $0x180] sm:$0xff]  }
  0x11   : > { %1992 = vmatpush3.bf16.msra.mxu1 %v2263_v11  ;;  %1929 = vmatprep.subr.bf16.mxu0 %v2264_v12  ;;  %v2284_v32 = vld [vmem:[%s2562_s13] ss:$36 sps:$4 sm:$0xff]   ;;  %v2287_v34 = vld [vmem:[%s2562_s13 + $0x8] ss:$36 sps:$4 sm:$0xff]   ;;  %v2296_v41 = vld [vmem:[%s2562_s13 + $0x54] ss:$36 sps:$4 sm:$0xff]  }
  0x12   : > { %1993 = vmatprep.subr.bf16.mxu1 %v2265_v13  ;;  %v2286_v33 = vld [vmem:[%s2562_s13 + $0x4] ss:$36 sps:$4 sm:$0xff]   ;;  %v2289_v35 = vld [vmem:[%s2562_s13 + $0xc] ss:$36 sps:$4 sm:$0xff]   ;;  %v2304_v48 = vld [vmem:[%s2562_s13 + $0x94] ss:$36 sps:$4 sm:$0xff]  }
  0x13   : > { %1241 = vmatprep.mubr.bf16.mxu0 %v2286_v33  ;;  %1338 = vmatprep.mubr.bf16.mxu1 %v2289_v35  ;;  %v2294_v40 = vld [vmem:[%s2562_s13 + $0x4c] ss:$36 sps:$4 sm:$0xff]   ;;  %v2306_v49 = vld [vmem:[%s2562_s13 + $0x9c] ss:$36 sps:$4 sm:$0xff]   ;;  %v2316_v57 = vld [vmem:[%s2562_s13 + $0xe4] ss:$36 sps:$4 sm:$0xff]  }
  0x14   : > { %1930 = vmatpush3.bf16.msra.mxu0 %v2266_v14  ;;  %v2298_v42 = vld [vmem:[%s2562_s13 + $0x48] ss:$36 sps:$4 sm:$0xff]   ;;  %v2299_v43 = vld [vmem:[%s2562_s13 + $0x50] ss:$36 sps:$4 sm:$0xff]   ;;  %v2309_v51 = vld [vmem:[%s2562_s13 + $0x98] ss:$36 sps:$4 sm:$0xff]  }
  0x15   : > { %1994 = vmatpush3.bf16.msra.mxu1 %v2267_v15  ;;  %1931 = vmatprep.subr.bf16.mxu0 %v2268_v16  ;;  %v2300_v44 = vld [vmem:[%s2903_s1 + $0x148] sm:$0xff]   ;;  %v2308_v50 = vld [vmem:[%s2562_s13 + $0x90] ss:$36 sps:$4 sm:$0xff]   ;;  %v2314_v56 = vld [vmem:[%s2562_s13 + $0xdc] ss:$36 sps:$4 sm:$0xff]  }
  0x16   : > { %1995 = vmatprep.subr.bf16.mxu1 %v2269_v17  ;;  %v2301_v45 = vld [vmem:[%s2903_s1 + $0x1c8] sm:$0xff]   ;;  %v2310_v52 = vld [vmem:[%s2903_s1 + $0x150] sm:$0xff]   ;;  %v2318_v58 = vld [vmem:[%s2562_s13 + $0xd8] ss:$36 sps:$4 sm:$0xff]  }
  0x17   : > { %v2302_v46 = vld [vmem:[%s2903_s1 + $0x108] sm:$0xff]   ;;  %v2311_v53 = vld [vmem:[%s2903_s1 + $0x1d0] sm:$0xff]   ;;  %v2319_v59 = vld [vmem:[%s2562_s13 + $0xe0] ss:$36 sps:$4 sm:$0xff]  }
  0x18   : > { %1932 = vmatpush3.bf16.msra.mxu0 %v2270_v18  ;;  %v2303_v47 = vld [vmem:[%s2903_s1 + $0x188] sm:$0xff]   ;;  %v2312_v54 = vld [vmem:[%s2903_s1 + $0x110] sm:$0xff]   ;;  %v2320_v60 = vld [vmem:[%s2903_s1 + $0x158] sm:$0xff]  }
  0x19   : > { %1996 = vmatpush3.bf16.msra.mxu1 %v2271_v19  ;;  %1933 = vmatprep.subr.bf16.mxu0 %v2272_v20  ;;  %v2313_v55 = vld [vmem:[%s2903_s1 + $0x190] sm:$0xff]   ;;  %v2321_v61 = vld [vmem:[%s2903_s1 + $0x1d8] sm:$0xff]   ;;  %v2324_v0 = vld [vmem:[%s2562_s13 + $0x124] ss:$36 sps:$4 sm:$0xff]  }
  0x1a   : > { %1997 = vmatprep.subr.bf16.mxu1 %v2273_v21  ;;  %v2322_v62 = vld [vmem:[%s2903_s1 + $0x118] sm:$0xff]   ;;  %v2326_v1 = vld [vmem:[%s2562_s13 + $0x12c] ss:$36 sps:$4 sm:$0xff]   ;;  %v2328_v2 = vld [vmem:[%s2562_s13 + $0x120] ss:$36 sps:$4 sm:$0xff]  }
  0x1b   : > { %v2323_v63 = vld [vmem:[%s2903_s1 + $0x198] sm:$0xff]   ;;  %v2330_v3 = vld [vmem:[%s2903_s1 + $0x160] sm:$0xff]   ;;  %v2329_v4 = vld [vmem:[%s2562_s13 + $0x128] ss:$36 sps:$4 sm:$0xff]  }
  0x1c   : > { %1934 = vmatpush3.bf16.msra.mxu0 %v2274_v22  ;;  %v2331_v5 = vld [vmem:[%s2903_s1 + $0x1e0] sm:$0xff]   ;;  %v2334_v8 = vld [vmem:[%s2562_s13 + $0x16c] ss:$36 sps:$4 sm:$0xff]   ;;  %v2336_v9 = vld [vmem:[%s2562_s13 + $0x174] ss:$36 sps:$4 sm:$0xff]  }
  0x1d   : > { %1998 = vmatpush3.bf16.msra.mxu1 %v2275_v23  ;;  %1935 = vmatprep.subr.bf16.mxu0 %v2276_v24  ;;  %v2332_v6 = vld [vmem:[%s2903_s1 + $0x120] sm:$0xff]   ;;  %v2340_v10 = vld [vmem:[%s2903_s1 + $0x168] sm:$0xff]   ;;  %v2339_v15 = vld [vmem:[%s2562_s13 + $0x170] ss:$36 sps:$4 sm:$0xff]  }
  0x1e   : > { %1999 = vmatprep.subr.bf16.mxu1 %v2277_v25  ;;  %v2333_v7 = vld [vmem:[%s2903_s1 + $0x1a0] sm:$0xff]   ;;  %v2341_v11 = vld [vmem:[%s2903_s1 + $0x1e8] sm:$0xff]   ;;  %v2344_v16 = vld [vmem:[%s2562_s13 + $0x1b4] ss:$36 sps:$4 sm:$0xff]  }
  0x1f   : > { %v2338_v12 = vld [vmem:[%s2562_s13 + $0x168] ss:$36 sps:$4 sm:$0xff]   ;;  %v2346_v17 = vld [vmem:[%s2562_s13 + $0x1bc] ss:$36 sps:$4 sm:$0xff]   ;;  %v2350_v18 = vld [vmem:[%s2903_s1 + $0x170] sm:$0xff]  }
  0x20   : > { %1936 = vmatpush3.bf16.msra.mxu0 %v2278_v26  ;;  %v2342_v13 = vld [vmem:[%s2903_s1 + $0x128] sm:$0xff]   ;;  %v2351_v19 = vld [vmem:[%s2903_s1 + $0x1f0] sm:$0xff]   ;;  %v2349_v23 = vld [vmem:[%s2562_s13 + $0x1b8] ss:$36 sps:$4 sm:$0xff]  }
  0x21   : > { %2000 = vmatpush3.bf16.msra.mxu1 %v2279_v27  ;;  %1937 = vmatprep.subr.bf16.mxu0 %v2280_v28  ;;  %v2343_v14 = vld [vmem:[%s2903_s1 + $0x1a8] sm:$0xff]   ;;  %v2352_v20 = vld [vmem:[%s2903_s1 + $0x130] sm:$0xff]   ;;  %v2354_v24 = vld [vmem:[%s2562_s13 + $0x1fc] ss:$36 sps:$4 sm:$0xff]  }
  0x22   : > { %2001 = vmatprep.subr.bf16.mxu1 %v2281_v29  ;;  %v2353_v21 = vld [vmem:[%s2903_s1 + $0x1b0] sm:$0xff]   ;;  %v2356_v25 = vld [vmem:[%s2562_s13 + $0x204] ss:$36 sps:$4 sm:$0xff]   ;;  %v2360_v26 = vld [vmem:[%s2903_s1 + $0x178] sm:$0xff]  }
  0x23   : > { %v2348_v22 = vld [vmem:[%s2562_s13 + $0x1b0] ss:$36 sps:$4 sm:$0xff]   ;;  %v2361_v27 = vld [vmem:[%s2903_s1 + $0x1f8] sm:$0xff]  }
  0x24   : > { %1938 = vmatpush3.bf16.msra.mxu0 %v2282_v30  ;;  %v2362_v28 = vld [vmem:[%s2903_s1 + $0x138] sm:$0xff]   ;;  %v2364_v35 = vld [vmem:[%s2562_s13 + $0x10] ss:$36 sps:$4 sm:$0xff]  }
  0x25   : > { %2002 = vmatpush3.bf16.msra.mxu1 %v2283_v31  ;;  %2051 = vmatprep.subr.bf16.mxu0 %v2290_v36  ;;  %v2363_v29 = vld [vmem:[%s2903_s1 + $0x1b8] sm:$0xff]   ;;  %v2359_v31 = vld [vmem:[%s2562_s13 + $0x200] ss:$36 sps:$4 sm:$0xff]  }
  0x26   : > { %2115 = vmatprep.subr.bf16.mxu1 %v2291_v37  ;;  %v2358_v30 = vld [vmem:[%s2562_s13 + $0x1f8] ss:$36 sps:$4 sm:$0xff]  }
  0x27   : > { %1242 = vmatmul.mubr.bf16.vlgmr.msra.gmra.mrb[0].mxu0 %v2284_v32  ;;  %v2370_v32 = vld [vmem:[%s2903_s1 + $0x200] sm:$0xff]   ;;  %v2366_v33 = vld [vmem:[%s2562_s13 + $0x14] ss:$36 sps:$4 sm:$0xff]  }
  0x28   : > { %1339 = vmatmul.mubr.bf16.vlgmr.msra.gmra.mrb[0].mxu1 %v2287_v34  ;;  %2052 = vmatpush3.bf16.msra.mxu0 %v2292_v38  ;;  %v2369_v34 = vld [vmem:[%s2562_s13 + $0x1c] ss:$36 sps:$4 sm:$0xff]   ;;  %v2373_v38 = vld [vmem:[%s2562_s13 + $0x64] ss:$36 sps:$4 sm:$0xff]  }
  0x29   : > { %2116 = vmatpush3.bf16.msra.mxu1 %v2293_v39  ;;  %1249 = vmatprep.mubr.bf16.mxu0 %v2294_v40  ;;  %v2367_v36 = vld [vmem:[%s2562_s13 + $0x18] ss:$36 sps:$4 sm:$0xff]   ;;  %v2377_v39 = vld [vmem:[%s2903_s1 + $0x208] sm:$0xff]   ;;  %v2384_v40 = vld [vmem:[%s2903_s1 + $0x210] sm:$0xff]  }
  0x2a   : > { %1346 = vmatprep.mubr.bf16.mxu1 %v2296_v41  ;;  %2053 = vmatprep.subr.bf16.mxu0 %v2300_v44  ;;  %v2371_v37 = vld [vmem:[%s2562_s13 + $0x5c] ss:$36 sps:$4 sm:$0xff]   ;;  %v2380_v44 = vld [vmem:[%s2562_s13 + $0xac] ss:$36 sps:$4 sm:$0xff]  }
  0x2b   : > { %2117 = vmatprep.subr.bf16.mxu1 %v2301_v45  ;;  %v2375_v41 = vld [vmem:[%s2562_s13 + $0x58] ss:$36 sps:$4 sm:$0xff]  }
  0x2c   : > { %2054 = vmatpush3.bf16.msra.mxu0 %v2302_v46  ;;  %v2391_v45 = vld [vmem:[%s2903_s1 + $0x218] sm:$0xff]   ;;  %v2398_v46 = vld [vmem:[%s2903_s1 + $0x220] sm:$0xff]  }
  0x2d   : > { %2118 = vmatpush3.bf16.msra.mxu1 %v2303_v47  ;;  %2055 = vmatprep.subr.bf16.mxu0 %v2310_v52  ;;  %v2382_v47 = vld [vmem:[%s2562_s13 + $0xa0] ss:$36 sps:$4 sm:$0xff]   ;;  %v2389_v52 = vld [vmem:[%s2562_s13 + $0xe8] ss:$36 sps:$4 sm:$0xff]  }
  0x2e   : > { %2119 = vmatprep.subr.bf16.mxu1 %v2311_v53  ;;  %v2412_v53 = vld [vmem:[%s2903_s1 + $0x230] sm:$0xff]  }
  0x2f   : > { %1250 = vmatmul.mubr.bf16.gmra.mrb[4].mxu0 %v2298_v42  ;;  %v2376_v42 = vld [vmem:[%s2562_s13 + $0x60] ss:$36 sps:$4 sm:$0xff]  }
  0x30   : > { %1347 = vmatmul.mubr.bf16.gmra.mrb[4].mxu1 %v2299_v43  ;;  %1257 = vmatprep.mubr.bf16.mxu0 %v2304_v48  ;;  %v2378_v43 = vld [vmem:[%s2562_s13 + $0xa4] ss:$36 sps:$4 sm:$0xff]  }
  0x31   : > { %1354 = vmatprep.mubr.bf16.mxu1 %v2306_v49  ;;  %2056 = vmatpush3.bf16.msra.mxu0 %v2312_v54  ;;  %v2383_v48 = vld [vmem:[%s2562_s13 + $0xa8] ss:$36 sps:$4 sm:$0xff]   ;;  %v2390_v54 = vld [vmem:[%s2562_s13 + $0xf0] ss:$36 sps:$4 sm:$0xff]  }
  0x32   : > { %2120 = vmatpush3.bf16.msra.mxu1 %v2313_v55  ;;  %2057 = vmatprep.subr.bf16.mxu0 %v2320_v60  ;;  %v2385_v49 = vld [vmem:[%s2562_s13 + $0xec] ss:$36 sps:$4 sm:$0xff]   ;;  %v2392_v55 = vld [vmem:[%s2562_s13 + $0x134] ss:$36 sps:$4 sm:$0xff]   ;;  %v2399_v60 = vld [vmem:[%s2562_s13 + $0x17c] ss:$36 sps:$4 sm:$0xff]  }
  0x33   : > { %2121 = vmatprep.subr.bf16.mxu1 %v2321_v61  ;;  %v2401_v61 = vld [vmem:[%s2562_s13 + $0x184] ss:$36 sps:$4 sm:$0xff]  }
  0x35   : > { %2058 = vmatpush3.bf16.msra.mxu0 %v2322_v62  ;;  %v2403_v62 = vld [vmem:[%s2562_s13 + $0x178] ss:$36 sps:$4 sm:$0xff]  }
  0x36   : > { %2122 = vmatpush3.bf16.msra.mxu1 %v2323_v63  ;;  %2059 = vmatprep.subr.bf16.mxu0 %v2330_v3  ;;  %v2404_v63 = vld [vmem:[%s2562_s13 + $0x180] ss:$36 sps:$4 sm:$0xff]   ;;  %v2411_v3 = vld [vmem:[%s2562_s13 + $0x1c8] ss:$36 sps:$4 sm:$0xff]  }
  0x37   : > { %1258 = vmatmul.mubr.bf16.gmra.mrb[8].mxu0 %v2308_v50  ;;  %2123 = vmatprep.subr.bf16.mxu1 %v2331_v5  ;;  %v2387_v50 = vld [vmem:[%s2562_s13 + $0xf4] ss:$36 sps:$4 sm:$0xff]  }
  0x38   : > { %1355 = vmatmul.mubr.bf16.gmra.mrb[8].mxu1 %v2309_v51  ;;  %1265 = vmatprep.mubr.bf16.mxu0 %v2314_v56  ;;  %v2405_v51 = vld [vmem:[%s2903_s1 + $0x228] sm:$0xff]   ;;  %v2394_v56 = vld [vmem:[%s2562_s13 + $0x13c] ss:$36 sps:$4 sm:$0xff]   ;;  %v2415_v5 = vld [vmem:[%s2562_s13 + $0x214] ss:$36 sps:$4 sm:$0xff]  }
  0x39   : > { %1362 = vmatprep.mubr.bf16.mxu1 %v2316_v57  ;;  %2060 = vmatpush3.bf16.msra.mxu0 %v2332_v6  ;;  %v2419_v57 = vld [vmem:[%s2903_s1 + $0x238] sm:$0xff]   ;;  %v2417_v6 = vld [vmem:[%s2562_s13 + $0x208] ss:$36 sps:$4 sm:$0xff]  }
  0x3a   : > { %2124 = vmatpush3.bf16.msra.mxu1 %v2333_v7  ;;  %2061 = vmatprep.subr.bf16.mxu0 %v2340_v10  ;;  %v2418_v7 = vld [vmem:[%s2562_s13 + $0x210] ss:$36 sps:$4 sm:$0xff]   ;;  %v2422_v10 = vld [vmem:[%s2562_s13 + $0x68] ss:$36 sps:$4 sm:$0xff]  }
  0x3b   : > { %2125 = vmatprep.subr.bf16.mxu1 %v2341_v11  ;;  %v2423_v11 = vld [vmem:[%s2562_s13 + $0x188] ss:$36 sps:$4 sm:$0xff]  }
  0x3d   : > { %2062 = vmatpush3.bf16.msra.mxu0 %v2342_v13  ;;  %v2425_v13 = vld [vmem:[%s2562_s13 + $0x1d0] ss:$36 sps:$4 sm:$0xff]  }
  0x3e   : > { %2126 = vmatpush3.bf16.msra.mxu1 %v2343_v14  ;;  %2063 = vmatprep.subr.bf16.mxu0 %v2350_v18  ;;  %v2426_v14 = vld [vmem:[%s2562_s13 + $0xf8] ss:$36 sps:$4 sm:$0xff]   ;;  %v2765_v18 = vld [vmem:[%s2904_s2] ss:$0 sm:$0xff] }
  0x3f   : > { %1266 = vmatmul.mubr.bf16.gmra.mrb[12].mxu0 %v2318_v58  ;;  %2127 = vmatprep.subr.bf16.mxu1 %v2351_v19  ;;  %v2396_v58 = vld [vmem:[%s2562_s13 + $0x130] ss:$36 sps:$4 sm:$0xff]  }
  0x40   : > { %1363 = vmatmul.mubr.bf16.gmra.mrb[12].mxu1 %v2319_v59  ;;  %1273 = vmatprep.mubr.bf16.mxu0 %v2324_v0  ;;  %v2397_v59 = vld [vmem:[%s2562_s13 + $0x138] ss:$36 sps:$4 sm:$0xff]   ;;  %v2406_v0 = vld [vmem:[%s2562_s13 + $0x1c4] ss:$36 sps:$4 sm:$0xff]  }
  0x41   : > { %1370 = vmatprep.mubr.bf16.mxu1 %v2326_v1  ;;  %2064 = vmatpush3.bf16.msra.mxu0 %v2352_v20  ;;  %v2408_v1 = vld [vmem:[%s2562_s13 + $0x1cc] ss:$36 sps:$4 sm:$0xff]  }
  0x42   : > { %2128 = vmatpush3.bf16.msra.mxu1 %v2353_v21  ;;  %2065 = vmatprep.subr.bf16.mxu0 %v2360_v26 }
  0x43   : > { %2129 = vmatprep.subr.bf16.mxu1 %v2361_v27 }
  0x45   : > { %2066 = vmatpush3.bf16.msra.mxu0 %v2362_v28 }
  0x46   : > { %2130 = vmatpush3.bf16.msra.mxu1 %v2363_v29  ;;  %2195 = vmatprep.subr.bf16.mxu0 %v2370_v32 }
  0x47   : > { %1274 = vmatmul.mubr.bf16.gmra.mrb[16].mxu0 %v2328_v2  ;;  %2227 = vmatprep.subr.bf16.mxu1 %v2370_v32  ;;  %v2410_v2 = vld [vmem:[%s2562_s13 + $0x1c0] ss:$36 sps:$4 sm:$0xff]  }
  0x48   : > { %1371 = vmatmul.mubr.bf16.gmra.mrb[16].mxu1 %v2329_v4  ;;  %1281 = vmatprep.mubr.bf16.mxu0 %v2334_v8  ;;  %v2413_v4 = vld [vmem:[%s2562_s13 + $0x20c] ss:$36 sps:$4 sm:$0xff]   ;;  %v2420_v8 = vld [vmem:[%s2562_s13 + $0x20] ss:$36 sps:$4 sm:$0xff]  }
  0x49   : > { %1378 = vmatprep.mubr.bf16.mxu1 %v2336_v9  ;;  %v2421_v9 = vld [vmem:[%s2562_s13 + $0x140] ss:$36 sps:$4 sm:$0xff]  }
  0x4f   : > { %1282 = vmatmul.mubr.bf16.gmra.mrb[20].mxu0 %v2338_v12  ;;  %v2424_v12 = vld [vmem:[%s2562_s13 + $0xb0] ss:$36 sps:$4 sm:$0xff]  }
  0x50   : > { %1379 = vmatmul.mubr.bf16.gmra.mrb[20].mxu1 %v2339_v15  ;;  %1289 = vmatprep.mubr.bf16.mxu0 %v2344_v16  ;;  %v2427_v15 = vld [vmem:[%s2562_s13 + $0x218] ss:$36 sps:$4 sm:$0xff]   ;;  %s1775_s13 = sshll.u32 %s2907_s19, 3 }
  0x51   : > { %1386 = vmatprep.mubr.bf16.mxu1 %v2346_v17  ;;  %s2855_s20 = scalar_lea.vmem %s2905_s3, %s1775_s13 }
  0x57   : > { %1290 = vmatmul.mubr.bf16.gmra.mrb[24].mxu0 %v2348_v22 }
  0x58   : > { %1387 = vmatmul.mubr.bf16.gmra.mrb[24].mxu1 %v2349_v23  ;;  %1297 = vmatprep.mubr.bf16.mxu0 %v2354_v24 }
  0x59   : > { %1394 = vmatprep.mubr.bf16.mxu1 %v2356_v25 }
  0x5f   : > { %1298 = vmatmul.mubr.bf16.gmra.mrb[28].mxu0 %v2358_v30 }
  0x60   : > { %1395 = vmatmul.mubr.bf16.gmra.mrb[28].mxu1 %v2359_v31  ;;  %1435 = vmatprep.mubr.bf16.mxu0 %v2366_v33 }
  0x61   : > { %1532 = vmatprep.mubr.bf16.mxu1 %v2369_v34 }
  0x67   : > { %1436 = vmatmul.mubr.bf16.vlgmr.msra.gmra.mrb[32].mxu0 %v2364_v35 }
  0x68   : > { %1533 = vmatmul.mubr.bf16.vlgmr.msra.gmra.mrb[32].mxu1 %v2367_v36  ;;  %2196 = vmatpush3.bf16.msra.mxu0 %v2370_v32 }
  0x69   : > { %2235 = vmatpush3.bf16.msra.mxu1 %v2370_v32  ;;  %1443 = vmatprep.mubr.bf16.mxu0 %v2371_v37 }
  0x6a   : > { %1540 = vmatprep.mubr.bf16.mxu1 %v2373_v38  ;;  %2197 = vmatprep.subr.bf16.mxu0 %v2377_v39 }
  0x6b   : > { %2228 = vmatprep.subr.bf16.mxu1 %v2377_v39 }
  0x6c   : > { %2198 = vmatpush3.bf16.msra.mxu0 %v2377_v39 }
  0x6d   : > { %2236 = vmatpush3.bf16.msra.mxu1 %v2377_v39  ;;  %2199 = vmatprep.subr.bf16.mxu0 %v2384_v40 }
  0x6e   : > { %2229 = vmatprep.subr.bf16.mxu1 %v2384_v40 }
  0x6f   : > { %1444 = vmatmul.mubr.bf16.gmra.mrb[36].mxu0 %v2375_v41 }
  0x70   : > { %1541 = vmatmul.mubr.bf16.gmra.mrb[36].mxu1 %v2376_v42  ;;  %1451 = vmatprep.mubr.bf16.mxu0 %v2378_v43 }
  0x71   : > { %1548 = vmatprep.mubr.bf16.mxu1 %v2380_v44  ;;  %2200 = vmatpush3.bf16.msra.mxu0 %v2384_v40 }
  0x72   : > { %2237 = vmatpush3.bf16.msra.mxu1 %v2384_v40  ;;  %2201 = vmatprep.subr.bf16.mxu0 %v2391_v45 }
  0x73   : > { %2230 = vmatprep.subr.bf16.mxu1 %v2391_v45 }
  0x75   : > { %2202 = vmatpush3.bf16.msra.mxu0 %v2391_v45 }
  0x76   : > { %2238 = vmatpush3.bf16.msra.mxu1 %v2391_v45  ;;  %2203 = vmatprep.subr.bf16.mxu0 %v2398_v46 }
  0x77   : > { %1452 = vmatmul.mubr.bf16.gmra.mrb[40].mxu0 %v2382_v47  ;;  %2231 = vmatprep.subr.bf16.mxu1 %v2398_v46 }
  0x78   : > { %1549 = vmatmul.mubr.bf16.gmra.mrb[40].mxu1 %v2383_v48  ;;  %1459 = vmatprep.mubr.bf16.mxu0 %v2385_v49 }
  0x79   : > { %1556 = vmatprep.mubr.bf16.mxu1 %v2387_v50  ;;  %2204 = vmatpush3.bf16.msra.mxu0 %v2398_v46 }
  0x7a   : > { %2239 = vmatpush3.bf16.msra.mxu1 %v2398_v46  ;;  %2205 = vmatprep.subr.bf16.mxu0 %v2405_v51 }
  0x7b   : > { %2232 = vmatprep.subr.bf16.mxu1 %v2405_v51 }
  0x7d   : > { %2206 = vmatpush3.bf16.msra.mxu0 %v2405_v51 }
  0x7e   : > { %2240 = vmatpush3.bf16.msra.mxu1 %v2405_v51  ;;  %2207 = vmatprep.subr.bf16.mxu0 %v2412_v53 }
  0x7f   : > { %1460 = vmatmul.mubr.bf16.gmra.mrb[44].mxu0 %v2389_v52  ;;  %2233 = vmatprep.subr.bf16.mxu1 %v2412_v53 }
  0x80   : > { %1557 = vmatmul.mubr.bf16.gmra.mrb[44].mxu1 %v2390_v54  ;;  %1467 = vmatprep.mubr.bf16.mxu0 %v2392_v55 }
  0x81   : > { %1564 = vmatprep.mubr.bf16.mxu1 %v2394_v56  ;;  %2208 = vmatpush3.bf16.msra.mxu0 %v2412_v53 }
  0x82   : > { %2241 = vmatpush3.bf16.msra.mxu1 %v2412_v53  ;;  %2209 = vmatprep.subr.bf16.mxu0 %v2419_v57 }
  0x83   : > { %2234 = vmatprep.subr.bf16.mxu1 %v2419_v57 }
  0x85   : > { %2210 = vmatpush3.bf16.msra.mxu0 %v2419_v57 }
  0x86   : > { %2242 = vmatpush3.bf16.msra.mxu1 %v2419_v57 }
  0x87   : > { %1468 = vmatmul.mubr.bf16.gmra.mrb[48].mxu0 %v2396_v58 }
  0x88   : > { %1565 = vmatmul.mubr.bf16.gmra.mrb[48].mxu1 %v2397_v59  ;;  %1475 = vmatprep.mubr.bf16.mxu0 %v2399_v60 }
  0x89   : > { %1572 = vmatprep.mubr.bf16.mxu1 %v2401_v61 }
  0x8f   : > { %1476 = vmatmul.mubr.bf16.gmra.mrb[52].mxu0 %v2403_v62 }
  0x90   : > { %1573 = vmatmul.mubr.bf16.gmra.mrb[52].mxu1 %v2404_v63  ;;  %1483 = vmatprep.mubr.bf16.mxu0 %v2406_v0 }
  0x91   : > { %1580 = vmatprep.mubr.bf16.mxu1 %v2408_v1 }
  0x97   : > { %1484 = vmatmul.mubr.bf16.gmra.mrb[56].mxu0 %v2410_v2 }
  0x98   : > { %1581 = vmatmul.mubr.bf16.gmra.mrb[56].mxu1 %v2411_v3  ;;  %1491 = vmatprep.mubr.bf16.mxu0 %v2413_v4 }
  0x99   : > { %1588 = vmatprep.mubr.bf16.mxu1 %v2415_v5 }
  0x9f   : > { %1492 = vmatmul.mubr.bf16.gmra.mrb[60].mxu0 %v2417_v6 }
  0xa0   : > { %1589 = vmatmul.mubr.bf16.gmra.mrb[60].mxu1 %v2418_v7  ;;  %2211 = vmatprep.mubr.bf16.mxu0 %v2420_v8 }
  0xa1   : > { %2219 = vmatprep.mubr.bf16.mxu1 %v2421_v9 }
  0xa7   : > { %2212 = vmatmul.mubr.bf16.vlgmr.msra.gmra.mrb[64].mxu0 %v2422_v10 }
  0xa8   : > { %2220 = vmatmul.mubr.bf16.vlgmr.msra.gmra.mrb[64].mxu1 %v2423_v11  ;;  %2215 = vmatprep.mubr.bf16.mxu0 %v2424_v12 }
  0xa9   : > { %2223 = vmatprep.mubr.bf16.mxu1 %v2425_v13 }
  0xaf   : > { %2216 = vmatmul.mubr.bf16.gmra.mrb[68].mxu0 %v2426_v14 }
  0xb0   : > { %2224 = vmatmul.mubr.bf16.gmra.mrb[68].mxu1 %v2427_v15 }
  0xfa   : > { %v1939_v16 = vpop.f32.mrb[0].mxu0 }
  0xfb   : > { %v2003_v17 = vpop.f32.mrb[0].mxu1  ;;  %v1940_v19 = vpop.f32.mrb[1].mxu0 }
  0xfc   : > { %v1941_v20 = vadd.f32 %v1940_v19, %v1939_v16  ;;  %v2004_v21 = vpop.f32.mrb[1].mxu1  ;;  %v1942_v22 = vpop.f32.mrb[2].mxu0 }
  0xfd   : > { %v2005_v23 = vadd.f32 %v2004_v21, %v2003_v17  ;;  %v2006_v24 = vpop.f32.mrb[2].mxu1  ;;  %v1943_v25 = vpop.f32.mrb[3].mxu0 }
  0xfe   : > { %v1244_v26 = vadd.f32 %v1941_v20, %v2765_v18  ;;  %v1944_v27 = vadd.f32 %v1943_v25, %v1942_v22  ;;  %v2007_v28 = vpop.f32.mrb[3].mxu1 }
  0xff   : > { %v2008_v29 = vadd.f32 %v2007_v28, %v2006_v24 }
 0x100   : > { %v2768_v30 = vadd.f32 %v2005_v23, %v1244_v26  ;;  %v1247_v31 = vadd.f32 %v1944_v27, %v2765_v18 }
 0x102   : > { %v2771_v32 = vadd.f32 %v2008_v29, %v1247_v31  ;;  %v1945_v33 = vpop.f32.mrb[4].mxu0 }
 0x103   : > { %v2009_v34 = vpop.f32.mrb[4].mxu1  ;;  %v1946_v35 = vpop.f32.mrb[5].mxu0 }
 0x104   : > { %v1947_v36 = vadd.f32 %v1946_v35, %v1945_v33  ;;  %v2010_v37 = vpop.f32.mrb[5].mxu1  ;;  %v1948_v38 = vpop.f32.mrb[6].mxu0 }
 0x105   : > { %v2011_v39 = vadd.f32 %v2010_v37, %v2009_v34  ;;  %v2012_v40 = vpop.f32.mrb[6].mxu1  ;;  %v1949_v41 = vpop.f32.mrb[7].mxu0 }
 0x106   : > { %v1252_v42 = vadd.f32 %v1947_v36, %v2765_v18  ;;  %v1950_v43 = vadd.f32 %v1949_v41, %v1948_v38  ;;  %v2013_v44 = vpop.f32.mrb[7].mxu1 }
 0x107   : > { %v2014_v45 = vadd.f32 %v2013_v44, %v2012_v40 }
 0x108   : > { %v2774_v46 = vadd.f32 %v2011_v39, %v1252_v42  ;;  %v1255_v47 = vadd.f32 %v1950_v43, %v2765_v18 }
 0x10a   : > { %v2777_v48 = vadd.f32 %v2014_v45, %v1255_v47  ;;  %v1951_v49 = vpop.f32.mrb[8].mxu0 }
 0x10b   : > { %v2015_v50 = vpop.f32.mrb[8].mxu1  ;;  %v1952_v51 = vpop.f32.mrb[9].mxu0 }
 0x10c   : > { %v1953_v52 = vadd.f32 %v1952_v51, %v1951_v49  ;;  %v2016_v53 = vpop.f32.mrb[9].mxu1  ;;  %v1954_v54 = vpop.f32.mrb[10].mxu0 }
 0x10d   : > { %v2017_v55 = vadd.f32 %v2016_v53, %v2015_v50  ;;  %v2018_v56 = vpop.f32.mrb[10].mxu1  ;;  %v1955_v57 = vpop.f32.mrb[11].mxu0 }
 0x10e   : > { %v1260_v58 = vadd.f32 %v1953_v52, %v2765_v18  ;;  %v1956_v59 = vadd.f32 %v1955_v57, %v1954_v54  ;;  %v2019_v60 = vpop.f32.mrb[11].mxu1 }
 0x10f   : > { %v2020_v61 = vadd.f32 %v2019_v60, %v2018_v56 }
 0x110   : > { %v2780_v62 = vadd.f32 %v2017_v55, %v1260_v58  ;;  %v1263_v63 = vadd.f32 %v1956_v59, %v2765_v18 }
 0x112   : > { %v2783_v0 = vadd.f32 %v2020_v61, %v1263_v63  ;;  %v1957_v1 = vpop.f32.mrb[12].mxu0 }
 0x113   : > { %v2021_v2 = vpop.f32.mrb[12].mxu1  ;;  %v1958_v3 = vpop.f32.mrb[13].mxu0 }
 0x114   : > { %v1959_v4 = vadd.f32 %v1958_v3, %v1957_v1  ;;  %v2022_v5 = vpop.f32.mrb[13].mxu1  ;;  %v1960_v6 = vpop.f32.mrb[14].mxu0 }
 0x115   : > { %v2023_v7 = vadd.f32 %v2022_v5, %v2021_v2  ;;  %v2024_v8 = vpop.f32.mrb[14].mxu1  ;;  %v1961_v9 = vpop.f32.mrb[15].mxu0 }
 0x116   : > { %v1268_v10 = vadd.f32 %v1959_v4, %v2765_v18  ;;  %v1962_v11 = vadd.f32 %v1961_v9, %v1960_v6  ;;  %v2025_v12 = vpop.f32.mrb[15].mxu1 }
 0x117   : > { %v2026_v13 = vadd.f32 %v2025_v12, %v2024_v8 }
 0x118   : > { %v2786_v14 = vadd.f32 %v2023_v7, %v1268_v10  ;;  %v1271_v15 = vadd.f32 %v1962_v11, %v2765_v18 }
 0x11a   : > { %v2789_v16 = vadd.f32 %v2026_v13, %v1271_v15  ;;  %v1963_v17 = vpop.f32.mrb[16].mxu0 }
 0x11b   : > { %v2027_v19 = vpop.f32.mrb[16].mxu1  ;;  %v1964_v20 = vpop.f32.mrb[17].mxu0 }
 0x11c   : > { %v1965_v21 = vadd.f32 %v1964_v20, %v1963_v17  ;;  %v2028_v22 = vpop.f32.mrb[17].mxu1  ;;  %v1966_v23 = vpop.f32.mrb[18].mxu0 }
 0x11d   : > { %v2029_v24 = vadd.f32 %v2028_v22, %v2027_v19  ;;  %v2030_v25 = vpop.f32.mrb[18].mxu1  ;;  %v1967_v26 = vpop.f32.mrb[19].mxu0 }
 0x11e   : > { %v1276_v27 = vadd.f32 %v1965_v21, %v2765_v18  ;;  %v1968_v28 = vadd.f32 %v1967_v26, %v1966_v23  ;;  %v2031_v29 = vpop.f32.mrb[19].mxu1 }
 0x11f   : > { %v2032_v31 = vadd.f32 %v2031_v29, %v2030_v25 }
 0x120   : > { %v2792_v33 = vadd.f32 %v2029_v24, %v1276_v27  ;;  %v1279_v34 = vadd.f32 %v1968_v28, %v2765_v18 }
 0x122   : > { %v2795_v35 = vadd.f32 %v2032_v31, %v1279_v34  ;;  %v1969_v36 = vpop.f32.mrb[20].mxu0 }
 0x123   : > { %v2033_v37 = vpop.f32.mrb[20].mxu1  ;;  %v1970_v38 = vpop.f32.mrb[21].mxu0 }
 0x124   : > { %v1971_v39 = vadd.f32 %v1970_v38, %v1969_v36  ;;  %v2034_v40 = vpop.f32.mrb[21].mxu1  ;;  %v1972_v41 = vpop.f32.mrb[22].mxu0 }
 0x125   : > { %v2035_v42 = vadd.f32 %v2034_v40, %v2033_v37  ;;  %v2036_v43 = vpop.f32.mrb[22].mxu1  ;;  %v1973_v44 = vpop.f32.mrb[23].mxu0 }
 0x126   : > { %v1284_v45 = vadd.f32 %v1971_v39, %v2765_v18  ;;  %v1974_v47 = vadd.f32 %v1973_v44, %v1972_v41  ;;  %v2037_v49 = vpop.f32.mrb[23].mxu1 }
 0x127   : > { %v2038_v50 = vadd.f32 %v2037_v49, %v2036_v43 }
 0x128   : > { %v2798_v51 = vadd.f32 %v2035_v42, %v1284_v45  ;;  %v1287_v52 = vadd.f32 %v1974_v47, %v2765_v18 }
 0x12a   : > { %v2801_v53 = vadd.f32 %v2038_v50, %v1287_v52  ;;  %v1975_v54 = vpop.f32.mrb[24].mxu0 }
 0x12b   : > { %v2039_v55 = vpop.f32.mrb[24].mxu1  ;;  %v1976_v56 = vpop.f32.mrb[25].mxu0 }
 0x12c   : > { %v1977_v57 = vadd.f32 %v1976_v56, %v1975_v54  ;;  %v2040_v58 = vpop.f32.mrb[25].mxu1  ;;  %v1978_v59 = vpop.f32.mrb[26].mxu0 }
 0x12d   : > { %v2041_v60 = vadd.f32 %v2040_v58, %v2039_v55  ;;  %v2042_v61 = vpop.f32.mrb[26].mxu1  ;;  %v1979_v63 = vpop.f32.mrb[27].mxu0 }
 0x12e   : > { %v1292_v1 = vadd.f32 %v1977_v57, %v2765_v18  ;;  %v1980_v2 = vadd.f32 %v1979_v63, %v1978_v59  ;;  %v2043_v3 = vpop.f32.mrb[27].mxu1 }
 0x12f   : > { %v2044_v4 = vadd.f32 %v2043_v3, %v2042_v61 }
 0x130   : > { %v2804_v5 = vadd.f32 %v2041_v60, %v1292_v1  ;;  %v1295_v6 = vadd.f32 %v1980_v2, %v2765_v18 }
 0x132   : > { %v2807_v7 = vadd.f32 %v2044_v4, %v1295_v6  ;;  %v1981_v8 = vpop.f32.mrb[28].mxu0 }
 0x133   : > { %v2045_v9 = vpop.f32.mrb[28].mxu1  ;;  %v1982_v10 = vpop.f32.mrb[29].mxu0 }
 0x134   : > { %v1983_v11 = vadd.f32 %v1982_v10, %v1981_v8  ;;  %v2046_v12 = vpop.f32.mrb[29].mxu1  ;;  %v1984_v13 = vpop.f32.mrb[30].mxu0 }
 0x135   : > { %v2047_v15 = vadd.f32 %v2046_v12, %v2045_v9  ;;  %v2048_v17 = vpop.f32.mrb[30].mxu1  ;;  %v1985_v19 = vpop.f32.mrb[31].mxu0 }
 0x136   : > { %v1300_v20 = vadd.f32 %v1983_v11, %v2765_v18  ;;  %v1986_v21 = vadd.f32 %v1985_v19, %v1984_v13  ;;  %v2049_v22 = vpop.f32.mrb[31].mxu1 }
 0x137   : > { %v2050_v23 = vadd.f32 %v2049_v22, %v2048_v17 }
 0x138   : > { %v2810_v24 = vadd.f32 %v2047_v15, %v1300_v20  ;;  %v1303_v25 = vadd.f32 %v1986_v21, %v2765_v18 }
 0x13a   : > { %v2813_v26 = vadd.f32 %v2050_v23, %v1303_v25  ;;  %v2067_v27 = vpop.f32.mrb[32].mxu0 }
 0x13b   : > { %v2131_v28 = vpop.f32.mrb[32].mxu1  ;;  %v2068_v29 = vpop.f32.mrb[33].mxu0 }
 0x13c   : > { %v2069_v31 = vadd.f32 %v2068_v29, %v2067_v27  ;;  %v2132_v34 = vpop.f32.mrb[33].mxu1  ;;  %v2070_v36 = vpop.f32.mrb[34].mxu0 }
 0x13d   : > { %v2133_v37 = vadd.f32 %v2132_v34, %v2131_v28  ;;  %v2134_v38 = vpop.f32.mrb[34].mxu1  ;;  %v2071_v39 = vpop.f32.mrb[35].mxu0 }
 0x13e   : > { %v1438_v40 = vadd.f32 %v2069_v31, %v2768_v30  ;;  %v2072_v41 = vadd.f32 %v2071_v39, %v2070_v36  ;;  %v2135_v42 = vpop.f32.mrb[35].mxu1 }
 0x13f   : > { %v2136_v43 = vadd.f32 %v2135_v42, %v2134_v38 }
 0x140   : > { %v1441_v44 = vadd.f32 %v2072_v41, %v2771_v32  ;;  %v2817_v45 = vadd.f32 %v2133_v37, %v1438_v40 }
 0x142   : > { %v2073_v18 = vpop.f32.mrb[36].mxu0  ;;  %v2819_v47 = vadd.f32 %v2136_v43, %v1441_v44 }
 0x143   : > { %v2137_v49 = vpop.f32.mrb[36].mxu1  ;;  %v2074_v50 = vpop.f32.mrb[37].mxu0 }
 0x144   : > { %v2075_v52 = vadd.f32 %v2074_v50, %v2073_v18  ;;  %v2138_v54 = vpop.f32.mrb[37].mxu1  ;;  %v2076_v55 = vpop.f32.mrb[38].mxu0 }
 0x145   : > { %v2139_v56 = vadd.f32 %v2138_v54, %v2137_v49  ;;  %v2140_v57 = vpop.f32.mrb[38].mxu1  ;;  %v2077_v58 = vpop.f32.mrb[39].mxu0 }
 0x146   : > { %v1446_v30 = vadd.f32 %v2075_v52, %v2774_v46  ;;  %v2078_v59 = vadd.f32 %v2077_v58, %v2076_v55  ;;  %v2141_v60 = vpop.f32.mrb[39].mxu1 }
 0x147   : > { %v2142_v61 = vadd.f32 %v2141_v60, %v2140_v57 }
 0x148   : > { %v1449_v32 = vadd.f32 %v2078_v59, %v2777_v48  ;;  %v2823_v63 = vadd.f32 %v2139_v56, %v1446_v30 }
 0x14a   : > { %v2079_v1 = vpop.f32.mrb[40].mxu0  ;;  %v2825_v2 = vadd.f32 %v2142_v61, %v1449_v32 }
 0x14b   : > { %v2143_v3 = vpop.f32.mrb[40].mxu1  ;;  %v2080_v4 = vpop.f32.mrb[41].mxu0 }
 0x14c   : > { %v2081_v6 = vadd.f32 %v2080_v4, %v2079_v1  ;;  %v2144_v8 = vpop.f32.mrb[41].mxu1  ;;  %v2082_v9 = vpop.f32.mrb[42].mxu0 }
 0x14d   : > { %v2145_v10 = vadd.f32 %v2144_v8, %v2143_v3  ;;  %v2146_v11 = vpop.f32.mrb[42].mxu1  ;;  %v2083_v12 = vpop.f32.mrb[43].mxu0 }
 0x14e   : > { %v1454_v46 = vadd.f32 %v2081_v6, %v2780_v62  ;;  %v2084_v13 = vadd.f32 %v2083_v12, %v2082_v9  ;;  %v2147_v15 = vpop.f32.mrb[43].mxu1 }
 0x14f   : > { %v2148_v17 = vadd.f32 %v2147_v15, %v2146_v11 }
 0x150   : > { %v1457_v48 = vadd.f32 %v2084_v13, %v2783_v0  ;;  %v2829_v19 = vadd.f32 %v2145_v10, %v1454_v46 }
 0x152   : > { %v2085_v20 = vpop.f32.mrb[44].mxu0  ;;  %v2831_v21 = vadd.f32 %v2148_v17, %v1457_v48 }
 0x153   : > { %v2149_v22 = vpop.f32.mrb[44].mxu1  ;;  %v2086_v23 = vpop.f32.mrb[45].mxu0 }
 0x154   : > { %v2087_v25 = vadd.f32 %v2086_v23, %v2085_v20  ;;  %v2150_v27 = vpop.f32.mrb[45].mxu1  ;;  %v2088_v28 = vpop.f32.mrb[46].mxu0 }
 0x155   : > { %v2151_v29 = vadd.f32 %v2150_v27, %v2149_v22  ;;  %v2152_v31 = vpop.f32.mrb[46].mxu1  ;;  %v2089_v34 = vpop.f32.mrb[47].mxu0 }
 0x156   : > { %v1462_v62 = vadd.f32 %v2087_v25, %v2786_v14  ;;  %v2090_v36 = vadd.f32 %v2089_v34, %v2088_v28  ;;  %v2153_v37 = vpop.f32.mrb[47].mxu1 }
 0x157   : > { %v2154_v38 = vadd.f32 %v2153_v37, %v2152_v31 }
 0x158   : > { %v1465_v0 = vadd.f32 %v2090_v36, %v2789_v16  ;;  %v2835_v39 = vadd.f32 %v2151_v29, %v1462_v62 }
 0x15a   : > { %v2091_v40 = vpop.f32.mrb[48].mxu0  ;;  %v2837_v41 = vadd.f32 %v2154_v38, %v1465_v0 }
 0x15b   : > { %v2155_v42 = vpop.f32.mrb[48].mxu1  ;;  %v2092_v43 = vpop.f32.mrb[49].mxu0 }
 0x15c   : > { %v2093_v44 = vadd.f32 %v2092_v43, %v2091_v40  ;;  %v2156_v18 = vpop.f32.mrb[49].mxu1  ;;  %v2094_v49 = vpop.f32.mrb[50].mxu0 }
 0x15d   : > { %v2157_v50 = vadd.f32 %v2156_v18, %v2155_v42  ;;  %v2158_v52 = vpop.f32.mrb[50].mxu1  ;;  %v2095_v54 = vpop.f32.mrb[51].mxu0 }
 0x15e   : > { %v1470_v14 = vadd.f32 %v2093_v44, %v2792_v33  ;;  %v2096_v55 = vadd.f32 %v2095_v54, %v2094_v49  ;;  %v2159_v56 = vpop.f32.mrb[51].mxu1 }
 0x15f   : > { %v2160_v57 = vadd.f32 %v2159_v56, %v2158_v52 }
 0x160   : > { %v1473_v16 = vadd.f32 %v2096_v55, %v2795_v35  ;;  %v1567_v58 = vadd.f32 %v2157_v50, %v1470_v14 }
 0x162   : > { %v2097_v30 = vpop.f32.mrb[52].mxu0  ;;  %v2841_v59 = vadd.f32 %v2160_v57, %v1473_v16 }
 0x163   : > { %v2161_v60 = vpop.f32.mrb[52].mxu1  ;;  %v2098_v61 = vpop.f32.mrb[53].mxu0 }
 0x164   : > { %v2099_v32 = vadd.f32 %v2098_v61, %v2097_v30  ;;  %v2162_v1 = vpop.f32.mrb[53].mxu1  ;;  %v2100_v3 = vpop.f32.mrb[54].mxu0 }
 0x165   : > { %v2163_v4 = vadd.f32 %v2162_v1, %v2161_v60  ;;  %v2164_v6 = vpop.f32.mrb[54].mxu1  ;;  %v2101_v8 = vpop.f32.mrb[55].mxu0 }
 0x166   : > { %v1478_v9 = vadd.f32 %v2099_v32, %v2798_v51  ;;  %v2102_v33 = vadd.f32 %v2101_v8, %v2100_v3  ;;  %v2165_v10 = vpop.f32.mrb[55].mxu1 }
 0x167   : > { %v2166_v11 = vadd.f32 %v2165_v10, %v2164_v6 }
 0x168   : > { %v1481_v12 = vadd.f32 %v2102_v33, %v2801_v53  ;;  %v1575_v35 = vadd.f32 %v2163_v4, %v1478_v9 }
 0x16a   : > { %v2103_v46 = vpop.f32.mrb[56].mxu0  ;;  %v1578_v13 = vadd.f32 %v2166_v11, %v1481_v12 }
 0x16b   : > { %v2167_v15 = vpop.f32.mrb[56].mxu1  ;;  %v2104_v17 = vpop.f32.mrb[57].mxu0 }
 0x16c   : > { %v2105_v48 = vadd.f32 %v2104_v17, %v2103_v46  ;;  %v2168_v20 = vpop.f32.mrb[57].mxu1  ;;  %v2106_v22 = vpop.f32.mrb[58].mxu0 }
 0x16d   : > { %v2169_v23 = vadd.f32 %v2168_v20, %v2167_v15  ;;  %v2170_v25 = vpop.f32.mrb[58].mxu1  ;;  %v2107_v27 = vpop.f32.mrb[59].mxu0 }
 0x16e   : > { %v1486_v28 = vadd.f32 %v2105_v48, %v2804_v5  ;;  %v2108_v29 = vadd.f32 %v2107_v27, %v2106_v22  ;;  %v2171_v51 = vpop.f32.mrb[59].mxu1 }
 0x16f   : > { %v2172_v31 = vadd.f32 %v2171_v51, %v2170_v25 }
 0x170   : > { %v1489_v34 = vadd.f32 %v2108_v29, %v2807_v7  ;;  %v1583_v53 = vadd.f32 %v2169_v23, %v1486_v28 }
 0x172   : > { %v2109_v62 = vpop.f32.mrb[60].mxu0  ;;  %v2847_v36 = vadd.f32 %v2172_v31, %v1489_v34 }
 0x173   : > { %v2173_v37 = vpop.f32.mrb[60].mxu1  ;;  %v2110_v38 = vpop.f32.mrb[61].mxu0 }
 0x174   : > { %v2111_v0 = vadd.f32 %v2110_v38, %v2109_v62  ;;  %v2174_v40 = vpop.f32.mrb[61].mxu1  ;;  %v2112_v42 = vpop.f32.mrb[62].mxu0 }
 0x175   : > { %v2175_v43 = vadd.f32 %v2174_v40, %v2173_v37  ;;  %v2176_v44 = vpop.f32.mrb[62].mxu1  ;;  %v2113_v18 = vpop.f32.mrb[63].mxu0 }
 0x176   : > { %v1494_v5 = vadd.f32 %v2111_v0, %v2810_v24  ;;  %v2114_v49 = vadd.f32 %v2113_v18, %v2112_v42  ;;  %v2177_v50 = vpop.f32.mrb[63].mxu1 }
 0x177   : > { %v2178_v52 = vadd.f32 %v2177_v50, %v2176_v44 }
 0x178   : > { %v1497_v7 = vadd.f32 %v2114_v49, %v2813_v26  ;;  %v1591_v54 = vadd.f32 %v2175_v43, %v1494_v5 }
 0x17a   : > { %v2213_v14 = vpop.f32.mrb[64].mxu0  ;;  %v1594_v55 = vadd.f32 %v2178_v52, %v1497_v7 }
 0x17b   : > { %v1640_v24 = vadd.f32 %v2213_v14, %v2823_v63  ;;  %v2221_v56 = vpop.f32.mrb[64].mxu1  ;;  %v1631_v57 = vpop.f32.mrb[65].mxu0 }
 0x17c   : > { %v1672_v16 = vadd.f32 %v2221_v56, %v1575_v35  ;;  %v1632_v26 = vadd.f32 %v1631_v57, %v2817_v45  ;;  %v1663_v30 = vpop.f32.mrb[65].mxu1  ;;  %v2214_v60 = vpop.f32.mrb[66].mxu0 }
 0x17d   : > { %1697 = vst.msk [vmem:[%s2855_s20 + $0x10] sm:$0xff] %vm1694_vm0, %v1640_v24  ;;  %v1664_v61 = vadd.f32 %v1663_v30, %v1567_v58  ;;  %v1643_v32 = vadd.f32 %v2214_v60, %v2825_v2  ;;  %v2222_v1 = vpop.f32.mrb[66].mxu1  ;;  %v1634_v3 = vpop.f32.mrb[67].mxu0 }
 0x17e   : > { %1705 = vst.msk [vmem:[%s2855_s20 + $0x50] sm:$0xff] %vm1694_vm0, %v1672_v16  ;;  %1695 = vst.msk [vmem:[%s2855_s20] sm:$0xff] %vm1694_vm0, %v1632_v26  ;;  %v1675_v63 = vadd.f32 %v2222_v1, %v1578_v13  ;;  %v1635_v4 = vadd.f32 %v1634_v3, %v2819_v47  ;;  %v1666_v45 = vpop.f32.mrb[67].mxu1 }
 0x17f   : > { %1703 = vst.msk [vmem:[%s2855_s20 + $0x40] sm:$0xff] %vm1694_vm0, %v1664_v61  ;;  %1698 = vst.msk [vmem:[%s2855_s20 + $0x18] sm:$0xff] %vm1694_vm0, %v1643_v32  ;;  %v1667_v6 = vadd.f32 %v1666_v45, %v2841_v59 }
 0x180   : > { %1706 = vst.msk [vmem:[%s2855_s20 + $0x58] sm:$0xff] %vm1694_vm0, %v1675_v63  ;;  %1696 = vst.msk [vmem:[%s2855_s20 + $0x8] sm:$0xff] %vm1694_vm0, %v1635_v4 }
 0x181   : > { %1704 = vst.msk [vmem:[%s2855_s20 + $0x48] sm:$0xff] %vm1694_vm0, %v1667_v6 }
 0x182   : > { %v2217_v2 = vpop.f32.mrb[68].mxu0 }
 0x183   : > { %v1656_v58 = vadd.f32 %v2217_v2, %v2835_v39  ;;  %v2225_v47 = vpop.f32.mrb[68].mxu1  ;;  %v1647_v8 = vpop.f32.mrb[69].mxu0 }
 0x184   : > { %v1688_v9 = vadd.f32 %v2225_v47, %v1591_v54  ;;  %v1648_v33 = vadd.f32 %v1647_v8, %v2829_v19  ;;  %v1679_v59 = vpop.f32.mrb[69].mxu1  ;;  %v2218_v10 = vpop.f32.mrb[70].mxu0 }
 0x185   : > { %1701 = vst.msk [vmem:[%s2855_s20 + $0x30] sm:$0xff] %vm1694_vm0, %v1656_v58  ;;  %v1680_v11 = vadd.f32 %v1679_v59, %v1583_v53  ;;  %v1659_v12 = vadd.f32 %v2218_v10, %v2837_v41  ;;  %v2226_v35 = vpop.f32.mrb[70].mxu1  ;;  %v1650_v46 = vpop.f32.mrb[71].mxu0 }
 0x186   : > { %1709 = vst.msk [vmem:[%s2855_s20 + $0x70] sm:$0xff] %vm1694_vm0, %v1688_v9  ;;  %1699 = vst.msk [vmem:[%s2855_s20 + $0x20] sm:$0xff] %vm1694_vm0, %v1648_v33  ;;  %v1691_v39 = vadd.f32 %v2226_v35, %v1594_v55  ;;  %v1651_v13 = vadd.f32 %v1650_v46, %v2831_v21  ;;  %v1682_v19 = vpop.f32.mrb[71].mxu1 }
 0x187   : > { %1707 = vst.msk [vmem:[%s2855_s20 + $0x60] sm:$0xff] %vm1694_vm0, %v1680_v11  ;;  %1702 = vst.msk [vmem:[%s2855_s20 + $0x38] sm:$0xff] %vm1694_vm0, %v1659_v12  ;;  %v1683_v15 = vadd.f32 %v1682_v19, %v2847_v36 }
 0x188   : > { %1710 = vst.msk [vmem:[%s2855_s20 + $0x78] sm:$0xff] %vm1694_vm0, %v1691_v39  ;;  %1700 = vst.msk [vmem:[%s2855_s20 + $0x28] sm:$0xff] %vm1694_vm0, %v1651_v13 }
 0x189   : > { %1708 = vst.msk [vmem:[%s2855_s20 + $0x68] sm:$0xff] %vm1694_vm0, %v1683_v15 }
 0x18a PF: > { %s13_s12 = sadd.s32 1, %s2434_s12  }
 0x18b   : > { %p10_p4 = scmp.ge.s32.totalorder %s13_s12, 7  }
 0x18d   :  { %12 = sbr.rel (!%p10_p4) target bundleno = 1 (0x1), region = 62 }

</bundles_post_ra>
